<compile_context>
chip_gen: v6e
topology: v6e:2x2x1
jax: 0.10.0
libtpu: 0.0.40
codegen_flags: <defaults>
</compile_context>

<pallas_src>
import jax
import jax.numpy as jnp
import numpy as np
from jax.experimental import pallas as pl
from jax.experimental.pallas import tpu as pltpu

# ---------------------------------------------------------------------------
# Model hyper-parameters (match the PyTorch module)
# ---------------------------------------------------------------------------
HIDDEN_SIZE = 64
IMAGE_CHANNELS = 3
LIDAR_CHANNELS = 3
LIDAR_PAD = 8           # lidar K padded 3 -> 8 (zero rows in wl1)
NUM_CLASSES = 10
OUT_PAD = 128           # classifier output padded 10 -> 128 (lane-dense store)
CONV3_CH = 128          # channels out of the last conv


# ---------------------------------------------------------------------------
# Fused forward kernel: one program per batch block of Bblk rows
# ---------------------------------------------------------------------------
def _fused_forward_kernel(img_ref, lid_ref,
                          w1_ref, w2_ref, w3_ref,
                          wl1_ref, wl2_ref, wl3_ref,
                          wf_img_ref, wf_lid_ref, wc_ref, bias_ref,
                          out_ref):
    f32 = jnp.float32
    bf16 = jnp.bfloat16

    # ---- image encoder: 3 Toeplitz convs, each = ONE MXU matmul ----
    x = img_ref[...]                                            # [Bb, H*W*3] bf16
    n1 = w1_ref.shape[1]
    x = jnp.dot(x, w1_ref[...], preferred_element_type=f32)
    x = jnp.maximum(x + bias_ref[0:1, 0:n1], 0.0).astype(bf16)  # [Bb, s1*32]
    n2 = w2_ref.shape[1]
    x = jnp.dot(x, w2_ref[...], preferred_element_type=f32)
    x = jnp.maximum(x + bias_ref[1:2, 0:n2], 0.0).astype(bf16)  # [Bb, s2*64]
    n3 = w3_ref.shape[1]
    x = jnp.dot(x, w3_ref[...], preferred_element_type=f32)
    x = jnp.maximum(x + bias_ref[2:3, 0:n3], 0.0)               # [Bb, s3*128] f32

    # AdaptiveAvgPool2d((1,1)) + Flatten: mean over the remaining pixels.
    # Output layout is pixel-major / channel-minor, so each pixel is a
    # 128-lane aligned slice -> cheap lane-aligned adds.
    s3 = n3 // CONV3_CH
    pooled = x[:, 0:CONV3_CH]
    for p in range(1, s3):                                      # static unroll
        pooled = pooled + x[:, p * CONV3_CH:(p + 1) * CONV3_CH]
    img_feat = pooled * (1.0 / s3)                              # [Bb, 128] f32

    # ---- lidar encoder (tiny, f32) ----
    l = lid_ref[...]                                            # [Bb, 8] f32
    l = jnp.maximum(jnp.dot(l, wl1_ref[...], preferred_element_type=f32)
                    + bias_ref[3:4, 0:64], 0.0)
    l = jnp.maximum(jnp.dot(l, wl2_ref[...], preferred_element_type=f32)
                    + bias_ref[4:5, 0:128], 0.0)
    l = jnp.maximum(jnp.dot(l, wl3_ref[...], preferred_element_type=f32)
                    + bias_ref[5:6, 0:256], 0.0)                # [Bb, 256]

    # ---- fusion: cat([img_feat, lidar_feat]) @ Wf  ==  split matmul ----
    h = (jnp.dot(img_feat, wf_img_ref[...], preferred_element_type=f32)
         + jnp.dot(l, wf_lid_ref[...], preferred_element_type=f32)
         + bias_ref[6:7, 0:HIDDEN_SIZE])
    h = jnp.maximum(h, 0.0)                                     # [Bb, 64]

    # ---- classifier (lane-dense padded output block) ----
    out_ref[...] = (jnp.dot(h, wc_ref[...], preferred_element_type=f32)
                    + bias_ref[7:8, 0:OUT_PAD])                 # [Bb, 128]


# ---------------------------------------------------------------------------
# Dense "Toeplitz" matrix: 3x3 / stride-2 / pad-1 conv on NHWC-flat input
# (gather + weights folded together, built once at init)
# ---------------------------------------------------------------------------
def _conv_toeplitz(w_oihw, h, w):
    cout, cin = w_oihw.shape[0], w_oihw.shape[1]
    ho, wo = (h + 1) // 2, (w + 1) // 2
    m = np.zeros((h * w * cin, ho * wo * cout), np.float32)
    for oi in range(ho):
        for oj in range(wo):
            col = (oi * wo + oj) * cout
            for di in range(3):
                ii = 2 * oi + di - 1
                if not (0 <= ii < h):
                    continue                     # zero padding
                for dj in range(3):
                    jj = 2 * oj + dj - 1
                    if not (0 <= jj < w):
                        continue
                    row = (ii * w + jj) * cin
                    # [cin, cout] block = W[co, ci, di, dj] transposed
                    m[row:row + cin, col:col + cout] = w_oihw[:, :, di, dj].T
    return m, ho, wo


# ---------------------------------------------------------------------------
# Deterministic synthetic parameters (PyTorch layouts) + kernel-side packing
# ---------------------------------------------------------------------------
def init_params(key, h, w):
    ks = jax.random.split(key, 16)

    def rnd(k, shape, fan_in):
        return jax.random.normal(k, shape, jnp.float32) / np.sqrt(fan_in)

    # Raw f32 weights (PyTorch layouts) — also used by the pure-JAX reference.
    conv_defs = [(32, IMAGE_CHANNELS), (64, 32), (128, 64)]
    conv_w, conv_b = [], []
    for i, (cout, cin) in enumerate(conv_defs):
        conv_w.append(rnd(ks[i], (cout, cin, 3, 3), cin * 9))
        conv_b.append(rnd(ks[3 + i], (cout,), cin * 9))

    wl1 = rnd(ks[6], (LIDAR_CHANNELS, 64), LIDAR_CHANNELS)
    bl1 = rnd(ks[7], (64,), LIDAR_CHANNELS)
    wl2 = rnd(ks[8], (64, 128), 64)
    bl2 = rnd(ks[9], (128,), 64)
    wl3 = rnd(ks[10], (128, 256), 128)
    bl3 = rnd(ks[11], (256,), 128)

    wf = rnd(ks[12], (128 + 256, HIDDEN_SIZE), 128 + 256)
    bf = rnd(ks[13], (HIDDEN_SIZE,), 128 + 256)
    wc = rnd(ks[14], (HIDDEN_SIZE, NUM_CLASSES), HIDDEN_SIZE)
    bc = rnd(ks[15], (NUM_CLASSES,), HIDDEN_SIZE)

    ref_params = {
        "convs": list(zip(conv_w, conv_b)),
        "lins": [(wl1, bl1), (wl2, bl2), (wl3, bl3)],
        "fuse": (wf, bf),
        "cls": (wc, bc),
    }

    # ---- kernel-side parameters ----
    # Fold im2col into each conv's weight -> one dense bf16 matrix per layer.
    hh, ww = h, w
    toeplitz, spatial_out = [], []
    for w_oihw in conv_w:
        m, ho, wo = _conv_toeplitz(np.asarray(w_oihw), hh, ww)
        toeplitz.append(jnp.asarray(m, jnp.bfloat16))
        spatial_out.append(ho * wo)
        hh, ww = ho, wo

    # Lidar first layer zero-padded K=3 -> 8; classifier padded N=10 -> 128.
    wl1_pad = jnp.zeros((LIDAR_PAD, 64), jnp.float32).at[:LIDAR_CHANNELS].set(wl1)
    wc_pad = jnp.zeros((HIDDEN_SIZE, OUT_PAD), jnp.float32).at[:, :NUM_CLASSES].set(wc)
    bc_pad = np.zeros((OUT_PAD,), np.float32)
    bc_pad[:NUM_CLASSES] = np.asarray(bc)

    # Pack all 8 bias vectors into one f32 tile (one DMA).  Conv biases are
    # pre-tiled over output pixels to match the pixel-major/channel-minor
    # flattened conv output.
    n_outs = [spatial_out[i] * conv_defs[i][0] for i in range(3)]
    bias_cols = int(np.ceil(max(n_outs + [256, OUT_PAD]) / 128.0)) * 128
    bias_rows = [np.tile(np.asarray(conv_b[i]), spatial_out[i]) for i in range(3)]
    bias_rows += [np.asarray(bl1), np.asarray(bl2), np.asarray(bl3),
                  np.asarray(bf), bc_pad]
    biases = np.zeros((8, bias_cols), np.float32)
    for r, v in enumerate(bias_rows):
        biases[r, :v.shape[0]] = v

    kernel_params = {
        "w1": toeplitz[0], "w2": toeplitz[1], "w3": toeplitz[2],
        "wl1": wl1_pad, "wl2": wl2, "wl3": wl3,
        "wf_img": wf[:128], "wf_lid": wf[128:],
        "wc": wc_pad, "biases": jnp.asarray(biases),
    }
    return kernel_params, ref_params


# ---------------------------------------------------------------------------
# Forward pass (mirrors MultiModalNavigationModel.forward)
# ---------------------------------------------------------------------------
def forward(params, image_nchw, lidar, block_b=8):
    assert block_b % 8 == 0, "batch block must be a multiple of 8 (sublanes)"
    B, C, H, W = image_nchw.shape
    s_in = H * W * C

    # Input glue only (XLA side): lane-dense NHWC-flat bf16 image, padded lidar.
    img = (jnp.transpose(image_nchw, (0, 2, 3, 1))
           .reshape(B, s_in).astype(jnp.bfloat16))
    lid = jnp.pad(lidar.astype(jnp.float32),
                  ((0, 0), (0, LIDAR_PAD - lidar.shape[1])))

    # Zero-pad the batch to a multiple of the block; pad rows sliced off below.
    Bp = ((B + block_b - 1) // block_b) * block_b
    if Bp != B:
        img = jnp.pad(img, ((0, Bp - B), (0, 0)))
        lid = jnp.pad(lid, ((0, Bp - B), (0, 0)))

    weights = (params["w1"], params["w2"], params["w3"],
               params["wl1"], params["wl2"], params["wl3"],
               params["wf_img"], params["wf_lid"], params["wc"],
               params["biases"])

    def const_spec(arr):
        return pl.BlockSpec(arr.shape, lambda b: (0,) * arr.ndim)

    in_specs = ([pl.BlockSpec((block_b, s_in), lambda b: (b, 0)),
                 pl.BlockSpec((block_b, LIDAR_PAD), lambda b: (b, 0))]
                + [const_spec(t) for t in weights])

    out = pl.pallas_call(
        _fused_forward_kernel,
        out_shape=jax.ShapeDtypeStruct((Bp, OUT_PAD), jnp.float32),
        grid_spec=pltpu.PrefetchScalarGridSpec(
            num_scalar_prefetch=0,
            grid=(Bp // block_b,),
            in_specs=in_specs,
            out_specs=pl.BlockSpec((block_b, OUT_PAD), lambda b: (b, 0)),
        ),
        compiler_params=pltpu.CompilerParams(
            dimension_semantics=("parallel",),
            vmem_limit_bytes=32 * 1024 * 1024,
        ),
    )(img, lid, *weights)

    return out[:B, :NUM_CLASSES]


# ---------------------------------------------------------------------------
# Pure-JAX f32 reference (for a tolerance check against the bf16 kernel)
# ---------------------------------------------------------------------------
def reference_forward(ref_params, image, lidar):
    x = image
    for w_oihw, b in ref_params["convs"]:
        x = jax.lax.conv_general_dilated(
            x, w_oihw, window_strides=(2, 2), padding=((1, 1), (1, 1)),
            dimension_numbers=("NCHW", "OIHW", "NCHW"))
        x = jnp.maximum(x + b[None, :, None, None], 0.0)
    img_feat = jnp.mean(x, axis=(2, 3))
    l = lidar
    for w_, b_ in ref_params["lins"]:
        l = jnp.maximum(l @ w_ + b_, 0.0)
    fused = jnp.concatenate([img_feat, l], axis=1)
    wf, bf_ = ref_params["fuse"]
    h = jnp.maximum(fused @ wf + bf_, 0.0)
    wc_, bc_ = ref_params["cls"]
    return h @ wc_ + bc_


# ---------------------------------------------------------------------------
if __name__ == "__main__":
    key = jax.random.PRNGKey(0)
    k_params, k_img, k_lidar = jax.random.split(key, 3)

    B, H, W = 16, 16, 16                     # small demo; grid length 2
    kernel_params, ref_params = init_params(k_params, H, W)

    image = jax.random.normal(k_img, (B, IMAGE_CHANNELS, H, W), jnp.float32)
    lidar = jax.random.normal(k_lidar, (B, LIDAR_CHANNELS), jnp.float32)

    fwd = jax.jit(lambda p, i, l: forward(p, i, l, block_b=8))
    out = fwd(kernel_params, image, lidar)
    out = jax.block_until_ready(out)

    assert out.shape == (B, NUM_CLASSES), out.shape
    assert bool(jnp.all(jnp.isfinite(out)))

    # bf16 conv stack vs f32 reference: expect ~1e-2-level deviations.
    ref = reference_forward(ref_params, image, lidar)
    err = float(jnp.max(jnp.abs(out - ref)))
    assert err < 5e-2, f"max |kernel - reference| = {err}"

    print("KERNEL_OK")
</pallas_src>

<mosaic_0001>
module attributes {stable_mosaic.version = 11 : i64} {
  func.func @_fused_forward_kernel(%arg0: i32, %arg1: memref<8x768xbf16, #tpu.memory_space<vmem>>, %arg2: memref<8x8xf32, #tpu.memory_space<vmem>>, %arg3: memref<768x2048xbf16, #tpu.memory_space<vmem>>, %arg4: memref<2048x1024xbf16, #tpu.memory_space<vmem>>, %arg5: memref<1024x512xbf16, #tpu.memory_space<vmem>>, %arg6: memref<8x64xf32, #tpu.memory_space<vmem>>, %arg7: memref<64x128xf32, #tpu.memory_space<vmem>>, %arg8: memref<128x256xf32, #tpu.memory_space<vmem>>, %arg9: memref<128x64xf32, #tpu.memory_space<vmem>>, %arg10: memref<256x64xf32, #tpu.memory_space<vmem>>, %arg11: memref<64x128xf32, #tpu.memory_space<vmem>>, %arg12: memref<8x2048xf32, #tpu.memory_space<vmem>>, %arg13: memref<8x128xf32, #tpu.memory_space<vmem>>) attributes {dimension_semantics = [#tpu.dimension_semantics<parallel>], iteration_bounds = array<i64: 2>, scalar_prefetch = 0 : i64, scratch_operands = 0 : i64, tpu.core_type = #tpu.core_type<tc>, window_params = [{transform_indices = @transform_0, window_bounds = array<i64: 8, 768>}, {transform_indices = @transform_1, window_bounds = array<i64: 8, 8>}, {pipeline_mode = #tpu.pipeline_mode<synchronous>, transform_indices = @transform_2, window_bounds = array<i64: 768, 2048>}, {pipeline_mode = #tpu.pipeline_mode<synchronous>, transform_indices = @transform_3, window_bounds = array<i64: 2048, 1024>}, {pipeline_mode = #tpu.pipeline_mode<synchronous>, transform_indices = @transform_4, window_bounds = array<i64: 1024, 512>}, {pipeline_mode = #tpu.pipeline_mode<synchronous>, transform_indices = @transform_5, window_bounds = array<i64: 8, 64>}, {pipeline_mode = #tpu.pipeline_mode<synchronous>, transform_indices = @transform_6, window_bounds = array<i64: 64, 128>}, {pipeline_mode = #tpu.pipeline_mode<synchronous>, transform_indices = @transform_7, window_bounds = array<i64: 128, 256>}, {pipeline_mode = #tpu.pipeline_mode<synchronous>, transform_indices = @transform_8, window_bounds = array<i64: 128, 64>}, {pipeline_mode = #tpu.pipeline_mode<synchronous>, transform_indices = @transform_9, window_bounds = array<i64: 256, 64>}, {pipeline_mode = #tpu.pipeline_mode<synchronous>, transform_indices = @transform_10, window_bounds = array<i64: 64, 128>}, {pipeline_mode = #tpu.pipeline_mode<synchronous>, transform_indices = @transform_11, window_bounds = array<i64: 8, 2048>}, {transform_indices = @transform_12, window_bounds = array<i64: 8, 128>}]} {
    %c0 = arith.constant 0 : index
    %c0_0 = arith.constant 0 : index
    %0 = vector.load %arg1[%c0, %c0_0] : memref<8x768xbf16, #tpu.memory_space<vmem>>, vector<8x768xbf16>
    %c0_1 = arith.constant 0 : index
    %c0_2 = arith.constant 0 : index
    %1 = vector.load %arg3[%c0_1, %c0_2] : memref<768x2048xbf16, #tpu.memory_space<vmem>>, vector<768x2048xbf16>
    %cst = arith.constant dense<0.000000e+00> : vector<8x2048xf32>
    %2 = tpu.matmul %0, %1, %cst {dimension_numbers = #tpu.dot_dimension_numbers<[1], [0], [0], [1], [0, 0, 1, 1], [], []>} : vector<8x768xbf16>, vector<768x2048xbf16>, vector<8x2048xf32> -> vector<8x2048xf32>
    %c0_3 = arith.constant 0 : index
    %c0_4 = arith.constant 0 : index
    %3 = vector.load %arg12[%c0_3, %c0_4] : memref<8x2048xf32, #tpu.memory_space<vmem>>, vector<1x2048xf32>
    %4 = vector.broadcast %3 : vector<1x2048xf32> to vector<8x2048xf32>
    %5 = arith.addf %2, %4 : vector<8x2048xf32>
    %cst_5 = arith.constant 0.000000e+00 : f32
    %6 = vector.broadcast %cst_5 : f32 to vector<8x2048xf32>
    %7 = arith.maximumf %5, %6 : vector<8x2048xf32>
    %8 = arith.truncf %7 : vector<8x2048xf32> to vector<8x2048xbf16>
    %c0_6 = arith.constant 0 : index
    %c0_7 = arith.constant 0 : index
    %9 = vector.load %arg4[%c0_6, %c0_7] : memref<2048x1024xbf16, #tpu.memory_space<vmem>>, vector<2048x1024xbf16>
    %cst_8 = arith.constant dense<0.000000e+00> : vector<8x1024xf32>
    %10 = tpu.matmul %8, %9, %cst_8 {dimension_numbers = #tpu.dot_dimension_numbers<[1], [0], [0], [1], [0, 0, 1, 1], [], []>} : vector<8x2048xbf16>, vector<2048x1024xbf16>, vector<8x1024xf32> -> vector<8x1024xf32>
    %c1 = arith.constant 1 : index
    %c0_9 = arith.constant 0 : index
    %11 = vector.load %arg12[%c1, %c0_9] : memref<8x2048xf32, #tpu.memory_space<vmem>>, vector<1x1024xf32>
    %12 = vector.broadcast %11 : vector<1x1024xf32> to vector<8x1024xf32>
    %13 = arith.addf %10, %12 : vector<8x1024xf32>
    %cst_10 = arith.constant 0.000000e+00 : f32
    %14 = vector.broadcast %cst_10 : f32 to vector<8x1024xf32>
    %15 = arith.maximumf %13, %14 : vector<8x1024xf32>
    %16 = arith.truncf %15 : vector<8x1024xf32> to vector<8x1024xbf16>
    %c0_11 = arith.constant 0 : index
    %c0_12 = arith.constant 0 : index
    %17 = vector.load %arg5[%c0_11, %c0_12] : memref<1024x512xbf16, #tpu.memory_space<vmem>>, vector<1024x512xbf16>
    %cst_13 = arith.constant dense<0.000000e+00> : vector<8x512xf32>
    %18 = tpu.matmul %16, %17, %cst_13 {dimension_numbers = #tpu.dot_dimension_numbers<[1], [0], [0], [1], [0, 0, 1, 1], [], []>} : vector<8x1024xbf16>, vector<1024x512xbf16>, vector<8x512xf32> -> vector<8x512xf32>
    %c2 = arith.constant 2 : index
    %c0_14 = arith.constant 0 : index
    %19 = vector.load %arg12[%c2, %c0_14] : memref<8x2048xf32, #tpu.memory_space<vmem>>, vector<1x512xf32>
    %20 = vector.broadcast %19 : vector<1x512xf32> to vector<8x512xf32>
    %21 = arith.addf %18, %20 : vector<8x512xf32>
    %cst_15 = arith.constant 0.000000e+00 : f32
    %22 = vector.broadcast %cst_15 : f32 to vector<8x512xf32>
    %23 = arith.maximumf %21, %22 : vector<8x512xf32>
    %24 = vector.extract_strided_slice %23 {offsets = [0, 0], sizes = [8, 128], strides = [1, 1]} : vector<8x512xf32> to vector<8x128xf32>
    %25 = vector.extract_strided_slice %23 {offsets = [0, 128], sizes = [8, 128], strides = [1, 1]} : vector<8x512xf32> to vector<8x128xf32>
    %26 = arith.addf %24, %25 : vector<8x128xf32>
    %27 = vector.extract_strided_slice %23 {offsets = [0, 256], sizes = [8, 128], strides = [1, 1]} : vector<8x512xf32> to vector<8x128xf32>
    %28 = arith.addf %26, %27 : vector<8x128xf32>
    %29 = vector.extract_strided_slice %23 {offsets = [0, 384], sizes = [8, 128], strides = [1, 1]} : vector<8x512xf32> to vector<8x128xf32>
    %30 = arith.addf %28, %29 : vector<8x128xf32>
    %cst_16 = arith.constant 2.500000e-01 : f32
    %31 = vector.broadcast %cst_16 : f32 to vector<8x128xf32>
    %32 = arith.mulf %30, %31 : vector<8x128xf32>
    %c0_17 = arith.constant 0 : index
    %c0_18 = arith.constant 0 : index
    %33 = vector.load %arg2[%c0_17, %c0_18] : memref<8x8xf32, #tpu.memory_space<vmem>>, vector<8x8xf32>
    %c0_19 = arith.constant 0 : index
    %c0_20 = arith.constant 0 : index
    %34 = vector.load %arg6[%c0_19, %c0_20] : memref<8x64xf32, #tpu.memory_space<vmem>>, vector<8x64xf32>
    %cst_21 = arith.constant dense<0.000000e+00> : vector<8x64xf32>
    %35 = tpu.matmul %33, %34, %cst_21 {dimension_numbers = #tpu.dot_dimension_numbers<[1], [0], [0], [1], [0, 0, 1, 1], [], []>} : vector<8x8xf32>, vector<8x64xf32>, vector<8x64xf32> -> vector<8x64xf32>
    %c3 = arith.constant 3 : index
    %c0_22 = arith.constant 0 : index
    %36 = vector.load %arg12[%c3, %c0_22] : memref<8x2048xf32, #tpu.memory_space<vmem>>, vector<1x64xf32>
    %37 = vector.broadcast %36 : vector<1x64xf32> to vector<8x64xf32>
    %38 = arith.addf %35, %37 : vector<8x64xf32>
    %cst_23 = arith.constant 0.000000e+00 : f32
    %39 = vector.broadcast %cst_23 : f32 to vector<8x64xf32>
    %40 = arith.maximumf %38, %39 : vector<8x64xf32>
    %c0_24 = arith.constant 0 : index
    %c0_25 = arith.constant 0 : index
    %41 = vector.load %arg7[%c0_24, %c0_25] : memref<64x128xf32, #tpu.memory_space<vmem>>, vector<64x128xf32>
    %cst_26 = arith.constant dense<0.000000e+00> : vector<8x128xf32>
    %42 = tpu.matmul %40, %41, %cst_26 {dimension_numbers = #tpu.dot_dimension_numbers<[1], [0], [0], [1], [0, 0, 1, 1], [], []>} : vector<8x64xf32>, vector<64x128xf32>, vector<8x128xf32> -> vector<8x128xf32>
    %c4 = arith.constant 4 : index
    %c0_27 = arith.constant 0 : index
    %43 = vector.load %arg12[%c4, %c0_27] : memref<8x2048xf32, #tpu.memory_space<vmem>>, vector<1x128xf32>
    %44 = vector.broadcast %43 : vector<1x128xf32> to vector<8x128xf32>
    %45 = arith.addf %42, %44 : vector<8x128xf32>
    %cst_28 = arith.constant 0.000000e+00 : f32
    %46 = vector.broadcast %cst_28 : f32 to vector<8x128xf32>
    %47 = arith.maximumf %45, %46 : vector<8x128xf32>
    %c0_29 = arith.constant 0 : index
    %c0_30 = arith.constant 0 : index
    %48 = vector.load %arg8[%c0_29, %c0_30] : memref<128x256xf32, #tpu.memory_space<vmem>>, vector<128x256xf32>
    %cst_31 = arith.constant dense<0.000000e+00> : vector<8x256xf32>
    %49 = tpu.matmul %47, %48, %cst_31 {dimension_numbers = #tpu.dot_dimension_numbers<[1], [0], [0], [1], [0, 0, 1, 1], [], []>} : vector<8x128xf32>, vector<128x256xf32>, vector<8x256xf32> -> vector<8x256xf32>
    %c5 = arith.constant 5 : index
    %c0_32 = arith.constant 0 : index
    %50 = vector.load %arg12[%c5, %c0_32] : memref<8x2048xf32, #tpu.memory_space<vmem>>, vector<1x256xf32>
    %51 = vector.broadcast %50 : vector<1x256xf32> to vector<8x256xf32>
    %52 = arith.addf %49, %51 : vector<8x256xf32>
    %cst_33 = arith.constant 0.000000e+00 : f32
    %53 = vector.broadcast %cst_33 : f32 to vector<8x256xf32>
    %54 = arith.maximumf %52, %53 : vector<8x256xf32>
    %c0_34 = arith.constant 0 : index
    %c0_35 = arith.constant 0 : index
    %55 = vector.load %arg9[%c0_34, %c0_35] : memref<128x64xf32, #tpu.memory_space<vmem>>, vector<128x64xf32>
    %cst_36 = arith.constant dense<0.000000e+00> : vector<8x64xf32>
    %56 = tpu.matmul %32, %55, %cst_36 {dimension_numbers = #tpu.dot_dimension_numbers<[1], [0], [0], [1], [0, 0, 1, 1], [], []>} : vector<8x128xf32>, vector<128x64xf32>, vector<8x64xf32> -> vector<8x64xf32>
    %c0_37 = arith.constant 0 : index
    %c0_38 = arith.constant 0 : index
    %57 = vector.load %arg10[%c0_37, %c0_38] : memref<256x64xf32, #tpu.memory_space<vmem>>, vector<256x64xf32>
    %cst_39 = arith.constant dense<0.000000e+00> : vector<8x64xf32>
    %58 = tpu.matmul %54, %57, %cst_39 {dimension_numbers = #tpu.dot_dimension_numbers<[1], [0], [0], [1], [0, 0, 1, 1], [], []>} : vector<8x256xf32>, vector<256x64xf32>, vector<8x64xf32> -> vector<8x64xf32>
    %59 = arith.addf %56, %58 : vector<8x64xf32>
    %c6 = arith.constant 6 : index
    %c0_40 = arith.constant 0 : index
    %60 = vector.load %arg12[%c6, %c0_40] : memref<8x2048xf32, #tpu.memory_space<vmem>>, vector<1x64xf32>
    %61 = vector.broadcast %60 : vector<1x64xf32> to vector<8x64xf32>
    %62 = arith.addf %59, %61 : vector<8x64xf32>
    %cst_41 = arith.constant 0.000000e+00 : f32
    %63 = vector.broadcast %cst_41 : f32 to vector<8x64xf32>
    %64 = arith.maximumf %62, %63 : vector<8x64xf32>
    %c0_42 = arith.constant 0 : index
    %c0_43 = arith.constant 0 : index
    %65 = vector.load %arg11[%c0_42, %c0_43] : memref<64x128xf32, #tpu.memory_space<vmem>>, vector<64x128xf32>
    %cst_44 = arith.constant dense<0.000000e+00> : vector<8x128xf32>
    %66 = tpu.matmul %64, %65, %cst_44 {dimension_numbers = #tpu.dot_dimension_numbers<[1], [0], [0], [1], [0, 0, 1, 1], [], []>} : vector<8x64xf32>, vector<64x128xf32>, vector<8x128xf32> -> vector<8x128xf32>
    %c7 = arith.constant 7 : index
    %c0_45 = arith.constant 0 : index
    %67 = vector.load %arg12[%c7, %c0_45] : memref<8x2048xf32, #tpu.memory_space<vmem>>, vector<1x128xf32>
    %68 = vector.broadcast %67 : vector<1x128xf32> to vector<8x128xf32>
    %69 = arith.addf %66, %68 : vector<8x128xf32>
    %c0_46 = arith.constant 0 : index
    %c0_47 = arith.constant 0 : index
    %70 = vector.load %arg13[%c0_46, %c0_47] : memref<8x128xf32, #tpu.memory_space<vmem>>, vector<8x128xf32>
    tpu.vector_store %arg13[%c0_46, %c0_47], %69 {strides = array<i32>} : memref<8x128xf32, #tpu.memory_space<vmem>>, vector<8x128xf32>,
    return
  }
  func.func @transform_0(%arg0: i32) -> (i32, i32) {
    %c0_i32 = arith.constant 0 : i32
    %c0_i32_0 = arith.constant 0 : i32
    return %arg0, %c0_i32 : i32, i32
  }
  func.func @transform_1(%arg0: i32) -> (i32, i32) {
    %c0_i32 = arith.constant 0 : i32
    %c0_i32_0 = arith.constant 0 : i32
    return %arg0, %c0_i32 : i32, i32
  }
  func.func @transform_2(%arg0: i32) -> (i32, i32) {
    %c0_i32 = arith.constant 0 : i32
    %c0_i32_0 = arith.constant 0 : i32
    %c0_i32_1 = arith.constant 0 : i32
    return %c0_i32, %c0_i32_0 : i32, i32
  }
  func.func @transform_3(%arg0: i32) -> (i32, i32) {
    %c0_i32 = arith.constant 0 : i32
    %c0_i32_0 = arith.constant 0 : i32
    %c0_i32_1 = arith.constant 0 : i32
    return %c0_i32, %c0_i32_0 : i32, i32
  }
  func.func @transform_4(%arg0: i32) -> (i32, i32) {
    %c0_i32 = arith.constant 0 : i32
    %c0_i32_0 = arith.constant 0 : i32
    %c0_i32_1 = arith.constant 0 : i32
    return %c0_i32, %c0_i32_0 : i32, i32
  }
  func.func @transform_5(%arg0: i32) -> (i32, i32) {
    %c0_i32 = arith.constant 0 : i32
    %c0_i32_0 = arith.constant 0 : i32
    %c0_i32_1 = arith.constant 0 : i32
    return %c0_i32, %c0_i32_0 : i32, i32
  }
  func.func @transform_6(%arg0: i32) -> (i32, i32) {
    %c0_i32 = arith.constant 0 : i32
    %c0_i32_0 = arith.constant 0 : i32
    %c0_i32_1 = arith.constant 0 : i32
    return %c0_i32, %c0_i32_0 : i32, i32
  }
  func.func @transform_7(%arg0: i32) -> (i32, i32) {
    %c0_i32 = arith.constant 0 : i32
    %c0_i32_0 = arith.constant 0 : i32
    %c0_i32_1 = arith.constant 0 : i32
    return %c0_i32, %c0_i32_0 : i32, i32
  }
  func.func @transform_8(%arg0: i32) -> (i32, i32) {
    %c0_i32 = arith.constant 0 : i32
    %c0_i32_0 = arith.constant 0 : i32
    %c0_i32_1 = arith.constant 0 : i32
    return %c0_i32, %c0_i32_0 : i32, i32
  }
  func.func @transform_9(%arg0: i32) -> (i32, i32) {
    %c0_i32 = arith.constant 0 : i32
    %c0_i32_0 = arith.constant 0 : i32
    %c0_i32_1 = arith.constant 0 : i32
    return %c0_i32, %c0_i32_0 : i32, i32
  }
  func.func @transform_10(%arg0: i32) -> (i32, i32) {
    %c0_i32 = arith.constant 0 : i32
    %c0_i32_0 = arith.constant 0 : i32
    %c0_i32_1 = arith.constant 0 : i32
    return %c0_i32, %c0_i32_0 : i32, i32
  }
  func.func @transform_11(%arg0: i32) -> (i32, i32) {
    %c0_i32 = arith.constant 0 : i32
    %c0_i32_0 = arith.constant 0 : i32
    %c0_i32_1 = arith.constant 0 : i32
    return %c0_i32, %c0_i32_0 : i32, i32
  }
  func.func @transform_12(%arg0: i32) -> (i32, i32) {
    %c0_i32 = arith.constant 0 : i32
    %c0_i32_0 = arith.constant 0 : i32
    return %arg0, %c0_i32 : i32, i32
  }
}

</mosaic_0001>

<bundles_post_ra>
// kernel: _lambda_.1
= control target key start
LH: loop header
LB: loop body
LE: loop exit
PB: predicated region body
PF: predicated region fallthrough
CT: control target
= control target key end

     0   :  { %s20442_s0 = inlined_call_operand.vmem [shape: bf16[16,768], index: 0, kind: input, shape index: {}]   ;;  %s20443_s1 = inlined_call_operand.vmem [shape: f32[16,8], index: 1, kind: input, shape index: {}]   ;;  %s20444_s2 = inlined_call_operand.hbm [shape: bf16[768,2048], index: 2, kind: input, shape index: {}]   ;;  %s20445_s3 = inlined_call_operand.hbm [shape: bf16[2048,1024], index: 3, kind: input, shape index: {}]   ;;  %s20446_s4 = inlined_call_operand.hbm [shape: bf16[1024,512], index: 4, kind: input, shape index: {}]   ;;  %s20447_s5 = inlined_call_operand.hbm [shape: f32[8,64], index: 5, kind: input, shape index: {}]   ;;  %s20448_s6 = inlined_call_operand.hbm [shape: f32[64,128], index: 6, kind: input, shape index: {}]   ;;  %s20449_s7 = inlined_call_operand.hbm [shape: f32[128,256], index: 7, kind: input, shape index: {}]   ;;  %s20450_s8 = inlined_call_operand.vmem [shape: f32[128,64], index: 8, kind: input, shape index: {}]   ;;  %s20451_s9 = inlined_call_operand.vmem [shape: f32[256,64], index: 9, kind: input, shape index: {}]   ;;  %s20452_s10 = inlined_call_operand.hbm [shape: f32[64,128], index: 10, kind: input, shape index: {}]   ;;  %s20453_s11 = inlined_call_operand.hbm [shape: f32[8,2048], index: 11, kind: input, shape index: {}]   ;;  %s20454_s12 = inlined_call_operand.hbm [shape: f32[16,128], index: 12, kind: output, shape index: {}]  }
   0x1   :  { %20464 = sst [smem:[#allocation27_spill]] %s20445_s3 }
   0x2   :  { %17 = vsyncpa [#allocation3], 0 }
   0x3   :  { %18 = vsyncpa [#allocation6], 0 }
   0x4   :  { %19 = vsyncpa [#allocation9], 0 }
   0x5   :  { %20 = vsyncpa [#allocation12], 0 }
   0x6   :  { %21 = vsyncpa [#allocation15], 0 }
   0x7   :  { %22 = vsyncpa [#allocation4], 0 }
   0x8   :  { %24 = vsyncpa [#allocation4 + $0x1], 0  ;;  %s19538_s21 = smov 0   ;;  %s19540_s22 = smov 0  }
   0x9   :  { %s19542_s23 = smov 0   ;;  %s19544_s24 = smov 0  }
   0xa LB: > { %20465 = sst [smem:[#allocation23_spill]] %s19448_s23  ;;  %s19559_s25 = sadd.s32 4294967295, %s19452_s24   ;;  %s19452_s24 = sphi %s19544_s24, %s20491_s24   ;;  %s19448_s23 = sphi %s19542_s23, %s20493_s23   ;;  %s19444_s22 = sphi %s19540_s22, %s20495_s22   ;;  %s19440_s21 = sphi %s19538_s21, %s20494_s21  }
   0xb   : > { %s16409_s26 = sadd.s32 4294967294, %s19452_s24   ;;  %s19563_s27 = sadd.s32 1, %s19452_s24  }
   0xc   : > { %20466 = sst [smem:[#allocation24_spill]] %s19563_s27  ;;  %s299_s28 = sadd.s32 1, %s19448_s23 }
   0xd   : > { %s296_s29 = ssub.s32 %s19452_s24, %s19563_s27  ;;  %p309_p0 = scmp.ne.s32.totalorder %s19448_s23, %s19444_s22 }
   0xe   : > { %p297_p1 = scmp.eq.s32.totalorder %s296_s29, 0  ;;  %p310_p2 = scmp.eq.s32.totalorder %s19559_s25, 1 }
   0xf   : > { %p315_p3 = scmp.ne.s32.totalorder %s19444_s22, %s19440_s21  ;;  %p316_p4 = scmp.eq.s32.totalorder %s16409_s26, 1 }
  0x10   : > { %s19574_s30 = scalar_select %p297_p1, %s19448_s23, %s299_s28  }
  0x11   : > { %p19576_p5 = por %p310_p2, %p309_p0  ;;  %p19580_p6 = por %p316_p4, %p315_p3 }
  0x12   : > { %20467 = sst [smem:[#allocation25_spill]] %s19574_s30  ;;  %p16410_p7 = scmp.ge.s32.totalorder %s19452_s24, 1 }
  0x13   : > { %s20468_s13 = scalar_select %p19576_p5, 1, 0 }
  0x14   : > { %s20469_s14 = scalar_select %p19580_p6, 1, 0 }
  0x15   : > { %p323_p8 = scmp.lt.s32.totalorder %s19452_s24, 3  ;;  %p20456_p9 = scmp.eq.s32.totalorder %s19559_s25, 0 }
  0x16   : > { %20470 = sst [smem:[#allocation26_spill]] %s20469_s14  ;;  %s19454_s16 = smov [#allocation5]  }
  0x17   : > { %p19587_p10 = pnand %p16410_p7, %p323_p8  ;;  %s348_s17 = sshll.u32 %s19454_s16, 4  ;;  %s349_s17 = int_to_ptr.vmem [resolvable:$true] %s348_s17 }
  0x18   : > { %s19455_s19 = smov [#allocation8]   ;;  %s19175_s28 = scalar_lea.vmem %s349_s17, 131072 }
  0x19   : > { %s20471_s15 = scalar_select %p19587_p10, 1, 0 }
  0x1a   : > { %p18678_p11 = pneg %p19587_p10  ;;  %s375_s20 = sshll.u32 %s19455_s19, 4  ;;  %s376_s20 = int_to_ptr.vmem [resolvable:$true] %s375_s20 }
  0x1b   : > { %p19176_p0 = scmp.ne.s32.totalorder %s349_s17, %s19175_s28  ;;  %p19183_p3 = scmp.lt.s32.totalorder %s349_s17, %s349_s17 }
  0x1c   : > { %p19595_p12 = pnand %p20456_p9, %p18678_p11  ;;  %p19184_p4 = scmp.lt.s32.totalorder %s19175_s28, %s19175_s28 }
  0x1e   : > { %p19601_p13 = pneg %p19595_p12  ;;  %p19185_p7 = por %p19184_p4, %p19183_p3 }
  0x20   : > { %p19178_p1 = pnand %p19176_p0, %p19601_p13 }
  0x22   : > { %p19179_p2 = pneg %p19178_p1 }
  0x24   : > { %p19186_p8 = pnand %p19185_p7, %p19179_p2 }
  0x26   : > { %19189 = shalt.err (!%p19186_p8)
}
  0x27   : > { %s19456_s29 = smov 512   ;;  %s19457_s16 = smov 32  }
  0x28   : > { %s20474_s3 = sld [smem:[#allocation27_spill]]  ;;  %s19201_s23 = scalar_lea.vmem %s376_s20, 128 }
  0x29   : > { %p19202_p11 = scmp.ne.s32.totalorder %s376_s20, %s19201_s23  ;;  %p19209_p1 = scmp.lt.s32.totalorder %s376_s20, %s376_s20 }
  0x2a   : > { %p19210_p6 = scmp.lt.s32.totalorder %s19201_s23, %s19201_s23 }
  0x2b   : > { %p19204_p9 = pnand %p19202_p11, %p19601_p13 }
  0x2c   : > { %p19211_p5 = por %p19210_p6, %p19209_p1 }
  0x2d   : > { %p19205_p0 = pneg %p19204_p9 }
  0x2e   : > { %18684 = dma.hbm_to_vmem [thread:$0]  (!%p19595_p12), %s20474_s3, 131072, %s349_s17, [#allocation6], %s19456_s29, %s19456_s29, %s19457_s16  }
  0x2f   : > { %p19212_p3 = pnand %p19211_p5, %p19205_p0 }
  0x31   : > { %19215 = shalt.err (!%p19212_p3)
}
  0x32   : > { %18690 = dma.hbm_to_vmem [thread:$0]  (!%p19595_p12), %s20447_s5, 128, %s376_s20, [#allocation9]  }
  0x33   : > { %s19458_s14 = smov [#allocation11]   ;;  %s19459_s17 = smov [#allocation2]  }
  0x34   : > { %s398_s30 = sshll.u32 %s19458_s14, 4  ;;  %s335_s29 = sshll.u32 %s19459_s17, 4  ;;  %s399_s30 = int_to_ptr.vmem [resolvable:$true] %s398_s30  ;;  %s336_s29 = int_to_ptr.vmem [resolvable:$true] %s335_s29 }
  0x35   : > { %s19227_s16 = scalar_lea.vmem %s399_s30, 4096  ;;  %p19235_p5 = scmp.lt.s32.totalorder %s399_s30, %s399_s30 }
  0x36   : > { %p19228_p9 = scmp.ne.s32.totalorder %s399_s30, %s19227_s16  ;;  %p19236_p4 = scmp.lt.s32.totalorder %s19227_s16, %s19227_s16 }
  0x38   : > { %p19230_p2 = pnand %p19228_p9, %p19601_p13  ;;  %p19237_p7 = por %p19236_p4, %p19235_p5 }
  0x3a   : > { %p19231_p6 = pneg %p19230_p2 }
  0x3c   : > { %p19238_p8 = pnand %p19237_p7, %p19231_p6 }
  0x3e   : > { %19241 = shalt.err (!%p19238_p8)
}
  0x3f   : > { %s20461_s23 = smov 256   ;;  %s20462_s27 = smov 16  }
  0x40   : > { %18696 = dma.hbm_to_vmem [thread:$0]  (!%p19595_p12), %s20449_s7, 4096, %s399_s30, [#allocation12], %s20461_s23, %s20461_s23, %s20462_s27  }
  0x41   : > { %s19253_s19 = scalar_lea.vmem %s336_s29, 98304  ;;  %p19261_p3 = scmp.lt.s32.totalorder %s336_s29, %s336_s29 }
  0x42   : > { %p19254_p11 = scmp.ne.s32.totalorder %s336_s29, %s19253_s19  ;;  %p19262_p9 = scmp.lt.s32.totalorder %s19253_s19, %s19253_s19 }
  0x44   : > { %p19256_p0 = pnand %p19254_p11, %p19601_p13  ;;  %p19263_p2 = por %p19262_p9, %p19261_p3 }
  0x46   : > { %p19257_p1 = pneg %p19256_p0 }
  0x48   : > { %p19264_p6 = pnand %p19263_p2, %p19257_p1 }
  0x4a   : > { %19267 = shalt.err (!%p19264_p6)
}
  0x4b   : > { %s19462_s28 = smov 1024   ;;  %s19463_s17 = smov 64  }
  0x4c   : > { %18681 = dma.hbm_to_vmem [thread:$0]  (!%p19595_p12), %s20444_s2, 98304, %s336_s29, [#allocation3], %s19462_s28, %s19462_s28, %s19463_s17  }
  0x4d   : > { %s19464_s30 = smov [#allocation7]   ;;  %s19465_s20 = smov [#allocation10]  }
  0x4e   : > { %s361_s14 = sshll.u32 %s19464_s30, 4  ;;  %s385_s23 = sshll.u32 %s19465_s20, 4  ;;  %s362_s14 = int_to_ptr.vmem [resolvable:$true] %s361_s14  ;;  %s386_s23 = int_to_ptr.vmem [resolvable:$true] %s385_s23 }
  0x4f   : > { %s19279_s27 = scalar_lea.vmem %s362_s14, 32768  ;;  %p19287_p8 = scmp.lt.s32.totalorder %s362_s14, %s362_s14 }
  0x50   : > { %p19280_p5 = scmp.ne.s32.totalorder %s362_s14, %s19279_s27  ;;  %p19288_p11 = scmp.lt.s32.totalorder %s19279_s27, %s19279_s27 }
  0x52   : > { %p19282_p4 = pnand %p19280_p5, %p19601_p13  ;;  %p19289_p0 = por %p19288_p11, %p19287_p8 }
  0x54   : > { %p19283_p7 = pneg %p19282_p4 }
  0x56   : > { %p19290_p1 = pnand %p19289_p0, %p19283_p7 }
  0x58   : > { %19293 = shalt.err (!%p19290_p1)
}
  0x59   : > { %s20475_s3 = smov 16   ;;  %s20476_s29 = smov 256  }
  0x5a   : > { %18687 = dma.hbm_to_vmem [thread:$0]  (!%p19595_p12), %s20446_s4, 32768, %s362_s14, [#allocation6], %s20476_s29, %s20476_s29, %s20475_s3  }
  0x5b   : > { %s19305_s17 = scalar_lea.vmem %s386_s23, 1024  ;;  %p19313_p6 = scmp.lt.s32.totalorder %s386_s23, %s386_s23 }
  0x5c   : > { %p19306_p3 = scmp.ne.s32.totalorder %s386_s23, %s19305_s17  ;;  %p19314_p5 = scmp.lt.s32.totalorder %s19305_s17, %s19305_s17 }
  0x5e   : > { %p19308_p9 = pnand %p19306_p3, %p19601_p13  ;;  %p19315_p4 = por %p19314_p5, %p19313_p6 }
  0x60   : > { %p19309_p2 = pneg %p19308_p9 }
  0x62   : > { %p19316_p7 = pnand %p19315_p4, %p19309_p2 }
  0x64   : > { %19319 = shalt.err (!%p19316_p7)
}
  0x65   : > { %s19466_s27 = smov 128   ;;  %s19467_s16 = smov 8  }
  0x66   : > { %18693 = dma.hbm_to_vmem [thread:$0]  (!%p19595_p12), %s20448_s6, 1024, %s386_s23, [#allocation9], %s19466_s27, %s19466_s27, %s19467_s16  }
  0x67   : > { %s19468_s14 = smov [#allocation13]   ;;  %s19469_s29 = smov [#allocation14]  }
  0x68   : > { %s417_s3 = sshll.u32 %s19468_s14, 4  ;;  %s431_s19 = sshll.u32 %s19469_s29, 4  ;;  %s418_s3 = int_to_ptr.vmem [resolvable:$true] %s417_s3  ;;  %s432_s19 = int_to_ptr.vmem [resolvable:$true] %s431_s19 }
  0x69   : > { %s19331_s28 = scalar_lea.vmem %s418_s3, 1024  ;;  %p19339_p1 = scmp.lt.s32.totalorder %s418_s3, %s418_s3 }
  0x6a   : > { %p19332_p8 = scmp.ne.s32.totalorder %s418_s3, %s19331_s28  ;;  %p19340_p3 = scmp.lt.s32.totalorder %s19331_s28, %s19331_s28 }
  0x6c   : > { %p19334_p11 = pnand %p19332_p8, %p19601_p13  ;;  %p19341_p9 = por %p19340_p3, %p19339_p1 }
  0x6e   : > { %p19335_p0 = pneg %p19334_p11 }
  0x70   : > { %p19342_p2 = pnand %p19341_p9, %p19335_p0 }
  0x72   : > { %19345 = shalt.err (!%p19342_p2)
}
  0x73   : > { %18699 = dma.hbm_to_vmem [thread:$0]  (!%p19595_p12), %s20452_s10, 1024, %s418_s3, [#allocation12], %s19466_s27, %s19466_s27, %s19467_s16  }
  0x74   : > { %s19357_s30 = scalar_lea.vmem %s432_s19, 2048  ;;  %p19365_p7 = scmp.lt.s32.totalorder %s432_s19, %s432_s19 }
  0x75   : > { %p19358_p6 = scmp.ne.s32.totalorder %s432_s19, %s19357_s30  ;;  %p19366_p8 = scmp.lt.s32.totalorder %s19357_s30, %s19357_s30 }
  0x77   : > { %p19360_p5 = pnand %p19358_p6, %p19601_p13  ;;  %p19367_p11 = por %p19366_p8, %p19365_p7 }
  0x79   : > { %p19361_p4 = pneg %p19360_p5 }
  0x7b   : > { %p19368_p10 = pnand %p19367_p11, %p19361_p4 }
  0x7d   : > { %19371 = shalt.err (!%p19368_p10)
}
  0x7e   : > { %18702 = dma.hbm_to_vmem [thread:$0]  (!%p19595_p12), %s20453_s11, 2048, %s432_s19, [#allocation15]  }
  0x7f   : > { %p20477_p0 = scmp.ne.s32.totalorder %s20471_s15, 0 }
  0x80   : > { %p20478_p1 = scmp.eq.s32.totalorder (!%p20477_p0), %s19559_s25, 0 }
  0x81   : > { %459 = sbr.rel (%p20477_p0) target bundleno = 3215 (0xc8f), region = 68 }
  0x86   : > { %19415 = dma.done.wait (%p20478_p1), [#allocation3], 98304   ;;  %p20479_p13 = pmov %p20478_p1 }
  0x87   : > { %p20480_p3 = pmov %p20478_p1 }
  0x88   : > { %19417 = vsyncadd (%p20479_p13), [#allocation3], 4294868992 }
  0x89   : > { %19419 = dma.done.wait (%p20480_p3), [#allocation6], 163840   ;;  %p20481_p10 = pmov %p20478_p1 }
  0x8a   : > { %p20482_p9 = pmov %p20478_p1 }
  0x8b   : > { %19421 = vsyncadd (%p20481_p10), [#allocation6], 4294803456 }
  0x8c   : > { %19423 = dma.done.wait (%p20482_p9), [#allocation9], 1152   ;;  %p20483_p12 = pmov %p20478_p1 }
  0x8d   : > { %p20484_p2 = pmov %p20478_p1 }
  0x8e   : > { %19425 = vsyncadd (%p20483_p12), [#allocation9], 4294966144 }
  0x8f   : > { %19427 = dma.done.wait (%p20484_p2), [#allocation12], 5120   ;;  %p20485_p6 = pmov %p20478_p1 }
  0x90   : > { %p20486_p5 = pmov %p20478_p1 }
  0x91   : > { %19429 = vsyncadd (%p20485_p6), [#allocation12], 4294962176 }
  0x92   : > { %19431 = dma.done.wait (%p20486_p5), [#allocation15], 2048   ;;  %p20487_p4 = pmov %p20478_p1 }
  0x93   : > { %v657_v0 = vld [vmem:[#allocation2 + $0x380] sm:$0xff]  ;;  %p533_p7 = scmp.lt.s32.totalorder %s19559_s25, 1  ;;  %vm19471_vm0 = vmmov 0   ;;  %vm15694_vm1 = vcmask 64512   ;;  %vm15778_vm2 = vcmask 523264   ;;  %s530_s19 = sand.u32 1, %s19444_s22  }
  0x94   : > { %19433 = vsyncadd (%p20487_p4), [#allocation15], 4294965248  ;;  %v665_v1 = vld [vmem:[#allocation2 + $0x3c0] sm:$0xff]  ;;  %s18490_s17 = sshll.u32 %s19559_s25, 7  ;;  %p20488_p11 = scmp.ne.s32.totalorder %s20468_s13, 0 }
  0x95   : > { %v913_v2 = vld [vmem:[#allocation2 + $0xb80] sm:$0xff]  ;;  %v16551_v3 = vcombine.high %v657_v0, %v665_v1  ;;  %v16550_v5 = vcombine.low %v657_v0, %v665_v1  ;;  %s19691_s15 = scalar_select %p533_p7, %s19559_s25, 1 }
  0x96   : > { %v921_v4 = vld [vmem:[#allocation2 + $0xbc0] sm:$0xff]  ;;  %s19472_s27 = smov [#allocation16]  }
  0x97   : > { %v641_v6 = vld [vmem:[#allocation2 + $0x300] sm:$0xff]  ;;  %v16807_v8 = vcombine.high %v913_v2, %v921_v4  ;;  %v16806_v9 = vcombine.low %v913_v2, %v921_v4  ;;  %5263 = vmatprep.subr.bf16.mxu0 %v16551_v3  ;;  %s18643_s18 = smul.u32 24, %s19691_s15  ;;  %s16431_s3 = sshll.u32 %s19691_s15, 3 }
  0x98   : > { %v649_v7 = vld [vmem:[#allocation2 + $0x340] sm:$0xff]  ;;  %5264 = vmatpush1.bf16.msra.mxu0 %v16550_v5  ;;  %s541_s28 = scalar_lea.vmem %s20443_s1, %s16431_s3  ;;  %s20407_s15 = scalar_lea.hbm %s20454_s12, %s18490_s17 }
  0x99   : > { %v16535_v10 = vcombine.high %v641_v6, %v649_v7  ;;  %v897_v11 = vld [vmem:[#allocation2 + $0xb00] sm:$0xff]  ;;  %5304 = vmatprep.subr.bf16.mxu1 %v16807_v8  ;;  %v16534_v18 = vcombine.low %v641_v6, %v649_v7  ;;  %s19697_s16 = scalar_lea.vmem %s20442_s0, %s18643_s18  ;;  %s16246_s18 = scalar_lea.sflag [#allocation4], %s530_s19 }
  0x9a   : > { %v905_v12 = vld [vmem:[#allocation2 + $0xb40] sm:$0xff]  ;;  %5305 = vmatpush1.bf16.msra.mxu1 %v16806_v9  ;;  %v19703_v54 = vld [vmem:[%s19697_s16 + $0x8] sm:$0xff]  ;;  %s19376_s25 = sshll.u32 %s19472_s27, 4  ;;  %s19377_s25 = int_to_ptr.vmem [resolvable:$false] %s19376_s25 }
  0x9b   : > { %v625_v13 = vld [vmem:[#allocation2 + $0x280] sm:$0xff]  ;;  %v16791_v14 = vcombine.high %v897_v11, %v905_v12  ;;  %5265 = vmatprep.subr.bf16.mxu0 %v16535_v10  ;;  %v16790_v19 = vcombine.low %v897_v11, %v905_v12  ;;  %v19711_v61 = vcombine.high %v19703_v54, %v19703_v54 }
  0x9c   : > { %v633_v15 = vld [vmem:[#allocation2 + $0x2c0] sm:$0xff]  ;;  %5266 = vmatpush1.bf16.msra.mxu0 %v16534_v18 }
  0x9d   : > { %v881_v16 = vld [vmem:[#allocation2 + $0xa80] sm:$0xff]  ;;  %v16519_v20 = vcombine.high %v625_v13, %v633_v15  ;;  %5306 = vmatprep.subr.bf16.mxu1 %v16791_v14  ;;  %v16518_v26 = vcombine.low %v625_v13, %v633_v15  ;;  %5336 = vmatprep.mubr.bf16.mxu1 %v19711_v61 }
  0x9e   : > { %v889_v17 = vld [vmem:[#allocation2 + $0xac0] sm:$0xff]  ;;  %5307 = vmatpush1.bf16.msra.mxu1 %v16790_v19 }
  0x9f   : > { %v16775_v21 = vcombine.high %v881_v16, %v889_v17  ;;  %v609_v22 = vld [vmem:[#allocation2 + $0x200] sm:$0xff]  ;;  %5267 = vmatprep.subr.bf16.mxu0 %v16519_v20  ;;  %v16774_v27 = vcombine.low %v881_v16, %v889_v17 }
  0xa0   : > { %v617_v23 = vld [vmem:[#allocation2 + $0x240] sm:$0xff]  ;;  %5268 = vmatpush1.bf16.msra.mxu0 %v16518_v26 }
  0xa1   : > { %v865_v24 = vld [vmem:[#allocation2 + $0xa00] sm:$0xff]  ;;  %v16503_v28 = vcombine.high %v609_v22, %v617_v23  ;;  %5308 = vmatprep.subr.bf16.mxu1 %v16775_v21  ;;  %v16502_v34 = vcombine.low %v609_v22, %v617_v23 }
  0xa2   : > { %v873_v25 = vld [vmem:[#allocation2 + $0xa40] sm:$0xff]  ;;  %5309 = vmatpush1.bf16.msra.mxu1 %v16774_v27 }
  0xa3   : > { %v16759_v29 = vcombine.high %v865_v24, %v873_v25  ;;  %v593_v30 = vld [vmem:[#allocation2 + $0x180] sm:$0xff]  ;;  %5269 = vmatprep.subr.bf16.mxu0 %v16503_v28  ;;  %v16758_v35 = vcombine.low %v865_v24, %v873_v25 }
  0xa4   : > { %v601_v31 = vld [vmem:[#allocation2 + $0x1c0] sm:$0xff]  ;;  %5270 = vmatpush1.bf16.msra.mxu0 %v16502_v34 }
  0xa5   : > { %v849_v32 = vld [vmem:[#allocation2 + $0x980] sm:$0xff]  ;;  %v16487_v36 = vcombine.high %v593_v30, %v601_v31  ;;  %5310 = vmatprep.subr.bf16.mxu1 %v16759_v29  ;;  %v16486_v42 = vcombine.low %v593_v30, %v601_v31 }
  0xa6   : > { %v857_v33 = vld [vmem:[#allocation2 + $0x9c0] sm:$0xff]  ;;  %5311 = vmatpush1.bf16.msra.mxu1 %v16758_v35 }
  0xa7   : > { %v16743_v37 = vcombine.high %v849_v32, %v857_v33  ;;  %v577_v38 = vld [vmem:[#allocation2 + $0x100] sm:$0xff]  ;;  %5271 = vmatprep.subr.bf16.mxu0 %v16487_v36  ;;  %v16742_v43 = vcombine.low %v849_v32, %v857_v33 }
  0xa8   : > { %v585_v39 = vld [vmem:[#allocation2 + $0x140] sm:$0xff]  ;;  %5272 = vmatpush1.bf16.msra.mxu0 %v16486_v42 }
  0xa9   : > { %v833_v40 = vld [vmem:[#allocation2 + $0x900] sm:$0xff]  ;;  %v16471_v44 = vcombine.high %v577_v38, %v585_v39  ;;  %5312 = vmatprep.subr.bf16.mxu1 %v16743_v37  ;;  %v16470_v50 = vcombine.low %v577_v38, %v585_v39 }
  0xaa   : > { %v841_v41 = vld [vmem:[#allocation2 + $0x940] sm:$0xff]  ;;  %5313 = vmatpush1.bf16.msra.mxu1 %v16742_v43 }
  0xab   : > { %v16727_v45 = vcombine.high %v833_v40, %v841_v41  ;;  %v561_v46 = vld [vmem:[#allocation2 + $0x80] sm:$0xff]  ;;  %5273 = vmatprep.subr.bf16.mxu0 %v16471_v44  ;;  %v16726_v51 = vcombine.low %v833_v40, %v841_v41 }
  0xac   : > { %v569_v47 = vld [vmem:[#allocation2 + $0xc0] sm:$0xff]  ;;  %5274 = vmatpush1.bf16.msra.mxu0 %v16470_v50 }
  0xad   : > { %v817_v48 = vld [vmem:[#allocation2 + $0x880] sm:$0xff]  ;;  %v16455_v52 = vcombine.high %v561_v46, %v569_v47  ;;  %5314 = vmatprep.subr.bf16.mxu1 %v16727_v45  ;;  %v16454_v62 = vcombine.low %v561_v46, %v569_v47 }
  0xae   : > { %v825_v49 = vld [vmem:[#allocation2 + $0x8c0] sm:$0xff]  ;;  %5315 = vmatpush1.bf16.msra.mxu1 %v16726_v51 }
  0xaf   : > { %v19700_v53 = vld [vmem:[%s19697_s16] sm:$0xff]  ;;  %v16711_v55 = vcombine.high %v817_v48, %v825_v49  ;;  %5275 = vmatprep.subr.bf16.mxu0 %v16455_v52  ;;  %v16710_v63 = vcombine.low %v817_v48, %v825_v49 }
  0xb0   : > { %v545_v56 = vld [vmem:[#allocation2] sm:$0xff]  ;;  %v19707_v58 = vcombine.high %v19700_v53, %v19700_v53  ;;  %5276 = vmatpush1.bf16.msra.mxu0 %v16454_v62 }
  0xb1   : > { %v553_v57 = vld [vmem:[#allocation2 + $0x40] sm:$0xff]  ;;  %5316 = vmatprep.subr.bf16.mxu1 %v16711_v55 }
  0xb2   : > { %v801_v59 = vld [vmem:[#allocation2 + $0x800] sm:$0xff]  ;;  %5295 = vmatprep.mubr.bf16.mxu0 %v19707_v58  ;;  %v16439_v0 = vcombine.high %v545_v56, %v553_v57  ;;  %v16438_v6 = vcombine.low %v545_v56, %v553_v57  ;;  %5317 = vmatpush1.bf16.msra.mxu1 %v16710_v63 }
  0xb3   : > { %v809_v60 = vld [vmem:[#allocation2 + $0x840] sm:$0xff] }
  0xb4   : > { %v16695_v1 = vcombine.high %v801_v59, %v809_v60  ;;  %v785_v2 = vld [vmem:[#allocation2 + $0x780] sm:$0xff]  ;;  %5277 = vmatprep.subr.bf16.mxu0 %v16439_v0  ;;  %v16694_v7 = vcombine.low %v801_v59, %v809_v60 }
  0xb5   : > { %v793_v3 = vld [vmem:[#allocation2 + $0x7c0] sm:$0xff]  ;;  %5278 = vmatpush1.bf16.msra.mxu0 %v16438_v6 }
  0xb6   : > { %v1041_v4 = vld [vmem:[#allocation2 + $0xf80] sm:$0xff]  ;;  %v16679_v8 = vcombine.high %v785_v2, %v793_v3  ;;  %5318 = vmatprep.subr.bf16.mxu1 %v16695_v1  ;;  %v16678_v14 = vcombine.low %v785_v2, %v793_v3 }
  0xb7   : > { %v1049_v5 = vld [vmem:[#allocation2 + $0xfc0] sm:$0xff]  ;;  %5319 = vmatpush1.bf16.msra.mxu1 %v16694_v7 }
  0xb8   : > { %v16935_v9 = vcombine.high %v1041_v4, %v1049_v5  ;;  %v769_v10 = vld [vmem:[#allocation2 + $0x700] sm:$0xff]  ;;  %5279 = vmatprep.subr.bf16.mxu0 %v16679_v8  ;;  %v16934_v15 = vcombine.low %v1041_v4, %v1049_v5  ;;  %v658_v8 = vld [vmem:[#allocation2 + $0x388] sm:$0xff] }
  0xb9   : > { %v777_v11 = vld [vmem:[#allocation2 + $0x740] sm:$0xff]  ;;  %5280 = vmatpush2.bf16.msra.mxu0 %v16678_v14 }
  0xba   : > { %v1025_v12 = vld [vmem:[#allocation2 + $0xf00] sm:$0xff]  ;;  %v16663_v16 = vcombine.high %v769_v10, %v777_v11  ;;  %5320 = vmatprep.subr.bf16.mxu1 %v16935_v9  ;;  %v16662_v22 = vcombine.low %v769_v10, %v777_v11  ;;  %v666_v9 = vld [vmem:[#allocation2 + $0x3c8] sm:$0xff] }
  0xbb   : > { %v1033_v13 = vld [vmem:[#allocation2 + $0xf40] sm:$0xff]  ;;  %5321 = vmatpush2.bf16.msra.mxu1 %v16934_v15 }
  0xbc   : > { %v16919_v17 = vcombine.high %v1025_v12, %v1033_v13  ;;  %v753_v18 = vld [vmem:[#allocation2 + $0x680] sm:$0xff]  ;;  %5281 = vmatprep.subr.bf16.mxu0 %v16663_v16  ;;  %v16918_v23 = vcombine.low %v1025_v12, %v1033_v13  ;;  %v16553_v13 = vcombine.high %v658_v8, %v666_v9  ;;  %v19717_v16 = vcombine.low %v19700_v53, %v19700_v53 }
  0xbd   : > { %v761_v19 = vld [vmem:[#allocation2 + $0x6c0] sm:$0xff]  ;;  %5282 = vmatpush2.bf16.msra.mxu0 %v16662_v22  ;;  %v16552_v22 = vcombine.low %v658_v8, %v666_v9 }
  0xbe   : > { %v1009_v20 = vld [vmem:[#allocation2 + $0xe80] sm:$0xff]  ;;  %v16647_v24 = vcombine.high %v753_v18, %v761_v19  ;;  %5322 = vmatprep.subr.bf16.mxu1 %v16919_v17  ;;  %v16646_v30 = vcombine.low %v753_v18, %v761_v19  ;;  %v642_v17 = vld [vmem:[#allocation2 + $0x308] sm:$0xff]  ;;  %v19720_v19 = vld [vmem:[%s19697_s16 + $0x10] sm:$0xff]  ;;  %s19378_s16 = scalar_lea.vmem %s19377_s25, 256 }
  0xbf   : > { %v1017_v21 = vld [vmem:[#allocation2 + $0xec0] sm:$0xff]  ;;  %5323 = vmatpush2.bf16.msra.mxu1 %v16918_v23  ;;  %v650_v18 = vld [vmem:[#allocation2 + $0x348] sm:$0xff] }
  0xc0   : > { %v16903_v25 = vcombine.high %v1009_v20, %v1017_v21  ;;  %v737_v26 = vld [vmem:[#allocation2 + $0x600] sm:$0xff]  ;;  %5283 = vmatprep.subr.bf16.mxu0 %v16647_v24  ;;  %v16902_v31 = vcombine.low %v1009_v20, %v1017_v21  ;;  %v19724_v21 = vcombine.low %v19703_v54, %v19703_v54  ;;  %v16537_v53 = vcombine.high %v642_v17, %v650_v18 }
  0xc1   : > { %v745_v27 = vld [vmem:[#allocation2 + $0x640] sm:$0xff]  ;;  %5284 = vmatpush2.bf16.msra.mxu0 %v16646_v30 }
  0xc2   : > { %v993_v28 = vld [vmem:[#allocation2 + $0xe00] sm:$0xff]  ;;  %v16631_v32 = vcombine.high %v737_v26, %v745_v27  ;;  %5324 = vmatprep.subr.bf16.mxu1 %v16903_v25  ;;  %v16630_v38 = vcombine.low %v737_v26, %v745_v27  ;;  %v626_v26 = vld [vmem:[#allocation2 + $0x288] sm:$0xff] }
  0xc3   : > { %v1001_v29 = vld [vmem:[#allocation2 + $0xe40] sm:$0xff]  ;;  %5325 = vmatpush2.bf16.msra.mxu1 %v16902_v31  ;;  %v634_v27 = vld [vmem:[#allocation2 + $0x2c8] sm:$0xff] }
  0xc4   : > { %v16887_v33 = vcombine.high %v993_v28, %v1001_v29  ;;  %v721_v34 = vld [vmem:[#allocation2 + $0x580] sm:$0xff]  ;;  %5285 = vmatprep.subr.bf16.mxu0 %v16631_v32  ;;  %v16886_v39 = vcombine.low %v993_v28, %v1001_v29  ;;  %v19728_v28 = vcombine.high %v19720_v19, %v19720_v19  ;;  %v16536_v29 = vcombine.low %v642_v17, %v650_v18 }
  0xc5   : > { %v729_v35 = vld [vmem:[#allocation2 + $0x5c0] sm:$0xff]  ;;  %5286 = vmatpush2.bf16.msra.mxu0 %v16630_v38 }
  0xc6   : > { %v977_v36 = vld [vmem:[#allocation2 + $0xd80] sm:$0xff]  ;;  %v16615_v40 = vcombine.high %v721_v34, %v729_v35  ;;  %5326 = vmatprep.subr.bf16.mxu1 %v16887_v33  ;;  %v16614_v46 = vcombine.low %v721_v34, %v729_v35  ;;  %v610_v33 = vld [vmem:[#allocation2 + $0x208] sm:$0xff]  ;;  %v16521_v34 = vcombine.high %v626_v26, %v634_v27 }
  0xc7   : > { %v985_v37 = vld [vmem:[#allocation2 + $0xdc0] sm:$0xff]  ;;  %5327 = vmatpush2.bf16.msra.mxu1 %v16886_v39  ;;  %v618_v35 = vld [vmem:[#allocation2 + $0x248] sm:$0xff] }
  0xc8   : > { %v16871_v41 = vcombine.high %v977_v36, %v985_v37  ;;  %v705_v42 = vld [vmem:[#allocation2 + $0x500] sm:$0xff]  ;;  %5287 = vmatprep.subr.bf16.mxu0 %v16615_v40  ;;  %v16870_v47 = vcombine.low %v977_v36, %v985_v37  ;;  %v16520_v37 = vcombine.low %v626_v26, %v634_v27  ;;  %v778_v26 = vld [vmem:[#allocation2 + $0x748] sm:$0xff] }
  0xc9   : > { %v713_v43 = vld [vmem:[#allocation2 + $0x540] sm:$0xff]  ;;  %5288 = vmatpush2.bf16.msra.mxu0 %v16614_v46 }
  0xca   : > { %v961_v44 = vld [vmem:[#allocation2 + $0xd00] sm:$0xff]  ;;  %v16599_v48 = vcombine.high %v705_v42, %v713_v43  ;;  %5328 = vmatprep.subr.bf16.mxu1 %v16871_v41  ;;  %v16598_v56 = vcombine.low %v705_v42, %v713_v43  ;;  %v594_v41 = vld [vmem:[#allocation2 + $0x188] sm:$0xff]  ;;  %v16505_v42 = vcombine.high %v610_v33, %v618_v35 }
  0xcb   : > { %v969_v45 = vld [vmem:[#allocation2 + $0xd40] sm:$0xff]  ;;  %5329 = vmatpush2.bf16.msra.mxu1 %v16870_v47  ;;  %v602_v43 = vld [vmem:[#allocation2 + $0x1c8] sm:$0xff] }
  0xcc   : > { %v16855_v49 = vcombine.high %v961_v44, %v969_v45  ;;  %v689_v50 = vld [vmem:[#allocation2 + $0x480] sm:$0xff]  ;;  %5289 = vmatprep.subr.bf16.mxu0 %v16599_v48  ;;  %v16854_v57 = vcombine.low %v961_v44, %v969_v45  ;;  %v16504_v45 = vcombine.low %v610_v33, %v618_v35  ;;  %v762_v33 = vld [vmem:[#allocation2 + $0x6c8] sm:$0xff] }
  0xcd   : > { %v697_v51 = vld [vmem:[#allocation2 + $0x4c0] sm:$0xff]  ;;  %5290 = vmatpush2.bf16.msra.mxu0 %v16598_v56 }
  0xce   : > { %v945_v52 = vld [vmem:[#allocation2 + $0xc80] sm:$0xff]  ;;  %v16583_v59 = vcombine.high %v689_v50, %v697_v51  ;;  %5330 = vmatprep.subr.bf16.mxu1 %v16855_v49  ;;  %v16582_v2 = vcombine.low %v689_v50, %v697_v51  ;;  %v578_v49 = vld [vmem:[#allocation2 + $0x108] sm:$0xff]  ;;  %v16489_v50 = vcombine.high %v594_v41, %v602_v43 }
  0xcf   : > { %v953_v55 = vld [vmem:[#allocation2 + $0xcc0] sm:$0xff]  ;;  %5331 = vmatpush2.bf16.msra.mxu1 %v16854_v57  ;;  %v586_v51 = vld [vmem:[#allocation2 + $0x148] sm:$0xff] }
  0xd0   : > { %v16839_v60 = vcombine.high %v945_v52, %v953_v55  ;;  %v673_v62 = vld [vmem:[#allocation2 + $0x400] sm:$0xff]  ;;  %5291 = vmatprep.subr.bf16.mxu0 %v16583_v59  ;;  %v16838_v3 = vcombine.low %v945_v52, %v953_v55  ;;  %v16488_v55 = vcombine.low %v594_v41, %v602_v43  ;;  %v746_v41 = vld [vmem:[#allocation2 + $0x648] sm:$0xff] }
  0xd1   : > { %v681_v63 = vld [vmem:[#allocation2 + $0x440] sm:$0xff]  ;;  %5292 = vmatpush2.bf16.msra.mxu0 %v16582_v2 }
  0xd2   : > { %v929_v0 = vld [vmem:[#allocation2 + $0xc00] sm:$0xff]  ;;  %v16567_v4 = vcombine.high %v673_v62, %v681_v63  ;;  %5332 = vmatprep.subr.bf16.mxu1 %v16839_v60  ;;  %v16566_v10 = vcombine.low %v673_v62, %v681_v63  ;;  %v562_v60 = vld [vmem:[#allocation2 + $0x88] sm:$0xff]  ;;  %v16473_v62 = vcombine.high %v578_v49, %v586_v51 }
  0xd3   : > { %v937_v1 = vld [vmem:[#allocation2 + $0xc40] sm:$0xff]  ;;  %5333 = vmatpush2.bf16.msra.mxu1 %v16838_v3  ;;  %v570_v63 = vld [vmem:[#allocation2 + $0xc8] sm:$0xff] }
  0xd4   : > { %v16823_v5 = vcombine.high %v929_v0, %v937_v1  ;;  %v1169_v6 = vld [vmem:[#allocation2 + $0x1380] sm:$0xff]  ;;  %5293 = vmatprep.subr.bf16.mxu0 %v16567_v4  ;;  %v16822_v11 = vcombine.low %v929_v0, %v937_v1  ;;  %v16472_v1 = vcombine.low %v578_v49, %v586_v51  ;;  %v16456_v9 = vcombine.low %v562_v60, %v570_v63  ;;  %v730_v49 = vld [vmem:[#allocation2 + $0x5c8] sm:$0xff] }
  0xd5   : > { %v1177_v7 = vld [vmem:[#allocation2 + $0x13c0] sm:$0xff]  ;;  %5294 = vmatpush2.bf16.msra.mxu0 %v16566_v10 }
  0xd6   : > { %v17063_v12 = vcombine.high %v1169_v6, %v1177_v7  ;;  %5334 = vmatprep.subr.bf16.mxu1 %v16823_v5  ;;  %v1153_v14 = vld [vmem:[#allocation2 + $0x1300] sm:$0xff]  ;;  %v17062_v20 = vcombine.low %v1169_v6, %v1177_v7  ;;  %v546_v5 = vld [vmem:[#allocation2 + $0x8] sm:$0xff]  ;;  %v16457_v6 = vcombine.high %v562_v60, %v570_v63 }
  0xd7   : > { %v1161_v15 = vld [vmem:[#allocation2 + $0x1340] sm:$0xff]  ;;  %5335 = vmatpush2.bf16.msra.mxu1 %v16822_v11  ;;  %v554_v7 = vld [vmem:[#allocation2 + $0x48] sm:$0xff] }
  0xd8   : > { %5345 = vmatprep.subr.bf16.mxu0 %v17063_v12  ;;  %v17047_v23 = vcombine.high %v1153_v14, %v1161_v15  ;;  %v1137_v24 = vld [vmem:[#allocation2 + $0x1280] sm:$0xff]  ;;  %5386 = vmatprep.subr.bf16.mxu1 %v16553_v13  ;;  %v17046_v54 = vcombine.low %v1153_v14, %v1161_v15  ;;  %v786_v13 = vld [vmem:[#allocation2 + $0x788] sm:$0xff]  ;;  %v16441_v14 = vcombine.high %v546_v5, %v554_v7 }
  0xd9   : > { %v1145_v25 = vld [vmem:[#allocation2 + $0x12c0] sm:$0xff]  ;;  %5296 = vmatmul.mubr.bf16.vlgmr.msra.gmra.mxu0 %v19717_v16  ;;  %v794_v15 = vld [vmem:[#allocation2 + $0x7c8] sm:$0xff]  ;;  %v16440_v18 = vcombine.low %v546_v5, %v554_v7 }
  0xda   : > { %5337 = vmatmul.mubr.bf16.vlgmr.msra.gmra.mxu1 %v19724_v21  ;;  %5346 = vmatpush1.bf16.msra.mxu0 %v17062_v20  ;;  %v17031_v30 = vcombine.high %v1137_v24, %v1145_v25  ;;  %v1121_v31 = vld [vmem:[#allocation2 + $0x1200] sm:$0xff]  ;;  %v17030_v36 = vcombine.low %v1137_v24, %v1145_v25  ;;  %v770_v24 = vld [vmem:[#allocation2 + $0x708] sm:$0xff]  ;;  %v16681_v25 = vcombine.high %v786_v13, %v794_v15 }
  0xdb   : > { %5387 = vmatpush1.bf16.msra.mxu1 %v16552_v22  ;;  %5347 = vmatprep.subr.bf16.mxu0 %v17047_v23  ;;  %v1129_v32 = vld [vmem:[#allocation2 + $0x1240] sm:$0xff]  ;;  %v16680_v27 = vcombine.low %v786_v13, %v794_v15  ;;  %v16664_v35 = vcombine.low %v770_v24, %v778_v26  ;;  %v714_v60 = vld [vmem:[#allocation2 + $0x548] sm:$0xff] }
  0xdc   : > { %5388 = vmatprep.subr.bf16.mxu1 %v16537_v53  ;;  %5377 = vmatprep.mubr.bf16.mxu0 %v19728_v28  ;;  %v17015_v38 = vcombine.high %v1121_v31, %v1129_v32  ;;  %v1105_v39 = vld [vmem:[#allocation2 + $0x1180] sm:$0xff]  ;;  %v17014_v44 = vcombine.low %v1121_v31, %v1129_v32  ;;  %v754_v31 = vld [vmem:[#allocation2 + $0x688] sm:$0xff]  ;;  %v16665_v32 = vcombine.high %v770_v24, %v778_v26 }
  0xdd   : > { %5418 = vmatprep.mubr.bf16.mxu1 %v19707_v58  ;;  %v1113_v40 = vld [vmem:[#allocation2 + $0x11c0] sm:$0xff]  ;;  %v16648_v43 = vcombine.low %v754_v31, %v762_v33  ;;  %v698_v5 = vld [vmem:[#allocation2 + $0x4c8] sm:$0xff] }
  0xde   : > { %5348 = vmatpush1.bf16.msra.mxu0 %v17046_v54  ;;  %v16999_v46 = vcombine.high %v1105_v39, %v1113_v40  ;;  %v1089_v47 = vld [vmem:[#allocation2 + $0x1100] sm:$0xff]  ;;  %v16998_v52 = vcombine.low %v1105_v39, %v1113_v40  ;;  %v738_v39 = vld [vmem:[#allocation2 + $0x608] sm:$0xff]  ;;  %v16649_v40 = vcombine.high %v754_v31, %v762_v33 }
  0xdf   : > { %5389 = vmatpush1.bf16.msra.mxu1 %v16536_v29  ;;  %5349 = vmatprep.subr.bf16.mxu0 %v17031_v30  ;;  %v1097_v48 = vld [vmem:[#allocation2 + $0x1140] sm:$0xff]  ;;  %v16632_v51 = vcombine.low %v738_v39, %v746_v41  ;;  %v682_v13 = vld [vmem:[#allocation2 + $0x448] sm:$0xff] }
  0xe0   : > { %5390 = vmatprep.subr.bf16.mxu1 %v16521_v34  ;;  %v16983_v56 = vcombine.high %v1089_v47, %v1097_v48  ;;  %v1073_v57 = vld [vmem:[#allocation2 + $0x1080] sm:$0xff]  ;;  %v16982_v0 = vcombine.low %v1089_v47, %v1097_v48  ;;  %v722_v47 = vld [vmem:[#allocation2 + $0x588] sm:$0xff]  ;;  %v16633_v48 = vcombine.high %v738_v39, %v746_v41 }
  0xe1   : > { %v1081_v59 = vld [vmem:[#allocation2 + $0x10c0] sm:$0xff]  ;;  %v16616_v63 = vcombine.low %v722_v47, %v730_v49  ;;  %v1178_v24 = vld [vmem:[#allocation2 + $0x13c8] sm:$0xff] }
  0xe2   : > { %5350 = vmatpush1.bf16.msra.mxu0 %v17030_v36  ;;  %v16967_v2 = vcombine.high %v1073_v57, %v1081_v59  ;;  %v1057_v3 = vld [vmem:[#allocation2 + $0x1000] sm:$0xff]  ;;  %v16966_v8 = vcombine.low %v1073_v57, %v1081_v59  ;;  %v706_v57 = vld [vmem:[#allocation2 + $0x508] sm:$0xff]  ;;  %v16617_v59 = vcombine.high %v722_v47, %v730_v49 }
  0xe3   : > { %5391 = vmatpush1.bf16.msra.mxu1 %v16520_v37  ;;  %5351 = vmatprep.subr.bf16.mxu0 %v17015_v38  ;;  %v1065_v4 = vld [vmem:[#allocation2 + $0x1040] sm:$0xff]  ;;  %v16600_v7 = vcombine.low %v706_v57, %v714_v60  ;;  %v1162_v31 = vld [vmem:[#allocation2 + $0x1348] sm:$0xff] }
  0xe4   : > { %5392 = vmatprep.subr.bf16.mxu1 %v16505_v42  ;;  %v16951_v10 = vcombine.high %v1057_v3, %v1065_v4  ;;  %v1297_v11 = vld [vmem:[#allocation2 + $0x1780] sm:$0xff]  ;;  %v16950_v17 = vcombine.low %v1057_v3, %v1065_v4  ;;  %v690_v3 = vld [vmem:[#allocation2 + $0x488] sm:$0xff]  ;;  %v16601_v4 = vcombine.high %v706_v57, %v714_v60 }
  0xe5   : > { %v1305_v12 = vld [vmem:[#allocation2 + $0x17c0] sm:$0xff]  ;;  %v16584_v15 = vcombine.low %v690_v3, %v698_v5  ;;  %v1138_v39 = vld [vmem:[#allocation2 + $0x1288] sm:$0xff] }
  0xe6   : > { %5352 = vmatpush1.bf16.msra.mxu0 %v17014_v44  ;;  %v17191_v20 = vcombine.high %v1297_v11, %v1305_v12  ;;  %v1281_v22 = vld [vmem:[#allocation2 + $0x1700] sm:$0xff]  ;;  %v17190_v53 = vcombine.low %v1297_v11, %v1305_v12  ;;  %v674_v11 = vld [vmem:[#allocation2 + $0x408] sm:$0xff]  ;;  %v16585_v12 = vcombine.high %v690_v3, %v698_v5 }
  0xe7   : > { %5393 = vmatpush1.bf16.msra.mxu1 %v16504_v45  ;;  %5353 = vmatprep.subr.bf16.mxu0 %v16999_v46  ;;  %v1289_v23 = vld [vmem:[#allocation2 + $0x1740] sm:$0xff]  ;;  %v16568_v26 = vcombine.low %v674_v11, %v682_v13  ;;  %v1130_v47 = vld [vmem:[#allocation2 + $0x1248] sm:$0xff] }
  0xe8   : > { %5394 = vmatprep.subr.bf16.mxu1 %v16489_v50  ;;  %v17175_v54 = vcombine.high %v1281_v22, %v1289_v23  ;;  %v1265_v29 = vld [vmem:[#allocation2 + $0x1680] sm:$0xff]  ;;  %v17174_v34 = vcombine.low %v1281_v22, %v1289_v23  ;;  %v1170_v22 = vld [vmem:[#allocation2 + $0x1388] sm:$0xff]  ;;  %v16569_v23 = vcombine.high %v674_v11, %v682_v13 }
  0xe9   : > { %v1273_v30 = vld [vmem:[#allocation2 + $0x16c0] sm:$0xff]  ;;  %v1114_v57 = vld [vmem:[#allocation2 + $0x11c8] sm:$0xff] }
  0xea   : > { %5354 = vmatpush1.bf16.msra.mxu0 %v16998_v52  ;;  %v17159_v36 = vcombine.high %v1265_v29, %v1273_v30  ;;  %v1249_v37 = vld [vmem:[#allocation2 + $0x1600] sm:$0xff]  ;;  %v17158_v42 = vcombine.low %v1265_v29, %v1273_v30  ;;  %v1154_v29 = vld [vmem:[#allocation2 + $0x1308] sm:$0xff]  ;;  %v17065_v30 = vcombine.high %v1170_v22, %v1178_v24 }
  0xeb   : > { %5395 = vmatpush1.bf16.msra.mxu1 %v16488_v55  ;;  %5355 = vmatprep.subr.bf16.mxu0 %v16983_v56  ;;  %v1257_v38 = vld [vmem:[#allocation2 + $0x1640] sm:$0xff]  ;;  %v1098_v3 = vld [vmem:[#allocation2 + $0x1148] sm:$0xff] }
  0xec   : > { %5396 = vmatprep.subr.bf16.mxu1 %v16473_v62  ;;  %v17143_v44 = vcombine.high %v1249_v37, %v1257_v38  ;;  %v1233_v45 = vld [vmem:[#allocation2 + $0x1580] sm:$0xff]  ;;  %v17142_v50 = vcombine.low %v1249_v37, %v1257_v38  ;;  %v882_v37 = vld [vmem:[#allocation2 + $0xa88] sm:$0xff] }
  0xed   : > { %v1241_v46 = vld [vmem:[#allocation2 + $0x15c0] sm:$0xff]  ;;  %v890_v38 = vld [vmem:[#allocation2 + $0xac8] sm:$0xff] }
  0xee   : > { %5356 = vmatpush1.bf16.msra.mxu0 %v16982_v0  ;;  %v17127_v52 = vcombine.high %v1233_v45, %v1241_v46  ;;  %v1217_v55 = vld [vmem:[#allocation2 + $0x1500] sm:$0xff]  ;;  %v17126_v62 = vcombine.low %v1233_v45, %v1241_v46  ;;  %v1122_v45 = vld [vmem:[#allocation2 + $0x1208] sm:$0xff] }
  0xef   : > { %5397 = vmatpush1.bf16.msra.mxu1 %v16472_v1  ;;  %5357 = vmatprep.subr.bf16.mxu0 %v16967_v2  ;;  %v1225_v56 = vld [vmem:[#allocation2 + $0x1540] sm:$0xff]  ;;  %v17016_v60 = vcombine.low %v1122_v45, %v1130_v47  ;;  %v1082_v11 = vld [vmem:[#allocation2 + $0x10c8] sm:$0xff] }
  0xf0   : > { %5398 = vmatprep.subr.bf16.mxu1 %v16457_v6  ;;  %v17111_v0 = vcombine.high %v1217_v55, %v1225_v56  ;;  %v1201_v1 = vld [vmem:[#allocation2 + $0x1480] sm:$0xff]  ;;  %v17110_v6 = vcombine.low %v1217_v55, %v1225_v56  ;;  %v1106_v55 = vld [vmem:[#allocation2 + $0x1188] sm:$0xff]  ;;  %v17017_v56 = vcombine.high %v1122_v45, %v1130_v47 }
  0xf1   : > { %v1209_v2 = vld [vmem:[#allocation2 + $0x14c0] sm:$0xff]  ;;  %v17000_v5 = vcombine.low %v1106_v55, %v1114_v57  ;;  %v1274_v45 = vld [vmem:[#allocation2 + $0x16c8] sm:$0xff] }
  0xf2   : > { %5358 = vmatpush1.bf16.msra.mxu0 %v16966_v8  ;;  %v17095_v8 = vcombine.high %v1201_v1, %v1209_v2 }
  0xf3   : > { %5399 = vmatpush1.bf16.msra.mxu1 %v16456_v9  ;;  %5359 = vmatprep.subr.bf16.mxu0 %v16951_v10  ;;  %v1185_v9 = vld [vmem:[#allocation2 + $0x1400] sm:$0xff] }
  0xf4   : > { %5400 = vmatprep.subr.bf16.mxu1 %v16441_v14  ;;  %v1193_v10 = vld [vmem:[#allocation2 + $0x1440] sm:$0xff]  ;;  %v17094_v14 = vcombine.low %v1201_v1, %v1209_v2  ;;  %v1090_v1 = vld [vmem:[#allocation2 + $0x1108] sm:$0xff]  ;;  %v17001_v2 = vcombine.high %v1106_v55, %v1114_v57 }
  0xf5   : > { %v16984_v13 = vcombine.low %v1090_v1, %v1098_v3  ;;  %v1258_v55 = vld [vmem:[#allocation2 + $0x1648] sm:$0xff] }
  0xf6   : > { %5360 = vmatpush1.bf16.msra.mxu0 %v16950_v17  ;;  %v17079_v17 = vcombine.high %v1185_v9, %v1193_v10 }
  0xf7   : > { %5401 = vmatpush1.bf16.msra.mxu1 %v16440_v18  ;;  %5361 = vmatprep.subr.bf16.mxu0 %v17191_v20  ;;  %v914_v18 = vld [vmem:[#allocation2 + $0xb88] sm:$0xff] }
  0xf8   : > { %5402 = vmatprep.subr.bf16.mxu1 %v16681_v25  ;;  %v922_v20 = vld [vmem:[#allocation2 + $0xbc8] sm:$0xff]  ;;  %v17078_v25 = vcombine.low %v1185_v9, %v1193_v10  ;;  %v16985_v10 = vcombine.high %v1090_v1, %v1098_v3 }
  0xf9   : > { %v16808_v33 = vcombine.low %v914_v18, %v922_v20  ;;  %v1074_v9 = vld [vmem:[#allocation2 + $0x1088] sm:$0xff] }
  0xfa   : > { %5362 = vmatpush2.bf16.msra.mxu0 %v17190_v53  ;;  %v16809_v53 = vcombine.high %v914_v18, %v922_v20  ;;  %v1058_v18 = vld [vmem:[#allocation2 + $0x1008] sm:$0xff]  ;;  %v16969_v20 = vcombine.high %v1074_v9, %v1082_v11 }
  0xfb   : > { %5403 = vmatpush2.bf16.msra.mxu1 %v16680_v27  ;;  %5363 = vmatprep.subr.bf16.mxu0 %v17175_v54  ;;  %v898_v27 = vld [vmem:[#allocation2 + $0xb08] sm:$0xff] }
  0xfc   : > { %5404 = vmatprep.subr.bf16.mxu1 %v16665_v32  ;;  %v906_v54 = vld [vmem:[#allocation2 + $0xb48] sm:$0xff]  ;;  %v19736_v32 = vcombine.low %v19720_v19, %v19720_v19  ;;  %v17048_v19 = vcombine.low %v1154_v29, %v1162_v31 }
  0xfd   : > { %v16792_v41 = vcombine.low %v898_v27, %v906_v54  ;;  %v1242_v1 = vld [vmem:[#allocation2 + $0x15c8] sm:$0xff] }
  0xfe   : > { %5364 = vmatpush2.bf16.msra.mxu0 %v17174_v34  ;;  %v17064_v34 = vcombine.low %v1170_v22, %v1178_v24  ;;  %v1066_v22 = vld [vmem:[#allocation2 + $0x1048] sm:$0xff]  ;;  %v16968_v24 = vcombine.low %v1074_v9, %v1082_v11 }
  0xff   : > { %5405 = vmatpush2.bf16.msra.mxu1 %v16664_v35  ;;  %5365 = vmatprep.subr.bf16.mxu0 %v17159_v36  ;;  %v16793_v35 = vcombine.high %v898_v27, %v906_v54  ;;  %v17049_v36 = vcombine.high %v1154_v29, %v1162_v31  ;;  %v1298_v27 = vld [vmem:[#allocation2 + $0x1788] sm:$0xff]  ;;  %v16953_v54 = vcombine.high %v1058_v18, %v1066_v22 }
 0x100   : > { %5406 = vmatprep.subr.bf16.mxu1 %v16649_v40  ;;  %v1146_v40 = vld [vmem:[#allocation2 + $0x12c8] sm:$0xff]  ;;  %v16952_v31 = vcombine.low %v1058_v18, %v1066_v22 }
 0x101   : > { %v17033_v46 = vcombine.high %v1138_v39, %v1146_v40  ;;  %v17032_v49 = vcombine.low %v1138_v39, %v1146_v40  ;;  %v1306_v29 = vld [vmem:[#allocation2 + $0x17c8] sm:$0xff] }
 0x102   : > { %5366 = vmatpush2.bf16.msra.mxu0 %v17158_v42  ;;  %v16777_v42 = vcombine.high %v882_v37, %v890_v38  ;;  %v17192_v40 = vcombine.low %v1298_v27, %v1306_v29  ;;  %v1226_v9 = vld [vmem:[#allocation2 + $0x1548] sm:$0xff] }
 0x103   : > { %5407 = vmatpush2.bf16.msra.mxu1 %v16648_v43  ;;  %5367 = vmatprep.subr.bf16.mxu0 %v17143_v44  ;;  %v866_v43 = vld [vmem:[#allocation2 + $0xa08] sm:$0xff] }
 0x104   : > { %5408 = vmatprep.subr.bf16.mxu1 %v16633_v48  ;;  %v874_v44 = vld [vmem:[#allocation2 + $0xa48] sm:$0xff]  ;;  %v16776_v48 = vcombine.low %v882_v37, %v890_v38  ;;  %v17193_v37 = vcombine.high %v1298_v27, %v1306_v29 }
 0x105   : > { %v1290_v38 = vld [vmem:[#allocation2 + $0x1748] sm:$0xff] }
 0x106   : > { %5368 = vmatpush2.bf16.msra.mxu0 %v17142_v50  ;;  %v16761_v50 = vcombine.high %v866_v43, %v874_v44  ;;  %v1210_v18 = vld [vmem:[#allocation2 + $0x14c8] sm:$0xff] }
 0x107   : > { %5409 = vmatpush2.bf16.msra.mxu1 %v16632_v51  ;;  %5369 = vmatprep.subr.bf16.mxu0 %v17127_v52  ;;  %v850_v51 = vld [vmem:[#allocation2 + $0x988] sm:$0xff] }
 0x108   : > { %5410 = vmatprep.subr.bf16.mxu1 %v16617_v59  ;;  %v858_v52 = vld [vmem:[#allocation2 + $0x9c8] sm:$0xff]  ;;  %v16760_v59 = vcombine.low %v866_v43, %v874_v44 }
 0x109   : > { %v1266_v43 = vld [vmem:[#allocation2 + $0x1688] sm:$0xff] }
 0x10a   : > { %5370 = vmatpush2.bf16.msra.mxu0 %v17126_v62  ;;  %v16745_v62 = vcombine.high %v850_v51, %v858_v52  ;;  %v17160_v57 = vcombine.low %v1266_v43, %v1274_v45  ;;  %v1194_v27 = vld [vmem:[#allocation2 + $0x1448] sm:$0xff] }
 0x10b   : > { %5411 = vmatpush2.bf16.msra.mxu1 %v16616_v63  ;;  %5371 = vmatprep.subr.bf16.mxu0 %v17111_v0  ;;  %v834_v63 = vld [vmem:[#allocation2 + $0x908] sm:$0xff] }
 0x10c   : > { %5412 = vmatprep.subr.bf16.mxu1 %v16601_v4  ;;  %v842_v0 = vld [vmem:[#allocation2 + $0x948] sm:$0xff]  ;;  %v16744_v4 = vcombine.low %v850_v51, %v858_v52  ;;  %v17161_v52 = vcombine.high %v1266_v43, %v1274_v45  ;;  %v907_v43 = vld [vmem:[#allocation2 + $0xb50] sm:$0xff] }
 0x10d   : > { %v1250_v51 = vld [vmem:[#allocation2 + $0x1608] sm:$0xff] }
 0x10e   : > { %5372 = vmatpush2.bf16.msra.mxu0 %v17110_v6  ;;  %v16729_v6 = vcombine.high %v834_v63, %v842_v0  ;;  %v17144_v3 = vcombine.low %v1250_v51, %v1258_v55 }
 0x10f   : > { %5413 = vmatpush2.bf16.msra.mxu1 %v16600_v7  ;;  %5373 = vmatprep.subr.bf16.mxu0 %v17095_v8  ;;  %v818_v7 = vld [vmem:[#allocation2 + $0x888] sm:$0xff] }
 0x110   : > { %5414 = vmatprep.subr.bf16.mxu1 %v16585_v12  ;;  %v826_v8 = vld [vmem:[#allocation2 + $0x8c8] sm:$0xff]  ;;  %v16728_v12 = vcombine.low %v834_v63, %v842_v0  ;;  %v17145_v0 = vcombine.high %v1250_v51, %v1258_v55  ;;  %v891_v51 = vld [vmem:[#allocation2 + $0xad0] sm:$0xff] }
 0x111   : > { %v1234_v63 = vld [vmem:[#allocation2 + $0x1588] sm:$0xff] }
 0x112   : > { %5374 = vmatpush2.bf16.msra.mxu0 %v17094_v14  ;;  %v16713_v14 = vcombine.high %v818_v7, %v826_v8  ;;  %v17128_v11 = vcombine.low %v1234_v63, %v1242_v1 }
 0x113   : > { %5415 = vmatpush2.bf16.msra.mxu1 %v16584_v15  ;;  %5375 = vmatprep.subr.bf16.mxu0 %v17079_v17  ;;  %v802_v15 = vld [vmem:[#allocation2 + $0x808] sm:$0xff] }
 0x114   : > { %5416 = vmatprep.subr.bf16.mxu1 %v16569_v23  ;;  %v810_v17 = vld [vmem:[#allocation2 + $0x848] sm:$0xff]  ;;  %v16712_v23 = vcombine.low %v818_v7, %v826_v8  ;;  %v17129_v8 = vcombine.high %v1234_v63, %v1242_v1  ;;  %v875_v63 = vld [vmem:[#allocation2 + $0xa50] sm:$0xff] }
 0x115   : > { %v1218_v7 = vld [vmem:[#allocation2 + $0x1508] sm:$0xff] }
 0x116   : > { %5376 = vmatpush2.bf16.msra.mxu0 %v17078_v25  ;;  %v16697_v25 = vcombine.high %v802_v15, %v810_v17  ;;  %v17112_v22 = vcombine.low %v1218_v7, %v1226_v9 }
 0x117   : > { %5417 = vmatpush2.bf16.msra.mxu1 %v16568_v26  ;;  %5427 = vmatprep.subr.bf16.mxu0 %v16809_v53  ;;  %v1042_v26 = vld [vmem:[#allocation2 + $0xf88] sm:$0xff] }
 0x118   : > { %5468 = vmatprep.subr.bf16.mxu1 %v17065_v30  ;;  %v1050_v53 = vld [vmem:[#allocation2 + $0xfc8] sm:$0xff]  ;;  %v16696_v30 = vcombine.low %v802_v15, %v810_v17  ;;  %v17113_v17 = vcombine.high %v1218_v7, %v1226_v9  ;;  %v859_v7 = vld [vmem:[#allocation2 + $0x9d0] sm:$0xff] }
 0x119   : > { %5378 = vmatmul.mubr.bf16.vlgmr.msra.gmra.mxu0 %v19736_v32  ;;  %v16936_v39 = vcombine.low %v1042_v26, %v1050_v53  ;;  %v1202_v15 = vld [vmem:[#allocation2 + $0x1488] sm:$0xff] }
 0x11a   : > { %5419 = vmatmul.mubr.bf16.vlgmr.msra.gmra.mxu1 %v19717_v16  ;;  %5428 = vmatpush1.bf16.msra.mxu0 %v16808_v33  ;;  %v16937_v33 = vcombine.high %v1042_v26, %v1050_v53  ;;  %v1186_v26 = vld [vmem:[#allocation2 + $0x1408] sm:$0xff]  ;;  %v17097_v53 = vcombine.high %v1202_v15, %v1210_v18  ;;  %v17096_v29 = vcombine.low %v1202_v15, %v1210_v18  ;;  %v843_v15 = vld [vmem:[#allocation2 + $0x950] sm:$0xff] }
 0x11b   : > { %5469 = vmatpush1.bf16.msra.mxu1 %v17064_v34  ;;  %5429 = vmatprep.subr.bf16.mxu0 %v16793_v35  ;;  %v1026_v34 = vld [vmem:[#allocation2 + $0xf08] sm:$0xff] }
 0x11c   : > { %5470 = vmatprep.subr.bf16.mxu1 %v17049_v36  ;;  %5459 = vmatprep.mubr.bf16.mxu0 %v19711_v61  ;;  %v1034_v35 = vld [vmem:[#allocation2 + $0xf48] sm:$0xff] }
 0x11d   : > { %5500 = vmatprep.mubr.bf16.mxu1 %v19728_v28  ;;  %v1282_v36 = vld [vmem:[#allocation2 + $0x1708] sm:$0xff] }
 0x11e   : > { %5430 = vmatpush1.bf16.msra.mxu0 %v16792_v41  ;;  %v16921_v41 = vcombine.high %v1026_v34, %v1034_v35  ;;  %v17177_v44 = vcombine.high %v1282_v36, %v1290_v38  ;;  %v17176_v47 = vcombine.low %v1282_v36, %v1290_v38  ;;  %v923_v36 = vld [vmem:[#allocation2 + $0xbd0] sm:$0xff]  ;;  %v17080_v38 = vcombine.low %v1186_v26, %v1194_v27 }
 0x11f   : > { %5471 = vmatpush1.bf16.msra.mxu1 %v17048_v19  ;;  %5431 = vmatprep.subr.bf16.mxu0 %v16777_v42  ;;  %v1010_v19 = vld [vmem:[#allocation2 + $0xe88] sm:$0xff] }
 0x120   : > { %5472 = vmatprep.subr.bf16.mxu1 %v17033_v46  ;;  %v1018_v42 = vld [vmem:[#allocation2 + $0xec8] sm:$0xff]  ;;  %v16920_v46 = vcombine.low %v1026_v34, %v1034_v35  ;;  %v915_v34 = vld [vmem:[#allocation2 + $0xb90] sm:$0xff]  ;;  %v17081_v35 = vcombine.high %v1186_v26, %v1194_v27 }
 0x121   : > { %v16810_v45 = vcombine.low %v915_v34, %v923_v36  ;;  %v827_v26 = vld [vmem:[#allocation2 + $0x8d0] sm:$0xff] }
 0x122   : > { %5432 = vmatpush1.bf16.msra.mxu0 %v16776_v48  ;;  %v16905_v48 = vcombine.high %v1010_v19, %v1018_v42 }
 0x123   : > { %5473 = vmatpush1.bf16.msra.mxu1 %v17032_v49  ;;  %5433 = vmatprep.subr.bf16.mxu0 %v16761_v50  ;;  %v994_v49 = vld [vmem:[#allocation2 + $0xe08] sm:$0xff] }
 0x124   : > { %5474 = vmatprep.subr.bf16.mxu1 %v17017_v56  ;;  %v1002_v50 = vld [vmem:[#allocation2 + $0xe48] sm:$0xff]  ;;  %v16904_v56 = vcombine.low %v1010_v19, %v1018_v42  ;;  %v899_v19 = vld [vmem:[#allocation2 + $0xb10] sm:$0xff]  ;;  %v16811_v42 = vcombine.high %v915_v34, %v923_v36 }
 0x125   : > { %v16794_v55 = vcombine.low %v899_v19, %v907_v43  ;;  %v811_v34 = vld [vmem:[#allocation2 + $0x850] sm:$0xff] }
 0x126   : > { %5434 = vmatpush1.bf16.msra.mxu0 %v16760_v59  ;;  %v16889_v59 = vcombine.high %v994_v49, %v1002_v50 }
 0x127   : > { %5475 = vmatpush1.bf16.msra.mxu1 %v17016_v60  ;;  %5435 = vmatprep.subr.bf16.mxu0 %v16745_v62  ;;  %v978_v60 = vld [vmem:[#allocation2 + $0xd88] sm:$0xff] }
 0x128   : > { %5476 = vmatprep.subr.bf16.mxu1 %v17001_v2  ;;  %v986_v62 = vld [vmem:[#allocation2 + $0xdc8] sm:$0xff]  ;;  %v16888_v2 = vcombine.low %v994_v49, %v1002_v50  ;;  %v635_v49 = vld [vmem:[#allocation2 + $0x2d0] sm:$0xff] }
 0x129   : > { %v883_v50 = vld [vmem:[#allocation2 + $0xa90] sm:$0xff] }
 0x12a   : > { %5436 = vmatpush1.bf16.msra.mxu0 %v16744_v4  ;;  %v16873_v4 = vcombine.high %v978_v60, %v986_v62  ;;  %v16778_v1 = vcombine.low %v883_v50, %v891_v51 }
 0x12b   : > { %5477 = vmatpush1.bf16.msra.mxu1 %v17000_v5  ;;  %5437 = vmatprep.subr.bf16.mxu0 %v16729_v6  ;;  %v962_v5 = vld [vmem:[#allocation2 + $0xd08] sm:$0xff] }
 0x12c   : > { %5478 = vmatprep.subr.bf16.mxu1 %v16985_v10  ;;  %v970_v6 = vld [vmem:[#allocation2 + $0xd48] sm:$0xff]  ;;  %v16872_v10 = vcombine.low %v978_v60, %v986_v62  ;;  %v619_v60 = vld [vmem:[#allocation2 + $0x250] sm:$0xff] }
 0x12d   : > { %v867_v62 = vld [vmem:[#allocation2 + $0xa10] sm:$0xff] }
 0x12e   : > { %5438 = vmatpush1.bf16.msra.mxu0 %v16728_v12  ;;  %v16857_v12 = vcombine.high %v962_v5, %v970_v6  ;;  %v16762_v9 = vcombine.low %v867_v62, %v875_v63 }
 0x12f   : > { %5479 = vmatpush1.bf16.msra.mxu1 %v16984_v13  ;;  %5439 = vmatprep.subr.bf16.mxu0 %v16713_v14  ;;  %v946_v13 = vld [vmem:[#allocation2 + $0xc88] sm:$0xff] }
 0x130   : > { %5480 = vmatprep.subr.bf16.mxu1 %v16969_v20  ;;  %v954_v14 = vld [vmem:[#allocation2 + $0xcc8] sm:$0xff]  ;;  %v16856_v20 = vcombine.low %v962_v5, %v970_v6  ;;  %v603_v5 = vld [vmem:[#allocation2 + $0x1d0] sm:$0xff] }
 0x131   : > { %v851_v6 = vld [vmem:[#allocation2 + $0x990] sm:$0xff] }
 0x132   : > { %5440 = vmatpush1.bf16.msra.mxu0 %v16712_v23  ;;  %v16841_v23 = vcombine.high %v946_v13, %v954_v14  ;;  %v16746_v18 = vcombine.low %v851_v6, %v859_v7 }
 0x133   : > { %5481 = vmatpush1.bf16.msra.mxu1 %v16968_v24  ;;  %5441 = vmatprep.subr.bf16.mxu0 %v16697_v25  ;;  %v930_v24 = vld [vmem:[#allocation2 + $0xc08] sm:$0xff] }
 0x134   : > { %5482 = vmatprep.subr.bf16.mxu1 %v16953_v54  ;;  %v938_v25 = vld [vmem:[#allocation2 + $0xc48] sm:$0xff]  ;;  %v16840_v54 = vcombine.low %v946_v13, %v954_v14  ;;  %v587_v13 = vld [vmem:[#allocation2 + $0x150] sm:$0xff] }
 0x135   : > { %v835_v14 = vld [vmem:[#allocation2 + $0x910] sm:$0xff] }
 0x136   : > { %5442 = vmatpush1.bf16.msra.mxu0 %v16696_v30  ;;  %v16825_v30 = vcombine.high %v930_v24, %v938_v25  ;;  %v16730_v27 = vcombine.low %v835_v14, %v843_v15 }
 0x137   : > { %5483 = vmatpush1.bf16.msra.mxu1 %v16952_v31  ;;  %5443 = vmatprep.subr.bf16.mxu0 %v16937_v33  ;;  %v659_v31 = vld [vmem:[#allocation2 + $0x390] sm:$0xff] }
 0x138   : > { %5484 = vmatprep.subr.bf16.mxu1 %v17193_v37  ;;  %v667_v33 = vld [vmem:[#allocation2 + $0x3d0] sm:$0xff]  ;;  %v16824_v37 = vcombine.low %v930_v24, %v938_v25 }
 0x139   : > { %v571_v24 = vld [vmem:[#allocation2 + $0xd0] sm:$0xff] }
 0x13a   : > { %5444 = vmatpush2.bf16.msra.mxu0 %v16936_v39  ;;  %v16555_v39 = vcombine.high %v659_v31, %v667_v33  ;;  %v819_v25 = vld [vmem:[#allocation2 + $0x890] sm:$0xff] }
 0x13b   : > { %5485 = vmatpush2.bf16.msra.mxu1 %v17192_v40  ;;  %5445 = vmatprep.subr.bf16.mxu0 %v16921_v41  ;;  %v643_v40 = vld [vmem:[#allocation2 + $0x310] sm:$0xff]  ;;  %v16714_v36 = vcombine.low %v819_v25, %v827_v26 }
 0x13c   : > { %5486 = vmatprep.subr.bf16.mxu1 %v17177_v44  ;;  %v651_v41 = vld [vmem:[#allocation2 + $0x350] sm:$0xff]  ;;  %v16554_v44 = vcombine.low %v659_v31, %v667_v33 }
 0x13d   : > { %v555_v31 = vld [vmem:[#allocation2 + $0x50] sm:$0xff] }
 0x13e   : > { %5446 = vmatpush2.bf16.msra.mxu0 %v16920_v46  ;;  %v16539_v46 = vcombine.high %v643_v40, %v651_v41  ;;  %v803_v33 = vld [vmem:[#allocation2 + $0x810] sm:$0xff] }
 0x13f   : > { %5487 = vmatpush2.bf16.msra.mxu1 %v17176_v47  ;;  %5447 = vmatprep.subr.bf16.mxu0 %v16905_v48  ;;  %v627_v47 = vld [vmem:[#allocation2 + $0x290] sm:$0xff]  ;;  %v16795_v48 = vcombine.high %v899_v19, %v907_v43  ;;  %v16698_v43 = vcombine.low %v803_v33, %v811_v34 }
 0x140   : > { %5488 = vmatprep.subr.bf16.mxu1 %v17161_v52  ;;  %v16538_v52 = vcombine.low %v643_v40, %v651_v41  ;;  %v795_v40 = vld [vmem:[#allocation2 + $0x7d0] sm:$0xff] }
 0x141   : > { %v1043_v41 = vld [vmem:[#allocation2 + $0xf90] sm:$0xff] }
 0x142   : > { %5448 = vmatpush2.bf16.msra.mxu0 %v16904_v56  ;;  %v16523_v56 = vcombine.high %v627_v47, %v635_v49  ;;  %v1051_v19 = vld [vmem:[#allocation2 + $0xfd0] sm:$0xff] }
 0x143   : > { %5489 = vmatpush2.bf16.msra.mxu1 %v17160_v57  ;;  %5449 = vmatprep.subr.bf16.mxu0 %v16889_v59  ;;  %v16779_v57 = vcombine.high %v883_v50, %v891_v51  ;;  %v611_v59 = vld [vmem:[#allocation2 + $0x210] sm:$0xff]  ;;  %v16938_v51 = vcombine.low %v1043_v41, %v1051_v19 }
 0x144   : > { %5490 = vmatprep.subr.bf16.mxu1 %v17145_v0  ;;  %v16522_v0 = vcombine.low %v627_v47, %v635_v49  ;;  %v779_v47 = vld [vmem:[#allocation2 + $0x750] sm:$0xff] }
 0x145   : > { %v1035_v49 = vld [vmem:[#allocation2 + $0xf50] sm:$0xff] }
 0x146   : > { %5450 = vmatpush2.bf16.msra.mxu0 %v16888_v2  ;;  %v16507_v2 = vcombine.high %v611_v59, %v619_v60 }
 0x147   : > { %5491 = vmatpush2.bf16.msra.mxu1 %v17144_v3  ;;  %5451 = vmatprep.subr.bf16.mxu0 %v16873_v4  ;;  %v16763_v3 = vcombine.high %v867_v62, %v875_v63  ;;  %v595_v4 = vld [vmem:[#allocation2 + $0x190] sm:$0xff] }
 0x148   : > { %5492 = vmatprep.subr.bf16.mxu1 %v17129_v8  ;;  %v16506_v8 = vcombine.low %v611_v59, %v619_v60  ;;  %v1011_v59 = vld [vmem:[#allocation2 + $0xe90] sm:$0xff] }
 0x149   : > { %v1019_v60 = vld [vmem:[#allocation2 + $0xed0] sm:$0xff] }
 0x14a   : > { %5452 = vmatpush2.bf16.msra.mxu0 %v16872_v10  ;;  %v16491_v10 = vcombine.high %v595_v4, %v603_v5 }
 0x14b   : > { %5493 = vmatpush2.bf16.msra.mxu1 %v17128_v11  ;;  %5453 = vmatprep.subr.bf16.mxu0 %v16857_v12  ;;  %v16747_v11 = vcombine.high %v851_v6, %v859_v7  ;;  %v579_v12 = vld [vmem:[#allocation2 + $0x110] sm:$0xff]  ;;  %v16906_v7 = vcombine.low %v1011_v59, %v1019_v60 }
 0x14c   : > { %5494 = vmatprep.subr.bf16.mxu1 %v17113_v17  ;;  %v16490_v17 = vcombine.low %v595_v4, %v603_v5  ;;  %v995_v4 = vld [vmem:[#allocation2 + $0xe10] sm:$0xff] }
 0x14d   : > { %v1003_v5 = vld [vmem:[#allocation2 + $0xe50] sm:$0xff] }
 0x14e   : > { %5454 = vmatpush2.bf16.msra.mxu0 %v16856_v20  ;;  %v16475_v20 = vcombine.high %v579_v12, %v587_v13 }
 0x14f   : > { %5495 = vmatpush2.bf16.msra.mxu1 %v17112_v22  ;;  %5455 = vmatprep.subr.bf16.mxu0 %v16841_v23  ;;  %v16731_v22 = vcombine.high %v835_v14, %v843_v15  ;;  %v563_v23 = vld [vmem:[#allocation2 + $0x90] sm:$0xff]  ;;  %v16890_v15 = vcombine.low %v995_v4, %v1003_v5 }
 0x150   : > { %5496 = vmatprep.subr.bf16.mxu1 %v17097_v53  ;;  %v16474_v53 = vcombine.low %v579_v12, %v587_v13  ;;  %v979_v12 = vld [vmem:[#allocation2 + $0xd90] sm:$0xff] }
 0x151   : > { %v987_v13 = vld [vmem:[#allocation2 + $0xdd0] sm:$0xff] }
 0x152   : > { %5456 = vmatpush2.bf16.msra.mxu0 %v16840_v54  ;;  %v16459_v54 = vcombine.high %v563_v23, %v571_v24 }
 0x153   : > { %5497 = vmatpush2.bf16.msra.mxu1 %v17096_v29  ;;  %5457 = vmatprep.subr.bf16.mxu0 %v16825_v30  ;;  %v16715_v29 = vcombine.high %v819_v25, %v827_v26  ;;  %v547_v30 = vld [vmem:[#allocation2 + $0x10] sm:$0xff]  ;;  %v16874_v26 = vcombine.low %v979_v12, %v987_v13 }
 0x154   : > { %5498 = vmatprep.subr.bf16.mxu1 %v17081_v35  ;;  %v16458_v35 = vcombine.low %v563_v23, %v571_v24  ;;  %v963_v23 = vld [vmem:[#allocation2 + $0xd10] sm:$0xff] }
 0x155   : > { %v971_v24 = vld [vmem:[#allocation2 + $0xd50] sm:$0xff] }
 0x156   : > { %5458 = vmatpush2.bf16.msra.mxu0 %v16824_v37  ;;  %v16443_v37 = vcombine.high %v547_v30, %v555_v31 }
 0x157   : > { %5499 = vmatpush2.bf16.msra.mxu1 %v17080_v38  ;;  %5509 = vmatprep.subr.bf16.mxu0 %v16555_v39  ;;  %v16699_v38 = vcombine.high %v803_v33, %v811_v34  ;;  %v787_v39 = vld [vmem:[#allocation2 + $0x790] sm:$0xff]  ;;  %v1322_v34 = vlaneseq }
 0x158   : > { %5550 = vmatprep.subr.bf16.mxu1 %v16811_v42  ;;  %v16442_v42 = vcombine.low %v547_v30, %v555_v31  ;;  %v16682_v50 = vcombine.low %v787_v39, %v795_v40  ;;  %v947_v30 = vld [vmem:[#allocation2 + $0xc90] sm:$0xff] }
 0x159   : > { %5460 = vmatmul.mubr.bf16.vlgmr.msra.gmra.mxu0 %v19724_v21  ;;  %v955_v31 = vld [vmem:[#allocation2 + $0xcd0] sm:$0xff] }
 0x15a   : > { %5501 = vmatmul.mubr.bf16.vlgmr.msra.gmra.mxu1 %v19736_v32  ;;  %5510 = vmatpush1.bf16.msra.mxu0 %v16554_v44  ;;  %v16683_v44 = vcombine.high %v787_v39, %v795_v40  ;;  %v683_v39 = vld [vmem:[#allocation2 + $0x450] sm:$0xff] }
 0x15b   : > { %5551 = vmatpush1.bf16.msra.mxu1 %v16810_v45  ;;  %5511 = vmatprep.subr.bf16.mxu0 %v16539_v46  ;;  %v16939_v45 = vcombine.high %v1043_v41, %v1051_v19  ;;  %v771_v46 = vld [vmem:[#allocation2 + $0x710] sm:$0xff] }
 0x15c   : > { %5552 = vmatprep.subr.bf16.mxu1 %v16795_v48  ;;  %5541 = vmatprep.mubr.bf16.mxu0 %v19707_v58  ;;  %v1027_v48 = vld [vmem:[#allocation2 + $0xf10] sm:$0xff]  ;;  %v16666_v62 = vcombine.low %v771_v46, %v779_v47 }
 0x15d   : > { %5582 = vmatprep.mubr.bf16.mxu1 %v19711_v61  ;;  %v16922_v63 = vcombine.low %v1027_v48, %v1035_v49  ;;  %v931_v40 = vld [vmem:[#allocation2 + $0xc10] sm:$0xff] }
 0x15e   : > { %5512 = vmatpush1.bf16.msra.mxu0 %v16538_v52  ;;  %v16667_v52 = vcombine.high %v771_v46, %v779_v47  ;;  %v939_v41 = vld [vmem:[#allocation2 + $0xc50] sm:$0xff] }
 0x15f   : > { %5553 = vmatpush1.bf16.msra.mxu1 %v16794_v55  ;;  %5513 = vmatprep.subr.bf16.mxu0 %v16523_v56  ;;  %v16923_v55 = vcombine.high %v1027_v48, %v1035_v49  ;;  %v755_v56 = vld [vmem:[#allocation2 + $0x690] sm:$0xff]  ;;  %v16827_v47 = vcombine.high %v931_v40, %v939_v41 }
 0x160   : > { %5554 = vmatprep.subr.bf16.mxu1 %v16779_v57  ;;  %v763_v57 = vld [vmem:[#allocation2 + $0x6d0] sm:$0xff] }
 0x161   : > { %v16650_v6 = vcombine.low %v755_v56, %v763_v57  ;;  %v1314_v46 = vld [vmem:[#allocation14] ss:$8 sm:$0xf0] }
 0x162   : > { %5514 = vmatpush1.bf16.msra.mxu0 %v16522_v0  ;;  %v16651_v0 = vcombine.high %v755_v56, %v763_v57  ;;  %v1171_v48 = vld [vmem:[#allocation2 + $0x1390] sm:$0xff]  ;;  %v16826_v57 = vcombine.low %v931_v40, %v939_v41 }
 0x163   : > { %5555 = vmatpush1.bf16.msra.mxu1 %v16778_v1  ;;  %5515 = vmatprep.subr.bf16.mxu0 %v16507_v2  ;;  %v16907_v1 = vcombine.high %v1011_v59, %v1019_v60  ;;  %v739_v2 = vld [vmem:[#allocation2 + $0x610] sm:$0xff] }
 0x164   : > { %5556 = vmatprep.subr.bf16.mxu1 %v16763_v3  ;;  %v747_v3 = vld [vmem:[#allocation2 + $0x650] sm:$0xff] }
 0x165   : > { %v16634_v14 = vcombine.low %v739_v2, %v747_v3  ;;  %v1179_v49 = vld [vmem:[#allocation2 + $0x13d0] sm:$0xff] }
 0x166   : > { %5516 = vmatpush1.bf16.msra.mxu0 %v16506_v8  ;;  %v16635_v8 = vcombine.high %v739_v2, %v747_v3  ;;  %v17067_v59 = vcombine.high %v1171_v48, %v1179_v49  ;;  %v652_v2 = vld [vmem:[#allocation2 + $0x358] sm:$0xff]  ;;  %v1115_v40 = vld [vmem:[#allocation2 + $0x11d0] sm:$0xff] }
 0x167   : > { %5557 = vmatpush1.bf16.msra.mxu1 %v16762_v9  ;;  %5517 = vmatprep.subr.bf16.mxu0 %v16491_v10  ;;  %v16891_v9 = vcombine.high %v995_v4, %v1003_v5  ;;  %v723_v10 = vld [vmem:[#allocation2 + $0x590] sm:$0xff]  ;;  %v17066_v4 = vcombine.low %v1171_v48, %v1179_v49 }
 0x168   : > { %5558 = vmatprep.subr.bf16.mxu1 %v16747_v11  ;;  %v731_v11 = vld [vmem:[#allocation2 + $0x5d0] sm:$0xff] }
 0x169   : > { %v16618_v25 = vcombine.low %v723_v10, %v731_v11  ;;  %v1091_v48 = vld [vmem:[#allocation2 + $0x1110] sm:$0xff] }
 0x16a   : > { %5518 = vmatpush1.bf16.msra.mxu0 %v16490_v17  ;;  %v16619_v17 = vcombine.high %v723_v10, %v731_v11  ;;  %v1147_v10 = vld [vmem:[#allocation2 + $0x12d0] sm:$0xff] }
 0x16b   : > { %5559 = vmatpush1.bf16.msra.mxu1 %v16746_v18  ;;  %5519 = vmatprep.subr.bf16.mxu0 %v16475_v20  ;;  %v16875_v18 = vcombine.high %v979_v12, %v987_v13  ;;  %v707_v20 = vld [vmem:[#allocation2 + $0x510] sm:$0xff]  ;;  %v628_v12 = vld [vmem:[#allocation2 + $0x298] sm:$0xff] }
 0x16c   : > { %5560 = vmatprep.subr.bf16.mxu1 %v16731_v22  ;;  %v715_v22 = vld [vmem:[#allocation2 + $0x550] sm:$0xff]  ;;  %v636_v13 = vld [vmem:[#allocation2 + $0x2d8] sm:$0xff] }
 0x16d   : > { %v16602_v33 = vcombine.low %v707_v20, %v715_v22  ;;  %v1099_v49 = vld [vmem:[#allocation2 + $0x1150] sm:$0xff] }
 0x16e   : > { %5520 = vmatpush1.bf16.msra.mxu0 %v16474_v53  ;;  %v16603_v53 = vcombine.high %v707_v20, %v715_v22 }
 0x16f   : > { %5561 = vmatpush1.bf16.msra.mxu1 %v16730_v27  ;;  %5521 = vmatprep.subr.bf16.mxu0 %v16459_v54  ;;  %v16859_v27 = vcombine.high %v963_v23, %v971_v24  ;;  %v691_v54 = vld [vmem:[#allocation2 + $0x490] sm:$0xff] }
 0x170   : > { %5562 = vmatprep.subr.bf16.mxu1 %v16715_v29  ;;  %v699_v29 = vld [vmem:[#allocation2 + $0x4d0] sm:$0xff] }
 0x171   : > { %v16586_v19 = vcombine.low %v691_v54, %v699_v29 }
 0x172   : > { %5522 = vmatpush1.bf16.msra.mxu0 %v16458_v35  ;;  %v16858_v35 = vcombine.low %v963_v23, %v971_v24 }
 0x173   : > { %5563 = vmatpush1.bf16.msra.mxu1 %v16714_v36  ;;  %5523 = vmatprep.subr.bf16.mxu0 %v16443_v37  ;;  %v16587_v36 = vcombine.high %v691_v54, %v699_v29  ;;  %v16843_v37 = vcombine.high %v947_v30, %v955_v31  ;;  %v612_v29 = vld [vmem:[#allocation2 + $0x218] sm:$0xff] }
 0x174   : > { %5564 = vmatprep.subr.bf16.mxu1 %v16699_v38  ;;  %v675_v38 = vld [vmem:[#allocation2 + $0x410] sm:$0xff] }
 0x176   : > { %5524 = vmatpush1.bf16.msra.mxu0 %v16442_v42  ;;  %v19746_v42 = vshrl.u32 %v1322_v34, 7 }
 0x177   : > { %5565 = vmatpush1.bf16.msra.mxu1 %v16698_v43  ;;  %5525 = vmatprep.subr.bf16.mxu0 %v16683_v44  ;;  %v16842_v43 = vcombine.low %v947_v30, %v955_v31  ;;  %v16571_v44 = vcombine.high %v675_v38, %v683_v39  ;;  %v620_v30 = vld [vmem:[#allocation2 + $0x258] sm:$0xff] }
 0x178   : > { %5566 = vmatprep.subr.bf16.mxu1 %v16939_v45  ;;  %v1313_v45 = vld [vmem:[#allocation14] ss:$8 sm:$0xf]  ;;  %v19751_v56 = vsub.s32 0, %v19746_v42 }
 0x17a   : > { %5526 = vmatpush2.bf16.msra.mxu0 %v16682_v50  ;;  %v660_v50 = vld [vmem:[#allocation2 + $0x398] sm:$0xff] }
 0x17b   : > { %5567 = vmatpush2.bf16.msra.mxu1 %v16938_v51  ;;  %5527 = vmatprep.subr.bf16.mxu0 %v16667_v52  ;;  %v668_v51 = vld [vmem:[#allocation2 + $0x3d8] sm:$0xff]  ;;  %v16570_v52 = vcombine.low %v675_v38, %v683_v39  ;;  %v16509_v38 = vcombine.high %v612_v29, %v620_v30  ;;  %v1107_v39 = vld [vmem:[#allocation2 + $0x1190] sm:$0xff] }
 0x17c   : > { %5568 = vmatprep.subr.bf16.mxu1 %v16923_v55  ;;  %v19748_v55 = vor.u32 %v1314_v46, %v1313_v45  ;;  %v16557_v60 = vcombine.high %v660_v50, %v668_v51  ;;  %v16556_v5 = vcombine.low %v660_v50, %v668_v51  ;;  %v16508_v45 = vcombine.low %v612_v29, %v620_v30  ;;  %v580_v50 = vld [vmem:[#allocation2 + $0x118] sm:$0xff] }
 0x17d   : > { %v17003_v46 = vcombine.high %v1107_v39, %v1115_v40  ;;  %v588_v51 = vld [vmem:[#allocation2 + $0x158] sm:$0xff] }
 0x17e   : > { %5528 = vmatpush2.bf16.msra.mxu0 %v16666_v62  ;;  %v19754_v62 = vsub.s32 1, %v19746_v42  ;;  %v1325_v3 = vrot.slane %v19748_v55, %v19751_v56  ;;  %v780_v29 = vld [vmem:[#allocation2 + $0x758] sm:$0xff] }
 0x17f   : > { %5569 = vmatpush2.bf16.msra.mxu1 %v16922_v63  ;;  %5529 = vmatprep.subr.bf16.mxu0 %v16651_v0  ;;  %v1155_v63 = vld [vmem:[#allocation2 + $0x1310] sm:$0xff] }
 0x180   : > { %5570 = vmatprep.subr.bf16.mxu1 %v16907_v1  ;;  %v1163_v0 = vld [vmem:[#allocation2 + $0x1350] sm:$0xff]  ;;  %v644_v1 = vld [vmem:[#allocation2 + $0x318] sm:$0xff] }
 0x181   : > { %v16540_v20 = vcombine.low %v644_v1, %v652_v2 }
 0x182   : > { %5530 = vmatpush2.bf16.msra.mxu0 %v16650_v6  ;;  %v17051_v6 = vcombine.high %v1155_v63, %v1163_v0 }
 0x183   : > { %5571 = vmatpush2.bf16.msra.mxu1 %v16906_v7  ;;  %5531 = vmatprep.subr.bf16.mxu0 %v16635_v8  ;;  %v1329_v7 = vrot.slane %v19748_v55, %v19754_v62  ;;  %v16541_v8 = vcombine.high %v644_v1, %v652_v2  ;;  %v564_v1 = vld [vmem:[#allocation2 + $0x98] sm:$0xff] }
 0x184   : > { %5572 = vmatprep.subr.bf16.mxu1 %v16891_v9  ;;  %v1139_v9 = vld [vmem:[#allocation2 + $0x1290] sm:$0xff]  ;;  %v572_v2 = vld [vmem:[#allocation2 + $0xd8] sm:$0xff] }
 0x185   : > { %v17035_v22 = vcombine.high %v1139_v9, %v1147_v10 }
 0x186   : > { %5532 = vmatpush2.bf16.msra.mxu0 %v16634_v14 }
 0x187   : > { %5573 = vmatpush2.bf16.msra.mxu1 %v16890_v15  ;;  %5533 = vmatprep.subr.bf16.mxu0 %v16619_v17  ;;  %v17050_v17 = vcombine.low %v1155_v63, %v1163_v0  ;;  %v1075_v63 = vld [vmem:[#allocation2 + $0x1090] sm:$0xff] }
 0x188   : > { %5574 = vmatprep.subr.bf16.mxu1 %v16875_v18  ;;  %v1083_v0 = vld [vmem:[#allocation2 + $0x10d0] sm:$0xff] }
 0x18a   : > { %5534 = vmatpush2.bf16.msra.mxu0 %v16618_v25 }
 0x18b   : > { %5575 = vmatpush2.bf16.msra.mxu1 %v16874_v26  ;;  %5535 = vmatprep.subr.bf16.mxu0 %v16603_v53  ;;  %v16525_v26 = vcombine.high %v628_v12, %v636_v13  ;;  %v1123_v53 = vld [vmem:[#allocation2 + $0x1210] sm:$0xff] }
 0x18c   : > { %5576 = vmatprep.subr.bf16.mxu1 %v16859_v27  ;;  %v1131_v27 = vld [vmem:[#allocation2 + $0x1250] sm:$0xff] }
 0x18e   : > { %5536 = vmatpush2.bf16.msra.mxu0 %v16602_v33  ;;  %v17034_v33 = vcombine.low %v1139_v9, %v1147_v10  ;;  %v548_v9 = vld [vmem:[#allocation2 + $0x18] sm:$0xff] }
 0x18f   : > { %5577 = vmatpush2.bf16.msra.mxu1 %v16858_v35  ;;  %5537 = vmatprep.subr.bf16.mxu0 %v16587_v36  ;;  %v16524_v36 = vcombine.low %v628_v12, %v636_v13  ;;  %v556_v10 = vld [vmem:[#allocation2 + $0x58] sm:$0xff]  ;;  %v16460_v12 = vcombine.low %v564_v1, %v572_v2 }
 0x190   : > { %5578 = vmatprep.subr.bf16.mxu1 %v16843_v37  ;;  %v17019_v37 = vcombine.high %v1123_v53, %v1131_v27 }
 0x192   : > { %5538 = vmatpush2.bf16.msra.mxu0 %v16586_v19  ;;  %v596_v19 = vld [vmem:[#allocation2 + $0x198] sm:$0xff] }
 0x193   : > { %5579 = vmatpush2.bf16.msra.mxu1 %v16842_v43  ;;  %5539 = vmatprep.subr.bf16.mxu0 %v16571_v44  ;;  %v604_v43 = vld [vmem:[#allocation2 + $0x1d8] sm:$0xff]  ;;  %v17018_v44 = vcombine.low %v1123_v53, %v1131_v27  ;;  %v1283_v53 = vld [vmem:[#allocation2 + $0x1710] sm:$0xff] }
 0x194   : > { %5580 = vmatprep.subr.bf16.mxu1 %v16827_v47  ;;  %v16493_v47 = vcombine.high %v596_v19, %v604_v43  ;;  %v1291_v27 = vld [vmem:[#allocation2 + $0x1750] sm:$0xff] }
 0x196   : > { %5540 = vmatpush2.bf16.msra.mxu0 %v16570_v52  ;;  %v17002_v52 = vcombine.low %v1107_v39, %v1115_v40  ;;  %v764_v39 = vld [vmem:[#allocation2 + $0x6d8] sm:$0xff]  ;;  %v17178_v40 = vcombine.low %v1283_v53, %v1291_v27 }
 0x197   : > { %5581 = vmatpush2.bf16.msra.mxu1 %v16826_v57  ;;  %5591 = vmatprep.subr.bf16.mxu0 %v17067_v59  ;;  %v16492_v57 = vcombine.low %v596_v19, %v604_v43  ;;  %v16987_v59 = vcombine.high %v1091_v48, %v1099_v49 }
 0x198   : > { %5632 = vmatprep.subr.bf16.mxu1 %v16557_v60  ;;  %v16477_v60 = vcombine.high %v580_v50, %v588_v51 }
 0x199   : > { %v5297_v11 = vpop.f32.mrf.mxu0  ;;  %5542 = vmatmul.mubr.bf16.vlgmr.msra.gmra.mxu0 %v19717_v16 }
 0x19a   : > { %v5298_v14 = vadd.f32 %v5297_v11, %v1325_v3  ;;  %5583 = vmatmul.mubr.bf16.vlgmr.msra.gmra.mxu1 %v19724_v21  ;;  %5592 = vmatpush1.bf16.msra.mxu0 %v17066_v4  ;;  %v5338_v15 = vpop.f32.mrf.mxu1  ;;  %v16986_v3 = vcombine.low %v1091_v48, %v1099_v49  ;;  %v16476_v4 = vcombine.low %v580_v50, %v588_v51 }
 0x19b   : > { %5633 = vmatpush1.bf16.msra.mxu1 %v16556_v5  ;;  %v5299_v18 = vpop.f32.mrf.mxu0  ;;  %5593 = vmatprep.subr.bf16.mxu0 %v17051_v6  ;;  %v16971_v5 = vcombine.high %v1075_v63, %v1083_v0  ;;  %v16461_v6 = vcombine.high %v564_v1, %v572_v2  ;;  %v16970_v11 = vcombine.low %v1075_v63, %v1083_v0 }
 0x19c   : > { %v5300_v23 = vadd.f32 %v5299_v18, %v1329_v7  ;;  %v19762_v24 = vadd.f32 %v5338_v15, %v5298_v14  ;;  %v5340_v25 = vpop.f32.mrf.mxu1  ;;  %5634 = vmatprep.subr.bf16.mxu1 %v16541_v8  ;;  %5623 = vmatprep.mubr.bf16.mxu0 %v19728_v28  ;;  %v1059_v7 = vld [vmem:[#allocation2 + $0x1010] sm:$0xff]  ;;  %v16445_v14 = vcombine.high %v548_v9, %v556_v10  ;;  %v788_v18 = vld [vmem:[#allocation2 + $0x798] sm:$0xff] }
 0x19d   : > { %v5301_v54 = vpop.f32.mrf.mxu0  ;;  %5664 = vmatprep.mubr.bf16.mxu1 %v19707_v58  ;;  %v1067_v8 = vld [vmem:[#allocation2 + $0x1050] sm:$0xff] }
 0x19e   : > { %v19766_v31 = vadd.f32 %v5340_v25, %v5300_v23  ;;  %5594 = vmatpush1.bf16.msra.mxu0 %v17050_v17  ;;  %v5342_v34 = vpop.f32.mrf.mxu1  ;;  %v16955_v13 = vcombine.high %v1059_v7, %v1067_v8  ;;  %v1299_v15 = vld [vmem:[#allocation2 + $0x1790] sm:$0xff]  ;;  %v16444_v23 = vcombine.low %v548_v9, %v556_v10  ;;  %v772_v54 = vld [vmem:[#allocation2 + $0x718] sm:$0xff] }
 0x19f   : > { %5635 = vmatpush1.bf16.msra.mxu1 %v16540_v20  ;;  %v5302_v35 = vpop.f32.mrf.mxu0  ;;  %5595 = vmatprep.subr.bf16.mxu0 %v17035_v22  ;;  %v1307_v17 = vld [vmem:[#allocation2 + $0x17d0] sm:$0xff]  ;;  %v796_v20 = vld [vmem:[#allocation2 + $0x7d8] sm:$0xff]  ;;  %v16954_v22 = vcombine.low %v1059_v7, %v1067_v8  ;;  %v17179_v34 = vcombine.high %v1283_v53, %v1291_v27 }
 0x1a0   : > { %5636 = vmatprep.subr.bf16.mxu1 %v16525_v26  ;;  %v5343_v41 = vpop.f32.mrf.mxu1  ;;  %v17195_v25 = vcombine.high %v1299_v15, %v1307_v17  ;;  %v16685_v26 = vcombine.high %v788_v18, %v796_v20  ;;  %v17194_v30 = vcombine.low %v1299_v15, %v1307_v17  ;;  %v16669_v35 = vcombine.high %v772_v54, %v780_v29 }
 0x1a1   : > { %v16668_v41 = vcombine.low %v772_v54, %v780_v29 }
 0x1a2   : > { %5596 = vmatpush1.bf16.msra.mxu0 %v17034_v33  ;;  %v16684_v33 = vcombine.low %v788_v18, %v796_v20 }
 0x1a3   : > { %5637 = vmatpush1.bf16.msra.mxu1 %v16524_v36  ;;  %5597 = vmatprep.subr.bf16.mxu0 %v17019_v37  ;;  %v1267_v36 = vld [vmem:[#allocation2 + $0x1690] sm:$0xff] }
 0x1a4   : > { %5638 = vmatprep.subr.bf16.mxu1 %v16509_v38  ;;  %v1275_v37 = vld [vmem:[#allocation2 + $0x16d0] sm:$0xff]  ;;  %v756_v38 = vld [vmem:[#allocation2 + $0x698] sm:$0xff] }
 0x1a5   : > { %v17163_v19 = vcombine.high %v1267_v36, %v1275_v37  ;;  %v16653_v43 = vcombine.high %v756_v38, %v764_v39  ;;  %v17162_v48 = vcombine.low %v1267_v36, %v1275_v37  ;;  %v16652_v49 = vcombine.low %v756_v38, %v764_v39 }
 0x1a6   : > { %5598 = vmatpush1.bf16.msra.mxu0 %v17018_v44  ;;  %v1251_v44 = vld [vmem:[#allocation2 + $0x1610] sm:$0xff] }
 0x1a7   : > { %5639 = vmatpush1.bf16.msra.mxu1 %v16508_v45  ;;  %5599 = vmatprep.subr.bf16.mxu0 %v17003_v46  ;;  %v1259_v45 = vld [vmem:[#allocation2 + $0x1650] sm:$0xff]  ;;  %v740_v46 = vld [vmem:[#allocation2 + $0x618] sm:$0xff] }
 0x1a8   : > { %5640 = vmatprep.subr.bf16.mxu1 %v16493_v47  ;;  %v748_v47 = vld [vmem:[#allocation2 + $0x658] sm:$0xff]  ;;  %v17147_v50 = vcombine.high %v1251_v44, %v1259_v45  ;;  %v17146_v63 = vcombine.low %v1251_v44, %v1259_v45 }
 0x1a9   : > { %v16637_v51 = vcombine.high %v740_v46, %v748_v47  ;;  %v16636_v0 = vcombine.low %v740_v46, %v748_v47 }
 0x1aa   : > { %5600 = vmatpush1.bf16.msra.mxu0 %v17002_v52  ;;  %v1235_v52 = vld [vmem:[#allocation2 + $0x1590] sm:$0xff] }
 0x1ab   : > { %5641 = vmatpush1.bf16.msra.mxu1 %v16492_v57  ;;  %5601 = vmatprep.subr.bf16.mxu0 %v16987_v59  ;;  %v1243_v57 = vld [vmem:[#allocation2 + $0x15d0] sm:$0xff]  ;;  %v724_v59 = vld [vmem:[#allocation2 + $0x598] sm:$0xff] }
 0x1ac   : > { %5642 = vmatprep.subr.bf16.mxu1 %v16477_v60  ;;  %v732_v60 = vld [vmem:[#allocation2 + $0x5d8] sm:$0xff]  ;;  %v17131_v1 = vcombine.high %v1235_v52, %v1243_v57  ;;  %v17130_v7 = vcombine.low %v1235_v52, %v1243_v57 }
 0x1ad   : > { %v16621_v2 = vcombine.high %v724_v59, %v732_v60  ;;  %v16620_v8 = vcombine.low %v724_v59, %v732_v60  ;;  %v1148_v52 = vld [vmem:[#allocation2 + $0x12d8] sm:$0xff] }
 0x1ae   : > { %5602 = vmatpush1.bf16.msra.mxu0 %v16986_v3  ;;  %v1219_v3 = vld [vmem:[#allocation2 + $0x1510] sm:$0xff] }
 0x1af   : > { %5643 = vmatpush1.bf16.msra.mxu1 %v16476_v4  ;;  %5603 = vmatprep.subr.bf16.mxu0 %v16971_v5  ;;  %v1227_v4 = vld [vmem:[#allocation2 + $0x1550] sm:$0xff]  ;;  %v708_v5 = vld [vmem:[#allocation2 + $0x518] sm:$0xff] }
 0x1b0   : > { %5644 = vmatprep.subr.bf16.mxu1 %v16461_v6  ;;  %v716_v6 = vld [vmem:[#allocation2 + $0x558] sm:$0xff]  ;;  %v17115_v9 = vcombine.high %v1219_v3, %v1227_v4  ;;  %v17114_v15 = vcombine.low %v1219_v3, %v1227_v4 }
 0x1b1   : > { %v16605_v10 = vcombine.high %v708_v5, %v716_v6  ;;  %v16604_v17 = vcombine.low %v708_v5, %v716_v6  ;;  %v868_v4 = vld [vmem:[#allocation2 + $0xa18] sm:$0xff] }
 0x1b2   : > { %5604 = vmatpush1.bf16.msra.mxu0 %v16970_v11  ;;  %v1203_v11 = vld [vmem:[#allocation2 + $0x1490] sm:$0xff]  ;;  %v876_v5 = vld [vmem:[#allocation2 + $0xa58] sm:$0xff] }
 0x1b3   : > { %5645 = vmatpush1.bf16.msra.mxu1 %v16460_v12  ;;  %5605 = vmatprep.subr.bf16.mxu0 %v16955_v13  ;;  %v1211_v12 = vld [vmem:[#allocation2 + $0x14d0] sm:$0xff]  ;;  %v692_v13 = vld [vmem:[#allocation2 + $0x498] sm:$0xff] }
 0x1b4   : > { %5646 = vmatprep.subr.bf16.mxu1 %v16445_v14  ;;  %v700_v14 = vld [vmem:[#allocation2 + $0x4d8] sm:$0xff]  ;;  %v17099_v18 = vcombine.high %v1203_v11, %v1211_v12  ;;  %v17098_v53 = vcombine.low %v1203_v11, %v1211_v12  ;;  %v16765_v12 = vcombine.high %v868_v4, %v876_v5 }
 0x1b5   : > { %v16589_v20 = vcombine.high %v692_v13, %v700_v14  ;;  %v16588_v27 = vcombine.low %v692_v13, %v700_v14  ;;  %v852_v14 = vld [vmem:[#allocation2 + $0x998] sm:$0xff] }
 0x1b6   : > { %5606 = vmatpush1.bf16.msra.mxu0 %v16954_v22  ;;  %v1187_v22 = vld [vmem:[#allocation2 + $0x1410] sm:$0xff] }
 0x1b7   : > { %5647 = vmatpush1.bf16.msra.mxu1 %v16444_v23  ;;  %5607 = vmatprep.subr.bf16.mxu0 %v17195_v25  ;;  %v1195_v23 = vld [vmem:[#allocation2 + $0x1450] sm:$0xff]  ;;  %v676_v25 = vld [vmem:[#allocation2 + $0x418] sm:$0xff] }
 0x1b8   : > { %5648 = vmatprep.subr.bf16.mxu1 %v16685_v26  ;;  %v684_v26 = vld [vmem:[#allocation2 + $0x458] sm:$0xff]  ;;  %v17083_v54 = vcombine.high %v1187_v22, %v1195_v23  ;;  %v17082_v36 = vcombine.low %v1187_v22, %v1195_v23  ;;  %v16764_v22 = vcombine.low %v868_v4, %v876_v5 }
 0x1b9   : > { %v16573_v29 = vcombine.high %v676_v25, %v684_v26  ;;  %v16572_v37 = vcombine.low %v676_v25, %v684_v26 }
 0x1ba   : > { %5608 = vmatpush2.bf16.msra.mxu0 %v17194_v30  ;;  %v916_v30 = vld [vmem:[#allocation2 + $0xb98] sm:$0xff] }
 0x1bb   : > { %5649 = vmatpush2.bf16.msra.mxu1 %v16684_v33  ;;  %5609 = vmatprep.subr.bf16.mxu0 %v17179_v34  ;;  %v924_v33 = vld [vmem:[#allocation2 + $0xbd8] sm:$0xff] }
 0x1bc   : > { %5650 = vmatprep.subr.bf16.mxu1 %v16669_v35  ;;  %v1172_v34 = vld [vmem:[#allocation2 + $0x1398] sm:$0xff]  ;;  %v16813_v38 = vcombine.high %v916_v30, %v924_v33  ;;  %v16812_v44 = vcombine.low %v916_v30, %v924_v33 }
 0x1bd   : > { %v1180_v35 = vld [vmem:[#allocation2 + $0x13d8] sm:$0xff] }
 0x1be   : > { %5610 = vmatpush2.bf16.msra.mxu0 %v17178_v40  ;;  %v17069_v39 = vcombine.high %v1172_v34, %v1180_v35  ;;  %v900_v40 = vld [vmem:[#allocation2 + $0xb18] sm:$0xff]  ;;  %v17068_v45 = vcombine.low %v1172_v34, %v1180_v35 }
 0x1bf   : > { %5651 = vmatpush2.bf16.msra.mxu1 %v16668_v41  ;;  %5611 = vmatprep.subr.bf16.mxu0 %v17163_v19  ;;  %v908_v41 = vld [vmem:[#allocation2 + $0xb58] sm:$0xff] }
 0x1c0   : > { %5652 = vmatprep.subr.bf16.mxu1 %v16653_v43  ;;  %v1156_v19 = vld [vmem:[#allocation2 + $0x1318] sm:$0xff]  ;;  %v16797_v46 = vcombine.high %v900_v40, %v908_v41  ;;  %v16796_v59 = vcombine.low %v900_v40, %v908_v41 }
 0x1c1   : > { %v1164_v43 = vld [vmem:[#allocation2 + $0x1358] sm:$0xff] }
 0x1c2   : > { %5612 = vmatpush2.bf16.msra.mxu0 %v17162_v48  ;;  %v17053_v47 = vcombine.high %v1156_v19, %v1164_v43  ;;  %v884_v48 = vld [vmem:[#allocation2 + $0xa98] sm:$0xff] }
 0x1c3   : > { %5653 = vmatpush2.bf16.msra.mxu1 %v16652_v49  ;;  %5613 = vmatprep.subr.bf16.mxu0 %v17147_v50  ;;  %v892_v49 = vld [vmem:[#allocation2 + $0xad8] sm:$0xff] }
 0x1c4   : > { %5654 = vmatprep.subr.bf16.mxu1 %v16637_v51  ;;  %v1140_v51 = vld [vmem:[#allocation2 + $0x1298] sm:$0xff] }
 0x1c5   : > { %v17037_v3 = vcombine.high %v1140_v51, %v1148_v52 }
 0x1c6   : > { %5614 = vmatpush2.bf16.msra.mxu0 %v17146_v63 }
 0x1c7   : > { %5655 = vmatpush2.bf16.msra.mxu1 %v16636_v0  ;;  %5615 = vmatprep.subr.bf16.mxu0 %v17131_v1  ;;  %v17052_v0 = vcombine.low %v1156_v19, %v1164_v43  ;;  %v16781_v1 = vcombine.high %v884_v48, %v892_v49 }
 0x1c8   : > { %5656 = vmatprep.subr.bf16.mxu1 %v16621_v2 }
 0x1ca   : > { %5616 = vmatpush2.bf16.msra.mxu0 %v17130_v7  ;;  %v1124_v7 = vld [vmem:[#allocation2 + $0x1218] sm:$0xff] }
 0x1cb   : > { %5657 = vmatpush2.bf16.msra.mxu1 %v16620_v8  ;;  %5617 = vmatprep.subr.bf16.mxu0 %v17115_v9  ;;  %v1132_v8 = vld [vmem:[#allocation2 + $0x1258] sm:$0xff]  ;;  %v16780_v9 = vcombine.low %v884_v48, %v892_v49 }
 0x1cc   : > { %5658 = vmatprep.subr.bf16.mxu1 %v16605_v10  ;;  %v17021_v13 = vcombine.high %v1124_v7, %v1132_v8  ;;  %v17020_v23 = vcombine.low %v1124_v7, %v1132_v8  ;;  %v1036_v7 = vld [vmem:[#allocation2 + $0xf58] sm:$0xff] }
 0x1cd   : > { %v1284_v8 = vld [vmem:[#allocation2 + $0x1718] sm:$0xff] }
 0x1ce   : > { %5618 = vmatpush2.bf16.msra.mxu0 %v17114_v15  ;;  %v860_v15 = vld [vmem:[#allocation2 + $0x9d8] sm:$0xff] }
 0x1cf   : > { %5659 = vmatpush2.bf16.msra.mxu1 %v16604_v17  ;;  %5619 = vmatprep.subr.bf16.mxu0 %v17099_v18  ;;  %v1108_v18 = vld [vmem:[#allocation2 + $0x1198] sm:$0xff]  ;;  %v16749_v25 = vcombine.high %v852_v14, %v860_v15  ;;  %v16748_v30 = vcombine.low %v852_v14, %v860_v15 }
 0x1d0   : > { %5660 = vmatprep.subr.bf16.mxu1 %v16589_v20  ;;  %v1116_v20 = vld [vmem:[#allocation2 + $0x11d8] sm:$0xff] }
 0x1d1   : > { %v17005_v26 = vcombine.high %v1108_v18, %v1116_v20  ;;  %v17004_v33 = vcombine.low %v1108_v18, %v1116_v20  ;;  %v1020_v14 = vld [vmem:[#allocation2 + $0xed8] sm:$0xff] }
 0x1d2   : > { %5620 = vmatpush2.bf16.msra.mxu0 %v17098_v53  ;;  %v836_v53 = vld [vmem:[#allocation2 + $0x918] sm:$0xff] }
 0x1d3   : > { %5661 = vmatpush2.bf16.msra.mxu1 %v16588_v27  ;;  %5621 = vmatprep.subr.bf16.mxu0 %v17083_v54  ;;  %v844_v27 = vld [vmem:[#allocation2 + $0x958] sm:$0xff] }
 0x1d4   : > { %5662 = vmatprep.subr.bf16.mxu1 %v16573_v29  ;;  %v1092_v54 = vld [vmem:[#allocation2 + $0x1118] sm:$0xff]  ;;  %v16733_v34 = vcombine.high %v836_v53, %v844_v27  ;;  %v16732_v40 = vcombine.low %v836_v53, %v844_v27 }
 0x1d5   : > { %v1100_v29 = vld [vmem:[#allocation2 + $0x1158] sm:$0xff] }
 0x1d6   : > { %5622 = vmatpush2.bf16.msra.mxu0 %v17082_v36  ;;  %v16989_v35 = vcombine.high %v1092_v54, %v1100_v29  ;;  %v820_v36 = vld [vmem:[#allocation2 + $0x898] sm:$0xff]  ;;  %v16988_v41 = vcombine.low %v1092_v54, %v1100_v29 }
 0x1d7   : > { %5663 = vmatpush2.bf16.msra.mxu1 %v16572_v37  ;;  %5673 = vmatprep.subr.bf16.mxu0 %v16813_v38  ;;  %v828_v37 = vld [vmem:[#allocation2 + $0x8d8] sm:$0xff] }
 0x1d8   : > { %5714 = vmatprep.subr.bf16.mxu1 %v17069_v39  ;;  %v1076_v38 = vld [vmem:[#allocation2 + $0x1098] sm:$0xff]  ;;  %v16717_v19 = vcombine.high %v820_v36, %v828_v37  ;;  %v16716_v48 = vcombine.low %v820_v36, %v828_v37 }
 0x1d9   : > { %v5379_v50 = vpop.f32.mrf.mxu0  ;;  %5624 = vmatmul.mubr.bf16.vlgmr.msra.gmra.mxu0 %v19736_v32  ;;  %v1084_v39 = vld [vmem:[#allocation2 + $0x10d8] sm:$0xff] }
 0x1da   : > { %v19770_v57 = vadd.f32 %v5379_v50, %v19762_v24  ;;  %5665 = vmatmul.mubr.bf16.vlgmr.msra.gmra.mxu1 %v19717_v16  ;;  %5674 = vmatpush1.bf16.msra.mxu0 %v16812_v44  ;;  %v19773_v60 = vpop.f32.mrf.mxu1  ;;  %v16973_v43 = vcombine.high %v1076_v38, %v1084_v39  ;;  %v804_v44 = vld [vmem:[#allocation2 + $0x818] sm:$0xff]  ;;  %v16972_v49 = vcombine.low %v1076_v38, %v1084_v39 }
 0x1db   : > { %5715 = vmatpush1.bf16.msra.mxu1 %v17068_v45  ;;  %v5381_v63 = vpop.f32.mrf.mxu0  ;;  %5675 = vmatprep.subr.bf16.mxu0 %v16797_v46  ;;  %v812_v45 = vld [vmem:[#allocation2 + $0x858] sm:$0xff] }
 0x1dc   : > { %v19776_v2 = vadd.f32 %v5381_v63, %v19766_v31  ;;  %5716 = vmatprep.subr.bf16.mxu1 %v17053_v47  ;;  %v19778_v24 = vpop.f32.mrf.mxu1  ;;  %5705 = vmatprep.mubr.bf16.mxu0 %v19711_v61  ;;  %v17036_v31 = vcombine.low %v1140_v51, %v1148_v52  ;;  %v1060_v46 = vld [vmem:[#allocation2 + $0x1018] sm:$0xff]  ;;  %v16701_v50 = vcombine.high %v804_v44, %v812_v45 }
 0x1dd   : > { %v5383_v6 = vpop.f32.mrf.mxu0  ;;  %5746 = vmatprep.mubr.bf16.mxu1 %v19728_v28  ;;  %v1068_v47 = vld [vmem:[#allocation2 + $0x1058] sm:$0xff] }
 0x1de   : > { %5676 = vmatpush1.bf16.msra.mxu0 %v16796_v59  ;;  %v5424_v10 = vpop.f32.mrf.mxu1  ;;  %v16957_v51 = vcombine.high %v1060_v46, %v1068_v47  ;;  %v1044_v52 = vld [vmem:[#allocation2 + $0xf98] sm:$0xff] }
 0x1df   : > { %5717 = vmatpush1.bf16.msra.mxu1 %v17052_v0  ;;  %v5384_v11 = vpop.f32.mrf.mxu0  ;;  %5677 = vmatprep.subr.bf16.mxu0 %v16781_v1  ;;  %v1052_v59 = vld [vmem:[#allocation2 + $0xfd8] sm:$0xff]  ;;  %v16700_v1 = vcombine.low %v804_v44, %v812_v45 }
 0x1e0   : > { %5718 = vmatprep.subr.bf16.mxu1 %v17037_v3  ;;  %v5425_v17 = vpop.f32.mrf.mxu1  ;;  %v1300_v63 = vld [vmem:[#allocation2 + $0x1798] sm:$0xff]  ;;  %v16956_v3 = vcombine.low %v1060_v46, %v1068_v47  ;;  %v16941_v4 = vcombine.high %v1044_v52, %v1052_v59  ;;  %v16940_v10 = vcombine.low %v1044_v52, %v1052_v59 }
 0x1e1   : > { %v1308_v0 = vld [vmem:[#allocation2 + $0x17d8] sm:$0xff] }
 0x1e2   : > { %5678 = vmatpush1.bf16.msra.mxu0 %v16780_v9  ;;  %v17197_v5 = vcombine.high %v1300_v63, %v1308_v0  ;;  %v1028_v6 = vld [vmem:[#allocation2 + $0xf18] sm:$0xff]  ;;  %v17196_v11 = vcombine.low %v1300_v63, %v1308_v0 }
 0x1e3   : > { %5719 = vmatpush1.bf16.msra.mxu1 %v17036_v31  ;;  %5679 = vmatprep.subr.bf16.mxu0 %v16765_v12  ;;  %v1292_v9 = vld [vmem:[#allocation2 + $0x1758] sm:$0xff]  ;;  %v16925_v31 = vcombine.high %v1028_v6, %v1036_v7  ;;  %v16924_v18 = vcombine.low %v1028_v6, %v1036_v7 }
 0x1e4   : > { %5720 = vmatprep.subr.bf16.mxu1 %v17021_v13  ;;  %v17181_v12 = vcombine.high %v1284_v8, %v1292_v9  ;;  %v1012_v13 = vld [vmem:[#allocation2 + $0xe98] sm:$0xff]  ;;  %v17180_v20 = vcombine.low %v1284_v8, %v1292_v9  ;;  %v19783_v9 = vsub.s32 2, %v19746_v42 }
 0x1e5   : > { %v1268_v15 = vld [vmem:[#allocation2 + $0x1698] sm:$0xff]  ;;  %v16908_v54 = vcombine.low %v1012_v13, %v1020_v14 }
 0x1e6   : > { %5680 = vmatpush1.bf16.msra.mxu0 %v16764_v22  ;;  %v1276_v17 = vld [vmem:[#allocation2 + $0x16d8] sm:$0xff]  ;;  %v16909_v22 = vcombine.high %v1012_v13, %v1020_v14  ;;  %v661_v13 = vld [vmem:[#allocation2 + $0x3a0] sm:$0xff] }
 0x1e7   : > { %5721 = vmatpush1.bf16.msra.mxu1 %v17020_v23  ;;  %5681 = vmatprep.subr.bf16.mxu0 %v16749_v25  ;;  %v17165_v23 = vcombine.high %v1268_v15, %v1276_v17  ;;  %v996_v25 = vld [vmem:[#allocation2 + $0xe18] sm:$0xff]  ;;  %v17164_v29 = vcombine.low %v1268_v15, %v1276_v17  ;;  %v669_v14 = vld [vmem:[#allocation2 + $0x3e0] sm:$0xff] }
 0x1e8   : > { %5722 = vmatprep.subr.bf16.mxu1 %v17005_v26  ;;  %v1004_v26 = vld [vmem:[#allocation2 + $0xe58] sm:$0xff]  ;;  %v917_v15 = vld [vmem:[#allocation2 + $0xba0] sm:$0xff] }
 0x1e9   : > { %v1252_v53 = vld [vmem:[#allocation2 + $0x1618] sm:$0xff]  ;;  %v16892_v38 = vcombine.low %v996_v25, %v1004_v26  ;;  %v925_v17 = vld [vmem:[#allocation2 + $0xbe0] sm:$0xff] }
 0x1ea   : > { %5682 = vmatpush1.bf16.msra.mxu0 %v16748_v30  ;;  %v1260_v27 = vld [vmem:[#allocation2 + $0x1658] sm:$0xff]  ;;  %v16893_v30 = vcombine.high %v996_v25, %v1004_v26  ;;  %v16815_v26 = vcombine.high %v917_v15, %v925_v17 }
 0x1eb   : > { %5723 = vmatpush1.bf16.msra.mxu1 %v17004_v33  ;;  %5683 = vmatprep.subr.bf16.mxu0 %v16733_v34  ;;  %v17149_v33 = vcombine.high %v1252_v53, %v1260_v27  ;;  %v980_v34 = vld [vmem:[#allocation2 + $0xd98] sm:$0xff]  ;;  %v17148_v39 = vcombine.low %v1252_v53, %v1260_v27  ;;  %v645_v53 = vld [vmem:[#allocation2 + $0x320] sm:$0xff] }
 0x1ec   : > { %5724 = vmatprep.subr.bf16.mxu1 %v16989_v35  ;;  %v988_v35 = vld [vmem:[#allocation2 + $0xdd8] sm:$0xff]  ;;  %v653_v27 = vld [vmem:[#allocation2 + $0x360] sm:$0xff] }
 0x1ed   : > { %v1236_v36 = vld [vmem:[#allocation2 + $0x1598] sm:$0xff]  ;;  %v16876_v46 = vcombine.low %v980_v34, %v988_v35 }
 0x1ee   : > { %5684 = vmatpush1.bf16.msra.mxu0 %v16732_v40  ;;  %v1244_v37 = vld [vmem:[#allocation2 + $0x15d8] sm:$0xff]  ;;  %v16877_v40 = vcombine.high %v980_v34, %v988_v35  ;;  %v16814_v34 = vcombine.low %v917_v15, %v925_v17  ;;  %v16543_v35 = vcombine.high %v645_v53, %v653_v27 }
 0x1ef   : > { %5725 = vmatpush1.bf16.msra.mxu1 %v16988_v41  ;;  %5685 = vmatprep.subr.bf16.mxu0 %v16717_v19  ;;  %v17133_v41 = vcombine.high %v1236_v36, %v1244_v37  ;;  %v964_v19 = vld [vmem:[#allocation2 + $0xd18] sm:$0xff]  ;;  %v17132_v47 = vcombine.low %v1236_v36, %v1244_v37 }
 0x1f0   : > { %5726 = vmatprep.subr.bf16.mxu1 %v16973_v43  ;;  %v972_v43 = vld [vmem:[#allocation2 + $0xd58] sm:$0xff] }
 0x1f1   : > { %v1220_v44 = vld [vmem:[#allocation2 + $0x1518] sm:$0xff]  ;;  %v16860_v63 = vcombine.low %v964_v19, %v972_v43 }
 0x1f2   : > { %5686 = vmatpush1.bf16.msra.mxu0 %v16716_v48  ;;  %v1228_v45 = vld [vmem:[#allocation2 + $0x1558] sm:$0xff]  ;;  %v16861_v48 = vcombine.high %v964_v19, %v972_v43  ;;  %v893_v19 = vld [vmem:[#allocation2 + $0xae0] sm:$0xff] }
 0x1f3   : > { %5727 = vmatpush1.bf16.msra.mxu1 %v16972_v49  ;;  %5687 = vmatprep.subr.bf16.mxu0 %v16701_v50  ;;  %v17117_v49 = vcombine.high %v1220_v44, %v1228_v45  ;;  %v948_v50 = vld [vmem:[#allocation2 + $0xc98] sm:$0xff]  ;;  %v17116_v0 = vcombine.low %v1220_v44, %v1228_v45  ;;  %v16542_v44 = vcombine.low %v645_v53, %v653_v27 }
 0x1f4   : > { %5728 = vmatprep.subr.bf16.mxu1 %v16957_v51  ;;  %v956_v51 = vld [vmem:[#allocation2 + $0xcd8] sm:$0xff] }
 0x1f5   : > { %v1204_v52 = vld [vmem:[#allocation2 + $0x1498] sm:$0xff]  ;;  %v16844_v8 = vcombine.low %v948_v50, %v956_v51 }
 0x1f6   : > { %5688 = vmatpush1.bf16.msra.mxu0 %v16700_v1  ;;  %v1212_v59 = vld [vmem:[#allocation2 + $0x14d8] sm:$0xff]  ;;  %v16845_v1 = vcombine.high %v948_v50, %v956_v51  ;;  %v613_v51 = vld [vmem:[#allocation2 + $0x220] sm:$0xff] }
 0x1f7   : > { %5729 = vmatpush1.bf16.msra.mxu1 %v16956_v3  ;;  %5689 = vmatprep.subr.bf16.mxu0 %v16941_v4  ;;  %v17101_v3 = vcombine.high %v1204_v52, %v1212_v59  ;;  %v932_v4 = vld [vmem:[#allocation2 + $0xc18] sm:$0xff] }
 0x1f8   : > { %5730 = vmatprep.subr.bf16.mxu1 %v17197_v5  ;;  %v940_v5 = vld [vmem:[#allocation2 + $0xc58] sm:$0xff] }
 0x1f9   : > { %v1188_v6 = vld [vmem:[#allocation2 + $0x1418] sm:$0xff] }
 0x1fa   : > { %5690 = vmatpush2.bf16.msra.mxu0 %v16940_v10  ;;  %v1196_v7 = vld [vmem:[#allocation2 + $0x1458] sm:$0xff]  ;;  %v17100_v10 = vcombine.low %v1204_v52, %v1212_v59  ;;  %v621_v52 = vld [vmem:[#allocation2 + $0x260] sm:$0xff] }
 0x1fb   : > { %5731 = vmatpush2.bf16.msra.mxu1 %v17196_v11  ;;  %5691 = vmatprep.subr.bf16.mxu0 %v16925_v31  ;;  %v16829_v11 = vcombine.high %v932_v4, %v940_v5  ;;  %v19786_v31 = vsub.s32 3, %v19746_v42  ;;  %v16510_v15 = vcombine.low %v613_v51, %v621_v52 }
 0x1fc   : > { %5732 = vmatprep.subr.bf16.mxu1 %v17181_v12  ;;  %v17085_v12 = vcombine.high %v1188_v6, %v1196_v7 }
 0x1fd   : > { %v1337_v25 = vrot.slane %v19748_v55, %v19786_v31 }
 0x1fe   : > { %5692 = vmatpush2.bf16.msra.mxu0 %v16924_v18  ;;  %v1333_v18 = vrot.slane %v19748_v55, %v19783_v9 }
 0x1ff   : > { %5733 = vmatpush2.bf16.msra.mxu1 %v17180_v20  ;;  %5693 = vmatprep.subr.bf16.mxu0 %v16909_v22  ;;  %v16828_v20 = vcombine.low %v932_v4, %v940_v5  ;;  %v17084_v22 = vcombine.low %v1188_v6, %v1196_v7  ;;  %v5423_v36 = vadd.f32 %v19778_v24, %v1337_v25  ;;  %v837_v25 = vld [vmem:[#allocation2 + $0x920] sm:$0xff] }
 0x200   : > { %5734 = vmatprep.subr.bf16.mxu1 %v17165_v23  ;;  %v16559_v23 = vcombine.high %v661_v13, %v669_v14  ;;  %v16511_v7 = vcombine.high %v613_v51, %v621_v52 }
 0x202   : > { %5694 = vmatpush2.bf16.msra.mxu0 %v16908_v54  ;;  %v901_v54 = vld [vmem:[#allocation2 + $0xb20] sm:$0xff] }
 0x203   : > { %5735 = vmatpush2.bf16.msra.mxu1 %v17164_v29  ;;  %5695 = vmatprep.subr.bf16.mxu0 %v16893_v30  ;;  %v909_v29 = vld [vmem:[#allocation2 + $0xb60] sm:$0xff]  ;;  %v5421_v30 = vadd.f32 %v19773_v60, %v1333_v18 }
 0x204   : > { %5736 = vmatprep.subr.bf16.mxu1 %v17149_v33  ;;  %v16558_v33 = vcombine.low %v661_v13, %v669_v14  ;;  %v16799_v37 = vcombine.high %v901_v54, %v909_v29  ;;  %v853_v13 = vld [vmem:[#allocation2 + $0x9a0] sm:$0xff] }
 0x205   : > { %v861_v14 = vld [vmem:[#allocation2 + $0x9e0] sm:$0xff] }
 0x206   : > { %5696 = vmatpush2.bf16.msra.mxu0 %v16892_v38  ;;  %v629_v38 = vld [vmem:[#allocation2 + $0x2a0] sm:$0xff]  ;;  %v16750_v27 = vcombine.low %v853_v13, %v861_v14 }
 0x207   : > { %5737 = vmatpush2.bf16.msra.mxu1 %v17148_v39  ;;  %5697 = vmatprep.subr.bf16.mxu0 %v16877_v40  ;;  %v637_v39 = vld [vmem:[#allocation2 + $0x2e0] sm:$0xff] }
 0x208   : > { %5738 = vmatprep.subr.bf16.mxu1 %v17133_v41  ;;  %v885_v41 = vld [vmem:[#allocation2 + $0xaa0] sm:$0xff]  ;;  %v16527_v24 = vcombine.high %v629_v38, %v637_v39 }
 0x209   : > { %v16783_v50 = vcombine.high %v885_v41, %v893_v19  ;;  %v16782_v6 = vcombine.low %v885_v41, %v893_v19  ;;  %v557_v41 = vld [vmem:[#allocation2 + $0x60] sm:$0xff] }
 0x20a   : > { %5698 = vmatpush2.bf16.msra.mxu0 %v16876_v46  ;;  %v16798_v46 = vcombine.low %v901_v54, %v909_v29  ;;  %v805_v19 = vld [vmem:[#allocation2 + $0x820] sm:$0xff] }
 0x20b   : > { %5739 = vmatpush2.bf16.msra.mxu1 %v17132_v47  ;;  %5699 = vmatprep.subr.bf16.mxu0 %v16861_v48 }
 0x20c   : > { %5740 = vmatprep.subr.bf16.mxu1 %v17117_v49 }
 0x20e   : > { %5700 = vmatpush2.bf16.msra.mxu0 %v16860_v63  ;;  %v869_v63 = vld [vmem:[#allocation2 + $0xa20] sm:$0xff] }
 0x20f   : > { %5741 = vmatpush2.bf16.msra.mxu1 %v17116_v0  ;;  %5701 = vmatprep.subr.bf16.mxu0 %v16845_v1  ;;  %v877_v0 = vld [vmem:[#allocation2 + $0xa60] sm:$0xff] }
 0x210   : > { %5742 = vmatprep.subr.bf16.mxu1 %v17101_v3  ;;  %v16526_v3 = vcombine.low %v629_v38, %v637_v39  ;;  %v16766_v17 = vcombine.low %v869_v63, %v877_v0 }
 0x212   : > { %5702 = vmatpush2.bf16.msra.mxu0 %v16844_v8  ;;  %v16767_v8 = vcombine.high %v869_v63, %v877_v0  ;;  %v773_v0 = vld [vmem:[#allocation2 + $0x720] sm:$0xff] }
 0x213   : > { %5743 = vmatpush2.bf16.msra.mxu1 %v17100_v10  ;;  %5703 = vmatprep.subr.bf16.mxu0 %v16829_v11  ;;  %v597_v10 = vld [vmem:[#allocation2 + $0x1a0] sm:$0xff] }
 0x214   : > { %5744 = vmatprep.subr.bf16.mxu1 %v17085_v12  ;;  %v605_v11 = vld [vmem:[#allocation2 + $0x1e0] sm:$0xff] }
 0x215   : > { %v16495_v18 = vcombine.high %v597_v10, %v605_v11  ;;  %v16494_v53 = vcombine.low %v597_v10, %v605_v11  ;;  %v757_v11 = vld [vmem:[#allocation2 + $0x6a0] sm:$0xff] }
 0x216   : > { %5704 = vmatpush2.bf16.msra.mxu0 %v16828_v20  ;;  %v16751_v20 = vcombine.high %v853_v13, %v861_v14  ;;  %v1013_v13 = vld [vmem:[#allocation2 + $0xea0] sm:$0xff] }
 0x217   : > { %5745 = vmatpush2.bf16.msra.mxu1 %v17084_v22  ;;  %5755 = vmatprep.subr.bf16.mxu0 %v16559_v23  ;;  %v581_v22 = vld [vmem:[#allocation2 + $0x120] sm:$0xff] }
 0x218   : > { %5796 = vmatprep.subr.bf16.mxu1 %v16815_v26  ;;  %v589_v23 = vld [vmem:[#allocation2 + $0x160] sm:$0xff] }
 0x219   : > { %v5461_v40 = vpop.f32.mrf.mxu0  ;;  %5706 = vmatmul.mubr.bf16.vlgmr.msra.gmra.mxu0 %v19724_v21  ;;  %v845_v26 = vld [vmem:[#allocation2 + $0x960] sm:$0xff]  ;;  %v16479_v54 = vcombine.high %v581_v22, %v589_v23 }
 0x21a   : > { %v5462_v43 = vadd.f32 %v5461_v40, %v5421_v30  ;;  %5747 = vmatmul.mubr.bf16.vlgmr.msra.gmra.mxu1 %v19736_v32  ;;  %5756 = vmatpush1.bf16.msra.mxu0 %v16558_v33  ;;  %v5502_v60 = vpop.f32.mrf.mxu1  ;;  %v16735_v29 = vcombine.high %v837_v25, %v845_v26  ;;  %v565_v30 = vld [vmem:[#allocation2 + $0xa0] sm:$0xff] }
 0x21b   : > { %5797 = vmatpush1.bf16.msra.mxu1 %v16814_v34  ;;  %v5463_v45 = vpop.f32.mrf.mxu0  ;;  %5757 = vmatprep.subr.bf16.mxu0 %v16543_v35  ;;  %v573_v33 = vld [vmem:[#allocation2 + $0xe0] sm:$0xff] }
 0x21c   : > { %v5464_v47 = vadd.f32 %v5463_v45, %v5423_v36  ;;  %v19796_v48 = vadd.f32 %v5502_v60, %v5462_v43  ;;  %v5504_v49 = vpop.f32.mrf.mxu1  ;;  %5798 = vmatprep.subr.bf16.mxu1 %v16799_v37  ;;  %5787 = vmatprep.mubr.bf16.mxu0 %v19707_v58  ;;  %v821_v34 = vld [vmem:[#allocation2 + $0x8a0] sm:$0xff]  ;;  %v16478_v36 = vcombine.low %v581_v22, %v589_v23 }
 0x21d   : > { %v5465_v59 = vpop.f32.mrf.mxu0  ;;  %5828 = vmatprep.mubr.bf16.mxu1 %v19711_v61  ;;  %v829_v35 = vld [vmem:[#allocation2 + $0x8e0] sm:$0xff]  ;;  %v16734_v37 = vcombine.low %v837_v25, %v845_v26  ;;  %v16463_v38 = vcombine.high %v565_v30, %v573_v33  ;;  %v16462_v60 = vcombine.low %v565_v30, %v573_v33 }
 0x21e   : > { %v19800_v1 = vadd.f32 %v5504_v49, %v5464_v47  ;;  %5758 = vmatpush1.bf16.msra.mxu0 %v16542_v44  ;;  %v5506_v4 = vpop.f32.mrf.mxu1  ;;  %v16719_v39 = vcombine.high %v821_v34, %v829_v35  ;;  %v549_v40 = vld [vmem:[#allocation2 + $0x20] sm:$0xff]  ;;  %v16718_v44 = vcombine.low %v821_v34, %v829_v35 }
 0x21f   : > { %5799 = vmatpush1.bf16.msra.mxu1 %v16798_v46  ;;  %v5466_v5 = vpop.f32.mrf.mxu0  ;;  %5759 = vmatprep.subr.bf16.mxu0 %v16527_v24  ;;  %v813_v43 = vld [vmem:[#allocation2 + $0x860] sm:$0xff]  ;;  %v16447_v45 = vcombine.high %v549_v40, %v557_v41  ;;  %v16446_v51 = vcombine.low %v549_v40, %v557_v41 }
 0x220   : > { %5800 = vmatprep.subr.bf16.mxu1 %v16783_v50  ;;  %v5507_v12 = vpop.f32.mrf.mxu1  ;;  %v16703_v46 = vcombine.high %v805_v19, %v813_v43  ;;  %v789_v24 = vld [vmem:[#allocation2 + $0x7a0] sm:$0xff]  ;;  %v16702_v52 = vcombine.low %v805_v19, %v813_v43 }
 0x221   : > { %v797_v47 = vld [vmem:[#allocation2 + $0x7e0] sm:$0xff] }
 0x222   : > { %5760 = vmatpush1.bf16.msra.mxu0 %v16526_v3  ;;  %v1045_v49 = vld [vmem:[#allocation2 + $0xfa0] sm:$0xff]  ;;  %v16687_v59 = vcombine.high %v789_v24, %v797_v47 }
 0x223   : > { %5801 = vmatpush1.bf16.msra.mxu1 %v16782_v6  ;;  %5761 = vmatprep.subr.bf16.mxu0 %v16511_v7  ;;  %v1053_v50 = vld [vmem:[#allocation2 + $0xfe0] sm:$0xff]  ;;  %v16686_v6 = vcombine.low %v789_v24, %v797_v47 }
 0x224   : > { %5802 = vmatprep.subr.bf16.mxu1 %v16767_v8  ;;  %v16943_v63 = vcombine.high %v1045_v49, %v1053_v50  ;;  %v781_v3 = vld [vmem:[#allocation2 + $0x760] sm:$0xff]  ;;  %v16942_v7 = vcombine.low %v1045_v49, %v1053_v50 }
 0x225   : > { %v1029_v4 = vld [vmem:[#allocation2 + $0xf20] sm:$0xff]  ;;  %v16671_v8 = vcombine.high %v773_v0, %v781_v3 }
 0x226   : > { %5762 = vmatpush1.bf16.msra.mxu0 %v16510_v15  ;;  %v1037_v5 = vld [vmem:[#allocation2 + $0xf60] sm:$0xff]  ;;  %v16670_v15 = vcombine.low %v773_v0, %v781_v3 }
 0x227   : > { %5803 = vmatpush1.bf16.msra.mxu1 %v16766_v17  ;;  %5763 = vmatprep.subr.bf16.mxu0 %v16495_v18  ;;  %v16927_v10 = vcombine.high %v1029_v4, %v1037_v5  ;;  %v765_v12 = vld [vmem:[#allocation2 + $0x6e0] sm:$0xff]  ;;  %v16926_v17 = vcombine.low %v1029_v4, %v1037_v5 }
 0x228   : > { %5804 = vmatprep.subr.bf16.mxu1 %v16751_v20  ;;  %v1021_v14 = vld [vmem:[#allocation2 + $0xee0] sm:$0xff]  ;;  %v16655_v18 = vcombine.high %v757_v11, %v765_v12 }
 0x229   : > { %v16911_v20 = vcombine.high %v1013_v13, %v1021_v14  ;;  %v741_v22 = vld [vmem:[#allocation2 + $0x620] sm:$0xff] }
 0x22a   : > { %5764 = vmatpush1.bf16.msra.mxu0 %v16494_v53  ;;  %v749_v23 = vld [vmem:[#allocation2 + $0x660] sm:$0xff]  ;;  %v16654_v53 = vcombine.low %v757_v11, %v765_v12 }
 0x22b   : > { %5805 = vmatpush1.bf16.msra.mxu1 %v16750_v27  ;;  %5765 = vmatprep.subr.bf16.mxu0 %v16479_v54  ;;  %v997_v25 = vld [vmem:[#allocation2 + $0xe20] sm:$0xff]  ;;  %v16910_v27 = vcombine.low %v1013_v13, %v1021_v14  ;;  %v16639_v54 = vcombine.high %v741_v22, %v749_v23  ;;  %v662_v13 = vld [vmem:[#allocation2 + $0x3a8] sm:$0xff] }
 0x22c   : > { %5806 = vmatprep.subr.bf16.mxu1 %v16735_v29  ;;  %v1005_v26 = vld [vmem:[#allocation2 + $0xe60] sm:$0xff]  ;;  %v670_v14 = vld [vmem:[#allocation2 + $0x3e8] sm:$0xff] }
 0x22d   : > { %v16895_v29 = vcombine.high %v997_v25, %v1005_v26  ;;  %v725_v30 = vld [vmem:[#allocation2 + $0x5a0] sm:$0xff] }
 0x22e   : > { %5766 = vmatpush1.bf16.msra.mxu0 %v16478_v36  ;;  %v733_v33 = vld [vmem:[#allocation2 + $0x5e0] sm:$0xff]  ;;  %v16638_v36 = vcombine.low %v741_v22, %v749_v23  ;;  %v16561_v22 = vcombine.high %v662_v13, %v670_v14  ;;  %v19806_v23 = vsub.s32 5, %v19746_v42 }
 0x22f   : > { %5807 = vmatpush1.bf16.msra.mxu1 %v16734_v37  ;;  %5767 = vmatprep.subr.bf16.mxu0 %v16463_v38  ;;  %v981_v34 = vld [vmem:[#allocation2 + $0xda0] sm:$0xff]  ;;  %v16894_v37 = vcombine.low %v997_v25, %v1005_v26  ;;  %v16623_v38 = vcombine.high %v725_v30, %v733_v33 }
 0x230   : > { %5808 = vmatprep.subr.bf16.mxu1 %v16719_v39  ;;  %v989_v35 = vld [vmem:[#allocation2 + $0xde0] sm:$0xff] }
 0x231   : > { %v16879_v39 = vcombine.high %v981_v34, %v989_v35  ;;  %v709_v40 = vld [vmem:[#allocation2 + $0x520] sm:$0xff] }
 0x232   : > { %5768 = vmatpush1.bf16.msra.mxu0 %v16462_v60  ;;  %v717_v41 = vld [vmem:[#allocation2 + $0x560] sm:$0xff]  ;;  %v16622_v60 = vcombine.low %v725_v30, %v733_v33  ;;  %v16560_v30 = vcombine.low %v662_v13, %v670_v14  ;;  %v598_v13 = vld [vmem:[#allocation2 + $0x1a8] sm:$0xff] }
 0x233   : > { %5809 = vmatpush1.bf16.msra.mxu1 %v16718_v44  ;;  %5769 = vmatprep.subr.bf16.mxu0 %v16447_v45  ;;  %v965_v19 = vld [vmem:[#allocation2 + $0xd20] sm:$0xff]  ;;  %v16878_v44 = vcombine.low %v981_v34, %v989_v35  ;;  %v16607_v45 = vcombine.high %v709_v40, %v717_v41  ;;  %v1345_v34 = vrot.slane %v19748_v55, %v19806_v23  ;;  %v606_v14 = vld [vmem:[#allocation2 + $0x1e8] sm:$0xff] }
 0x234   : > { %5810 = vmatprep.subr.bf16.mxu1 %v16703_v46  ;;  %v973_v43 = vld [vmem:[#allocation2 + $0xd60] sm:$0xff] }
 0x235   : > { %v16863_v46 = vcombine.high %v965_v19, %v973_v43  ;;  %v693_v24 = vld [vmem:[#allocation2 + $0x4a0] sm:$0xff] }
 0x236   : > { %5770 = vmatpush1.bf16.msra.mxu0 %v16446_v51  ;;  %v701_v47 = vld [vmem:[#allocation2 + $0x4e0] sm:$0xff]  ;;  %v16606_v51 = vcombine.low %v709_v40, %v717_v41  ;;  %v638_v40 = vld [vmem:[#allocation2 + $0x2e8] sm:$0xff] }
 0x237   : > { %5811 = vmatpush1.bf16.msra.mxu1 %v16702_v52  ;;  %5771 = vmatprep.subr.bf16.mxu0 %v16687_v59  ;;  %v949_v49 = vld [vmem:[#allocation2 + $0xca0] sm:$0xff]  ;;  %v16862_v52 = vcombine.low %v965_v19, %v973_v43  ;;  %v16591_v59 = vcombine.high %v693_v24, %v701_v47 }
 0x238   : > { %5812 = vmatprep.subr.bf16.mxu1 %v16943_v63  ;;  %v957_v50 = vld [vmem:[#allocation2 + $0xce0] sm:$0xff] }
 0x239   : > { %v16847_v63 = vcombine.high %v949_v49, %v957_v50  ;;  %v677_v0 = vld [vmem:[#allocation2 + $0x420] sm:$0xff] }
 0x23a   : > { %5772 = vmatpush2.bf16.msra.mxu0 %v16686_v6  ;;  %v685_v3 = vld [vmem:[#allocation2 + $0x460] sm:$0xff]  ;;  %v16590_v6 = vcombine.low %v693_v24, %v701_v47 }
 0x23b   : > { %5813 = vmatpush2.bf16.msra.mxu1 %v16942_v7  ;;  %5773 = vmatprep.subr.bf16.mxu0 %v16671_v8  ;;  %v933_v4 = vld [vmem:[#allocation2 + $0xc20] sm:$0xff]  ;;  %v16846_v7 = vcombine.low %v949_v49, %v957_v50  ;;  %v16575_v8 = vcombine.high %v677_v0, %v685_v3 }
 0x23c   : > { %5814 = vmatprep.subr.bf16.mxu1 %v16927_v10  ;;  %v941_v5 = vld [vmem:[#allocation2 + $0xc60] sm:$0xff] }
 0x23d   : > { %v16831_v10 = vcombine.high %v933_v4, %v941_v5  ;;  %v1173_v11 = vld [vmem:[#allocation2 + $0x13a0] sm:$0xff] }
 0x23e   : > { %5774 = vmatpush2.bf16.msra.mxu0 %v16670_v15  ;;  %v1181_v12 = vld [vmem:[#allocation2 + $0x13e0] sm:$0xff]  ;;  %v16574_v15 = vcombine.low %v677_v0, %v685_v3 }
 0x23f   : > { %5815 = vmatpush2.bf16.msra.mxu1 %v16926_v17  ;;  %5775 = vmatprep.subr.bf16.mxu0 %v16655_v18  ;;  %v19803_v17 = vsub.s32 4, %v19746_v42  ;;  %v16830_v18 = vcombine.low %v933_v4, %v941_v5  ;;  %v1157_v25 = vld [vmem:[#allocation2 + $0x1320] sm:$0xff] }
 0x240   : > { %5816 = vmatprep.subr.bf16.mxu1 %v16911_v20  ;;  %v17071_v20 = vcombine.high %v1173_v11, %v1181_v12  ;;  %v1165_v26 = vld [vmem:[#allocation2 + $0x1360] sm:$0xff] }
 0x241   : > { %v17055_v33 = vcombine.high %v1157_v25, %v1165_v26  ;;  %v17054_v43 = vcombine.low %v1157_v25, %v1165_v26  ;;  %v1125_v50 = vld [vmem:[#allocation2 + $0x1220] sm:$0xff] }
 0x242   : > { %5776 = vmatpush2.bf16.msra.mxu0 %v16654_v53  ;;  %v646_v53 = vld [vmem:[#allocation2 + $0x328] sm:$0xff]  ;;  %v1093_v25 = vld [vmem:[#allocation2 + $0x1120] sm:$0xff] }
 0x243   : > { %5817 = vmatpush2.bf16.msra.mxu1 %v16910_v27  ;;  %5777 = vmatprep.subr.bf16.mxu0 %v16639_v54  ;;  %v654_v27 = vld [vmem:[#allocation2 + $0x368] sm:$0xff]  ;;  %v1341_v54 = vrot.slane %v19748_v55, %v19803_v17  ;;  %v1101_v26 = vld [vmem:[#allocation2 + $0x1160] sm:$0xff] }
 0x244   : > { %5818 = vmatprep.subr.bf16.mxu1 %v16895_v29  ;;  %v17070_v29 = vcombine.low %v1173_v11, %v1181_v12  ;;  %v16545_v35 = vcombine.high %v646_v53, %v654_v27  ;;  %v1117_v11 = vld [vmem:[#allocation2 + $0x11e0] sm:$0xff] }
 0x246   : > { %5778 = vmatpush2.bf16.msra.mxu0 %v16638_v36  ;;  %v1141_v36 = vld [vmem:[#allocation2 + $0x12a0] sm:$0xff] }
 0x247   : > { %5819 = vmatpush2.bf16.msra.mxu1 %v16894_v37  ;;  %5779 = vmatprep.subr.bf16.mxu0 %v16623_v38  ;;  %v1149_v37 = vld [vmem:[#allocation2 + $0x12e0] sm:$0xff] }
 0x248   : > { %5820 = vmatprep.subr.bf16.mxu1 %v16879_v39  ;;  %v630_v39 = vld [vmem:[#allocation2 + $0x2a8] sm:$0xff]  ;;  %v17038_v3 = vcombine.low %v1141_v36, %v1149_v37 }
 0x249   : > { %v16529_v49 = vcombine.high %v630_v39, %v638_v40 }
 0x24a   : > { %5780 = vmatpush2.bf16.msra.mxu0 %v16622_v60 }
 0x24b   : > { %5821 = vmatpush2.bf16.msra.mxu1 %v16878_v44  ;;  %5781 = vmatprep.subr.bf16.mxu0 %v16607_v45  ;;  %v16544_v44 = vcombine.low %v646_v53, %v654_v27  ;;  %v17039_v45 = vcombine.high %v1141_v36, %v1149_v37  ;;  %v582_v53 = vld [vmem:[#allocation2 + $0x128] sm:$0xff] }
 0x24c   : > { %5822 = vmatprep.subr.bf16.mxu1 %v16863_v46  ;;  %v590_v27 = vld [vmem:[#allocation2 + $0x168] sm:$0xff] }
 0x24d   : > { %v566_v36 = vld [vmem:[#allocation2 + $0xa8] sm:$0xff] }
 0x24e   : > { %5782 = vmatpush2.bf16.msra.mxu0 %v16606_v51  ;;  %v1133_v51 = vld [vmem:[#allocation2 + $0x1260] sm:$0xff]  ;;  %v574_v37 = vld [vmem:[#allocation2 + $0xe8] sm:$0xff] }
 0x24f   : > { %5823 = vmatpush2.bf16.msra.mxu1 %v16862_v52  ;;  %5783 = vmatprep.subr.bf16.mxu0 %v16591_v59  ;;  %v614_v59 = vld [vmem:[#allocation2 + $0x228] sm:$0xff] }
 0x250   : > { %5824 = vmatprep.subr.bf16.mxu1 %v16847_v63  ;;  %v622_v63 = vld [vmem:[#allocation2 + $0x268] sm:$0xff] }
 0x252   : > { %5784 = vmatpush2.bf16.msra.mxu0 %v16590_v6  ;;  %v16528_v6 = vcombine.low %v630_v39, %v638_v40  ;;  %v16480_v39 = vcombine.low %v582_v53, %v590_v27 }
 0x253   : > { %5825 = vmatpush2.bf16.msra.mxu1 %v16846_v7  ;;  %5785 = vmatprep.subr.bf16.mxu0 %v16575_v8  ;;  %v17023_v7 = vcombine.high %v1125_v50, %v1133_v51  ;;  %v16513_v8 = vcombine.high %v614_v59, %v622_v63 }
 0x254   : > { %5826 = vmatprep.subr.bf16.mxu1 %v16831_v10  ;;  %v1109_v10 = vld [vmem:[#allocation2 + $0x11a0] sm:$0xff] }
 0x256   : > { %5786 = vmatpush2.bf16.msra.mxu0 %v16574_v15  ;;  %v17022_v15 = vcombine.low %v1125_v50, %v1133_v51  ;;  %v1301_v50 = vld [vmem:[#allocation2 + $0x17a0] sm:$0xff] }
 0x257   : > { %5827 = vmatpush2.bf16.msra.mxu1 %v16830_v18  ;;  %5837 = vmatprep.subr.bf16.mxu0 %v17071_v20  ;;  %v16512_v18 = vcombine.low %v614_v59, %v622_v63  ;;  %v17007_v20 = vcombine.high %v1109_v10, %v1117_v11  ;;  %v1309_v51 = vld [vmem:[#allocation2 + $0x17e0] sm:$0xff]  ;;  %v798_v59 = vld [vmem:[#allocation2 + $0x7e8] sm:$0xff] }
 0x258   : > { %5878 = vmatprep.subr.bf16.mxu1 %v16561_v22  ;;  %v16497_v22 = vcombine.high %v598_v13, %v606_v14 }
 0x259   : > { %v5543_v38 = vpop.f32.mrf.mxu0  ;;  %5788 = vmatmul.mubr.bf16.vlgmr.msra.gmra.mxu0 %v19717_v16 }
 0x25a   : > { %v5544_v41 = vadd.f32 %v5543_v38, %v1341_v54  ;;  %5829 = vmatmul.mubr.bf16.vlgmr.msra.gmra.mxu1 %v19724_v21  ;;  %5838 = vmatpush1.bf16.msra.mxu0 %v17070_v29  ;;  %v5584_v19 = vpop.f32.mrf.mxu1  ;;  %v17006_v54 = vcombine.low %v1109_v10, %v1117_v11  ;;  %v16496_v29 = vcombine.low %v598_v13, %v606_v14  ;;  %v782_v10 = vld [vmem:[#allocation2 + $0x768] sm:$0xff] }
 0x25b   : > { %5879 = vmatpush1.bf16.msra.mxu1 %v16560_v30  ;;  %v5545_v60 = vpop.f32.mrf.mxu0  ;;  %5839 = vmatprep.subr.bf16.mxu0 %v17055_v33  ;;  %v16991_v30 = vcombine.high %v1093_v25, %v1101_v26  ;;  %v16481_v33 = vcombine.high %v582_v53, %v590_v27  ;;  %v16990_v38 = vcombine.low %v1093_v25, %v1101_v26 }
 0x25c   : > { %v5546_v46 = vadd.f32 %v5545_v60, %v1345_v34  ;;  %v19814_v24 = vadd.f32 %v5584_v19, %v5544_v41  ;;  %v5586_v47 = vpop.f32.mrf.mxu1  ;;  %5880 = vmatprep.subr.bf16.mxu1 %v16545_v35  ;;  %5869 = vmatprep.mubr.bf16.mxu0 %v19728_v28  ;;  %v1077_v34 = vld [vmem:[#allocation2 + $0x10a0] sm:$0xff]  ;;  %v16465_v41 = vcombine.high %v566_v36, %v574_v37  ;;  %v550_v60 = vld [vmem:[#allocation2 + $0x28] sm:$0xff] }
 0x25d   : > { %v5547_v52 = vpop.f32.mrf.mxu0  ;;  %5910 = vmatprep.mubr.bf16.mxu1 %v19707_v58  ;;  %v1085_v35 = vld [vmem:[#allocation2 + $0x10e0] sm:$0xff]  ;;  %v17198_v11 = vcombine.low %v1301_v50, %v1309_v51 }
 0x25e   : > { %v19818_v0 = vadd.f32 %v5586_v47, %v5546_v46  ;;  %5840 = vmatpush1.bf16.msra.mxu0 %v17054_v43  ;;  %v5588_v4 = vpop.f32.mrf.mxu1  ;;  %v16975_v40 = vcombine.high %v1077_v34, %v1085_v35  ;;  %v1061_v19 = vld [vmem:[#allocation2 + $0x1020] sm:$0xff]  ;;  %v16464_v46 = vcombine.low %v566_v36, %v574_v37  ;;  %v790_v52 = vld [vmem:[#allocation2 + $0x7a8] sm:$0xff] }
 0x25f   : > { %5881 = vmatpush1.bf16.msra.mxu1 %v16544_v44  ;;  %v5548_v5 = vpop.f32.mrf.mxu0  ;;  %5841 = vmatprep.subr.bf16.mxu0 %v17039_v45  ;;  %v1069_v43 = vld [vmem:[#allocation2 + $0x1060] sm:$0xff]  ;;  %v558_v44 = vld [vmem:[#allocation2 + $0x68] sm:$0xff]  ;;  %v16974_v45 = vcombine.low %v1077_v34, %v1085_v35  ;;  %v17199_v4 = vcombine.high %v1301_v50, %v1309_v51 }
 0x260   : > { %5882 = vmatprep.subr.bf16.mxu1 %v16529_v49  ;;  %v5589_v12 = vpop.f32.mrf.mxu1  ;;  %v16959_v47 = vcombine.high %v1061_v19, %v1069_v43  ;;  %v16449_v49 = vcombine.high %v550_v60, %v558_v44  ;;  %v16958_v63 = vcombine.low %v1061_v19, %v1069_v43  ;;  %v16689_v5 = vcombine.high %v790_v52, %v798_v59 }
 0x261   : > { %v16688_v12 = vcombine.low %v790_v52, %v798_v59 }
 0x262   : > { %5842 = vmatpush1.bf16.msra.mxu0 %v17038_v3  ;;  %v16448_v3 = vcombine.low %v550_v60, %v558_v44 }
 0x263   : > { %5883 = vmatpush1.bf16.msra.mxu1 %v16528_v6  ;;  %5843 = vmatprep.subr.bf16.mxu0 %v17023_v7  ;;  %v1285_v6 = vld [vmem:[#allocation2 + $0x1720] sm:$0xff] }
 0x264   : > { %5884 = vmatprep.subr.bf16.mxu1 %v16513_v8  ;;  %v1293_v7 = vld [vmem:[#allocation2 + $0x1760] sm:$0xff]  ;;  %v774_v8 = vld [vmem:[#allocation2 + $0x728] sm:$0xff] }
 0x265   : > { %v17183_v13 = vcombine.high %v1285_v6, %v1293_v7  ;;  %v16673_v14 = vcombine.high %v774_v8, %v782_v10  ;;  %v17182_v25 = vcombine.low %v1285_v6, %v1293_v7  ;;  %v16672_v26 = vcombine.low %v774_v8, %v782_v10 }
 0x266   : > { %5844 = vmatpush1.bf16.msra.mxu0 %v17022_v15  ;;  %v1269_v15 = vld [vmem:[#allocation2 + $0x16a0] sm:$0xff] }
 0x267   : > { %5885 = vmatpush1.bf16.msra.mxu1 %v16512_v18  ;;  %5845 = vmatprep.subr.bf16.mxu0 %v17007_v20  ;;  %v1277_v18 = vld [vmem:[#allocation2 + $0x16e0] sm:$0xff]  ;;  %v758_v20 = vld [vmem:[#allocation2 + $0x6a8] sm:$0xff] }
 0x268   : > { %5886 = vmatprep.subr.bf16.mxu1 %v16497_v22  ;;  %v766_v22 = vld [vmem:[#allocation2 + $0x6e8] sm:$0xff]  ;;  %v17167_v53 = vcombine.high %v1269_v15, %v1277_v18  ;;  %v17166_v34 = vcombine.low %v1269_v15, %v1277_v18 }
 0x269   : > { %v16657_v27 = vcombine.high %v758_v20, %v766_v22  ;;  %v16656_v35 = vcombine.low %v758_v20, %v766_v22 }
 0x26a   : > { %5846 = vmatpush1.bf16.msra.mxu0 %v17006_v54  ;;  %v1253_v54 = vld [vmem:[#allocation2 + $0x1620] sm:$0xff] }
 0x26b   : > { %5887 = vmatpush1.bf16.msra.mxu1 %v16496_v29  ;;  %5847 = vmatprep.subr.bf16.mxu0 %v16991_v30  ;;  %v1261_v29 = vld [vmem:[#allocation2 + $0x1660] sm:$0xff]  ;;  %v742_v30 = vld [vmem:[#allocation2 + $0x628] sm:$0xff] }
 0x26c   : > { %5888 = vmatprep.subr.bf16.mxu1 %v16481_v33  ;;  %v750_v33 = vld [vmem:[#allocation2 + $0x668] sm:$0xff]  ;;  %v17151_v36 = vcombine.high %v1253_v54, %v1261_v29  ;;  %v17150_v19 = vcombine.low %v1253_v54, %v1261_v29 }
 0x26d   : > { %v16641_v37 = vcombine.high %v742_v30, %v750_v33  ;;  %v16640_v43 = vcombine.low %v742_v30, %v750_v33 }
 0x26e   : > { %5848 = vmatpush1.bf16.msra.mxu0 %v16990_v38  ;;  %v1237_v38 = vld [vmem:[#allocation2 + $0x15a0] sm:$0xff] }
 0x26f   : > { %5889 = vmatpush1.bf16.msra.mxu1 %v16480_v39  ;;  %5849 = vmatprep.subr.bf16.mxu0 %v16975_v40  ;;  %v1245_v39 = vld [vmem:[#allocation2 + $0x15e0] sm:$0xff]  ;;  %v726_v40 = vld [vmem:[#allocation2 + $0x5a8] sm:$0xff] }
 0x270   : > { %5890 = vmatprep.subr.bf16.mxu1 %v16465_v41  ;;  %v734_v41 = vld [vmem:[#allocation2 + $0x5e8] sm:$0xff]  ;;  %v17135_v60 = vcombine.high %v1237_v38, %v1245_v39  ;;  %v17134_v50 = vcombine.low %v1237_v38, %v1245_v39 }
 0x271   : > { %v16625_v44 = vcombine.high %v726_v40, %v734_v41  ;;  %v16624_v51 = vcombine.low %v726_v40, %v734_v41 }
 0x272   : > { %5850 = vmatpush1.bf16.msra.mxu0 %v16974_v45  ;;  %v1221_v45 = vld [vmem:[#allocation2 + $0x1520] sm:$0xff] }
 0x273   : > { %5891 = vmatpush1.bf16.msra.mxu1 %v16464_v46  ;;  %5851 = vmatprep.subr.bf16.mxu0 %v16959_v47  ;;  %v1229_v46 = vld [vmem:[#allocation2 + $0x1560] sm:$0xff]  ;;  %v710_v47 = vld [vmem:[#allocation2 + $0x528] sm:$0xff] }
 0x274   : > { %5892 = vmatprep.subr.bf16.mxu1 %v16449_v49  ;;  %v718_v49 = vld [vmem:[#allocation2 + $0x568] sm:$0xff]  ;;  %v17119_v52 = vcombine.high %v1221_v45, %v1229_v46  ;;  %v17118_v6 = vcombine.low %v1221_v45, %v1229_v46 }
 0x275   : > { %v16609_v59 = vcombine.high %v710_v47, %v718_v49  ;;  %v16608_v7 = vcombine.low %v710_v47, %v718_v49  ;;  %v1150_v45 = vld [vmem:[#allocation2 + $0x12e8] sm:$0xff] }
 0x276   : > { %5852 = vmatpush1.bf16.msra.mxu0 %v16958_v63  ;;  %v1205_v63 = vld [vmem:[#allocation2 + $0x14a0] sm:$0xff] }
 0x277   : > { %5893 = vmatpush1.bf16.msra.mxu1 %v16448_v3  ;;  %5853 = vmatprep.subr.bf16.mxu0 %v17199_v4  ;;  %v1213_v3 = vld [vmem:[#allocation2 + $0x14e0] sm:$0xff]  ;;  %v694_v4 = vld [vmem:[#allocation2 + $0x4a8] sm:$0xff] }
 0x278   : > { %5894 = vmatprep.subr.bf16.mxu1 %v16689_v5  ;;  %v702_v5 = vld [vmem:[#allocation2 + $0x4e8] sm:$0xff]  ;;  %v17103_v8 = vcombine.high %v1205_v63, %v1213_v3  ;;  %v17102_v15 = vcombine.low %v1205_v63, %v1213_v3 }
 0x279   : > { %v16593_v10 = vcombine.high %v694_v4, %v702_v5  ;;  %v16592_v18 = vcombine.low %v694_v4, %v702_v5  ;;  %v870_v63 = vld [vmem:[#allocation2 + $0xa28] sm:$0xff] }
 0x27a   : > { %5854 = vmatpush2.bf16.msra.mxu0 %v17198_v11  ;;  %v1189_v11 = vld [vmem:[#allocation2 + $0x1420] sm:$0xff]  ;;  %v878_v3 = vld [vmem:[#allocation2 + $0xa68] sm:$0xff] }
 0x27b   : > { %5895 = vmatpush2.bf16.msra.mxu1 %v16688_v12  ;;  %5855 = vmatprep.subr.bf16.mxu0 %v17183_v13  ;;  %v1197_v12 = vld [vmem:[#allocation2 + $0x1460] sm:$0xff]  ;;  %v678_v13 = vld [vmem:[#allocation2 + $0x428] sm:$0xff] }
 0x27c   : > { %5896 = vmatprep.subr.bf16.mxu1 %v16673_v14  ;;  %v686_v14 = vld [vmem:[#allocation2 + $0x468] sm:$0xff]  ;;  %v17087_v20 = vcombine.high %v1189_v11, %v1197_v12  ;;  %v17086_v54 = vcombine.low %v1189_v11, %v1197_v12  ;;  %v16769_v12 = vcombine.high %v870_v63, %v878_v3 }
 0x27d   : > { %v16577_v22 = vcombine.high %v678_v13, %v686_v14  ;;  %v16576_v29 = vcombine.low %v678_v13, %v686_v14  ;;  %v1126_v5 = vld [vmem:[#allocation2 + $0x1228] sm:$0xff] }
 0x27e   : > { %5856 = vmatpush2.bf16.msra.mxu0 %v17182_v25  ;;  %v918_v25 = vld [vmem:[#allocation2 + $0xba8] sm:$0xff] }
 0x27f   : > { %5897 = vmatpush2.bf16.msra.mxu1 %v16672_v26  ;;  %5857 = vmatprep.subr.bf16.mxu0 %v17167_v53  ;;  %v926_v26 = vld [vmem:[#allocation2 + $0xbe8] sm:$0xff] }
 0x280   : > { %5898 = vmatprep.subr.bf16.mxu1 %v16657_v27  ;;  %v1174_v53 = vld [vmem:[#allocation2 + $0x13a8] sm:$0xff]  ;;  %v16817_v30 = vcombine.high %v918_v25, %v926_v26  ;;  %v16816_v38 = vcombine.low %v918_v25, %v926_v26  ;;  %v16768_v25 = vcombine.low %v870_v63, %v878_v3 }
 0x281   : > { %v1182_v27 = vld [vmem:[#allocation2 + $0x13e8] sm:$0xff] }
 0x282   : > { %5858 = vmatpush2.bf16.msra.mxu0 %v17166_v34  ;;  %v17073_v33 = vcombine.high %v1174_v53, %v1182_v27  ;;  %v902_v34 = vld [vmem:[#allocation2 + $0xb28] sm:$0xff]  ;;  %v17072_v39 = vcombine.low %v1174_v53, %v1182_v27 }
 0x283   : > { %5899 = vmatpush2.bf16.msra.mxu1 %v16656_v35  ;;  %5859 = vmatprep.subr.bf16.mxu0 %v17151_v36  ;;  %v910_v35 = vld [vmem:[#allocation2 + $0xb68] sm:$0xff] }
 0x284   : > { %5900 = vmatprep.subr.bf16.mxu1 %v16641_v37  ;;  %v1158_v36 = vld [vmem:[#allocation2 + $0x1328] sm:$0xff]  ;;  %v16801_v40 = vcombine.high %v902_v34, %v910_v35  ;;  %v16800_v47 = vcombine.low %v902_v34, %v910_v35 }
 0x285   : > { %v1166_v37 = vld [vmem:[#allocation2 + $0x1368] sm:$0xff] }
 0x286   : > { %5860 = vmatpush2.bf16.msra.mxu0 %v17150_v19  ;;  %v17057_v41 = vcombine.high %v1158_v36, %v1166_v37  ;;  %v886_v19 = vld [vmem:[#allocation2 + $0xaa8] sm:$0xff] }
 0x287   : > { %5901 = vmatpush2.bf16.msra.mxu1 %v16640_v43  ;;  %5861 = vmatprep.subr.bf16.mxu0 %v17135_v60  ;;  %v894_v43 = vld [vmem:[#allocation2 + $0xae8] sm:$0xff] }
 0x288   : > { %5902 = vmatprep.subr.bf16.mxu1 %v16625_v44  ;;  %v1142_v44 = vld [vmem:[#allocation2 + $0x12a8] sm:$0xff] }
 0x289   : > { %v17040_v11 = vcombine.low %v1142_v44, %v1150_v45  ;;  %v854_v14 = vld [vmem:[#allocation2 + $0x9a8] sm:$0xff] }
 0x28a   : > { %5862 = vmatpush2.bf16.msra.mxu0 %v17134_v50 }
 0x28b   : > { %5903 = vmatpush2.bf16.msra.mxu1 %v16624_v51  ;;  %5863 = vmatprep.subr.bf16.mxu0 %v17119_v52  ;;  %v17056_v51 = vcombine.low %v1158_v36, %v1166_v37  ;;  %v16785_v52 = vcombine.high %v886_v19, %v894_v43 }
 0x28c   : > { %5904 = vmatprep.subr.bf16.mxu1 %v16609_v59  ;;  %v17041_v59 = vcombine.high %v1142_v44, %v1150_v45  ;;  %v806_v45 = vld [vmem:[#allocation2 + $0x828] sm:$0xff] }
 0x28e   : > { %5864 = vmatpush2.bf16.msra.mxu0 %v17118_v6  ;;  %v1134_v6 = vld [vmem:[#allocation2 + $0x1268] sm:$0xff] }
 0x28f   : > { %5905 = vmatpush2.bf16.msra.mxu1 %v16608_v7  ;;  %5865 = vmatprep.subr.bf16.mxu0 %v17103_v8  ;;  %v16784_v7 = vcombine.low %v886_v19, %v894_v43  ;;  %v17025_v13 = vcombine.high %v1126_v5, %v1134_v6  ;;  %v17024_v26 = vcombine.low %v1126_v5, %v1134_v6  ;;  %v1046_v5 = vld [vmem:[#allocation2 + $0xfa8] sm:$0xff] }
 0x290   : > { %5906 = vmatprep.subr.bf16.mxu1 %v16593_v10  ;;  %v1054_v6 = vld [vmem:[#allocation2 + $0xfe8] sm:$0xff] }
 0x292   : > { %5866 = vmatpush2.bf16.msra.mxu0 %v17102_v15  ;;  %v862_v15 = vld [vmem:[#allocation2 + $0x9e8] sm:$0xff] }
 0x293   : > { %5907 = vmatpush2.bf16.msra.mxu1 %v16592_v18  ;;  %5867 = vmatprep.subr.bf16.mxu0 %v17087_v20  ;;  %v1110_v20 = vld [vmem:[#allocation2 + $0x11a8] sm:$0xff]  ;;  %v16753_v53 = vcombine.high %v854_v14, %v862_v15  ;;  %v16752_v34 = vcombine.low %v854_v14, %v862_v15 }
 0x294   : > { %5908 = vmatprep.subr.bf16.mxu1 %v16577_v22  ;;  %v1118_v22 = vld [vmem:[#allocation2 + $0x11e8] sm:$0xff] }
 0x295   : > { %v17009_v27 = vcombine.high %v1110_v20, %v1118_v22  ;;  %v17008_v35 = vcombine.low %v1110_v20, %v1118_v22  ;;  %v1030_v14 = vld [vmem:[#allocation2 + $0xf28] sm:$0xff]  ;;  %v16944_v22 = vcombine.low %v1046_v5, %v1054_v6 }
 0x296   : > { %5868 = vmatpush2.bf16.msra.mxu0 %v17086_v54  ;;  %v838_v54 = vld [vmem:[#allocation2 + $0x928] sm:$0xff] }
 0x297   : > { %5909 = vmatpush2.bf16.msra.mxu1 %v16576_v29  ;;  %5919 = vmatprep.subr.bf16.mxu0 %v16817_v30  ;;  %v846_v29 = vld [vmem:[#allocation2 + $0x968] sm:$0xff] }
 0x298   : > { %5960 = vmatprep.subr.bf16.mxu1 %v17073_v33  ;;  %v1094_v30 = vld [vmem:[#allocation2 + $0x1128] sm:$0xff]  ;;  %v16737_v36 = vcombine.high %v838_v54, %v846_v29  ;;  %v16736_v19 = vcombine.low %v838_v54, %v846_v29 }
 0x299   : > { %v5625_v60 = vpop.f32.mrf.mxu0  ;;  %5870 = vmatmul.mubr.bf16.vlgmr.msra.gmra.mxu0 %v19736_v32  ;;  %v1102_v33 = vld [vmem:[#allocation2 + $0x1168] sm:$0xff] }
 0x29a   : > { %v19822_v46 = vadd.f32 %v5625_v60, %v19814_v24  ;;  %5911 = vmatmul.mubr.bf16.vlgmr.msra.gmra.mxu1 %v19717_v16  ;;  %5920 = vmatpush1.bf16.msra.mxu0 %v16816_v38  ;;  %v19825_v49 = vpop.f32.mrf.mxu1  ;;  %v16993_v37 = vcombine.high %v1094_v30, %v1102_v33  ;;  %v822_v38 = vld [vmem:[#allocation2 + $0x8a8] sm:$0xff]  ;;  %v16992_v43 = vcombine.low %v1094_v30, %v1102_v33 }
 0x29b   : > { %5961 = vmatpush1.bf16.msra.mxu1 %v17072_v39  ;;  %v19827_v50 = vpop.f32.mrf.mxu0  ;;  %5921 = vmatprep.subr.bf16.mxu0 %v16801_v40  ;;  %v830_v39 = vld [vmem:[#allocation2 + $0x8e8] sm:$0xff] }
 0x29c   : > { %5962 = vmatprep.subr.bf16.mxu1 %v17057_v41  ;;  %v19829_v4 = vpop.f32.mrf.mxu1  ;;  %5951 = vmatprep.mubr.bf16.mxu0 %v19711_v61  ;;  %v1078_v40 = vld [vmem:[#allocation2 + $0x10a8] sm:$0xff]  ;;  %v16721_v60 = vcombine.high %v822_v38, %v830_v39 }
 0x29d   : > { %v5629_v24 = vpop.f32.mrf.mxu0  ;;  %5992 = vmatprep.mubr.bf16.mxu1 %v19728_v28  ;;  %v1086_v41 = vld [vmem:[#allocation2 + $0x10e8] sm:$0xff] }
 0x29e   : > { %5922 = vmatpush1.bf16.msra.mxu0 %v16800_v47  ;;  %v5670_v8 = vpop.f32.mrf.mxu1  ;;  %v16977_v44 = vcombine.high %v1078_v40, %v1086_v41  ;;  %v814_v47 = vld [vmem:[#allocation2 + $0x868] sm:$0xff]  ;;  %v16976_v63 = vcombine.low %v1078_v40, %v1086_v41 }
 0x29f   : > { %5963 = vmatpush1.bf16.msra.mxu1 %v17056_v51  ;;  %v5630_v10 = vpop.f32.mrf.mxu0  ;;  %5923 = vmatprep.subr.bf16.mxu0 %v16785_v52  ;;  %v1062_v51 = vld [vmem:[#allocation2 + $0x1028] sm:$0xff]  ;;  %v16705_v3 = vcombine.high %v806_v45, %v814_v47 }
 0x2a0   : > { %5964 = vmatprep.subr.bf16.mxu1 %v17041_v59  ;;  %v5671_v18 = vpop.f32.mrf.mxu1  ;;  %v1070_v52 = vld [vmem:[#allocation2 + $0x1068] sm:$0xff]  ;;  %v16720_v59 = vcombine.low %v822_v38, %v830_v39  ;;  %v16704_v10 = vcombine.low %v806_v45, %v814_v47 }
 0x2a1   : > { %v16961_v24 = vcombine.high %v1062_v51, %v1070_v52  ;;  %v1310_v8 = vld [vmem:[#allocation2 + $0x17e8] sm:$0xff] }
 0x2a2   : > { %5924 = vmatpush1.bf16.msra.mxu0 %v16784_v7  ;;  %v1302_v7 = vld [vmem:[#allocation2 + $0x17a8] sm:$0xff] }
 0x2a3   : > { %5965 = vmatpush1.bf16.msra.mxu1 %v17040_v11  ;;  %5925 = vmatprep.subr.bf16.mxu0 %v16769_v12  ;;  %v16960_v11 = vcombine.low %v1062_v51, %v1070_v52  ;;  %v16945_v12 = vcombine.high %v1046_v5, %v1054_v6  ;;  %v1038_v15 = vld [vmem:[#allocation2 + $0xf68] sm:$0xff] }
 0x2a4   : > { %5966 = vmatprep.subr.bf16.mxu1 %v17025_v13  ;;  %v17201_v13 = vcombine.high %v1302_v7, %v1310_v8  ;;  %v1286_v18 = vld [vmem:[#allocation2 + $0x1728] sm:$0xff]  ;;  %v16928_v33 = vcombine.low %v1030_v14, %v1038_v15 }
 0x2a5   : > { %v1294_v20 = vld [vmem:[#allocation2 + $0x1768] sm:$0xff] }
 0x2a6   : > { %5926 = vmatpush1.bf16.msra.mxu0 %v16768_v25  ;;  %v17200_v25 = vcombine.low %v1302_v7, %v1310_v8  ;;  %v1022_v54 = vld [vmem:[#allocation2 + $0xee8] sm:$0xff] }
 0x2a7   : > { %5967 = vmatpush1.bf16.msra.mxu1 %v17024_v26  ;;  %5927 = vmatprep.subr.bf16.mxu0 %v16753_v53  ;;  %v16929_v26 = vcombine.high %v1030_v14, %v1038_v15  ;;  %v17185_v53 = vcombine.high %v1286_v18, %v1294_v20  ;;  %v1270_v29 = vld [vmem:[#allocation2 + $0x16a8] sm:$0xff] }
 0x2a8   : > { %5968 = vmatprep.subr.bf16.mxu1 %v17009_v27  ;;  %v1014_v27 = vld [vmem:[#allocation2 + $0xea8] sm:$0xff] }
 0x2a9   : > { %v1278_v30 = vld [vmem:[#allocation2 + $0x16e8] sm:$0xff]  ;;  %v16912_v41 = vcombine.low %v1014_v27, %v1022_v54 }
 0x2aa   : > { %5928 = vmatpush1.bf16.msra.mxu0 %v16752_v34  ;;  %v17184_v34 = vcombine.low %v1286_v18, %v1294_v20  ;;  %v1006_v38 = vld [vmem:[#allocation2 + $0xe68] sm:$0xff] }
 0x2ab   : > { %5969 = vmatpush1.bf16.msra.mxu1 %v17008_v35  ;;  %5929 = vmatprep.subr.bf16.mxu0 %v16737_v36  ;;  %v16913_v35 = vcombine.high %v1014_v27, %v1022_v54  ;;  %v17169_v36 = vcombine.high %v1270_v29, %v1278_v30  ;;  %v1254_v39 = vld [vmem:[#allocation2 + $0x1628] sm:$0xff] }
 0x2ac   : > { %5970 = vmatprep.subr.bf16.mxu1 %v16993_v37  ;;  %v998_v37 = vld [vmem:[#allocation2 + $0xe28] sm:$0xff] }
 0x2ad   : > { %v1262_v40 = vld [vmem:[#allocation2 + $0x1668] sm:$0xff]  ;;  %v16896_v52 = vcombine.low %v998_v37, %v1006_v38 }
 0x2ae   : > { %5930 = vmatpush1.bf16.msra.mxu0 %v16736_v19  ;;  %v17168_v19 = vcombine.low %v1270_v29, %v1278_v30  ;;  %v990_v45 = vld [vmem:[#allocation2 + $0xde8] sm:$0xff] }
 0x2af   : > { %5971 = vmatpush1.bf16.msra.mxu1 %v16992_v43  ;;  %5931 = vmatprep.subr.bf16.mxu0 %v16721_v60  ;;  %v16897_v43 = vcombine.high %v998_v37, %v1006_v38  ;;  %v17153_v60 = vcombine.high %v1254_v39, %v1262_v40  ;;  %v1238_v47 = vld [vmem:[#allocation2 + $0x15a8] sm:$0xff]  ;;  %v663_v37 = vld [vmem:[#allocation2 + $0x3b0] sm:$0xff] }
 0x2b0   : > { %5972 = vmatprep.subr.bf16.mxu1 %v16977_v44  ;;  %v982_v44 = vld [vmem:[#allocation2 + $0xda8] sm:$0xff]  ;;  %v671_v38 = vld [vmem:[#allocation2 + $0x3f0] sm:$0xff] }
 0x2b1   : > { %v1246_v51 = vld [vmem:[#allocation2 + $0x15e8] sm:$0xff]  ;;  %v16880_v8 = vcombine.low %v982_v44, %v990_v45 }
 0x2b2   : > { %5932 = vmatpush1.bf16.msra.mxu0 %v16720_v59  ;;  %v17152_v59 = vcombine.low %v1254_v39, %v1262_v40  ;;  %v974_v5 = vld [vmem:[#allocation2 + $0xd68] sm:$0xff]  ;;  %v919_v39 = vld [vmem:[#allocation2 + $0xbb0] sm:$0xff] }
 0x2b3   : > { %5973 = vmatpush1.bf16.msra.mxu1 %v16976_v63  ;;  %5933 = vmatprep.subr.bf16.mxu0 %v16705_v3  ;;  %v16881_v63 = vcombine.high %v982_v44, %v990_v45  ;;  %v17137_v3 = vcombine.high %v1238_v47, %v1246_v51  ;;  %v1222_v6 = vld [vmem:[#allocation2 + $0x1528] sm:$0xff]  ;;  %v927_v40 = vld [vmem:[#allocation2 + $0xbf0] sm:$0xff] }
 0x2b4   : > { %5974 = vmatprep.subr.bf16.mxu1 %v16961_v24  ;;  %v966_v24 = vld [vmem:[#allocation2 + $0xd28] sm:$0xff]  ;;  %v16819_v44 = vcombine.high %v919_v39, %v927_v40  ;;  %v647_v45 = vld [vmem:[#allocation2 + $0x330] sm:$0xff] }
 0x2b5   : > { %v1230_v7 = vld [vmem:[#allocation2 + $0x1568] sm:$0xff]  ;;  %v16864_v20 = vcombine.low %v966_v24, %v974_v5 }
 0x2b6   : > { %5934 = vmatpush1.bf16.msra.mxu0 %v16704_v10  ;;  %v17136_v10 = vcombine.low %v1238_v47, %v1246_v51  ;;  %v958_v14 = vld [vmem:[#allocation2 + $0xce8] sm:$0xff]  ;;  %v655_v47 = vld [vmem:[#allocation2 + $0x370] sm:$0xff] }
 0x2b7   : > { %5975 = vmatpush1.bf16.msra.mxu1 %v16960_v11  ;;  %5935 = vmatprep.subr.bf16.mxu0 %v16945_v12  ;;  %v16865_v11 = vcombine.high %v966_v24, %v974_v5  ;;  %v17121_v12 = vcombine.high %v1222_v6, %v1230_v7  ;;  %v1206_v15 = vld [vmem:[#allocation2 + $0x14a8] sm:$0xff]  ;;  %v903_v51 = vld [vmem:[#allocation2 + $0xb30] sm:$0xff]  ;;  %v16547_v24 = vcombine.high %v647_v45, %v655_v47 }
 0x2b8   : > { %5976 = vmatprep.subr.bf16.mxu1 %v17201_v13  ;;  %v950_v13 = vld [vmem:[#allocation2 + $0xca8] sm:$0xff] }
 0x2b9   : > { %v1214_v18 = vld [vmem:[#allocation2 + $0x14e8] sm:$0xff]  ;;  %v16848_v30 = vcombine.low %v950_v13, %v958_v14 }
 0x2ba   : > { %5936 = vmatpush2.bf16.msra.mxu0 %v16944_v22  ;;  %v17120_v22 = vcombine.low %v1222_v6, %v1230_v7  ;;  %v942_v27 = vld [vmem:[#allocation2 + $0xc68] sm:$0xff]  ;;  %v631_v6 = vld [vmem:[#allocation2 + $0x2b0] sm:$0xff] }
 0x2bb   : > { %5977 = vmatpush2.bf16.msra.mxu1 %v17200_v25  ;;  %5937 = vmatprep.subr.bf16.mxu0 %v16929_v26  ;;  %v16849_v25 = vcombine.high %v950_v13, %v958_v14  ;;  %v17105_v26 = vcombine.high %v1206_v15, %v1214_v18  ;;  %v1190_v54 = vld [vmem:[#allocation2 + $0x1428] sm:$0xff]  ;;  %v639_v7 = vld [vmem:[#allocation2 + $0x2f0] sm:$0xff]  ;;  %v16546_v13 = vcombine.low %v647_v45, %v655_v47 }
 0x2bc   : > { %5978 = vmatprep.subr.bf16.mxu1 %v17185_v53  ;;  %v934_v53 = vld [vmem:[#allocation2 + $0xc28] sm:$0xff] }
 0x2bd   : > { %v1198_v29 = vld [vmem:[#allocation2 + $0x1468] sm:$0xff] }
 0x2be   : > { %5938 = vmatpush2.bf16.msra.mxu0 %v16928_v33  ;;  %v19834_v33 = vsub.s32 6, %v19746_v42 }
 0x2bf   : > { %5979 = vmatpush2.bf16.msra.mxu1 %v17184_v34  ;;  %5939 = vmatprep.subr.bf16.mxu0 %v16913_v35  ;;  %v17104_v34 = vcombine.low %v1206_v15, %v1214_v18  ;;  %v16833_v35 = vcombine.high %v934_v53, %v942_v27  ;;  %v16531_v18 = vcombine.high %v631_v6, %v639_v7 }
 0x2c0   : > { %5980 = vmatprep.subr.bf16.mxu1 %v17169_v36  ;;  %v17089_v36 = vcombine.high %v1190_v54, %v1198_v29 }
 0x2c2   : > { %5940 = vmatpush2.bf16.msra.mxu0 %v16912_v41  ;;  %v1349_v41 = vrot.slane %v19748_v55, %v19834_v33 }
 0x2c3   : > { %5981 = vmatpush2.bf16.msra.mxu1 %v17168_v19  ;;  %5941 = vmatprep.subr.bf16.mxu0 %v16897_v43  ;;  %v16832_v19 = vcombine.low %v934_v53, %v942_v27  ;;  %v17088_v43 = vcombine.low %v1190_v54, %v1198_v29  ;;  %v623_v53 = vld [vmem:[#allocation2 + $0x270] sm:$0xff] }
 0x2c4   : > { %5982 = vmatprep.subr.bf16.mxu1 %v17153_v60  ;;  %v16563_v60 = vcombine.high %v663_v37, %v671_v38  ;;  %v871_v54 = vld [vmem:[#allocation2 + $0xa30] sm:$0xff] }
 0x2c5   : > { %v879_v29 = vld [vmem:[#allocation2 + $0xa70] sm:$0xff] }
 0x2c6   : > { %5942 = vmatpush2.bf16.msra.mxu0 %v16896_v52  ;;  %v911_v52 = vld [vmem:[#allocation2 + $0xb70] sm:$0xff] }
 0x2c7   : > { %5983 = vmatpush2.bf16.msra.mxu1 %v17152_v59  ;;  %5943 = vmatprep.subr.bf16.mxu0 %v16881_v63  ;;  %v5667_v59 = vadd.f32 %v19825_v49, %v1349_v41  ;;  %v16562_v63 = vcombine.low %v663_v37, %v671_v38  ;;  %v16803_v5 = vcombine.high %v903_v51, %v911_v52 }
 0x2c8   : > { %5984 = vmatprep.subr.bf16.mxu1 %v17137_v3  ;;  %v16818_v3 = vcombine.low %v919_v39, %v927_v40  ;;  %v16802_v15 = vcombine.low %v903_v51, %v911_v52  ;;  %v16771_v38 = vcombine.high %v871_v54, %v879_v29  ;;  %v599_v39 = vld [vmem:[#allocation2 + $0x1b0] sm:$0xff] }
 0x2c9   : > { %v607_v40 = vld [vmem:[#allocation2 + $0x1f0] sm:$0xff] }
 0x2ca   : > { %5944 = vmatpush2.bf16.msra.mxu0 %v16880_v8  ;;  %v16499_v45 = vcombine.high %v599_v39, %v607_v40  ;;  %v583_v51 = vld [vmem:[#allocation2 + $0x130] sm:$0xff] }
 0x2cb   : > { %5985 = vmatpush2.bf16.msra.mxu1 %v17136_v10  ;;  %5945 = vmatprep.subr.bf16.mxu0 %v16865_v11  ;;  %v887_v10 = vld [vmem:[#allocation2 + $0xab0] sm:$0xff] }
 0x2cc   : > { %5986 = vmatprep.subr.bf16.mxu1 %v17121_v12  ;;  %v895_v11 = vld [vmem:[#allocation2 + $0xaf0] sm:$0xff] }
 0x2cd   : > { %v591_v52 = vld [vmem:[#allocation2 + $0x170] sm:$0xff] }
 0x2ce   : > { %5946 = vmatpush2.bf16.msra.mxu0 %v16864_v20 }
 0x2cf   : > { %5987 = vmatpush2.bf16.msra.mxu1 %v17120_v22  ;;  %5947 = vmatprep.subr.bf16.mxu0 %v16849_v25  ;;  %v16787_v25 = vcombine.high %v887_v10, %v895_v11 }
 0x2d0   : > { %5988 = vmatprep.subr.bf16.mxu1 %v17105_v26  ;;  %v615_v26 = vld [vmem:[#allocation2 + $0x230] sm:$0xff] }
 0x2d1   : > { %v16515_v37 = vcombine.high %v615_v26, %v623_v53 }
 0x2d2   : > { %5948 = vmatpush2.bf16.msra.mxu0 %v16848_v30  ;;  %v16530_v30 = vcombine.low %v631_v6, %v639_v7  ;;  %v567_v7 = vld [vmem:[#allocation2 + $0xb0] sm:$0xff] }
 0x2d3   : > { %5989 = vmatpush2.bf16.msra.mxu1 %v17104_v34  ;;  %5949 = vmatprep.subr.bf16.mxu0 %v16833_v35 }
 0x2d4   : > { %5990 = vmatprep.subr.bf16.mxu1 %v17089_v36  ;;  %v16786_v36 = vcombine.low %v887_v10, %v895_v11  ;;  %v823_v10 = vld [vmem:[#allocation2 + $0x8b0] sm:$0xff] }
 0x2d5   : > { %v831_v11 = vld [vmem:[#allocation2 + $0x8f0] sm:$0xff] }
 0x2d6   : > { %5950 = vmatpush2.bf16.msra.mxu0 %v16832_v19  ;;  %v855_v19 = vld [vmem:[#allocation2 + $0x9b0] sm:$0xff] }
 0x2d7   : > { %5991 = vmatpush2.bf16.msra.mxu1 %v17088_v43  ;;  %6001 = vmatprep.subr.bf16.mxu0 %v16563_v60  ;;  %v863_v43 = vld [vmem:[#allocation2 + $0x9f0] sm:$0xff]  ;;  %v16514_v60 = vcombine.low %v615_v26, %v623_v53 }
 0x2d8   : > { %6042 = vmatprep.subr.bf16.mxu1 %v16819_v44  ;;  %v16770_v44 = vcombine.low %v871_v54, %v879_v29  ;;  %v16755_v47 = vcombine.high %v855_v19, %v863_v43  ;;  %v807_v26 = vld [vmem:[#allocation2 + $0x830] sm:$0xff]  ;;  %v16722_v54 = vcombine.low %v823_v10, %v831_v11 }
 0x2d9   : > { %v5707_v8 = vpop.f32.mrf.mxu0  ;;  %5952 = vmatmul.mubr.bf16.vlgmr.msra.gmra.mxu0 %v19724_v21  ;;  %v815_v53 = vld [vmem:[#allocation2 + $0x870] sm:$0xff] }
 0x2da   : > { %v5708_v12 = vadd.f32 %v5707_v8, %v5667_v59  ;;  %5993 = vmatmul.mubr.bf16.vlgmr.msra.gmra.mxu1 %v19736_v32  ;;  %6002 = vmatpush1.bf16.msra.mxu0 %v16562_v63  ;;  %v5748_v49 = vpop.f32.mrf.mxu1  ;;  %v839_v59 = vld [vmem:[#allocation2 + $0x930] sm:$0xff] }
 0x2db   : > { %6043 = vmatpush1.bf16.msra.mxu1 %v16818_v3  ;;  %v19841_v14 = vpop.f32.mrf.mxu0  ;;  %6003 = vmatprep.subr.bf16.mxu0 %v16547_v24  ;;  %v847_v63 = vld [vmem:[#allocation2 + $0x970] sm:$0xff]  ;;  %v16498_v3 = vcombine.low %v599_v39, %v607_v40  ;;  %v16754_v24 = vcombine.low %v855_v19, %v863_v43  ;;  %v16706_v39 = vcombine.low %v807_v26, %v815_v53 }
 0x2dc   : > { %v19843_v20 = vadd.f32 %v5748_v49, %v5708_v12  ;;  %v19845_v22 = vpop.f32.mrf.mxu1  ;;  %6044 = vmatprep.subr.bf16.mxu1 %v16803_v5  ;;  %6033 = vmatprep.mubr.bf16.mxu0 %v19707_v58  ;;  %v16483_v5 = vcombine.high %v583_v51, %v591_v52  ;;  %v16739_v6 = vcombine.high %v839_v59, %v847_v63  ;;  %v575_v8 = vld [vmem:[#allocation2 + $0xf0] sm:$0xff] }
 0x2dd   : > { %v5711_v27 = vpop.f32.mrf.mxu0  ;;  %6074 = vmatprep.mubr.bf16.mxu1 %v19711_v61  ;;  %v16482_v12 = vcombine.low %v583_v51, %v591_v52  ;;  %v16738_v49 = vcombine.low %v839_v59, %v847_v63  ;;  %v775_v19 = vld [vmem:[#allocation2 + $0x730] sm:$0xff] }
 0x2de   : > { %6004 = vmatpush1.bf16.msra.mxu0 %v16546_v13  ;;  %v5752_v34 = vpop.f32.mrf.mxu1  ;;  %v16467_v13 = vcombine.high %v567_v7, %v575_v8  ;;  %v16466_v27 = vcombine.low %v567_v7, %v575_v8  ;;  %v783_v43 = vld [vmem:[#allocation2 + $0x770] sm:$0xff] }
 0x2df   : > { %6045 = vmatpush1.bf16.msra.mxu1 %v16802_v15  ;;  %v5712_v35 = vpop.f32.mrf.mxu0  ;;  %6005 = vmatprep.subr.bf16.mxu0 %v16531_v18  ;;  %v16723_v15 = vcombine.high %v823_v10, %v831_v11  ;;  %v551_v18 = vld [vmem:[#allocation2 + $0x30] sm:$0xff]  ;;  %v16675_v51 = vcombine.high %v775_v19, %v783_v43 }
 0x2e0   : > { %6046 = vmatprep.subr.bf16.mxu1 %v16787_v25  ;;  %v5753_v41 = vpop.f32.mrf.mxu1  ;;  %v559_v25 = vld [vmem:[#allocation2 + $0x70] sm:$0xff] }
 0x2e1   : > { %v16451_v29 = vcombine.high %v551_v18, %v559_v25  ;;  %v791_v34 = vld [vmem:[#allocation2 + $0x7b0] sm:$0xff] }
 0x2e2   : > { %6006 = vmatpush1.bf16.msra.mxu0 %v16530_v30  ;;  %v16707_v30 = vcombine.high %v807_v26, %v815_v53  ;;  %v799_v35 = vld [vmem:[#allocation2 + $0x7f0] sm:$0xff] }
 0x2e3   : > { %6047 = vmatpush1.bf16.msra.mxu1 %v16786_v36  ;;  %6007 = vmatprep.subr.bf16.mxu0 %v16515_v37  ;;  %v1047_v36 = vld [vmem:[#allocation2 + $0xfb0] sm:$0xff]  ;;  %v16691_v40 = vcombine.high %v791_v34, %v799_v35 }
 0x2e4   : > { %6048 = vmatprep.subr.bf16.mxu1 %v16771_v38  ;;  %v1055_v37 = vld [vmem:[#allocation2 + $0xff0] sm:$0xff]  ;;  %v16450_v38 = vcombine.low %v551_v18, %v559_v25 }
 0x2e5   : > { %v16947_v41 = vcombine.high %v1047_v36, %v1055_v37  ;;  %v759_v59 = vld [vmem:[#allocation2 + $0x6b0] sm:$0xff] }
 0x2e6   : > { %6008 = vmatpush1.bf16.msra.mxu0 %v16514_v60  ;;  %v1031_v60 = vld [vmem:[#allocation2 + $0xf30] sm:$0xff] }
 0x2e7   : > { %6049 = vmatpush1.bf16.msra.mxu1 %v16770_v44  ;;  %6009 = vmatprep.subr.bf16.mxu0 %v16499_v45  ;;  %v1039_v44 = vld [vmem:[#allocation2 + $0xf70] sm:$0xff]  ;;  %v16690_v45 = vcombine.low %v791_v34, %v799_v35 }
 0x2e8   : > { %6050 = vmatprep.subr.bf16.mxu1 %v16755_v47  ;;  %v16946_v47 = vcombine.low %v1047_v36, %v1055_v37  ;;  %v16931_v52 = vcombine.high %v1031_v60, %v1039_v44  ;;  %v767_v63 = vld [vmem:[#allocation2 + $0x6f0] sm:$0xff] }
 0x2e9   : > { %v16659_v7 = vcombine.high %v759_v59, %v767_v63  ;;  %v743_v10 = vld [vmem:[#allocation2 + $0x630] sm:$0xff] }
 0x2ea   : > { %6010 = vmatpush1.bf16.msra.mxu0 %v16498_v3  ;;  %v1015_v3 = vld [vmem:[#allocation2 + $0xeb0] sm:$0xff] }
 0x2eb   : > { %6051 = vmatpush1.bf16.msra.mxu1 %v16754_v24  ;;  %6011 = vmatprep.subr.bf16.mxu0 %v16483_v5  ;;  %v1023_v24 = vld [vmem:[#allocation2 + $0xef0] sm:$0xff]  ;;  %v16674_v5 = vcombine.low %v775_v19, %v783_v43 }
 0x2ec   : > { %6052 = vmatprep.subr.bf16.mxu1 %v16739_v6  ;;  %v16930_v6 = vcombine.low %v1031_v60, %v1039_v44  ;;  %v16915_v8 = vcombine.high %v1015_v3, %v1023_v24  ;;  %v751_v11 = vld [vmem:[#allocation2 + $0x670] sm:$0xff] }
 0x2ed   : > { %v16643_v18 = vcombine.high %v743_v10, %v751_v11  ;;  %v727_v26 = vld [vmem:[#allocation2 + $0x5b0] sm:$0xff] }
 0x2ee   : > { %6012 = vmatpush1.bf16.msra.mxu0 %v16482_v12  ;;  %v999_v12 = vld [vmem:[#allocation2 + $0xe30] sm:$0xff] }
 0x2ef   : > { %6053 = vmatpush1.bf16.msra.mxu1 %v16738_v49  ;;  %6013 = vmatprep.subr.bf16.mxu0 %v16467_v13  ;;  %v1007_v49 = vld [vmem:[#allocation2 + $0xe70] sm:$0xff]  ;;  %v16658_v13 = vcombine.low %v759_v59, %v767_v63 }
 0x2f0   : > { %6054 = vmatprep.subr.bf16.mxu1 %v16723_v15  ;;  %v16914_v15 = vcombine.low %v1015_v3, %v1023_v24  ;;  %v16899_v25 = vcombine.high %v999_v12, %v1007_v49  ;;  %v735_v53 = vld [vmem:[#allocation2 + $0x5f0] sm:$0xff] }
 0x2f1   : > { %v16627_v34 = vcombine.high %v727_v26, %v735_v53  ;;  %v711_v36 = vld [vmem:[#allocation2 + $0x530] sm:$0xff] }
 0x2f2   : > { %6014 = vmatpush1.bf16.msra.mxu0 %v16466_v27  ;;  %v983_v27 = vld [vmem:[#allocation2 + $0xdb0] sm:$0xff] }
 0x2f3   : > { %6055 = vmatpush1.bf16.msra.mxu1 %v16722_v54  ;;  %6015 = vmatprep.subr.bf16.mxu0 %v16451_v29  ;;  %v991_v54 = vld [vmem:[#allocation2 + $0xdf0] sm:$0xff]  ;;  %v16642_v29 = vcombine.low %v743_v10, %v751_v11 }
 0x2f4   : > { %6056 = vmatprep.subr.bf16.mxu1 %v16707_v30  ;;  %v16898_v30 = vcombine.low %v999_v12, %v1007_v49  ;;  %v16883_v35 = vcombine.high %v983_v27, %v991_v54  ;;  %v719_v37 = vld [vmem:[#allocation2 + $0x570] sm:$0xff] }
 0x2f5   : > { %v16611_v19 = vcombine.high %v711_v36, %v719_v37  ;;  %v695_v60 = vld [vmem:[#allocation2 + $0x4b0] sm:$0xff] }
 0x2f6   : > { %6016 = vmatpush1.bf16.msra.mxu0 %v16450_v38  ;;  %v967_v38 = vld [vmem:[#allocation2 + $0xd30] sm:$0xff] }
 0x2f7   : > { %6057 = vmatpush1.bf16.msra.mxu1 %v16706_v39  ;;  %6017 = vmatprep.subr.bf16.mxu0 %v16691_v40  ;;  %v975_v39 = vld [vmem:[#allocation2 + $0xd70] sm:$0xff]  ;;  %v16626_v40 = vcombine.low %v727_v26, %v735_v53 }
 0x2f8   : > { %6058 = vmatprep.subr.bf16.mxu1 %v16947_v41  ;;  %v16882_v41 = vcombine.low %v983_v27, %v991_v54  ;;  %v16867_v43 = vcombine.high %v967_v38, %v975_v39  ;;  %v703_v44 = vld [vmem:[#allocation2 + $0x4f0] sm:$0xff] }
 0x2f9   : > { %v16595_v59 = vcombine.high %v695_v60, %v703_v44  ;;  %v679_v3 = vld [vmem:[#allocation2 + $0x430] sm:$0xff] }
 0x2fa   : > { %6018 = vmatpush2.bf16.msra.mxu0 %v16690_v45  ;;  %v951_v45 = vld [vmem:[#allocation2 + $0xcb0] sm:$0xff] }
 0x2fb   : > { %6059 = vmatpush2.bf16.msra.mxu1 %v16946_v47  ;;  %6019 = vmatprep.subr.bf16.mxu0 %v16675_v51  ;;  %v959_v47 = vld [vmem:[#allocation2 + $0xcf0] sm:$0xff]  ;;  %v16610_v51 = vcombine.low %v711_v36, %v719_v37  ;;  %v656_v36 = vld [vmem:[#allocation2 + $0x378] sm:$0xff] }
 0x2fc   : > { %6060 = vmatprep.subr.bf16.mxu1 %v16931_v52  ;;  %v16866_v52 = vcombine.low %v967_v38, %v975_v39  ;;  %v16851_v63 = vcombine.high %v951_v45, %v959_v47  ;;  %v687_v24 = vld [vmem:[#allocation2 + $0x470] sm:$0xff] }
 0x2fd   : > { %v16579_v10 = vcombine.high %v679_v3, %v687_v24  ;;  %v1317_v11 = vld [vmem:[#allocation14 + $0x40] ss:$8 sm:$0xf]  ;;  %v16578_v26 = vcombine.low %v679_v3, %v687_v24 }
 0x2fe   : > { %6020 = vmatpush2.bf16.msra.mxu0 %v16674_v5  ;;  %v935_v5 = vld [vmem:[#allocation2 + $0xc30] sm:$0xff] }
 0x2ff   : > { %6061 = vmatpush2.bf16.msra.mxu1 %v16930_v6  ;;  %6021 = vmatprep.subr.bf16.mxu0 %v16659_v7  ;;  %v943_v6 = vld [vmem:[#allocation2 + $0xc70] sm:$0xff]  ;;  %v16594_v7 = vcombine.low %v695_v60, %v703_v44 }
 0x300   : > { %6062 = vmatprep.subr.bf16.mxu1 %v16915_v8  ;;  %v16850_v8 = vcombine.low %v951_v45, %v959_v47  ;;  %v1318_v12 = vld [vmem:[#allocation14 + $0x40] ss:$8 sm:$0xf0]  ;;  %v16835_v49 = vcombine.high %v935_v5, %v943_v6  ;;  %v16834_v27 = vcombine.low %v935_v5, %v943_v6 }
 0x301   : > { %v19849_v53 = vor.u32 %v1318_v12, %v1317_v11  ;;  %v1151_v60 = vld [vmem:[#allocation2 + $0x12f0] sm:$0xff]  ;;  %v632_v45 = vld [vmem:[#allocation2 + $0x2b8] sm:$0xff] }
 0x302   : > { %6022 = vmatpush2.bf16.msra.mxu0 %v16658_v13  ;;  %v1175_v13 = vld [vmem:[#allocation2 + $0x13b0] sm:$0xff]  ;;  %v640_v47 = vld [vmem:[#allocation2 + $0x2f8] sm:$0xff] }
 0x303   : > { %6063 = vmatpush2.bf16.msra.mxu1 %v16914_v15  ;;  %6023 = vmatprep.subr.bf16.mxu0 %v16643_v18  ;;  %v1183_v15 = vld [vmem:[#allocation2 + $0x13f0] sm:$0xff]  ;;  %v664_v18 = vld [vmem:[#allocation2 + $0x3b8] sm:$0xff]  ;;  %v1357_v37 = vrot.slane %v19849_v53, %v19751_v56 }
 0x304   : > { %6064 = vmatprep.subr.bf16.mxu1 %v16899_v25  ;;  %v672_v25 = vld [vmem:[#allocation2 + $0x3f8] sm:$0xff]  ;;  %v17075_v54 = vcombine.high %v1175_v13, %v1183_v15  ;;  %v17074_v38 = vcombine.low %v1175_v13, %v1183_v15  ;;  %v1135_v11 = vld [vmem:[#allocation2 + $0x1270] sm:$0xff] }
 0x305   : > { %v16564_v39 = vcombine.low %v664_v18, %v672_v25  ;;  %v624_v13 = vld [vmem:[#allocation2 + $0x278] sm:$0xff] }
 0x306   : > { %6024 = vmatpush2.bf16.msra.mxu0 %v16642_v29  ;;  %v16565_v29 = vcombine.high %v664_v18, %v672_v25 }
 0x307   : > { %6065 = vmatpush2.bf16.msra.mxu1 %v16898_v30  ;;  %6025 = vmatprep.subr.bf16.mxu0 %v16627_v34  ;;  %v1159_v30 = vld [vmem:[#allocation2 + $0x1330] sm:$0xff] }
 0x308   : > { %6066 = vmatprep.subr.bf16.mxu1 %v16883_v35  ;;  %v1167_v34 = vld [vmem:[#allocation2 + $0x1370] sm:$0xff]  ;;  %v648_v35 = vld [vmem:[#allocation2 + $0x338] sm:$0xff] }
 0x309   : > { %v16548_v3 = vcombine.low %v648_v35, %v656_v36 }
 0x30a   : > { %6026 = vmatpush2.bf16.msra.mxu0 %v16626_v40  ;;  %v17059_v40 = vcombine.high %v1159_v30, %v1167_v34 }
 0x30b   : > { %6067 = vmatpush2.bf16.msra.mxu1 %v16882_v41  ;;  %6027 = vmatprep.subr.bf16.mxu0 %v16611_v19  ;;  %v1361_v41 = vrot.slane %v19849_v53, %v19754_v62  ;;  %v16549_v19 = vcombine.high %v648_v35, %v656_v36  ;;  %v600_v36 = vld [vmem:[#allocation2 + $0x1b8] sm:$0xff] }
 0x30c   : > { %6068 = vmatprep.subr.bf16.mxu1 %v16867_v43  ;;  %v1143_v43 = vld [vmem:[#allocation2 + $0x12b0] sm:$0xff] }
 0x30d   : > { %v17043_v24 = vcombine.high %v1143_v43, %v1151_v60  ;;  %v17042_v18 = vcombine.low %v1143_v43, %v1151_v60  ;;  %v584_v43 = vld [vmem:[#allocation2 + $0x138] sm:$0xff] }
 0x30e   : > { %6028 = vmatpush2.bf16.msra.mxu0 %v16610_v51  ;;  %v592_v60 = vld [vmem:[#allocation2 + $0x178] sm:$0xff] }
 0x30f   : > { %6069 = vmatpush2.bf16.msra.mxu1 %v16866_v52  ;;  %6029 = vmatprep.subr.bf16.mxu0 %v16595_v59  ;;  %v17058_v59 = vcombine.low %v1159_v30, %v1167_v34  ;;  %v1111_v30 = vld [vmem:[#allocation2 + $0x11b0] sm:$0xff] }
 0x310   : > { %6070 = vmatprep.subr.bf16.mxu1 %v16851_v63  ;;  %v1119_v34 = vld [vmem:[#allocation2 + $0x11f0] sm:$0xff] }
 0x312   : > { %6030 = vmatpush2.bf16.msra.mxu0 %v16594_v7 }
 0x313   : > { %6071 = vmatpush2.bf16.msra.mxu1 %v16850_v8  ;;  %6031 = vmatprep.subr.bf16.mxu0 %v16579_v10  ;;  %v16533_v8 = vcombine.high %v632_v45, %v640_v47  ;;  %v1127_v10 = vld [vmem:[#allocation2 + $0x1230] sm:$0xff] }
 0x314   : > { %6072 = vmatprep.subr.bf16.mxu1 %v16835_v49  ;;  %v616_v49 = vld [vmem:[#allocation2 + $0x238] sm:$0xff] }
 0x316   : > { %6032 = vmatpush2.bf16.msra.mxu0 %v16578_v26 }
 0x317   : > { %6073 = vmatpush2.bf16.msra.mxu1 %v16834_v27  ;;  %6083 = vmatprep.subr.bf16.mxu0 %v17075_v54  ;;  %v16532_v27 = vcombine.low %v632_v45, %v640_v47  ;;  %v17027_v54 = vcombine.high %v1127_v10, %v1135_v11 }
 0x318   : > { %6124 = vmatprep.subr.bf16.mxu1 %v16565_v29  ;;  %v16517_v29 = vcombine.high %v616_v49, %v624_v13 }
 0x319   : > { %v5789_v44 = vpop.f32.mrf.mxu0  ;;  %6034 = vmatmul.mubr.bf16.vlgmr.msra.gmra.mxu0 %v19717_v16 }
 0x31a   : > { %v5790_v51 = vadd.f32 %v5789_v44, %v1357_v37  ;;  %6075 = vmatmul.mubr.bf16.vlgmr.msra.gmra.mxu1 %v19724_v21  ;;  %6084 = vmatpush1.bf16.msra.mxu0 %v17074_v38  ;;  %v5830_v52 = vpop.f32.mrf.mxu1  ;;  %v608_v37 = vld [vmem:[#allocation2 + $0x1f8] sm:$0xff]  ;;  %v17026_v38 = vcombine.low %v1127_v10, %v1135_v11  ;;  %v17010_v44 = vcombine.low %v1111_v30, %v1119_v34  ;;  %v1063_v10 = vld [vmem:[#allocation2 + $0x1030] sm:$0xff] }
 0x31b   : > { %6125 = vmatpush1.bf16.msra.mxu1 %v16564_v39  ;;  %v5791_v63 = vpop.f32.mrf.mxu0  ;;  %6085 = vmatprep.subr.bf16.mxu0 %v17059_v40  ;;  %v17011_v39 = vcombine.high %v1111_v30, %v1119_v34  ;;  %v16501_v40 = vcombine.high %v600_v36, %v608_v37  ;;  %v16500_v45 = vcombine.low %v600_v36, %v608_v37  ;;  %v1071_v11 = vld [vmem:[#allocation2 + $0x1070] sm:$0xff]  ;;  %v800_v30 = vld [vmem:[#allocation2 + $0x7f8] sm:$0xff] }
 0x31c   : > { %v5792_v5 = vadd.f32 %v5791_v63, %v1361_v41  ;;  %v19857_v6 = vadd.f32 %v5830_v52, %v5790_v51  ;;  %v5832_v7 = vpop.f32.mrf.mxu1  ;;  %6126 = vmatprep.subr.bf16.mxu1 %v16549_v19  ;;  %6115 = vmatprep.mubr.bf16.mxu0 %v19728_v28  ;;  %v1095_v41 = vld [vmem:[#allocation2 + $0x1130] sm:$0xff]  ;;  %v16485_v51 = vcombine.high %v584_v43, %v592_v60  ;;  %v568_v63 = vld [vmem:[#allocation2 + $0xb8] sm:$0xff] }
 0x31d   : > { %v5793_v12 = vpop.f32.mrf.mxu0  ;;  %6156 = vmatprep.mubr.bf16.mxu1 %v19707_v58  ;;  %v16516_v58 = vcombine.low %v616_v49, %v624_v13  ;;  %v1103_v19 = vld [vmem:[#allocation2 + $0x1170] sm:$0xff]  ;;  %v560_v49 = vld [vmem:[#allocation2 + $0x78] sm:$0xff]  ;;  %v16962_v34 = vcombine.low %v1063_v10, %v1071_v11 }
 0x31e   : > { %v19861_v15 = vadd.f32 %v5832_v7, %v5792_v5  ;;  %6086 = vmatpush1.bf16.msra.mxu0 %v17058_v59  ;;  %v5834_v25 = vpop.f32.mrf.mxu1  ;;  %v16995_v47 = vcombine.high %v1095_v41, %v1103_v19  ;;  %v1079_v52 = vld [vmem:[#allocation2 + $0x10b0] sm:$0xff]  ;;  %v16484_v5 = vcombine.low %v584_v43, %v592_v60  ;;  %v552_v12 = vld [vmem:[#allocation2 + $0x38] sm:$0xff] }
 0x31f   : > { %6127 = vmatpush1.bf16.msra.mxu1 %v16548_v3  ;;  %v5794_v26 = vpop.f32.mrf.mxu0  ;;  %6087 = vmatprep.subr.bf16.mxu0 %v17043_v24  ;;  %v1087_v59 = vld [vmem:[#allocation2 + $0x10f0] sm:$0xff]  ;;  %v576_v3 = vld [vmem:[#allocation2 + $0xf8] sm:$0xff]  ;;  %v16994_v24 = vcombine.low %v1095_v41, %v1103_v19  ;;  %v16963_v25 = vcombine.high %v1063_v10, %v1071_v11 }
 0x320   : > { %6128 = vmatprep.subr.bf16.mxu1 %v16533_v8  ;;  %v5835_v35 = vpop.f32.mrf.mxu1  ;;  %v16979_v7 = vcombine.high %v1079_v52, %v1087_v59  ;;  %v16469_v8 = vcombine.high %v568_v63, %v576_v3  ;;  %v16978_v13 = vcombine.low %v1079_v52, %v1087_v59  ;;  %v16453_v26 = vcombine.high %v552_v12, %v560_v49 }
 0x321   : > { %v16452_v35 = vcombine.low %v552_v12, %v560_v49 }
 0x322   : > { %6088 = vmatpush1.bf16.msra.mxu0 %v17042_v18  ;;  %v16468_v18 = vcombine.low %v568_v63, %v576_v3 }
 0x323   : > { %6129 = vmatpush1.bf16.msra.mxu1 %v16532_v27  ;;  %6089 = vmatprep.subr.bf16.mxu0 %v17027_v54  ;;  %v1303_v27 = vld [vmem:[#allocation2 + $0x17b0] sm:$0xff] }
 0x324   : > { %6130 = vmatprep.subr.bf16.mxu1 %v16517_v29  ;;  %v1311_v54 = vld [vmem:[#allocation2 + $0x17f0] sm:$0xff]  ;;  %v792_v29 = vld [vmem:[#allocation2 + $0x7b8] sm:$0xff] }
 0x325   : > { %v17203_v36 = vcombine.high %v1303_v27, %v1311_v54  ;;  %v16693_v37 = vcombine.high %v792_v29, %v800_v30  ;;  %v17202_v41 = vcombine.low %v1303_v27, %v1311_v54  ;;  %v16692_v19 = vcombine.low %v792_v29, %v800_v30 }
 0x326   : > { %6090 = vmatpush1.bf16.msra.mxu0 %v17026_v38  ;;  %v1287_v38 = vld [vmem:[#allocation2 + $0x1730] sm:$0xff] }
 0x327   : > { %6131 = vmatpush1.bf16.msra.mxu1 %v16516_v58  ;;  %6091 = vmatprep.subr.bf16.mxu0 %v17011_v39  ;;  %v1295_v58 = vld [vmem:[#allocation2 + $0x1770] sm:$0xff]  ;;  %v776_v39 = vld [vmem:[#allocation2 + $0x738] sm:$0xff] }
 0x328   : > { %6132 = vmatprep.subr.bf16.mxu1 %v16501_v40  ;;  %v784_v40 = vld [vmem:[#allocation2 + $0x778] sm:$0xff]  ;;  %v17187_v43 = vcombine.high %v1287_v38, %v1295_v58  ;;  %v17186_v52 = vcombine.low %v1287_v38, %v1295_v58 }
 0x329   : > { %v16677_v60 = vcombine.high %v776_v39, %v784_v40  ;;  %v16676_v59 = vcombine.low %v776_v39, %v784_v40 }
 0x32a   : > { %6092 = vmatpush1.bf16.msra.mxu0 %v17010_v44  ;;  %v1271_v44 = vld [vmem:[#allocation2 + $0x16b0] sm:$0xff] }
 0x32b   : > { %6133 = vmatpush1.bf16.msra.mxu1 %v16500_v45  ;;  %6093 = vmatprep.subr.bf16.mxu0 %v16995_v47  ;;  %v1279_v45 = vld [vmem:[#allocation2 + $0x16f0] sm:$0xff]  ;;  %v760_v47 = vld [vmem:[#allocation2 + $0x6b8] sm:$0xff] }
 0x32c   : > { %6134 = vmatprep.subr.bf16.mxu1 %v16485_v51  ;;  %v768_v51 = vld [vmem:[#allocation2 + $0x6f8] sm:$0xff]  ;;  %v17171_v63 = vcombine.high %v1271_v44, %v1279_v45  ;;  %v17170_v10 = vcombine.low %v1271_v44, %v1279_v45 }
 0x32d   : > { %v16661_v3 = vcombine.high %v760_v47, %v768_v51  ;;  %v16660_v11 = vcombine.low %v760_v47, %v768_v51 }
 0x32e   : > { %6094 = vmatpush1.bf16.msra.mxu0 %v16994_v24  ;;  %v1255_v24 = vld [vmem:[#allocation2 + $0x1630] sm:$0xff] }
 0x32f   : > { %6135 = vmatpush1.bf16.msra.mxu1 %v16484_v5  ;;  %6095 = vmatprep.subr.bf16.mxu0 %v16979_v7  ;;  %v1263_v5 = vld [vmem:[#allocation2 + $0x1670] sm:$0xff]  ;;  %v744_v7 = vld [vmem:[#allocation2 + $0x638] sm:$0xff] }
 0x330   : > { %6136 = vmatprep.subr.bf16.mxu1 %v16469_v8  ;;  %v752_v8 = vld [vmem:[#allocation2 + $0x678] sm:$0xff]  ;;  %v17155_v12 = vcombine.high %v1255_v24, %v1263_v5  ;;  %v17154_v27 = vcombine.low %v1255_v24, %v1263_v5 }
 0x331   : > { %v16645_v49 = vcombine.high %v744_v7, %v752_v8  ;;  %v16644_v54 = vcombine.low %v744_v7, %v752_v8 }
 0x332   : > { %6096 = vmatpush1.bf16.msra.mxu0 %v16978_v13  ;;  %v1239_v13 = vld [vmem:[#allocation2 + $0x15b0] sm:$0xff] }
 0x333   : > { %6137 = vmatpush1.bf16.msra.mxu1 %v16468_v18  ;;  %6097 = vmatprep.subr.bf16.mxu0 %v16963_v25  ;;  %v1247_v18 = vld [vmem:[#allocation2 + $0x15f0] sm:$0xff]  ;;  %v728_v25 = vld [vmem:[#allocation2 + $0x5b8] sm:$0xff] }
 0x334   : > { %6138 = vmatprep.subr.bf16.mxu1 %v16453_v26  ;;  %v736_v26 = vld [vmem:[#allocation2 + $0x5f8] sm:$0xff]  ;;  %v17139_v29 = vcombine.high %v1239_v13, %v1247_v18  ;;  %v17138_v38 = vcombine.low %v1239_v13, %v1247_v18 }
 0x335   : > { %v16629_v30 = vcombine.high %v728_v25, %v736_v26  ;;  %v16628_v58 = vcombine.low %v728_v25, %v736_v26 }
 0x336   : > { %6098 = vmatpush1.bf16.msra.mxu0 %v16962_v34  ;;  %v1223_v34 = vld [vmem:[#allocation2 + $0x1530] sm:$0xff] }
 0x337   : > { %6139 = vmatpush1.bf16.msra.mxu1 %v16452_v35  ;;  %6099 = vmatprep.subr.bf16.mxu0 %v17203_v36  ;;  %v1231_v35 = vld [vmem:[#allocation2 + $0x1570] sm:$0xff]  ;;  %v712_v36 = vld [vmem:[#allocation2 + $0x538] sm:$0xff] }
 0x338   : > { %6140 = vmatprep.subr.bf16.mxu1 %v16693_v37  ;;  %v720_v37 = vld [vmem:[#allocation2 + $0x578] sm:$0xff]  ;;  %v17123_v39 = vcombine.high %v1223_v34, %v1231_v35  ;;  %v17122_v44 = vcombine.low %v1223_v34, %v1231_v35 }
 0x339   : > { %v16613_v40 = vcombine.high %v712_v36, %v720_v37  ;;  %v16612_v45 = vcombine.low %v712_v36, %v720_v37 }
 0x33a   : > { %6100 = vmatpush2.bf16.msra.mxu0 %v17202_v41  ;;  %v1207_v41 = vld [vmem:[#allocation2 + $0x14b0] sm:$0xff] }
 0x33b   : > { %6141 = vmatpush2.bf16.msra.mxu1 %v16692_v19  ;;  %6101 = vmatprep.subr.bf16.mxu0 %v17187_v43  ;;  %v1215_v19 = vld [vmem:[#allocation2 + $0x14f0] sm:$0xff]  ;;  %v696_v43 = vld [vmem:[#allocation2 + $0x4b8] sm:$0xff] }
 0x33c   : > { %6142 = vmatprep.subr.bf16.mxu1 %v16677_v60  ;;  %v704_v60 = vld [vmem:[#allocation2 + $0x4f8] sm:$0xff]  ;;  %v17107_v47 = vcombine.high %v1207_v41, %v1215_v19  ;;  %v17106_v24 = vcombine.low %v1207_v41, %v1215_v19 }
 0x33d   : > { %v16597_v51 = vcombine.high %v696_v43, %v704_v60  ;;  %v16596_v5 = vcombine.low %v696_v43, %v704_v60  ;;  %v1152_v41 = vld [vmem:[#allocation2 + $0x12f8] sm:$0xff] }
 0x33e   : > { %6102 = vmatpush2.bf16.msra.mxu0 %v17186_v52  ;;  %v1191_v52 = vld [vmem:[#allocation2 + $0x1430] sm:$0xff] }
 0x33f   : > { %6143 = vmatpush2.bf16.msra.mxu1 %v16676_v59  ;;  %6103 = vmatprep.subr.bf16.mxu0 %v17171_v63  ;;  %v1199_v59 = vld [vmem:[#allocation2 + $0x1470] sm:$0xff]  ;;  %v680_v63 = vld [vmem:[#allocation2 + $0x438] sm:$0xff] }
 0x340   : > { %6144 = vmatprep.subr.bf16.mxu1 %v16661_v3  ;;  %v688_v3 = vld [vmem:[#allocation2 + $0x478] sm:$0xff]  ;;  %v17091_v7 = vcombine.high %v1191_v52, %v1199_v59  ;;  %v17090_v13 = vcombine.low %v1191_v52, %v1199_v59 }
 0x341   : > { %v16581_v8 = vcombine.high %v680_v63, %v688_v3  ;;  %v16580_v18 = vcombine.low %v680_v63, %v688_v3  ;;  %v872_v59 = vld [vmem:[#allocation2 + $0xa38] sm:$0xff] }
 0x342   : > { %6104 = vmatpush2.bf16.msra.mxu0 %v17170_v10  ;;  %v920_v10 = vld [vmem:[#allocation2 + $0xbb8] sm:$0xff] }
 0x343   : > { %6145 = vmatpush2.bf16.msra.mxu1 %v16660_v11  ;;  %6105 = vmatprep.subr.bf16.mxu0 %v17155_v12  ;;  %v928_v11 = vld [vmem:[#allocation2 + $0xbf8] sm:$0xff] }
 0x344   : > { %6146 = vmatprep.subr.bf16.mxu1 %v16645_v49  ;;  %v1176_v12 = vld [vmem:[#allocation2 + $0x13b8] sm:$0xff]  ;;  %v16821_v25 = vcombine.high %v920_v10, %v928_v11  ;;  %v16820_v34 = vcombine.low %v920_v10, %v928_v11 }
 0x345   : > { %v1184_v49 = vld [vmem:[#allocation2 + $0x13f8] sm:$0xff] }
 0x346   : > { %6106 = vmatpush2.bf16.msra.mxu0 %v17154_v27  ;;  %v17077_v26 = vcombine.high %v1176_v12, %v1184_v49  ;;  %v904_v27 = vld [vmem:[#allocation2 + $0xb38] sm:$0xff]  ;;  %v17076_v35 = vcombine.low %v1176_v12, %v1184_v49 }
 0x347   : > { %6147 = vmatpush2.bf16.msra.mxu1 %v16644_v54  ;;  %6107 = vmatprep.subr.bf16.mxu0 %v17139_v29  ;;  %v912_v54 = vld [vmem:[#allocation2 + $0xb78] sm:$0xff] }
 0x348   : > { %6148 = vmatprep.subr.bf16.mxu1 %v16629_v30  ;;  %v1160_v29 = vld [vmem:[#allocation2 + $0x1338] sm:$0xff]  ;;  %v16805_v36 = vcombine.high %v904_v27, %v912_v54  ;;  %v16804_v43 = vcombine.low %v904_v27, %v912_v54 }
 0x349   : > { %v1168_v30 = vld [vmem:[#allocation2 + $0x1378] sm:$0xff] }
 0x34a   : > { %6108 = vmatpush2.bf16.msra.mxu0 %v17138_v38  ;;  %v17061_v37 = vcombine.high %v1160_v29, %v1168_v30  ;;  %v888_v38 = vld [vmem:[#allocation2 + $0xab8] sm:$0xff] }
 0x34b   : > { %6149 = vmatpush2.bf16.msra.mxu1 %v16628_v58  ;;  %6109 = vmatprep.subr.bf16.mxu0 %v17123_v39  ;;  %v896_v58 = vld [vmem:[#allocation2 + $0xaf8] sm:$0xff] }
 0x34c   : > { %6150 = vmatprep.subr.bf16.mxu1 %v16613_v40  ;;  %v1144_v40 = vld [vmem:[#allocation2 + $0x12b8] sm:$0xff] }
 0x34d   : > { %v17045_v52 = vcombine.high %v1144_v40, %v1152_v41  ;;  %v880_v63 = vld [vmem:[#allocation2 + $0xa78] sm:$0xff] }
 0x34e   : > { %6110 = vmatpush2.bf16.msra.mxu0 %v17122_v44  ;;  %v1128_v3 = vld [vmem:[#allocation2 + $0x1238] sm:$0xff]  ;;  %v16773_v10 = vcombine.high %v872_v59, %v880_v63 }
 0x34f   : > { %6151 = vmatpush2.bf16.msra.mxu1 %v16612_v45  ;;  %6111 = vmatprep.subr.bf16.mxu0 %v17107_v47  ;;  %v17060_v45 = vcombine.low %v1160_v29, %v1168_v30  ;;  %v16789_v47 = vcombine.high %v888_v38, %v896_v58  ;;  %v856_v12 = vld [vmem:[#allocation2 + $0x9b8] sm:$0xff] }
 0x350   : > { %6152 = vmatprep.subr.bf16.mxu1 %v16597_v51  ;;  %v864_v49 = vld [vmem:[#allocation2 + $0x9f8] sm:$0xff] }
 0x351   : > { %v840_v54 = vld [vmem:[#allocation2 + $0x938] sm:$0xff] }
 0x352   : > { %6112 = vmatpush2.bf16.msra.mxu0 %v17106_v24  ;;  %v1136_v24 = vld [vmem:[#allocation2 + $0x1278] sm:$0xff] }
 0x353   : > { %6153 = vmatpush2.bf16.msra.mxu1 %v16596_v5  ;;  %6113 = vmatprep.subr.bf16.mxu0 %v17091_v7  ;;  %v16788_v5 = vcombine.low %v888_v38, %v896_v58  ;;  %v17029_v11 = vcombine.high %v1128_v3, %v1136_v24  ;;  %v848_v29 = vld [vmem:[#allocation2 + $0x978] sm:$0xff] }
 0x354   : > { %6154 = vmatprep.subr.bf16.mxu1 %v16581_v8  ;;  %v1096_v30 = vld [vmem:[#allocation2 + $0x1138] sm:$0xff] }
 0x355   : > { %v824_v58 = vld [vmem:[#allocation2 + $0x8b8] sm:$0xff] }
 0x356   : > { %6114 = vmatpush2.bf16.msra.mxu0 %v17090_v13 }
 0x357   : > { %6155 = vmatpush2.bf16.msra.mxu1 %v16580_v18  ;;  %6165 = vmatprep.subr.bf16.mxu0 %v16821_v25  ;;  %v1112_v18 = vld [vmem:[#allocation2 + $0x11b8] sm:$0xff]  ;;  %v16772_v25 = vcombine.low %v872_v59, %v880_v63 }
 0x358   : > { %6206 = vmatprep.subr.bf16.mxu1 %v17077_v26  ;;  %v16757_v26 = vcombine.high %v856_v12, %v864_v49  ;;  %v816_v59 = vld [vmem:[#allocation2 + $0x878] sm:$0xff] }
 0x359   : > { %v5871_v39 = vpop.f32.mrf.mxu0  ;;  %6116 = vmatmul.mubr.bf16.vlgmr.msra.gmra.mxu0 %v19736_v32  ;;  %v1064_v63 = vld [vmem:[#allocation2 + $0x1038] sm:$0xff] }
 0x35a   : > { %v19865_v19 = vadd.f32 %v5871_v39, %v19857_v6  ;;  %6157 = vmatmul.mubr.bf16.vlgmr.msra.gmra.mxu1 %v19717_v16  ;;  %6166 = vmatpush1.bf16.msra.mxu0 %v16820_v34  ;;  %v19868_v60 = vpop.f32.mrf.mxu1  ;;  %v1104_v34 = vld [vmem:[#allocation2 + $0x1178] sm:$0xff] }
 0x35b   : > { %6207 = vmatpush1.bf16.msra.mxu1 %v17076_v35  ;;  %v5873_v44 = vpop.f32.mrf.mxu0  ;;  %6167 = vmatprep.subr.bf16.mxu0 %v16805_v36  ;;  %v16756_v35 = vcombine.low %v856_v12, %v864_v49  ;;  %v16997_v38 = vcombine.high %v1096_v30, %v1104_v34  ;;  %v832_v39 = vld [vmem:[#allocation2 + $0x8f8] sm:$0xff] }
 0x35c   : > { %v19871_v51 = vadd.f32 %v5873_v44, %v19861_v15  ;;  %6208 = vmatprep.subr.bf16.mxu1 %v17061_v37  ;;  %v19873_v6 = vpop.f32.mrf.mxu1  ;;  %6197 = vmatprep.mubr.bf16.mxu0 %v19711_v61  ;;  %v17044_v15 = vcombine.low %v1144_v40, %v1152_v41  ;;  %v1120_v61 = vld [vmem:[#allocation2 + $0x11f8] sm:$0xff]  ;;  %v16741_v37 = vcombine.high %v840_v54, %v848_v29 }
 0x35d   : > { %v5875_v16 = vpop.f32.mrf.mxu0  ;;  %6238 = vmatprep.mubr.bf16.mxu1 %v19728_v28  ;;  %v17028_v28 = vcombine.low %v1128_v3, %v1136_v24  ;;  %v17013_v27 = vcombine.high %v1112_v18, %v1120_v61  ;;  %v17012_v36 = vcombine.low %v1112_v18, %v1120_v61  ;;  %v1080_v40 = vld [vmem:[#allocation2 + $0x10b8] sm:$0xff]  ;;  %v16996_v44 = vcombine.low %v1096_v30, %v1104_v34 }
 0x35e   : > { %6168 = vmatpush1.bf16.msra.mxu0 %v16804_v43  ;;  %v5916_v7 = vpop.f32.mrf.mxu1  ;;  %v1088_v41 = vld [vmem:[#allocation2 + $0x10f8] sm:$0xff]  ;;  %v16740_v43 = vcombine.low %v840_v54, %v848_v29  ;;  %v16724_v3 = vcombine.low %v824_v58, %v832_v39 }
 0x35f   : > { %6209 = vmatpush1.bf16.msra.mxu1 %v17060_v45  ;;  %v5876_v8 = vpop.f32.mrf.mxu0  ;;  %6169 = vmatprep.subr.bf16.mxu0 %v16789_v47  ;;  %v16725_v45 = vcombine.high %v824_v58, %v832_v39  ;;  %v16981_v47 = vcombine.high %v1080_v40, %v1088_v41  ;;  %v1072_v16 = vld [vmem:[#allocation2 + $0x1078] sm:$0xff]  ;;  %v16980_v24 = vcombine.low %v1080_v40, %v1088_v41 }
 0x360   : > { %6210 = vmatprep.subr.bf16.mxu1 %v17045_v52  ;;  %v5917_v13 = vpop.f32.mrf.mxu1  ;;  %v808_v52 = vld [vmem:[#allocation2 + $0x838] sm:$0xff]  ;;  %v16965_v7 = vcombine.high %v1064_v63, %v1072_v16  ;;  %v16964_v49 = vcombine.low %v1064_v63, %v1072_v16 }
 0x361   : > { %v1048_v8 = vld [vmem:[#allocation2 + $0xfb8] sm:$0xff]  ;;  %v16708_v12 = vcombine.low %v808_v52, %v816_v59 }
 0x362   : > { %6170 = vmatpush1.bf16.msra.mxu0 %v16788_v5  ;;  %v16709_v5 = vcombine.high %v808_v52, %v816_v59  ;;  %v1032_v61 = vld [vmem:[#allocation2 + $0xf38] sm:$0xff] }
 0x363   : > { %6211 = vmatpush1.bf16.msra.mxu1 %v17044_v15  ;;  %6171 = vmatprep.subr.bf16.mxu0 %v16773_v10  ;;  %v1056_v15 = vld [vmem:[#allocation2 + $0xff8] sm:$0xff] }
 0x364   : > { %6212 = vmatprep.subr.bf16.mxu1 %v17029_v11  ;;  %v1304_v10 = vld [vmem:[#allocation2 + $0x17b8] sm:$0xff]  ;;  %v16949_v13 = vcombine.high %v1048_v8, %v1056_v15 }
 0x365   : > { %v1312_v11 = vld [vmem:[#allocation2 + $0x17f8] sm:$0xff] }
 0x366   : > { %6172 = vmatpush1.bf16.msra.mxu0 %v16772_v25  ;;  %v17205_v18 = vcombine.high %v1304_v10, %v1312_v11  ;;  %v1040_v25 = vld [vmem:[#allocation2 + $0xf78] sm:$0xff]  ;;  %v17204_v54 = vcombine.low %v1304_v10, %v1312_v11 }
 0x367   : > { %6213 = vmatpush1.bf16.msra.mxu1 %v17028_v28  ;;  %6173 = vmatprep.subr.bf16.mxu0 %v16757_v26  ;;  %v1288_v28 = vld [vmem:[#allocation2 + $0x1738] sm:$0xff]  ;;  %v16933_v29 = vcombine.high %v1032_v61, %v1040_v25 }
 0x368   : > { %6214 = vmatprep.subr.bf16.mxu1 %v17013_v27  ;;  %v1296_v26 = vld [vmem:[#allocation2 + $0x1778] sm:$0xff]  ;;  %v16948_v27 = vcombine.low %v1048_v8, %v1056_v15 }
 0x369   : > { %v17189_v30 = vcombine.high %v1288_v28, %v1296_v26  ;;  %v1016_v34 = vld [vmem:[#allocation2 + $0xeb8] sm:$0xff]  ;;  %v17188_v58 = vcombine.low %v1288_v28, %v1296_v26 }
 0x36a   : > { %6174 = vmatpush1.bf16.msra.mxu0 %v16756_v35  ;;  %v1024_v35 = vld [vmem:[#allocation2 + $0xef8] sm:$0xff] }
 0x36b   : > { %6215 = vmatpush1.bf16.msra.mxu1 %v17012_v36  ;;  %6175 = vmatprep.subr.bf16.mxu0 %v16741_v37  ;;  %v1272_v36 = vld [vmem:[#allocation2 + $0x16b8] sm:$0xff]  ;;  %v16917_v39 = vcombine.high %v1016_v34, %v1024_v35 }
 0x36c   : > { %6216 = vmatprep.subr.bf16.mxu1 %v16997_v38  ;;  %v1280_v37 = vld [vmem:[#allocation2 + $0x16f8] sm:$0xff]  ;;  %v16932_v38 = vcombine.low %v1032_v61, %v1040_v25 }
 0x36d   : > { %v17173_v40 = vcombine.high %v1272_v36, %v1280_v37  ;;  %v1000_v41 = vld [vmem:[#allocation2 + $0xe38] sm:$0xff]  ;;  %v17172_v52 = vcombine.low %v1272_v36, %v1280_v37 }
 0x36e   : > { %6176 = vmatpush1.bf16.msra.mxu0 %v16740_v43  ;;  %v1008_v43 = vld [vmem:[#allocation2 + $0xe78] sm:$0xff] }
 0x36f   : > { %6217 = vmatpush1.bf16.msra.mxu1 %v16996_v44  ;;  %6177 = vmatprep.subr.bf16.mxu0 %v16725_v45  ;;  %v1256_v44 = vld [vmem:[#allocation2 + $0x1638] sm:$0xff]  ;;  %v16901_v59 = vcombine.high %v1000_v41, %v1008_v43 }
 0x370   : > { %6218 = vmatprep.subr.bf16.mxu1 %v16981_v47  ;;  %v1264_v45 = vld [vmem:[#allocation2 + $0x1678] sm:$0xff]  ;;  %v16916_v47 = vcombine.low %v1016_v34, %v1024_v35 }
 0x371   : > { %v17157_v63 = vcombine.high %v1256_v44, %v1264_v45  ;;  %v984_v16 = vld [vmem:[#allocation2 + $0xdb8] sm:$0xff]  ;;  %v17156_v8 = vcombine.low %v1256_v44, %v1264_v45  ;;  %v6335_v45 = vld [vmem:[#allocation5 + $0x1c0] sm:$0xff] }
 0x372   : > { %6178 = vmatpush1.bf16.msra.mxu0 %v16724_v3  ;;  %v992_v3 = vld [vmem:[#allocation2 + $0xdf8] sm:$0xff] }
 0x373   : > { %6219 = vmatpush1.bf16.msra.mxu1 %v16980_v24  ;;  %6179 = vmatprep.subr.bf16.mxu0 %v16709_v5  ;;  %v1240_v24 = vld [vmem:[#allocation2 + $0x15b8] sm:$0xff]  ;;  %v16885_v15 = vcombine.high %v984_v16, %v992_v3 }
 0x374   : > { %6220 = vmatprep.subr.bf16.mxu1 %v16965_v7  ;;  %v1248_v5 = vld [vmem:[#allocation2 + $0x15f8] sm:$0xff]  ;;  %v16900_v7 = vcombine.low %v1000_v41, %v1008_v43 }
 0x375   : > { %v17141_v10 = vcombine.high %v1240_v24, %v1248_v5  ;;  %v968_v11 = vld [vmem:[#allocation2 + $0xd38] sm:$0xff]  ;;  %v17140_v61 = vcombine.low %v1240_v24, %v1248_v5  ;;  %v1369_v5 = vrot.slane %v19849_v53, %v19786_v31 }
 0x376   : > { %6180 = vmatpush1.bf16.msra.mxu0 %v16708_v12  ;;  %v976_v12 = vld [vmem:[#allocation2 + $0xd78] sm:$0xff] }
 0x377   : > { %6221 = vmatpush1.bf16.msra.mxu1 %v16964_v49  ;;  %6181 = vmatprep.subr.bf16.mxu0 %v16949_v13  ;;  %v1224_v49 = vld [vmem:[#allocation2 + $0x1538] sm:$0xff]  ;;  %v16869_v25 = vcombine.high %v968_v11, %v976_v12 }
 0x378   : > { %6222 = vmatprep.subr.bf16.mxu1 %v17205_v18  ;;  %v1232_v13 = vld [vmem:[#allocation2 + $0x1578] sm:$0xff]  ;;  %v16884_v18 = vcombine.low %v984_v16, %v992_v3 }
 0x379   : > { %v17125_v28 = vcombine.high %v1224_v49, %v1232_v13  ;;  %v952_v26 = vld [vmem:[#allocation2 + $0xcb8] sm:$0xff]  ;;  %v17124_v34 = vcombine.low %v1224_v49, %v1232_v13  ;;  %v6455_v13 = vld [vmem:[#allocation5 + $0x580] sm:$0xff] }
 0x37a   : > { %6182 = vmatpush2.bf16.msra.mxu0 %v16948_v27  ;;  %v960_v27 = vld [vmem:[#allocation2 + $0xcf8] sm:$0xff] }
 0x37b   : > { %6223 = vmatpush2.bf16.msra.mxu1 %v17204_v54  ;;  %6183 = vmatprep.subr.bf16.mxu0 %v16933_v29  ;;  %v1208_v54 = vld [vmem:[#allocation2 + $0x14b8] sm:$0xff]  ;;  %v16853_v35 = vcombine.high %v952_v26, %v960_v27 }
 0x37c   : > { %6224 = vmatprep.subr.bf16.mxu1 %v17189_v30  ;;  %v1216_v29 = vld [vmem:[#allocation2 + $0x14f8] sm:$0xff]  ;;  %v16868_v30 = vcombine.low %v968_v11, %v976_v12  ;;  %v6250_v11 = vmax.f32 %v19800_v1, 0.0 }
 0x37d   : > { %v17109_v36 = vcombine.high %v1208_v54, %v1216_v29  ;;  %v936_v37 = vld [vmem:[#allocation2 + $0xc38] sm:$0xff]  ;;  %v17108_v41 = vcombine.low %v1208_v54, %v1216_v29  ;;  %v6451_v29 = vld [vmem:[#allocation5 + $0x560] sm:$0xff] }
 0x37e   : > { %6184 = vmatpush2.bf16.msra.mxu0 %v16932_v38  ;;  %v944_v38 = vld [vmem:[#allocation2 + $0xc78] sm:$0xff] }
 0x37f   : > { %6225 = vmatpush2.bf16.msra.mxu1 %v17188_v58  ;;  %6185 = vmatprep.subr.bf16.mxu0 %v16917_v39  ;;  %v1192_v58 = vld [vmem:[#allocation2 + $0x1438] sm:$0xff]  ;;  %v16837_v43 = vcombine.high %v936_v37, %v944_v38  ;;  %v16836_v16 = vcombine.low %v936_v37, %v944_v38 }
 0x380   : > { %6226 = vmatprep.subr.bf16.mxu1 %v17173_v40  ;;  %v1200_v39 = vld [vmem:[#allocation2 + $0x1478] sm:$0xff]  ;;  %v16852_v40 = vcombine.low %v952_v26, %v960_v27  ;;  %v6319_v26 = vld [vmem:[#allocation5 + $0x140] sm:$0xff] }
 0x381   : > { %v17093_v44 = vcombine.high %v1192_v58, %v1200_v39  ;;  %v17092_v3 = vcombine.low %v1192_v58, %v1200_v39  ;;  %v6323_v27 = vld [vmem:[#allocation5 + $0x160] sm:$0xff] }
 0x382   : > { %6186 = vmatpush2.bf16.msra.mxu0 %v16916_v47  ;;  %v6339_v47 = vld [vmem:[#allocation5 + $0x1e0] sm:$0xff]  ;;  %v17247_v38 = vcombine.high %v6319_v26, %v6323_v27 }
 0x383   : > { %6227 = vmatpush2.bf16.msra.mxu1 %v17172_v52  ;;  %6187 = vmatprep.subr.bf16.mxu0 %v16901_v59  ;;  %v6463_v52 = vld [vmem:[#allocation5 + $0x5c0] sm:$0xff]  ;;  %v17263_v24 = vcombine.high %v6335_v45, %v6339_v47  ;;  %v17262_v49 = vcombine.low %v6335_v45, %v6339_v47 }
 0x384   : > { %6228 = vmatprep.subr.bf16.mxu1 %v17157_v63  ;;  %v6467_v59 = vld [vmem:[#allocation5 + $0x5e0] sm:$0xff]  ;;  %v1365_v63 = vrot.slane %v19849_v53, %v19783_v9 }
 0x385   : > { %v6443_v45 = vld [vmem:[#allocation5 + $0x520] sm:$0xff] }
 0x386   : > { %6188 = vmatpush2.bf16.msra.mxu0 %v16900_v7  ;;  %v17391_v7 = vcombine.high %v6463_v52, %v6467_v59  ;;  %v5913_v12 = vadd.f32 %v19868_v60, %v1365_v63  ;;  %v6447_v60 = vld [vmem:[#allocation5 + $0x540] sm:$0xff] }
 0x387   : > { %6229 = vmatpush2.bf16.msra.mxu1 %v17156_v8  ;;  %6189 = vmatprep.subr.bf16.mxu0 %v16885_v15  ;;  %v6248_v8 = vmax.f32 %v19776_v2, 0.0  ;;  %v6327_v15 = vld [vmem:[#allocation5 + $0x180] sm:$0xff] }
 0x388   : > { %6230 = vmatprep.subr.bf16.mxu1 %v17141_v10  ;;  %v6331_v10 = vld [vmem:[#allocation5 + $0x1a0] sm:$0xff] }
 0x389   : > { %v19885_v2 = vpack.c.bf16 %v6248_v8, %v6248_v8 }
 0x38a   : > { %6190 = vmatpush2.bf16.msra.mxu0 %v16884_v18  ;;  %v6459_v18 = vld [vmem:[#allocation5 + $0x5a0] sm:$0xff] }
 0x38b   : > { %6231 = vmatpush2.bf16.msra.mxu1 %v17140_v61  ;;  %6191 = vmatprep.subr.bf16.mxu0 %v16869_v25  ;;  %v17390_v61 = vcombine.low %v6463_v52, %v6467_v59  ;;  %v5915_v25 = vadd.f32 %v19873_v6, %v1369_v5  ;;  %v17383_v1 = vcombine.high %v6455_v13, %v6459_v18  ;;  %v6303_v5 = vld [vmem:[#allocation5 + $0xc0] sm:$0xff] }
 0x38c   : > { %6232 = vmatprep.subr.bf16.mxu1 %v17125_v28  ;;  %v17255_v28 = vcombine.high %v6327_v15, %v6331_v10  ;;  %v17254_v6 = vcombine.low %v6327_v15, %v6331_v10  ;;  %v17382_v37 = vcombine.low %v6455_v13, %v6459_v18  ;;  %v17246_v52 = vcombine.low %v6319_v26, %v6323_v27  ;;  %v6431_v15 = vld [vmem:[#allocation5 + $0x4c0] sm:$0xff] }
 0x38d   : > { %v6435_v10 = vld [vmem:[#allocation5 + $0x4e0] sm:$0xff] }
 0x38e   : > { %6192 = vmatpush2.bf16.msra.mxu0 %v16868_v30  ;;  %v19888_v30 = vpack.c.bf16 %v6250_v11, %v6250_v11  ;;  %v17359_v13 = vcombine.high %v6431_v15, %v6435_v10  ;;  %v6295_v18 = vld [vmem:[#allocation5 + $0x80] sm:$0xff]  ;;  %v17358_v27 = vcombine.low %v6431_v15, %v6435_v10 }
 0x38f   : > { %6233 = vmatpush2.bf16.msra.mxu1 %v17124_v34  ;;  %6193 = vmatprep.subr.bf16.mxu0 %v16853_v35  ;;  %v6395_v15 = vld [vmem:[#allocation5 + $0x3a0] sm:$0xff] }
 0x390   : > { %6234 = vmatprep.subr.bf16.mxu1 %v17109_v36  ;;  %v6519_v10 = vld [vmem:[#allocation5 + $0x780] sm:$0xff] }
 0x392   : > { %6194 = vmatpush2.bf16.msra.mxu0 %v16852_v40  ;;  %v17375_v40 = vcombine.high %v6447_v60, %v6451_v29 }
 0x393   : > { %6235 = vmatpush2.bf16.msra.mxu1 %v17108_v41  ;;  %6195 = vmatprep.subr.bf16.mxu0 %v16837_v43  ;;  %v6311_v41 = vld [vmem:[#allocation5 + $0x100] sm:$0xff] }
 0x394   : > { %6236 = vmatprep.subr.bf16.mxu1 %v17093_v44  ;;  %v6315_v43 = vld [vmem:[#allocation5 + $0x120] sm:$0xff] }
 0x395   : > { %v6439_v44 = vld [vmem:[#allocation5 + $0x500] sm:$0xff]  ;;  %v17238_v11 = vcombine.low %v6311_v41, %v6315_v43 }
 0x396   : > { %6196 = vmatpush2.bf16.msra.mxu0 %v16836_v16  ;;  %v17374_v16 = vcombine.low %v6447_v60, %v6451_v29  ;;  %v6287_v60 = vld [vmem:[#allocation5 + $0x40] sm:$0xff] }
 0x397   : > { %6237 = vmatpush2.bf16.msra.mxu1 %v17092_v3  ;;  %12468 = vmatprep.subr.bf16.mxu0 %v17263_v24  ;;  %v17239_v3 = vcombine.high %v6311_v41, %v6315_v43  ;;  %v17367_v24 = vcombine.high %v6439_v44, %v6443_v45  ;;  %v6291_v29 = vld [vmem:[#allocation5 + $0x60] sm:$0xff] }
 0x398   : > { %12509 = vmatprep.subr.bf16.mxu1 %v17391_v7  ;;  %v6307_v7 = vld [vmem:[#allocation5 + $0xe0] sm:$0xff]  ;;  %v17214_v43 = vcombine.low %v6287_v60, %v6291_v29 }
 0x399   : > { %v5953_v54 = vpop.f32.mrf.mxu0  ;;  %6198 = vmatmul.mubr.bf16.vlgmr.msra.gmra.mxu0 %v19724_v21  ;;  %v17230_v26 = vcombine.low %v6303_v5, %v6307_v7  ;;  %v6411_v41 = vld [vmem:[#allocation5 + $0x420] sm:$0xff] }
 0x39a   : > { %v5954_v34 = vadd.f32 %v5953_v54, %v5913_v12  ;;  %6239 = vmatmul.mubr.bf16.vlgmr.msra.gmra.mxu1 %v19736_v32  ;;  %12469 = vmatpush1.bf16.msra.mxu0 %v17262_v49  ;;  %v5994_v35 = vpop.f32.mrf.mxu1  ;;  %v17366_v12 = vcombine.low %v6439_v44, %v6443_v45  ;;  %v17231_v49 = vcombine.high %v6303_v5, %v6307_v7 }
 0x39b   : > { %12500 = vmatprep.mubr.bf16.mxu0 %v19885_v2  ;;  %12510 = vmatpush1.bf16.msra.mxu1 %v17390_v61  ;;  %v5955_v36 = vpop.f32.mrf.mxu0  ;;  %v6299_v61 = vld [vmem:[#allocation5 + $0xa0] sm:$0xff] }
 0x39c   : > { %12541 = vmatprep.mubr.bf16.mxu1 %v19888_v30  ;;  %v5956_v21 = vadd.f32 %v5955_v36, %v5915_v25  ;;  %v19893_v58 = vadd.f32 %v5994_v35, %v5954_v34  ;;  %v5996_v39 = vpop.f32.mrf.mxu1  ;;  %12470 = vmatprep.subr.bf16.mxu0 %v17255_v28  ;;  %v6423_v25 = vld [vmem:[#allocation5 + $0x480] sm:$0xff]  ;;  %v17223_v54 = vcombine.high %v6295_v18, %v6299_v61 }
 0x39d   : > { %v5957_v32 = vpop.f32.mrf.mxu0  ;;  %12511 = vmatprep.subr.bf16.mxu1 %v17383_v1  ;;  %v6427_v28 = vld [vmem:[#allocation5 + $0x4a0] sm:$0xff] }
 0x39e   : > { %v19895_v47 = vadd.f32 %v5996_v39, %v5956_v21  ;;  %12471 = vmatpush1.bf16.msra.mxu0 %v17254_v6  ;;  %v5998_v59 = vpop.f32.mrf.mxu1  ;;  %v17351_v1 = vcombine.high %v6423_v25, %v6427_v28  ;;  %v6415_v34 = vld [vmem:[#allocation5 + $0x440] sm:$0xff]  ;;  %v17222_v6 = vcombine.low %v6295_v18, %v6299_v61  ;;  %v17350_v36 = vcombine.low %v6423_v25, %v6427_v28 }
 0x39f   : > { %12512 = vmatpush1.bf16.msra.mxu1 %v17382_v37  ;;  %v5958_v63 = vpop.f32.mrf.mxu0  ;;  %12472 = vmatprep.subr.bf16.mxu0 %v17247_v38  ;;  %v6419_v35 = vld [vmem:[#allocation5 + $0x460] sm:$0xff]  ;;  %v17215_v37 = vcombine.high %v6287_v60, %v6291_v29 }
 0x3a0   : > { %12513 = vmatprep.subr.bf16.mxu1 %v17375_v40  ;;  %v5999_v8 = vpop.f32.mrf.mxu1  ;;  %v17343_v38 = vcombine.high %v6415_v34, %v6419_v35  ;;  %v6279_v21 = vld [vmem:[#allocation5] sm:$0xff]  ;;  %v17342_v32 = vcombine.low %v6415_v34, %v6419_v35 }
 0x3a1   : > { %v6283_v39 = vld [vmem:[#allocation5 + $0x20] sm:$0xff] }
 0x3a2   : > { %12473 = vmatpush1.bf16.msra.mxu0 %v17246_v52  ;;  %v6407_v40 = vld [vmem:[#allocation5 + $0x400] sm:$0xff]  ;;  %v17207_v44 = vcombine.high %v6279_v21, %v6283_v39 }
 0x3a3   : > { %12514 = vmatpush1.bf16.msra.mxu1 %v17374_v16  ;;  %12474 = vmatprep.subr.bf16.mxu0 %v17239_v3  ;;  %v17335_v45 = vcombine.high %v6407_v40, %v6411_v41  ;;  %v6399_v52 = vld [vmem:[#allocation5 + $0x3c0] sm:$0xff]  ;;  %v17206_v3 = vcombine.low %v6279_v21, %v6283_v39 }
 0x3a4   : > { %12515 = vmatprep.subr.bf16.mxu1 %v17367_v24  ;;  %v6403_v59 = vld [vmem:[#allocation5 + $0x3e0] sm:$0xff]  ;;  %v17334_v24 = vcombine.low %v6407_v40, %v6411_v41 }
 0x3a5   : > { %v6527_v63 = vld [vmem:[#allocation5 + $0x7c0] sm:$0xff]  ;;  %v17327_v5 = vcombine.high %v6399_v52, %v6403_v59 }
 0x3a6   : > { %12475 = vmatpush1.bf16.msra.mxu0 %v17238_v11  ;;  %v6531_v16 = vld [vmem:[#allocation5 + $0x7e0] sm:$0xff] }
 0x3a7   : > { %12516 = vmatpush1.bf16.msra.mxu1 %v17366_v12  ;;  %12476 = vmatprep.subr.bf16.mxu0 %v17231_v49  ;;  %v17455_v7 = vcombine.high %v6527_v63, %v6531_v16  ;;  %v6391_v8 = vld [vmem:[#allocation5 + $0x380] sm:$0xff]  ;;  %v17326_v12 = vcombine.low %v6399_v52, %v6403_v59  ;;  %v17454_v49 = vcombine.low %v6527_v63, %v6531_v16 }
 0x3a8   : > { %12517 = vmatprep.subr.bf16.mxu1 %v17359_v13  ;;  %v6523_v11 = vld [vmem:[#allocation5 + $0x7a0] sm:$0xff]  ;;  %v17319_v13 = vcombine.high %v6391_v8, %v6395_v15 }
 0x3a9   : > { %v17447_v18 = vcombine.high %v6519_v10, %v6523_v11  ;;  %v6383_v61 = vld [vmem:[#allocation5 + $0x340] sm:$0xff] }
 0x3aa   : > { %12477 = vmatpush1.bf16.msra.mxu0 %v17230_v26  ;;  %v6387_v25 = vld [vmem:[#allocation5 + $0x360] sm:$0xff] }
 0x3ab   : > { %12518 = vmatpush1.bf16.msra.mxu1 %v17358_v27  ;;  %12478 = vmatprep.subr.bf16.mxu0 %v17223_v54  ;;  %v6511_v28 = vld [vmem:[#allocation5 + $0x740] sm:$0xff]  ;;  %v17318_v27 = vcombine.low %v6391_v8, %v6395_v15  ;;  %v17446_v54 = vcombine.low %v6519_v10, %v6523_v11 }
 0x3ac   : > { %12519 = vmatprep.subr.bf16.mxu1 %v17351_v1  ;;  %v6515_v26 = vld [vmem:[#allocation5 + $0x760] sm:$0xff]  ;;  %v17311_v1 = vcombine.high %v6383_v61, %v6387_v25 }
 0x3ad   : > { %v17439_v60 = vcombine.high %v6511_v28, %v6515_v26  ;;  %v6375_v29 = vld [vmem:[#allocation5 + $0x300] sm:$0xff] }
 0x3ae   : > { %12479 = vmatpush1.bf16.msra.mxu0 %v17222_v6  ;;  %v6379_v34 = vld [vmem:[#allocation5 + $0x320] sm:$0xff] }
 0x3af   : > { %12520 = vmatpush1.bf16.msra.mxu1 %v17350_v36  ;;  %12480 = vmatprep.subr.bf16.mxu0 %v17215_v37  ;;  %v6503_v35 = vld [vmem:[#allocation5 + $0x700] sm:$0xff]  ;;  %v17310_v36 = vcombine.low %v6383_v61, %v6387_v25  ;;  %v17438_v37 = vcombine.low %v6511_v28, %v6515_v26 }
 0x3b0   : > { %12521 = vmatprep.subr.bf16.mxu1 %v17343_v38  ;;  %v6507_v6 = vld [vmem:[#allocation5 + $0x720] sm:$0xff]  ;;  %v17303_v38 = vcombine.high %v6375_v29, %v6379_v34 }
 0x3b1   : > { %v17431_v21 = vcombine.high %v6503_v35, %v6507_v6  ;;  %v6367_v39 = vld [vmem:[#allocation5 + $0x2c0] sm:$0xff] }
 0x3b2   : > { %12481 = vmatpush1.bf16.msra.mxu0 %v17214_v43  ;;  %v6371_v40 = vld [vmem:[#allocation5 + $0x2e0] sm:$0xff] }
 0x3b3   : > { %12522 = vmatpush1.bf16.msra.mxu1 %v17342_v32  ;;  %12482 = vmatprep.subr.bf16.mxu0 %v17207_v44  ;;  %v6495_v41 = vld [vmem:[#allocation5 + $0x6c0] sm:$0xff]  ;;  %v19898_v32 = vsub.s32 7, %v19746_v42  ;;  %v17302_v44 = vcombine.low %v6375_v29, %v6379_v34  ;;  %v17295_v52 = vcombine.high %v6367_v39, %v6371_v40 }
 0x3b4   : > { %12523 = vmatprep.subr.bf16.mxu1 %v17335_v45  ;;  %v6499_v43 = vld [vmem:[#allocation5 + $0x6e0] sm:$0xff]  ;;  %v17430_v45 = vcombine.low %v6503_v35, %v6507_v6 }
 0x3b5   : > { %v17423_v59 = vcombine.high %v6495_v41, %v6499_v43  ;;  %v6359_v63 = vld [vmem:[#allocation5 + $0x280] sm:$0xff]  ;;  %v17422_v42 = vcombine.low %v6495_v41, %v6499_v43  ;;  %v6249_v43 = vmax.f32 %v19796_v48, 0.0  ;;  %v1377_v48 = vrot.slane %v19849_v53, %v19806_v23 }
 0x3b6   : > { %12483 = vmatpush1.bf16.msra.mxu0 %v17206_v3  ;;  %v6363_v16 = vld [vmem:[#allocation5 + $0x2a0] sm:$0xff] }
 0x3b7   : > { %12524 = vmatpush1.bf16.msra.mxu1 %v17334_v24  ;;  %12484 = vmatprep.subr.bf16.mxu0 %v17327_v5  ;;  %v6487_v3 = vld [vmem:[#allocation5 + $0x680] sm:$0xff]  ;;  %v1353_v5 = vrot.slane %v19748_v55, %v19898_v32  ;;  %v17287_v8 = vcombine.high %v6359_v63, %v6363_v16 }
 0x3b8   : > { %12525 = vmatprep.subr.bf16.mxu1 %v17455_v7  ;;  %v6491_v24 = vld [vmem:[#allocation5 + $0x6a0] sm:$0xff]  ;;  %v17294_v7 = vcombine.low %v6367_v39, %v6371_v40 }
 0x3b9   : > { %v17415_v15 = vcombine.high %v6487_v3, %v6491_v24  ;;  %v6351_v10 = vld [vmem:[#allocation5 + $0x240] sm:$0xff]  ;;  %v17414_v61 = vcombine.low %v6487_v3, %v6491_v24  ;;  %v19913_v24 = vpack.c.bf16 %v6249_v43, %v6249_v43 }
 0x3ba   : > { %12485 = vmatpush2.bf16.msra.mxu0 %v17326_v12  ;;  %v6355_v11 = vld [vmem:[#allocation5 + $0x260] sm:$0xff] }
 0x3bb   : > { %12526 = vmatpush2.bf16.msra.mxu1 %v17454_v49  ;;  %12486 = vmatprep.subr.bf16.mxu0 %v17319_v13  ;;  %v6479_v12 = vld [vmem:[#allocation5 + $0x640] sm:$0xff]  ;;  %v5669_v13 = vadd.f32 %v19829_v4, %v1353_v5  ;;  %v17279_v55 = vcombine.high %v6351_v10, %v6355_v11 }
 0x3bc   : > { %12527 = vmatprep.subr.bf16.mxu1 %v17447_v18  ;;  %v6483_v49 = vld [vmem:[#allocation5 + $0x660] sm:$0xff]  ;;  %v17286_v18 = vcombine.low %v6359_v63, %v6363_v16 }
 0x3bd   : > { %v17407_v25 = vcombine.high %v6479_v12, %v6483_v49  ;;  %v6343_v28 = vld [vmem:[#allocation5 + $0x200] sm:$0xff]  ;;  %v17406_v29 = vcombine.low %v6479_v12, %v6483_v49 }
 0x3be   : > { %12487 = vmatpush2.bf16.msra.mxu0 %v17318_v27  ;;  %v6347_v26 = vld [vmem:[#allocation5 + $0x220] sm:$0xff] }
 0x3bf   : > { %12528 = vmatpush2.bf16.msra.mxu1 %v17446_v54  ;;  %12488 = vmatprep.subr.bf16.mxu0 %v17311_v1  ;;  %v6471_v27 = vld [vmem:[#allocation5 + $0x600] sm:$0xff]  ;;  %v5710_v1 = vadd.f32 %v19841_v14, %v5669_v13  ;;  %v17271_v4 = vcombine.high %v6343_v28, %v6347_v26  ;;  %v17270_v39 = vcombine.low %v6343_v28, %v6347_v26  ;;  %v6247_v14 = vmax.f32 %v19770_v57, 0.0 }
 0x3c0   : > { %12529 = vmatprep.subr.bf16.mxu1 %v17439_v60  ;;  %v6475_v54 = vld [vmem:[#allocation5 + $0x620] sm:$0xff]  ;;  %v17278_v60 = vcombine.low %v6351_v10, %v6355_v11 }
 0x3c1   : > { %v17399_v34 = vcombine.high %v6471_v27, %v6475_v54  ;;  %v6591_v35 = vld [vmem:[#allocation5 + $0x9c0] sm:$0xff]  ;;  %v17398_v40 = vcombine.low %v6471_v27, %v6475_v54  ;;  %v19911_v57 = vpack.c.bf16 %v6247_v14, %v6247_v14 }
 0x3c2   : > { %12489 = vmatpush2.bf16.msra.mxu0 %v17310_v36  ;;  %v6595_v6 = vld [vmem:[#allocation5 + $0x9e0] sm:$0xff]  ;;  %v5628_v36 = vadd.f32 %v19827_v50, %v19818_v0  ;;  %v1373_v50 = vrot.slane %v19849_v53, %v19803_v17 }
 0x3c3   : > { %12530 = vmatpush2.bf16.msra.mxu1 %v17438_v37  ;;  %12490 = vmatprep.subr.bf16.mxu0 %v17303_v38  ;;  %v6719_v37 = vld [vmem:[#allocation5 + $0xdc0] sm:$0xff]  ;;  %v17519_v41 = vcombine.high %v6591_v35, %v6595_v6 }
 0x3c4   : > { %12531 = vmatprep.subr.bf16.mxu1 %v17431_v21  ;;  %v6723_v38 = vld [vmem:[#allocation5 + $0xde0] sm:$0xff]  ;;  %v5751_v21 = vadd.f32 %v19845_v22, %v5710_v1  ;;  %v17518_v22 = vcombine.low %v6591_v35, %v6595_v6 }
 0x3c5   : > { %v6711_v63 = vld [vmem:[#allocation5 + $0xd80] sm:$0xff]  ;;  %v17646_v3 = vcombine.low %v6719_v37, %v6723_v38 }
 0x3c6   : > { %12491 = vmatpush2.bf16.msra.mxu0 %v17302_v44  ;;  %v17647_v44 = vcombine.high %v6719_v37, %v6723_v38  ;;  %v6254_v0 = vmax.f32 %v5751_v21, 0.0  ;;  %v6715_v16 = vld [vmem:[#allocation5 + $0xda0] sm:$0xff] }
 0x3c7   : > { %12532 = vmatpush2.bf16.msra.mxu1 %v17430_v45  ;;  %12492 = vmatprep.subr.bf16.mxu0 %v17295_v52  ;;  %v6252_v45 = vmax.f32 %v5628_v36, 0.0  ;;  %v6583_v52 = vld [vmem:[#allocation5 + $0x980] sm:$0xff]  ;;  %v17639_v10 = vcombine.high %v6711_v63, %v6715_v16 }
 0x3c8   : > { %12533 = vmatprep.subr.bf16.mxu1 %v17423_v59  ;;  %v6587_v59 = vld [vmem:[#allocation5 + $0x9a0] sm:$0xff]  ;;  %v19920_v49 = vpack.c.bf16 %v6254_v0, %v6254_v0 }
 0x3c9   : > { %v17511_v5 = vcombine.high %v6583_v52, %v6587_v59  ;;  %v6703_v11 = vld [vmem:[#allocation5 + $0xd40] sm:$0xff] }
 0x3ca   : > { %12493 = vmatpush2.bf16.msra.mxu0 %v17294_v7  ;;  %v6575_v7 = vld [vmem:[#allocation5 + $0x940] sm:$0xff] }
 0x3cb   : > { %12534 = vmatpush2.bf16.msra.mxu1 %v17422_v42  ;;  %12494 = vmatprep.subr.bf16.mxu0 %v17287_v8  ;;  %v6579_v42 = vld [vmem:[#allocation5 + $0x960] sm:$0xff]  ;;  %v19917_v8 = vpack.c.bf16 %v6252_v45, %v6252_v45 }
 0x3cc   : > { %12535 = vmatprep.subr.bf16.mxu1 %v17415_v15  ;;  %v6707_v12 = vld [vmem:[#allocation5 + $0xd60] sm:$0xff]  ;;  %v17503_v28 = vcombine.high %v6575_v7, %v6579_v42  ;;  %v17502_v36 = vcombine.low %v6575_v7, %v6579_v42 }
 0x3cd   : > { %v17631_v1 = vcombine.high %v6703_v11, %v6707_v12  ;;  %v6699_v35 = vld [vmem:[#allocation5 + $0xd20] sm:$0xff]  ;;  %v17630_v21 = vcombine.low %v6703_v11, %v6707_v12 }
 0x3ce   : > { %12495 = vmatpush2.bf16.msra.mxu0 %v17286_v18  ;;  %v6691_v45 = vld [vmem:[#allocation5 + $0xce0] sm:$0xff] }
 0x3cf   : > { %12536 = vmatpush2.bf16.msra.mxu1 %v17414_v61  ;;  %12496 = vmatprep.subr.bf16.mxu0 %v17279_v55  ;;  %v17510_v61 = vcombine.low %v6583_v52, %v6587_v59  ;;  %v6671_v11 = vld [vmem:[#allocation5 + $0xc40] sm:$0xff] }
 0x3d0   : > { %12537 = vmatprep.subr.bf16.mxu1 %v17407_v25  ;;  %v17638_v25 = vcombine.low %v6711_v63, %v6715_v16  ;;  %v6555_v63 = vld [vmem:[#allocation5 + $0x8a0] sm:$0xff] }
 0x3d1   : > { %v6679_v16 = vld [vmem:[#allocation5 + $0xc80] sm:$0xff] }
 0x3d2   : > { %12497 = vmatpush2.bf16.msra.mxu0 %v17278_v60  ;;  %v6567_v60 = vld [vmem:[#allocation5 + $0x900] sm:$0xff] }
 0x3d3   : > { %12538 = vmatpush2.bf16.msra.mxu1 %v17406_v29  ;;  %12498 = vmatprep.subr.bf16.mxu0 %v17271_v4  ;;  %v6571_v29 = vld [vmem:[#allocation5 + $0x920] sm:$0xff] }
 0x3d4   : > { %12539 = vmatprep.subr.bf16.mxu1 %v17399_v34  ;;  %v6695_v34 = vld [vmem:[#allocation5 + $0xd00] sm:$0xff]  ;;  %v17494_v52 = vcombine.low %v6567_v60, %v6571_v29 }
 0x3d5   : > { %v17623_v14 = vcombine.high %v6695_v34, %v6699_v35  ;;  %v17622_v59 = vcombine.low %v6695_v34, %v6699_v35  ;;  %v6675_v12 = vld [vmem:[#allocation5 + $0xc60] sm:$0xff] }
 0x3d6   : > { %12499 = vmatpush2.bf16.msra.mxu0 %v17270_v39  ;;  %v17495_v39 = vcombine.high %v6567_v60, %v6571_v29  ;;  %v17598_v60 = vcombine.low %v6671_v11, %v6675_v12  ;;  %v6655_v34 = vld [vmem:[#allocation5 + $0xbc0] sm:$0xff] }
 0x3d7   : > { %12540 = vmatpush2.bf16.msra.mxu1 %v17398_v40  ;;  %12550 = vmatprep.subr.bf16.mxu0 %v17519_v41  ;;  %v6559_v40 = vld [vmem:[#allocation5 + $0x8c0] sm:$0xff] }
 0x3d8   : > { %12591 = vmatprep.subr.bf16.mxu1 %v17647_v44  ;;  %v6563_v41 = vld [vmem:[#allocation5 + $0x8e0] sm:$0xff] }
 0x3d9   : > { %v6035_v15 = vpop.f32.mrf.mxu0  ;;  %12501 = vmatmul.mubr.bf16.vlgmr.msra.gmra.mxu0 %v19911_v57  ;;  %v6687_v44 = vld [vmem:[#allocation5 + $0xcc0] sm:$0xff]  ;;  %v17487_v0 = vcombine.high %v6559_v40, %v6563_v41 }
 0x3da   : > { %v6036_v13 = vadd.f32 %v6035_v15, %v1373_v50  ;;  %12542 = vmatmul.mubr.bf16.vlgmr.msra.gmra.mxu1 %v19913_v24  ;;  %12551 = vmatpush1.bf16.msra.mxu0 %v17518_v22  ;;  %v6076_v18 = vpop.f32.mrf.mxu1  ;;  %v17615_v50 = vcombine.high %v6687_v44, %v6691_v45  ;;  %v6551_v22 = vld [vmem:[#allocation5 + $0x880] sm:$0xff] }
 0x3db   : > { %12582 = vmatprep.mubr.bf16.mxu0 %v19917_v8  ;;  %12592 = vmatpush1.bf16.msra.mxu1 %v17646_v3  ;;  %v6037_v55 = vpop.f32.mrf.mxu0  ;;  %v6683_v3 = vld [vmem:[#allocation5 + $0xca0] sm:$0xff]  ;;  %v17479_v7 = vcombine.high %v6551_v22, %v6555_v63 }
 0x3dc   : > { %12623 = vmatprep.mubr.bf16.mxu1 %v19920_v49  ;;  %v6038_v26 = vadd.f32 %v6037_v55, %v1377_v48  ;;  %v19925_v27 = vadd.f32 %v6076_v18, %v6036_v13  ;;  %v6078_v54 = vpop.f32.mrf.mxu1  ;;  %12552 = vmatprep.subr.bf16.mxu0 %v17511_v5  ;;  %v17486_v48 = vcombine.low %v6559_v40, %v6563_v41  ;;  %v6543_v15 = vld [vmem:[#allocation5 + $0x840] sm:$0xff] }
 0x3dd   : > { %v6039_v4 = vpop.f32.mrf.mxu0  ;;  %12593 = vmatprep.subr.bf16.mxu1 %v17639_v10  ;;  %v17614_v5 = vcombine.low %v6687_v44, %v6691_v45  ;;  %v17607_v42 = vcombine.high %v6679_v16, %v6683_v3  ;;  %v6547_v10 = vld [vmem:[#allocation5 + $0x860] sm:$0xff]  ;;  %v17478_v13 = vcombine.low %v6551_v22, %v6555_v63  ;;  %v17606_v18 = vcombine.low %v6679_v16, %v6683_v3 }
 0x3de   : > { %v19927_v6 = vadd.f32 %v6078_v54, %v6038_v26  ;;  %12553 = vmatpush1.bf16.msra.mxu0 %v17510_v61  ;;  %v6080_v37 = vpop.f32.mrf.mxu1  ;;  %v17471_v61 = vcombine.high %v6543_v15, %v6547_v10  ;;  %v17599_v55 = vcombine.high %v6671_v11, %v6675_v12  ;;  %v6663_v26 = vld [vmem:[#allocation5 + $0xc00] sm:$0xff] }
 0x3df   : > { %12594 = vmatpush1.bf16.msra.mxu1 %v17638_v25  ;;  %v6040_v38 = vpop.f32.mrf.mxu0  ;;  %12554 = vmatprep.subr.bf16.mxu0 %v17503_v28  ;;  %v6535_v25 = vld [vmem:[#allocation5 + $0x800] sm:$0xff] }
 0x3e0   : > { %12595 = vmatprep.subr.bf16.mxu1 %v17631_v1  ;;  %v6081_v43 = vpop.f32.mrf.mxu1  ;;  %v6539_v28 = vld [vmem:[#allocation5 + $0x820] sm:$0xff]  ;;  %v17470_v1 = vcombine.low %v6543_v15, %v6547_v10 }
 0x3e1   : > { %v6667_v54 = vld [vmem:[#allocation5 + $0xc20] sm:$0xff]  ;;  %v17463_v29 = vcombine.high %v6535_v25, %v6539_v28  ;;  %v17462_v38 = vcombine.low %v6535_v25, %v6539_v28 }
 0x3e2   : > { %12555 = vmatpush1.bf16.msra.mxu0 %v17502_v36  ;;  %v17591_v4 = vcombine.high %v6663_v26, %v6667_v54  ;;  %v6659_v35 = vld [vmem:[#allocation5 + $0xbe0] sm:$0xff] }
 0x3e3   : > { %12596 = vmatpush1.bf16.msra.mxu1 %v17630_v21  ;;  %12556 = vmatprep.subr.bf16.mxu0 %v17495_v39  ;;  %v6783_v36 = vld [vmem:[#allocation5 + $0xfc0] sm:$0xff]  ;;  %v17590_v21 = vcombine.low %v6663_v26, %v6667_v54  ;;  %v17583_v39 = vcombine.high %v6655_v34, %v6659_v35  ;;  %v17582_v45 = vcombine.low %v6655_v34, %v6659_v35 }
 0x3e4   : > { %12597 = vmatprep.subr.bf16.mxu1 %v17623_v14  ;;  %v6787_v37 = vld [vmem:[#allocation5 + $0xfe0] sm:$0xff] }
 0x3e5   : > { %v17711_v14 = vcombine.high %v6783_v36, %v6787_v37  ;;  %v6647_v40 = vld [vmem:[#allocation5 + $0xb80] sm:$0xff] }
 0x3e6   : > { %12557 = vmatpush1.bf16.msra.mxu0 %v17494_v52  ;;  %v6651_v41 = vld [vmem:[#allocation5 + $0xba0] sm:$0xff]  ;;  %v17710_v52 = vcombine.low %v6783_v36, %v6787_v37 }
 0x3e7   : > { %12598 = vmatpush1.bf16.msra.mxu1 %v17622_v59  ;;  %12558 = vmatprep.subr.bf16.mxu0 %v17487_v0  ;;  %v6775_v43 = vld [vmem:[#allocation5 + $0xf80] sm:$0xff]  ;;  %v17575_v59 = vcombine.high %v6647_v40, %v6651_v41  ;;  %v17574_v3 = vcombine.low %v6647_v40, %v6651_v41 }
 0x3e8   : > { %12599 = vmatprep.subr.bf16.mxu1 %v17615_v50  ;;  %v6779_v44 = vld [vmem:[#allocation5 + $0xfa0] sm:$0xff] }
 0x3e9   : > { %v17703_v0 = vcombine.high %v6775_v43, %v6779_v44  ;;  %v6639_v50 = vld [vmem:[#allocation5 + $0xb40] sm:$0xff] }
 0x3ea   : > { %12559 = vmatpush1.bf16.msra.mxu0 %v17486_v48  ;;  %v6643_v22 = vld [vmem:[#allocation5 + $0xb60] sm:$0xff]  ;;  %v17702_v48 = vcombine.low %v6775_v43, %v6779_v44 }
 0x3eb   : > { %12600 = vmatpush1.bf16.msra.mxu1 %v17614_v5  ;;  %12560 = vmatprep.subr.bf16.mxu0 %v17479_v7  ;;  %v6767_v63 = vld [vmem:[#allocation5 + $0xf40] sm:$0xff]  ;;  %v17567_v5 = vcombine.high %v6639_v50, %v6643_v22  ;;  %v17566_v12 = vcombine.low %v6639_v50, %v6643_v22 }
 0x3ec   : > { %12601 = vmatprep.subr.bf16.mxu1 %v17607_v42  ;;  %v6771_v16 = vld [vmem:[#allocation5 + $0xf60] sm:$0xff] }
 0x3ed   : > { %v17695_v7 = vcombine.high %v6767_v63, %v6771_v16  ;;  %v6631_v42 = vld [vmem:[#allocation5 + $0xb00] sm:$0xff] }
 0x3ee   : > { %12561 = vmatpush1.bf16.msra.mxu0 %v17478_v13  ;;  %v6635_v15 = vld [vmem:[#allocation5 + $0xb20] sm:$0xff]  ;;  %v17694_v13 = vcombine.low %v6767_v63, %v6771_v16 }
 0x3ef   : > { %12602 = vmatpush1.bf16.msra.mxu1 %v17606_v18  ;;  %12562 = vmatprep.subr.bf16.mxu0 %v17471_v61  ;;  %v6759_v10 = vld [vmem:[#allocation5 + $0xf00] sm:$0xff]  ;;  %v17559_v18 = vcombine.high %v6631_v42, %v6635_v15  ;;  %v17558_v54 = vcombine.low %v6631_v42, %v6635_v15 }
 0x3f0   : > { %12603 = vmatprep.subr.bf16.mxu1 %v17599_v55  ;;  %v6763_v11 = vld [vmem:[#allocation5 + $0xf20] sm:$0xff] }
 0x3f1   : > { %v17687_v61 = vcombine.high %v6759_v10, %v6763_v11  ;;  %v6623_v55 = vld [vmem:[#allocation5 + $0xac0] sm:$0xff] }
 0x3f2   : > { %12563 = vmatpush1.bf16.msra.mxu0 %v17470_v1  ;;  %v6627_v25 = vld [vmem:[#allocation5 + $0xae0] sm:$0xff]  ;;  %v17686_v1 = vcombine.low %v6759_v10, %v6763_v11 }
 0x3f3   : > { %12604 = vmatpush1.bf16.msra.mxu1 %v17598_v60  ;;  %12564 = vmatprep.subr.bf16.mxu0 %v17463_v29  ;;  %v6751_v28 = vld [vmem:[#allocation5 + $0xec0] sm:$0xff]  ;;  %v17551_v60 = vcombine.high %v6623_v55, %v6627_v25  ;;  %v17550_v37 = vcombine.low %v6623_v55, %v6627_v25  ;;  %v6256_v25 = vmax.f32 %v19871_v51, 0.0 }
 0x3f4   : > { %12605 = vmatprep.subr.bf16.mxu1 %v17591_v4  ;;  %v6755_v26 = vld [vmem:[#allocation5 + $0xee0] sm:$0xff] }
 0x3f5   : > { %v17679_v29 = vcombine.high %v6751_v28, %v6755_v26  ;;  %v6615_v4 = vld [vmem:[#allocation5 + $0xa80] sm:$0xff]  ;;  %v19937_v51 = vpack.c.bf16 %v6256_v25, %v6256_v25 }
 0x3f6   : > { %12565 = vmatpush1.bf16.msra.mxu0 %v17462_v38  ;;  %v6619_v34 = vld [vmem:[#allocation5 + $0xaa0] sm:$0xff]  ;;  %v17678_v38 = vcombine.low %v6751_v28, %v6755_v26 }
 0x3f7   : > { %12606 = vmatpush1.bf16.msra.mxu1 %v17590_v21  ;;  %12566 = vmatprep.subr.bf16.mxu0 %v17583_v39  ;;  %v6743_v35 = vld [vmem:[#allocation5 + $0xe80] sm:$0xff]  ;;  %v17543_v21 = vcombine.high %v6615_v4, %v6619_v34  ;;  %v17542_v44 = vcombine.low %v6615_v4, %v6619_v34 }
 0x3f8   : > { %12607 = vmatprep.subr.bf16.mxu1 %v17711_v14  ;;  %v6747_v36 = vld [vmem:[#allocation5 + $0xea0] sm:$0xff] }
 0x3f9   : > { %v17671_v39 = vcombine.high %v6743_v35, %v6747_v36  ;;  %v6607_v14 = vld [vmem:[#allocation5 + $0xa40] sm:$0xff] }
 0x3fa   : > { %12567 = vmatpush2.bf16.msra.mxu0 %v17582_v45  ;;  %v6611_v40 = vld [vmem:[#allocation5 + $0xa60] sm:$0xff]  ;;  %v17670_v45 = vcombine.low %v6743_v35, %v6747_v36 }
 0x3fb   : > { %12608 = vmatpush2.bf16.msra.mxu1 %v17710_v52  ;;  %12568 = vmatprep.subr.bf16.mxu0 %v17575_v59  ;;  %v6735_v41 = vld [vmem:[#allocation5 + $0xe40] sm:$0xff]  ;;  %v17535_v52 = vcombine.high %v6607_v14, %v6611_v40  ;;  %v17534_v16 = vcombine.low %v6607_v14, %v6611_v40 }
 0x3fc   : > { %12609 = vmatprep.subr.bf16.mxu1 %v17703_v0  ;;  %v6739_v43 = vld [vmem:[#allocation5 + $0xe60] sm:$0xff] }
 0x3fd   : > { %v17663_v59 = vcombine.high %v6735_v41, %v6739_v43  ;;  %v6599_v0 = vld [vmem:[#allocation5 + $0xa00] sm:$0xff] }
 0x3fe   : > { %12569 = vmatpush2.bf16.msra.mxu0 %v17574_v3  ;;  %v6603_v50 = vld [vmem:[#allocation5 + $0xa20] sm:$0xff]  ;;  %v17662_v3 = vcombine.low %v6735_v41, %v6739_v43 }
 0x3ff   : > { %12610 = vmatpush2.bf16.msra.mxu1 %v17702_v48  ;;  %12570 = vmatprep.subr.bf16.mxu0 %v17567_v5  ;;  %v6727_v22 = vld [vmem:[#allocation5 + $0xe00] sm:$0xff]  ;;  %v17527_v48 = vcombine.high %v6599_v0, %v6603_v50  ;;  %v17526_v11 = vcombine.low %v6599_v0, %v6603_v50 }
 0x400   : > { %12611 = vmatprep.subr.bf16.mxu1 %v17695_v7  ;;  %v6731_v63 = vld [vmem:[#allocation5 + $0xe20] sm:$0xff] }
 0x401   : > { %v17655_v5 = vcombine.high %v6727_v22, %v6731_v63  ;;  %v6847_v7 = vld [vmem:[#allocation5 + $0x11c0] sm:$0xff] }
 0x402   : > { %12571 = vmatpush2.bf16.msra.mxu0 %v17566_v12  ;;  %v6851_v42 = vld [vmem:[#allocation5 + $0x11e0] sm:$0xff]  ;;  %v6251_v12 = vmax.f32 %v19822_v46, 0.0 }
 0x403   : > { %12612 = vmatpush2.bf16.msra.mxu1 %v17694_v13  ;;  %12572 = vmatprep.subr.bf16.mxu0 %v17559_v18  ;;  %v6975_v15 = vld [vmem:[#allocation5 + $0x15c0] sm:$0xff]  ;;  %v17654_v13 = vcombine.low %v6727_v22, %v6731_v63  ;;  %v17775_v18 = vcombine.high %v6847_v7, %v6851_v42 }
 0x404   : > { %12613 = vmatprep.subr.bf16.mxu1 %v17687_v61  ;;  %v6979_v10 = vld [vmem:[#allocation5 + $0x15e0] sm:$0xff]  ;;  %v6253_v61 = vmax.f32 %v19843_v20, 0.0  ;;  %v19933_v4 = vpack.c.bf16 %v6251_v12, %v6251_v12 }
 0x405   : > { %v17903_v55 = vcombine.high %v6975_v15, %v6979_v10  ;;  %v6839_v28 = vld [vmem:[#allocation5 + $0x1180] sm:$0xff]  ;;  %v17902_v46 = vcombine.low %v6975_v15, %v6979_v10 }
 0x406   : > { %12573 = vmatpush2.bf16.msra.mxu0 %v17558_v54  ;;  %v6843_v26 = vld [vmem:[#allocation5 + $0x11a0] sm:$0xff]  ;;  %v6258_v54 = vmax.f32 %v19895_v47, 0.0  ;;  %v19935_v34 = vpack.c.bf16 %v6253_v61, %v6253_v61 }
 0x407   : > { %12614 = vmatpush2.bf16.msra.mxu1 %v17686_v1  ;;  %12574 = vmatprep.subr.bf16.mxu0 %v17551_v60  ;;  %v17774_v1 = vcombine.low %v6847_v7, %v6851_v42  ;;  %v6967_v60 = vld [vmem:[#allocation5 + $0x1580] sm:$0xff]  ;;  %v17767_v20 = vcombine.high %v6839_v28, %v6843_v26  ;;  %v17766_v40 = vcombine.low %v6839_v28, %v6843_v26 }
 0x408   : > { %12615 = vmatprep.subr.bf16.mxu1 %v17679_v29  ;;  %v6971_v29 = vld [vmem:[#allocation5 + $0x15a0] sm:$0xff] }
 0x409   : > { %v6831_v35 = vld [vmem:[#allocation5 + $0x1140] sm:$0xff]  ;;  %v17895_v47 = vcombine.high %v6967_v60, %v6971_v29 }
 0x40a   : > { %12575 = vmatpush2.bf16.msra.mxu0 %v17550_v37  ;;  %v6835_v36 = vld [vmem:[#allocation5 + $0x1160] sm:$0xff] }
 0x40b   : > { %12616 = vmatpush2.bf16.msra.mxu1 %v17678_v38  ;;  %12576 = vmatprep.subr.bf16.mxu0 %v17543_v21  ;;  %v6959_v38 = vld [vmem:[#allocation5 + $0x1540] sm:$0xff] }
 0x40c   : > { %12617 = vmatprep.subr.bf16.mxu1 %v17671_v39  ;;  %v6963_v21 = vld [vmem:[#allocation5 + $0x1560] sm:$0xff]  ;;  %v19940_v39 = vpack.c.bf16 %v6258_v54, %v6258_v54 }
 0x40d   : > { %v6951_v22 = vld [vmem:[#allocation5 + $0x1500] sm:$0xff] }
 0x40e   : > { %12577 = vmatpush2.bf16.msra.mxu0 %v17542_v44  ;;  %v17894_v44 = vcombine.low %v6967_v60, %v6971_v29  ;;  %v6955_v63 = vld [vmem:[#allocation5 + $0x1520] sm:$0xff] }
 0x40f   : > { %12618 = vmatpush2.bf16.msra.mxu1 %v17670_v45  ;;  %12578 = vmatprep.subr.bf16.mxu0 %v17535_v52  ;;  %v17759_v45 = vcombine.high %v6831_v35, %v6835_v36  ;;  %v17887_v52 = vcombine.high %v6959_v38, %v6963_v21  ;;  %v17879_v42 = vcombine.high %v6951_v22, %v6955_v63  ;;  %v6815_v15 = vld [vmem:[#allocation5 + $0x10c0] sm:$0xff] }
 0x410   : > { %12619 = vmatprep.subr.bf16.mxu1 %v17663_v59  ;;  %v6823_v59 = vld [vmem:[#allocation5 + $0x1100] sm:$0xff]  ;;  %v17878_v61 = vcombine.low %v6951_v22, %v6955_v63 }
 0x411   : > { %v6819_v10 = vld [vmem:[#allocation5 + $0x10e0] sm:$0xff] }
 0x412   : > { %12579 = vmatpush2.bf16.msra.mxu0 %v17534_v16  ;;  %v17758_v16 = vcombine.low %v6831_v35, %v6835_v36  ;;  %v6943_v12 = vld [vmem:[#allocation5 + $0x14c0] sm:$0xff]  ;;  %v17742_v60 = vcombine.low %v6815_v15, %v6819_v10 }
 0x413   : > { %12620 = vmatpush2.bf16.msra.mxu1 %v17662_v3  ;;  %12580 = vmatprep.subr.bf16.mxu0 %v17527_v48  ;;  %v6807_v28 = vld [vmem:[#allocation5 + $0x1080] sm:$0xff] }
 0x414   : > { %12621 = vmatprep.subr.bf16.mxu1 %v17655_v5  ;;  %v17886_v5 = vcombine.low %v6959_v38, %v6963_v21  ;;  %v6811_v26 = vld [vmem:[#allocation5 + $0x10a0] sm:$0xff] }
 0x415   : > { %v6935_v54 = vld [vmem:[#allocation5 + $0x1480] sm:$0xff]  ;;  %v17734_v38 = vcombine.low %v6807_v28, %v6811_v26 }
 0x416   : > { %12581 = vmatpush2.bf16.msra.mxu0 %v17526_v11  ;;  %v6799_v35 = vld [vmem:[#allocation5 + $0x1040] sm:$0xff] }
 0x417   : > { %12622 = vmatpush2.bf16.msra.mxu1 %v17654_v13  ;;  %12632 = vmatprep.subr.bf16.mxu0 %v17775_v18  ;;  %v6947_v13 = vld [vmem:[#allocation5 + $0x14e0] sm:$0xff] }
 0x418   : > { %12673 = vmatprep.subr.bf16.mxu1 %v17903_v55  ;;  %v17743_v55 = vcombine.high %v6815_v15, %v6819_v10  ;;  %v17871_v25 = vcombine.high %v6943_v12, %v6947_v13  ;;  %v17870_v29 = vcombine.low %v6943_v12, %v6947_v13  ;;  %v6803_v36 = vld [vmem:[#allocation5 + $0x1060] sm:$0xff] }
 0x419   : > { %v6117_v37 = vpop.f32.mrf.mxu0  ;;  %12583 = vmatmul.mubr.bf16.vlgmr.msra.gmra.mxu0 %v19933_v4  ;;  %v6903_v12 = vld [vmem:[#allocation5 + $0x1380] sm:$0xff] }
 0x41a   : > { %v19943_v14 = vadd.f32 %v6117_v37, %v19925_v27  ;;  %12624 = vmatmul.mubr.bf16.vlgmr.msra.gmra.mxu1 %v19935_v34  ;;  %12633 = vmatpush1.bf16.msra.mxu0 %v17774_v1  ;;  %v19946_v41 = vpop.f32.mrf.mxu1  ;;  %v6827_v27 = vld [vmem:[#allocation5 + $0x1120] sm:$0xff] }
 0x41b   : > { %12664 = vmatprep.mubr.bf16.mxu0 %v19937_v51  ;;  %12674 = vmatpush1.bf16.msra.mxu1 %v17902_v46  ;;  %v19949_v43 = vpop.f32.mrf.mxu0  ;;  %v17751_v7 = vcombine.high %v6823_v59, %v6827_v27  ;;  %v17750_v18 = vcombine.low %v6823_v59, %v6827_v27  ;;  %v6939_v1 = vld [vmem:[#allocation5 + $0x14a0] sm:$0xff]  ;;  %v17735_v46 = vcombine.high %v6807_v28, %v6811_v26 }
 0x41c   : > { %12705 = vmatprep.mubr.bf16.mxu1 %v19940_v39  ;;  %12634 = vmatprep.subr.bf16.mxu0 %v17767_v20  ;;  %v19952_v0 = vpop.f32.mrf.mxu1  ;;  %v17863_v20 = vcombine.high %v6935_v54, %v6939_v1  ;;  %v6927_v37 = vld [vmem:[#allocation5 + $0x1440] sm:$0xff]  ;;  %v17862_v21 = vcombine.low %v6935_v54, %v6939_v1 }
 0x41d   : > { %v6121_v50 = vpop.f32.mrf.mxu0  ;;  %12675 = vmatprep.subr.bf16.mxu1 %v17895_v47  ;;  %v6931_v47 = vld [vmem:[#allocation5 + $0x1460] sm:$0xff] }
 0x41e   : > { %12635 = vmatpush1.bf16.msra.mxu0 %v17766_v40  ;;  %v6162_v3 = vpop.f32.mrf.mxu1  ;;  %v17727_v40 = vcombine.high %v6799_v35, %v6803_v36  ;;  %v6919_v59 = vld [vmem:[#allocation5 + $0x1400] sm:$0xff]  ;;  %v17726_v50 = vcombine.low %v6799_v35, %v6803_v36  ;;  %v17854_v22 = vcombine.low %v6927_v37, %v6931_v47 }
 0x41f   : > { %12676 = vmatpush1.bf16.msra.mxu1 %v17894_v44  ;;  %v6122_v48 = vpop.f32.mrf.mxu0  ;;  %12636 = vmatprep.subr.bf16.mxu0 %v17759_v45  ;;  %v17855_v44 = vcombine.high %v6927_v37, %v6931_v47  ;;  %v6791_v45 = vld [vmem:[#allocation5 + $0x1000] sm:$0xff] }
 0x420   : > { %12677 = vmatprep.subr.bf16.mxu1 %v17887_v52  ;;  %v6163_v11 = vpop.f32.mrf.mxu1  ;;  %v6795_v52 = vld [vmem:[#allocation5 + $0x1020] sm:$0xff] }
 0x421   : > { %v6923_v27 = vld [vmem:[#allocation5 + $0x1420] sm:$0xff]  ;;  %v17719_v63 = vcombine.high %v6791_v45, %v6795_v52 }
 0x422   : > { %12637 = vmatpush1.bf16.msra.mxu0 %v17758_v16  ;;  %v17847_v16 = vcombine.high %v6919_v59, %v6923_v27  ;;  %v6911_v3 = vld [vmem:[#allocation5 + $0x13c0] sm:$0xff]  ;;  %v17846_v15 = vcombine.low %v6919_v59, %v6923_v27 }
 0x423   : > { %12678 = vmatpush1.bf16.msra.mxu1 %v17886_v5  ;;  %12638 = vmatprep.subr.bf16.mxu0 %v17751_v7  ;;  %v6915_v48 = vld [vmem:[#allocation5 + $0x13e0] sm:$0xff] }
 0x424   : > { %12679 = vmatprep.subr.bf16.mxu1 %v17879_v42  ;;  %v7039_v5 = vld [vmem:[#allocation5 + $0x17c0] sm:$0xff]  ;;  %v17718_v42 = vcombine.low %v6791_v45, %v6795_v52  ;;  %v17839_v10 = vcombine.high %v6911_v3, %v6915_v48 }
 0x425   : > { %v7043_v7 = vld [vmem:[#allocation5 + $0x17e0] sm:$0xff] }
 0x426   : > { %12639 = vmatpush1.bf16.msra.mxu0 %v17750_v18  ;;  %v17967_v11 = vcombine.high %v7039_v5, %v7043_v7  ;;  %v6907_v13 = vld [vmem:[#allocation5 + $0x13a0] sm:$0xff] }
 0x427   : > { %12680 = vmatpush1.bf16.msra.mxu1 %v17878_v61  ;;  %12640 = vmatprep.subr.bf16.mxu0 %v17743_v55  ;;  %v7031_v18 = vld [vmem:[#allocation5 + $0x1780] sm:$0xff]  ;;  %v17838_v55 = vcombine.low %v6911_v3, %v6915_v48  ;;  %v17831_v28 = vcombine.high %v6903_v12, %v6907_v13 }
 0x428   : > { %12681 = vmatprep.subr.bf16.mxu1 %v17871_v25  ;;  %v7035_v61 = vld [vmem:[#allocation5 + $0x17a0] sm:$0xff]  ;;  %v17966_v25 = vcombine.low %v7039_v5, %v7043_v7 }
 0x429   : > { %v17959_v26 = vcombine.high %v7031_v18, %v7035_v61  ;;  %v6895_v54 = vld [vmem:[#allocation5 + $0x1340] sm:$0xff] }
 0x42a   : > { %12641 = vmatpush1.bf16.msra.mxu0 %v17742_v60  ;;  %v6899_v1 = vld [vmem:[#allocation5 + $0x1360] sm:$0xff] }
 0x42b   : > { %12682 = vmatpush1.bf16.msra.mxu1 %v17870_v29  ;;  %12642 = vmatprep.subr.bf16.mxu0 %v17735_v46  ;;  %v7023_v60 = vld [vmem:[#allocation5 + $0x1740] sm:$0xff]  ;;  %v17830_v46 = vcombine.low %v6903_v12, %v6907_v13  ;;  %v17823_v35 = vcombine.high %v6895_v54, %v6899_v1 }
 0x42c   : > { %12683 = vmatprep.subr.bf16.mxu1 %v17863_v20  ;;  %v7027_v29 = vld [vmem:[#allocation5 + $0x1760] sm:$0xff]  ;;  %v17958_v20 = vcombine.low %v7031_v18, %v7035_v61 }
 0x42d   : > { %v17951_v36 = vcombine.high %v7023_v60, %v7027_v29  ;;  %v6887_v37 = vld [vmem:[#allocation5 + $0x1300] sm:$0xff] }
 0x42e   : > { %12643 = vmatpush1.bf16.msra.mxu0 %v17734_v38  ;;  %v6891_v47 = vld [vmem:[#allocation5 + $0x1320] sm:$0xff] }
 0x42f   : > { %12684 = vmatpush1.bf16.msra.mxu1 %v17862_v21  ;;  %12644 = vmatprep.subr.bf16.mxu0 %v17727_v40  ;;  %v7015_v38 = vld [vmem:[#allocation5 + $0x1700] sm:$0xff]  ;;  %v17822_v40 = vcombine.low %v6895_v54, %v6899_v1  ;;  %v17815_v45 = vcombine.high %v6887_v37, %v6891_v47 }
 0x430   : > { %12685 = vmatprep.subr.bf16.mxu1 %v17855_v44  ;;  %v7019_v21 = vld [vmem:[#allocation5 + $0x1720] sm:$0xff]  ;;  %v17950_v44 = vcombine.low %v7023_v60, %v7027_v29 }
 0x431   : > { %v17943_v52 = vcombine.high %v7015_v38, %v7019_v21  ;;  %v6879_v59 = vld [vmem:[#allocation5 + $0x12c0] sm:$0xff] }
 0x432   : > { %12645 = vmatpush1.bf16.msra.mxu0 %v17726_v50  ;;  %v6883_v27 = vld [vmem:[#allocation5 + $0x12e0] sm:$0xff] }
 0x433   : > { %12686 = vmatpush1.bf16.msra.mxu1 %v17854_v22  ;;  %12646 = vmatprep.subr.bf16.mxu0 %v17719_v63  ;;  %v7007_v50 = vld [vmem:[#allocation5 + $0x16c0] sm:$0xff]  ;;  %v17814_v63 = vcombine.low %v6887_v37, %v6891_v47  ;;  %v17807_v3 = vcombine.high %v6879_v59, %v6883_v27 }
 0x434   : > { %12687 = vmatprep.subr.bf16.mxu1 %v17847_v16  ;;  %v7011_v22 = vld [vmem:[#allocation5 + $0x16e0] sm:$0xff]  ;;  %v17942_v16 = vcombine.low %v7015_v38, %v7019_v21 }
 0x435   : > { %v17935_v48 = vcombine.high %v7007_v50, %v7011_v22  ;;  %v6871_v5 = vld [vmem:[#allocation5 + $0x1280] sm:$0xff] }
 0x436   : > { %12647 = vmatpush1.bf16.msra.mxu0 %v17718_v42  ;;  %v6875_v7 = vld [vmem:[#allocation5 + $0x12a0] sm:$0xff] }
 0x437   : > { %12688 = vmatpush1.bf16.msra.mxu1 %v17846_v15  ;;  %12648 = vmatprep.subr.bf16.mxu0 %v17839_v10  ;;  %v6999_v42 = vld [vmem:[#allocation5 + $0x1680] sm:$0xff]  ;;  %v17806_v10 = vcombine.low %v6879_v59, %v6883_v27  ;;  %v17799_v12 = vcombine.high %v6871_v5, %v6875_v7  ;;  %v6255_v59 = vmax.f32 %v19865_v19, 0.0 }
 0x438   : > { %12689 = vmatprep.subr.bf16.mxu1 %v17967_v11  ;;  %v7003_v15 = vld [vmem:[#allocation5 + $0x16a0] sm:$0xff]  ;;  %v17934_v11 = vcombine.low %v7007_v50, %v7011_v22  ;;  %v6257_v22 = vmax.f32 %v19893_v58, 0.0 }
 0x439   : > { %v17927_v13 = vcombine.high %v6999_v42, %v7003_v15  ;;  %v6863_v18 = vld [vmem:[#allocation5 + $0x1240] sm:$0xff] }
 0x43a   : > { %12649 = vmatpush2.bf16.msra.mxu0 %v17838_v55  ;;  %v6867_v61 = vld [vmem:[#allocation5 + $0x1260] sm:$0xff] }
 0x43b   : > { %12690 = vmatpush2.bf16.msra.mxu1 %v17966_v25  ;;  %12650 = vmatprep.subr.bf16.mxu0 %v17831_v28  ;;  %v6991_v55 = vld [vmem:[#allocation5 + $0x1640] sm:$0xff]  ;;  %v17798_v28 = vcombine.low %v6871_v5, %v6875_v7  ;;  %v17791_v54 = vcombine.high %v6863_v18, %v6867_v61 }
 0x43c   : > { %12691 = vmatprep.subr.bf16.mxu1 %v17959_v26  ;;  %v6995_v25 = vld [vmem:[#allocation5 + $0x1660] sm:$0xff]  ;;  %v17926_v26 = vcombine.low %v6999_v42, %v7003_v15  ;;  %v19960_v42 = vpack.c.bf16 %v6255_v59, %v6255_v59  ;;  %v19962_v15 = vpack.c.bf16 %v6257_v22, %v6257_v22 }
 0x43d   : > { %v17919_v1 = vcombine.high %v6991_v55, %v6995_v25  ;;  %v6855_v60 = vld [vmem:[#allocation5 + $0x1200] sm:$0xff] }
 0x43e   : > { %12651 = vmatpush2.bf16.msra.mxu0 %v17830_v46  ;;  %v6859_v29 = vld [vmem:[#allocation5 + $0x1220] sm:$0xff] }
 0x43f   : > { %12692 = vmatpush2.bf16.msra.mxu1 %v17958_v20  ;;  %12652 = vmatprep.subr.bf16.mxu0 %v17823_v35  ;;  %v6983_v46 = vld [vmem:[#allocation5 + $0x1600] sm:$0xff]  ;;  %v17790_v35 = vcombine.low %v6863_v18, %v6867_v61  ;;  %v17783_v37 = vcombine.high %v6855_v60, %v6859_v29 }
 0x440   : > { %12693 = vmatprep.subr.bf16.mxu1 %v17951_v36  ;;  %v6987_v20 = vld [vmem:[#allocation5 + $0x1620] sm:$0xff]  ;;  %v17918_v36 = vcombine.low %v6991_v55, %v6995_v25 }
 0x441   : > { %v17911_v47 = vcombine.high %v6983_v46, %v6987_v20  ;;  %v7103_v38 = vld [vmem:[#allocation5 + $0x19c0] sm:$0xff]  ;;  %v17910_v27 = vcombine.low %v6983_v46, %v6987_v20 }
 0x442   : > { %12653 = vmatpush2.bf16.msra.mxu0 %v17822_v40  ;;  %v7107_v21 = vld [vmem:[#allocation5 + $0x19e0] sm:$0xff]  ;;  %v6120_v40 = vadd.f32 %v19949_v43, %v19927_v6 }
 0x443   : > { %12694 = vmatpush2.bf16.msra.mxu1 %v17950_v44  ;;  %12654 = vmatprep.subr.bf16.mxu0 %v17815_v45  ;;  %v7231_v44 = vld [vmem:[#allocation5 + $0x1dc0] sm:$0xff]  ;;  %v18031_v50 = vcombine.high %v7103_v38, %v7107_v21  ;;  %v18030_v7 = vcombine.low %v7103_v38, %v7107_v21 }
 0x444   : > { %12695 = vmatprep.subr.bf16.mxu1 %v17943_v52  ;;  %v7235_v45 = vld [vmem:[#allocation5 + $0x1de0] sm:$0xff]  ;;  %v17782_v52 = vcombine.low %v6855_v60, %v6859_v29 }
 0x445   : > { %v7099_v6 = vld [vmem:[#allocation5 + $0x19a0] sm:$0xff]  ;;  %v18158_v19 = vcombine.low %v7231_v44, %v7235_v45 }
 0x446   : > { %12655 = vmatpush2.bf16.msra.mxu0 %v17814_v63  ;;  %v1385_v63 = vrot.slane %v19849_v53, %v19898_v32  ;;  %v7223_v43 = vld [vmem:[#allocation5 + $0x1d80] sm:$0xff] }
 0x447   : > { %12696 = vmatpush2.bf16.msra.mxu1 %v17942_v16  ;;  %12656 = vmatprep.subr.bf16.mxu0 %v17807_v3  ;;  %v18159_v16 = vcombine.high %v7231_v44, %v7235_v45  ;;  %v7095_v3 = vld [vmem:[#allocation5 + $0x1980] sm:$0xff] }
 0x448   : > { %12697 = vmatprep.subr.bf16.mxu1 %v17935_v48  ;;  %v6260_v48 = vmax.f32 %v6120_v40, 0.0  ;;  %v7227_v5 = vld [vmem:[#allocation5 + $0x1da0] sm:$0xff]  ;;  %v6161_v58 = vadd.f32 %v19952_v0, %v1385_v63 }
 0x449   : > { %v7215_v55 = vld [vmem:[#allocation5 + $0x1d40] sm:$0xff] }
 0x44a   : > { %12657 = vmatpush2.bf16.msra.mxu0 %v17806_v10  ;;  %v18023_v10 = vcombine.high %v7095_v3, %v7099_v6  ;;  %v19965_v18 = vpack.c.bf16 %v6260_v48, %v6260_v48  ;;  %v7219_v25 = vld [vmem:[#allocation5 + $0x1d60] sm:$0xff] }
 0x44b   : > { %12698 = vmatpush2.bf16.msra.mxu1 %v17934_v11  ;;  %12658 = vmatprep.subr.bf16.mxu0 %v17799_v12  ;;  %v18151_v11 = vcombine.high %v7223_v43, %v7227_v5  ;;  %v7087_v12 = vld [vmem:[#allocation5 + $0x1940] sm:$0xff]  ;;  %v18143_v46 = vcombine.high %v7215_v55, %v7219_v25  ;;  %v18142_v45 = vcombine.low %v7215_v55, %v7219_v25 }
 0x44c   : > { %12699 = vmatprep.subr.bf16.mxu1 %v17927_v13  ;;  %v7091_v13 = vld [vmem:[#allocation5 + $0x1960] sm:$0xff] }
 0x44d   : > { %v7079_v20 = vld [vmem:[#allocation5 + $0x1900] sm:$0xff]  ;;  %v18014_v21 = vcombine.low %v7087_v12, %v7091_v13 }
 0x44e   : > { %12659 = vmatpush2.bf16.msra.mxu0 %v17798_v28  ;;  %v7075_v22 = vld [vmem:[#allocation5 + $0x18e0] sm:$0xff] }
 0x44f   : > { %12700 = vmatpush2.bf16.msra.mxu1 %v17926_v26  ;;  %12660 = vmatprep.subr.bf16.mxu0 %v17791_v54  ;;  %v18022_v26 = vcombine.low %v7095_v3, %v7099_v6  ;;  %v18150_v54 = vcombine.low %v7223_v43, %v7227_v5  ;;  %v7203_v3 = vld [vmem:[#allocation5 + $0x1ce0] sm:$0xff] }
 0x450   : > { %12701 = vmatprep.subr.bf16.mxu1 %v17919_v1  ;;  %v18015_v1 = vcombine.high %v7087_v12, %v7091_v13 }
 0x452   : > { %12661 = vmatpush2.bf16.msra.mxu0 %v17790_v35  ;;  %v7083_v35 = vld [vmem:[#allocation5 + $0x1920] sm:$0xff] }
 0x453   : > { %12702 = vmatpush2.bf16.msra.mxu1 %v17918_v36  ;;  %12662 = vmatprep.subr.bf16.mxu0 %v17783_v37  ;;  %v7207_v37 = vld [vmem:[#allocation5 + $0x1d00] sm:$0xff]  ;;  %v18006_v6 = vcombine.low %v7079_v20, %v7083_v35 }
 0x454   : > { %12703 = vmatprep.subr.bf16.mxu1 %v17911_v47  ;;  %v7211_v47 = vld [vmem:[#allocation5 + $0x1d20] sm:$0xff] }
 0x455   : > { %v18134_v43 = vcombine.low %v7207_v37, %v7211_v47 }
 0x456   : > { %12663 = vmatpush2.bf16.msra.mxu0 %v17782_v52  ;;  %v18007_v52 = vcombine.high %v7079_v20, %v7083_v35  ;;  %v7047_v35 = vld [vmem:[#allocation5 + $0x1800] sm:$0xff] }
 0x457   : > { %12704 = vmatpush2.bf16.msra.mxu1 %v17910_v27  ;;  %12714 = vmatprep.subr.bf16.mxu0 %v18031_v50  ;;  %v18135_v27 = vcombine.high %v7207_v37, %v7211_v47  ;;  %v7071_v50 = vld [vmem:[#allocation5 + $0x18c0] sm:$0xff] }
 0x458   : > { %12755 = vmatprep.subr.bf16.mxu1 %v18159_v16  ;;  %v7199_v16 = vld [vmem:[#allocation5 + $0x1cc0] sm:$0xff]  ;;  %v17999_v5 = vcombine.high %v7071_v50, %v7075_v22  ;;  %v17998_v12 = vcombine.low %v7071_v50, %v7075_v22 }
 0x459   : > { %v19967_v61 = vpop.f32.mrf.mxu0  ;;  %12665 = vmatmul.mubr.bf16.vlgmr.msra.gmra.mxu0 %v19960_v42  ;;  %v18126_v13 = vcombine.low %v7199_v16, %v7203_v3  ;;  %v7175_v37 = vld [vmem:[#allocation5 + $0x1c00] sm:$0xff] }
 0x45a   : > { %12706 = vmatmul.mubr.bf16.vlgmr.msra.gmra.mxu1 %v19962_v15  ;;  %12715 = vmatpush1.bf16.msra.mxu0 %v18030_v7  ;;  %v19971_v28 = vpop.f32.mrf.mxu1  ;;  %v18127_v7 = vcombine.high %v7199_v16, %v7203_v3  ;;  %v7179_v47 = vld [vmem:[#allocation5 + $0x1c20] sm:$0xff] }
 0x45b   : > { %12746 = vmatprep.mubr.bf16.mxu0 %v19965_v18  ;;  %12756 = vmatpush1.bf16.msra.mxu1 %v18158_v19  ;;  %v6201_v0 = vpop.f32.mrf.mxu0  ;;  %v7063_v19 = vld [vmem:[#allocation5 + $0x1880] sm:$0xff]  ;;  %v18102_v22 = vcombine.low %v7175_v37, %v7179_v47 }
 0x45c   : > { %v6202_v60 = vadd.f32 %v6201_v0, %v6161_v58  ;;  %v6242_v29 = vpop.f32.mrf.mxu1  ;;  %12716 = vmatprep.subr.bf16.mxu0 %v18023_v10  ;;  %12757 = vmatprep.subr.bf16.mxu1 %v18151_v11  ;;  %v7067_v58 = vld [vmem:[#allocation5 + $0x18a0] sm:$0xff] }
 0x45d   : > { %v6203_v36 = vpop.f32.mrf.mxu0  ;;  %v7191_v10 = vld [vmem:[#allocation5 + $0x1c80] sm:$0xff]  ;;  %v17991_v55 = vcombine.high %v7063_v19, %v7067_v58 }
 0x45e   : > { %v6243_v38 = vadd.f32 %v6242_v29, %v6202_v60  ;;  %12717 = vmatpush1.bf16.msra.mxu0 %v18022_v26  ;;  %v6244_v40 = vpop.f32.mrf.mxu1  ;;  %v7195_v11 = vld [vmem:[#allocation5 + $0x1ca0] sm:$0xff]  ;;  %v17990_v60 = vcombine.low %v7063_v19, %v7067_v58 }
 0x45f   : > { %12758 = vmatpush1.bf16.msra.mxu1 %v18150_v54  ;;  %v6204_v44 = vpop.f32.mrf.mxu0  ;;  %12718 = vmatprep.subr.bf16.mxu0 %v18015_v1  ;;  %v18119_v25 = vcombine.high %v7191_v10, %v7195_v11  ;;  %v7055_v26 = vld [vmem:[#allocation5 + $0x1840] sm:$0xff]  ;;  %v18118_v29 = vcombine.low %v7191_v10, %v7195_v11 }
 0x460   : > { %v6262_v59 = vmax.f32 %v6243_v38, 0.0  ;;  %12759 = vmatprep.subr.bf16.mxu1 %v18143_v46  ;;  %v6245_v63 = vpop.f32.mrf.mxu1  ;;  %v7059_v0 = vld [vmem:[#allocation5 + $0x1860] sm:$0xff]  ;;  %v18103_v44 = vcombine.high %v7175_v37, %v7179_v47 }
 0x461   : > { %v7183_v54 = vld [vmem:[#allocation5 + $0x1c40] sm:$0xff]  ;;  %v17983_v46 = vcombine.high %v7055_v26, %v7059_v0  ;;  %v17982_v38 = vcombine.low %v7055_v26, %v7059_v0 }
 0x462   : > { %v19974_v48 = vpack.c.bf16 %v6262_v59, %v6262_v59  ;;  %12719 = vmatpush1.bf16.msra.mxu0 %v18014_v21  ;;  %v7187_v1 = vld [vmem:[#allocation5 + $0x1c60] sm:$0xff] }
 0x463   : > { %12760 = vmatpush1.bf16.msra.mxu1 %v18142_v45  ;;  %12720 = vmatprep.subr.bf16.mxu0 %v18007_v52  ;;  %v18111_v20 = vcombine.high %v7183_v54, %v7187_v1  ;;  %v7051_v36 = vld [vmem:[#allocation5 + $0x1820] sm:$0xff]  ;;  %v18110_v21 = vcombine.low %v7183_v54, %v7187_v1 }
 0x464   : > { %12787 = vmatprep.mubr.bf16.mxu1 %v19974_v48  ;;  %12761 = vmatprep.subr.bf16.mxu1 %v18135_v27  ;;  %v17975_v40 = vcombine.high %v7047_v35, %v7051_v36  ;;  %v7167_v45 = vld [vmem:[#allocation5 + $0x1bc0] sm:$0xff]  ;;  %v17974_v50 = vcombine.low %v7047_v35, %v7051_v36 }
 0x465   : > { %v7171_v52 = vld [vmem:[#allocation5 + $0x1be0] sm:$0xff] }
 0x466   : > { %12721 = vmatpush1.bf16.msra.mxu0 %v18006_v6  ;;  %v7295_v59 = vld [vmem:[#allocation5 + $0x1fc0] sm:$0xff]  ;;  %v18095_v63 = vcombine.high %v7167_v45, %v7171_v52 }
 0x467   : > { %12762 = vmatpush1.bf16.msra.mxu1 %v18134_v43  ;;  %12722 = vmatprep.subr.bf16.mxu0 %v17999_v5  ;;  %v7299_v27 = vld [vmem:[#allocation5 + $0x1fe0] sm:$0xff] }
 0x468   : > { %12763 = vmatprep.subr.bf16.mxu1 %v18127_v7  ;;  %v18223_v16 = vcombine.high %v7295_v59, %v7299_v27  ;;  %v7159_v3 = vld [vmem:[#allocation5 + $0x1b80] sm:$0xff]  ;;  %v18094_v7 = vcombine.low %v7167_v45, %v7171_v52  ;;  %v18222_v19 = vcombine.low %v7295_v59, %v7299_v27  ;;  %v1381_v59 = vrot.slane %v19849_v53, %v19834_v33 }
 0x469   : > { %v7163_v6 = vld [vmem:[#allocation5 + $0x1ba0] sm:$0xff] }
 0x46a   : > { %12723 = vmatpush1.bf16.msra.mxu0 %v17998_v12  ;;  %v7287_v43 = vld [vmem:[#allocation5 + $0x1f80] sm:$0xff]  ;;  %v18087_v58 = vcombine.high %v7159_v3, %v7163_v6 }
 0x46b   : > { %12764 = vmatpush1.bf16.msra.mxu1 %v18126_v13  ;;  %12724 = vmatprep.subr.bf16.mxu0 %v17991_v55  ;;  %v7291_v5 = vld [vmem:[#allocation5 + $0x1fa0] sm:$0xff] }
 0x46c   : > { %12765 = vmatprep.subr.bf16.mxu1 %v18119_v25  ;;  %v18215_v10 = vcombine.high %v7287_v43, %v7291_v5  ;;  %v7151_v11 = vld [vmem:[#allocation5 + $0x1b40] sm:$0xff]  ;;  %v18086_v25 = vcombine.low %v7159_v3, %v7163_v6  ;;  %v18214_v26 = vcombine.low %v7287_v43, %v7291_v5  ;;  %v6159_v5 = vadd.f32 %v19946_v41, %v1381_v59 }
 0x46d   : > { %v7155_v12 = vld [vmem:[#allocation5 + $0x1b60] sm:$0xff] }
 0x46e   : > { %12725 = vmatpush1.bf16.msra.mxu0 %v17990_v60  ;;  %v7279_v13 = vld [vmem:[#allocation5 + $0x1f40] sm:$0xff]  ;;  %v18079_v0 = vcombine.high %v7151_v11, %v7155_v12 }
 0x46f   : > { %12766 = vmatpush1.bf16.msra.mxu1 %v18118_v29  ;;  %12726 = vmatprep.subr.bf16.mxu0 %v17983_v46  ;;  %v7283_v55 = vld [vmem:[#allocation5 + $0x1f60] sm:$0xff] }
 0x470   : > { %12767 = vmatprep.subr.bf16.mxu1 %v18111_v20  ;;  %v18207_v54 = vcombine.high %v7279_v13, %v7283_v55  ;;  %v7143_v1 = vld [vmem:[#allocation5 + $0x1b00] sm:$0xff]  ;;  %v18078_v20 = vcombine.low %v7151_v11, %v7155_v12  ;;  %v18206_v35 = vcombine.low %v7279_v13, %v7283_v55  ;;  %v6200_v55 = vadd.f32 %v19967_v61, %v6159_v5  ;;  %v6340_v61 = vld [vmem:[#allocation5 + $0x1e8] sm:$0xff] }
 0x471   : > { %v7147_v60 = vld [vmem:[#allocation5 + $0x1b20] sm:$0xff] }
 0x472   : > { %12727 = vmatpush1.bf16.msra.mxu0 %v17982_v38  ;;  %v7271_v29 = vld [vmem:[#allocation5 + $0x1f00] sm:$0xff]  ;;  %v18071_v36 = vcombine.high %v7143_v1, %v7147_v60 }
 0x473   : > { %12768 = vmatpush1.bf16.msra.mxu1 %v18110_v21  ;;  %12728 = vmatprep.subr.bf16.mxu0 %v17975_v40  ;;  %v7275_v46 = vld [vmem:[#allocation5 + $0x1f20] sm:$0xff] }
 0x474   : > { %12769 = vmatprep.subr.bf16.mxu1 %v18103_v44  ;;  %v18199_v37 = vcombine.high %v7271_v29, %v7275_v46  ;;  %v7135_v47 = vld [vmem:[#allocation5 + $0x1ac0] sm:$0xff]  ;;  %v18070_v44 = vcombine.low %v7143_v1, %v7147_v60  ;;  %v18198_v45 = vcombine.low %v7271_v29, %v7275_v46 }
 0x475   : > { %v7139_v38 = vld [vmem:[#allocation5 + $0x1ae0] sm:$0xff] }
 0x476   : > { %12729 = vmatpush1.bf16.msra.mxu0 %v17974_v50  ;;  %v7263_v21 = vld [vmem:[#allocation5 + $0x1ec0] sm:$0xff]  ;;  %v18063_v52 = vcombine.high %v7135_v47, %v7139_v38  ;;  %v18062_v3 = vcombine.low %v7135_v47, %v7139_v38  ;;  %v6464_v47 = vld [vmem:[#allocation5 + $0x5c8] sm:$0xff] }
 0x477   : > { %12770 = vmatpush1.bf16.msra.mxu1 %v18102_v22  ;;  %12730 = vmatprep.subr.bf16.mxu0 %v18095_v63  ;;  %v7267_v40 = vld [vmem:[#allocation5 + $0x1ee0] sm:$0xff]  ;;  %v6468_v38 = vld [vmem:[#allocation5 + $0x5e8] sm:$0xff] }
 0x478   : > { %12771 = vmatprep.subr.bf16.mxu1 %v18223_v16  ;;  %v18191_v27 = vcombine.high %v7263_v21, %v7267_v40  ;;  %v7127_v50 = vld [vmem:[#allocation5 + $0x1a80] sm:$0xff]  ;;  %v18190_v6 = vcombine.low %v7263_v21, %v7267_v40 }
 0x479   : > { %v7131_v22 = vld [vmem:[#allocation5 + $0x1aa0] sm:$0xff] }
 0x47a   : > { %12731 = vmatpush2.bf16.msra.mxu0 %v18094_v7  ;;  %v7255_v63 = vld [vmem:[#allocation5 + $0x1e80] sm:$0xff]  ;;  %v18055_v43 = vcombine.high %v7127_v50, %v7131_v22  ;;  %v18054_v11 = vcombine.low %v7127_v50, %v7131_v22  ;;  %v6332_v50 = vld [vmem:[#allocation5 + $0x1a8] sm:$0xff] }
 0x47b   : > { %12772 = vmatpush2.bf16.msra.mxu1 %v18222_v19  ;;  %12732 = vmatprep.subr.bf16.mxu0 %v18087_v58  ;;  %v7259_v16 = vld [vmem:[#allocation5 + $0x1ea0] sm:$0xff] }
 0x47c   : > { %12773 = vmatprep.subr.bf16.mxu1 %v18215_v10  ;;  %v18183_v7 = vcombine.high %v7255_v63, %v7259_v16  ;;  %v7119_v19 = vld [vmem:[#allocation5 + $0x1a40] sm:$0xff]  ;;  %v18182_v12 = vcombine.low %v7255_v63, %v7259_v16  ;;  %v6456_v16 = vld [vmem:[#allocation5 + $0x588] sm:$0xff] }
 0x47d   : > { %v7123_v58 = vld [vmem:[#allocation5 + $0x1a60] sm:$0xff] }
 0x47e   : > { %12733 = vmatpush2.bf16.msra.mxu0 %v18086_v25  ;;  %v7247_v10 = vld [vmem:[#allocation5 + $0x1e40] sm:$0xff]  ;;  %v18047_v13 = vcombine.high %v7119_v19, %v7123_v58  ;;  %v18046_v1 = vcombine.low %v7119_v19, %v7123_v58  ;;  %v6320_v19 = vld [vmem:[#allocation5 + $0x148] sm:$0xff] }
 0x47f   : > { %12774 = vmatpush2.bf16.msra.mxu1 %v18214_v26  ;;  %12734 = vmatprep.subr.bf16.mxu0 %v18079_v0  ;;  %v7251_v53 = vld [vmem:[#allocation5 + $0x1e60] sm:$0xff]  ;;  %v6324_v58 = vld [vmem:[#allocation5 + $0x168] sm:$0xff] }
 0x480   : > { %12775 = vmatprep.subr.bf16.mxu1 %v18207_v54  ;;  %v18175_v25 = vcombine.high %v7247_v10, %v7251_v53  ;;  %v7111_v26 = vld [vmem:[#allocation5 + $0x1a00] sm:$0xff]  ;;  %v18174_v60 = vcombine.low %v7247_v10, %v7251_v53 }
 0x481   : > { %v7115_v0 = vld [vmem:[#allocation5 + $0x1a20] sm:$0xff] }
 0x482   : > { %12735 = vmatpush2.bf16.msra.mxu0 %v18078_v20  ;;  %v7239_v54 = vld [vmem:[#allocation5 + $0x1e00] sm:$0xff]  ;;  %v18039_v29 = vcombine.high %v7111_v26, %v7115_v0  ;;  %v18038_v21 = vcombine.low %v7111_v26, %v7115_v0 }
 0x483   : > { %12776 = vmatpush2.bf16.msra.mxu1 %v18206_v35  ;;  %12736 = vmatprep.subr.bf16.mxu0 %v18071_v36  ;;  %v7243_v41 = vld [vmem:[#allocation5 + $0x1e20] sm:$0xff]  ;;  %v6241_v35 = vadd.f32 %v19971_v28, %v6200_v55  ;;  %v6328_v28 = vld [vmem:[#allocation5 + $0x188] sm:$0xff] }
 0x484   : > { %12777 = vmatprep.subr.bf16.mxu1 %v18199_v37  ;;  %v7304_v46 = vld [vmem:[#allocation14 + $0x1] ss:$8 sm:$0xf]  ;;  %v18167_v36 = vcombine.high %v7239_v54, %v7243_v41 }
 0x485   : > { %v7305_v20 = vld [vmem:[#allocation14 + $0x1] ss:$8 sm:$0xf0]  ;;  %v6261_v59 = vmax.f32 %v6241_v35, 0.0 }
 0x486   : > { %12737 = vmatpush2.bf16.msra.mxu0 %v18070_v44  ;;  %v6336_v37 = vld [vmem:[#allocation5 + $0x1c8] sm:$0xff]  ;;  %v19982_v40 = vor.u32 %v7305_v20, %v7304_v46  ;;  %v6259_v44 = vmax.f32 %v19943_v14, 0.0  ;;  %v17392_v14 = vcombine.low %v6464_v47, %v6468_v38 }
 0x487   : > { %12778 = vmatpush2.bf16.msra.mxu1 %v18198_v45  ;;  %12738 = vmatprep.subr.bf16.mxu0 %v18063_v52  ;;  %v18166_v45 = vcombine.low %v7239_v54, %v7243_v41  ;;  %v17265_v52 = vcombine.high %v6336_v37, %v6340_v61  ;;  %v17264_v63 = vcombine.low %v6336_v37, %v6340_v61  ;;  %v6312_v46 = vld [vmem:[#allocation5 + $0x108] sm:$0xff] }
 0x488   : > { %12779 = vmatprep.subr.bf16.mxu1 %v18191_v27  ;;  %v17393_v27 = vcombine.high %v6464_v47, %v6468_v38  ;;  %v7311_v22 = vrot.slane %v19982_v40, %v19751_v56  ;;  %v7315_v5 = vrot.slane %v19982_v40, %v19754_v62  ;;  %v17249_v54 = vcombine.high %v6320_v19, %v6324_v58  ;;  %v6316_v20 = vld [vmem:[#allocation5 + $0x128] sm:$0xff] }
 0x489   : > { %v6444_v37 = vld [vmem:[#allocation5 + $0x528] sm:$0xff]  ;;  %v17248_v38 = vcombine.low %v6320_v19, %v6324_v58 }
 0x48a   : > { %12739 = vmatpush2.bf16.msra.mxu0 %v18062_v3  ;;  %v6460_v3 = vld [vmem:[#allocation5 + $0x5a8] sm:$0xff] }
 0x48b   : > { %12780 = vmatpush2.bf16.msra.mxu1 %v18190_v6  ;;  %12740 = vmatprep.subr.bf16.mxu0 %v18055_v43  ;;  %v19987_v6 = vpack.c.bf16 %v6259_v44, %v6259_v44  ;;  %v19989_v43 = vpack.c.bf16 %v6261_v59, %v6261_v59  ;;  %v17385_v53 = vcombine.high %v6456_v16, %v6460_v3  ;;  %v6424_v19 = vld [vmem:[#allocation5 + $0x488] sm:$0xff] }
 0x48c   : > { %12781 = vmatprep.subr.bf16.mxu1 %v18183_v7  ;;  %v17257_v7 = vcombine.high %v6328_v28, %v6332_v50  ;;  %v17384_v0 = vcombine.low %v6456_v16, %v6460_v3  ;;  %v6428_v58 = vld [vmem:[#allocation5 + $0x4a8] sm:$0xff] }
 0x48e   : > { %12741 = vmatpush2.bf16.msra.mxu0 %v18054_v11  ;;  %v6448_v11 = vld [vmem:[#allocation5 + $0x548] sm:$0xff] }
 0x48f   : > { %12782 = vmatpush2.bf16.msra.mxu1 %v18182_v12  ;;  %12742 = vmatprep.subr.bf16.mxu0 %v18047_v13  ;;  %v6452_v12 = vld [vmem:[#allocation5 + $0x568] sm:$0xff] }
 0x490   : > { %12783 = vmatprep.subr.bf16.mxu1 %v18175_v25  ;;  %v17256_v25 = vcombine.low %v6328_v28, %v6332_v50  ;;  %v17376_v44 = vcombine.low %v6448_v11, %v6452_v12  ;;  %v6308_v28 = vld [vmem:[#allocation5 + $0xe8] sm:$0xff] }
 0x491   : > { %v6432_v50 = vld [vmem:[#allocation5 + $0x4c8] sm:$0xff] }
 0x492   : > { %12743 = vmatpush2.bf16.msra.mxu0 %v18046_v1 }
 0x493   : > { %12784 = vmatpush2.bf16.msra.mxu1 %v18174_v60  ;;  %12744 = vmatprep.subr.bf16.mxu0 %v18039_v29  ;;  %v17377_v29 = vcombine.high %v6448_v11, %v6452_v12  ;;  %v17353_v12 = vcombine.high %v6424_v19, %v6428_v58 }
 0x494   : > { %12785 = vmatprep.subr.bf16.mxu1 %v18167_v36  ;;  %v6440_v36 = vld [vmem:[#allocation5 + $0x508] sm:$0xff] }
 0x495   : > { %v17369_v59 = vcombine.high %v6440_v36, %v6444_v37  ;;  %v17368_v16 = vcombine.low %v6440_v36, %v6444_v37 }
 0x496   : > { %12745 = vmatpush2.bf16.msra.mxu0 %v18038_v21 }
 0x497   : > { %12786 = vmatpush2.bf16.msra.mxu1 %v18166_v45  ;;  %12796 = vmatprep.subr.bf16.mxu0 %v17265_v52  ;;  %v17241_v45 = vcombine.high %v6312_v46, %v6316_v20 }
 0x498   : > { %12837 = vmatprep.subr.bf16.mxu1 %v17393_v27  ;;  %v6304_v27 = vld [vmem:[#allocation5 + $0xc8] sm:$0xff] }
 0x499   : > { %v12502_v10 = vpop.f32.mrf.mxu0  ;;  %12747 = vmatmul.mubr.bf16.vlgmr.msra.gmra.mxu0 %v19987_v6  ;;  %v17233_v3 = vcombine.high %v6304_v27, %v6308_v28 }
 0x49a   : > { %v12503_v13 = vadd.f32 %v12502_v10, %v7311_v22  ;;  %v12543_v55 = vpop.f32.mrf.mxu1  ;;  %12788 = vmatmul.mubr.bf16.vlgmr.msra.gmra.mxu1 %v19989_v43  ;;  %12797 = vmatpush1.bf16.msra.mxu0 %v17264_v63  ;;  %v6436_v22 = vld [vmem:[#allocation5 + $0x4e8] sm:$0xff]  ;;  %v17240_v63 = vcombine.low %v6312_v46, %v6316_v20  ;;  %v17232_v10 = vcombine.low %v6304_v27, %v6308_v28 }
 0x49b   : > { %12828 = vmatprep.mubr.bf16.mxu0 %v19885_v2  ;;  %12838 = vmatpush1.bf16.msra.mxu1 %v17392_v14  ;;  %v12504_v26 = vpop.f32.mrf.mxu0  ;;  %v17361_v14 = vcombine.high %v6432_v50, %v6436_v22  ;;  %v6284_v46 = vld [vmem:[#allocation5 + $0x28] sm:$0xff] }
 0x49c   : > { %v19996_v41 = vadd.f32 %v12543_v55, %v12503_v13  ;;  %12869 = vmatprep.mubr.bf16.mxu1 %v19888_v30  ;;  %v12505_v1 = vadd.f32 %v12504_v26, %v7315_v5  ;;  %v12545_v60 = vpop.f32.mrf.mxu1  ;;  %12798 = vmatprep.subr.bf16.mxu0 %v17257_v7  ;;  %v6296_v5 = vld [vmem:[#allocation5 + $0x88] sm:$0xff] }
 0x49d   : > { %v12506_v35 = vpop.f32.mrf.mxu0  ;;  %12839 = vmatprep.subr.bf16.mxu1 %v17385_v53  ;;  %v6300_v7 = vld [vmem:[#allocation5 + $0xa8] sm:$0xff]  ;;  %v17360_v53 = vcombine.low %v6432_v50, %v6436_v22 }
 0x49e   : > { %v19999_v61 = vadd.f32 %v12545_v60, %v12505_v1  ;;  %v12547_v47 = vpop.f32.mrf.mxu1  ;;  %12799 = vmatpush1.bf16.msra.mxu0 %v17256_v25  ;;  %v17225_v11 = vcombine.high %v6296_v5, %v6300_v7  ;;  %v6288_v13 = vld [vmem:[#allocation5 + $0x48] sm:$0xff] }
 0x49f   : > { %12840 = vmatpush1.bf16.msra.mxu1 %v17384_v0  ;;  %v12507_v21 = vpop.f32.mrf.mxu0  ;;  %12800 = vmatprep.subr.bf16.mxu0 %v17249_v54  ;;  %v6292_v55 = vld [vmem:[#allocation5 + $0x68] sm:$0xff]  ;;  %v17224_v0 = vcombine.low %v6296_v5, %v6300_v7  ;;  %v17352_v54 = vcombine.low %v6424_v19, %v6428_v58 }
 0x4a0   : > { %v12548_v52 = vpop.f32.mrf.mxu1  ;;  %12841 = vmatprep.subr.bf16.mxu1 %v17377_v29  ;;  %v6416_v25 = vld [vmem:[#allocation5 + $0x448] sm:$0xff]  ;;  %v17217_v1 = vcombine.high %v6288_v13, %v6292_v55  ;;  %v17216_v36 = vcombine.low %v6288_v13, %v6292_v55 }
 0x4a1   : > { %v6420_v26 = vld [vmem:[#allocation5 + $0x468] sm:$0xff] }
 0x4a2   : > { %12801 = vmatpush1.bf16.msra.mxu0 %v17248_v38  ;;  %v17345_v60 = vcombine.high %v6416_v25, %v6420_v26  ;;  %v6280_v29 = vld [vmem:[#allocation5 + $0x8] sm:$0xff]  ;;  %v17344_v37 = vcombine.low %v6416_v25, %v6420_v26 }
 0x4a3   : > { %12842 = vmatpush1.bf16.msra.mxu1 %v17376_v44  ;;  %12802 = vmatprep.subr.bf16.mxu0 %v17241_v45  ;;  %v6408_v20 = vld [vmem:[#allocation5 + $0x408] sm:$0xff]  ;;  %v17209_v47 = vcombine.high %v6280_v29, %v6284_v46 }
 0x4a4   : > { %12843 = vmatprep.subr.bf16.mxu1 %v17369_v59  ;;  %v6412_v35 = vld [vmem:[#allocation5 + $0x428] sm:$0xff]  ;;  %v17208_v59 = vcombine.low %v6280_v29, %v6284_v46 }
 0x4a5   : > { %v17337_v38 = vcombine.high %v6408_v20, %v6412_v35  ;;  %v6400_v21 = vld [vmem:[#allocation5 + $0x3c8] sm:$0xff]  ;;  %v17336_v27 = vcombine.low %v6408_v20, %v6412_v35 }
 0x4a6   : > { %12803 = vmatpush1.bf16.msra.mxu0 %v17240_v63  ;;  %v6404_v44 = vld [vmem:[#allocation5 + $0x3e8] sm:$0xff] }
 0x4a7   : > { %12844 = vmatpush1.bf16.msra.mxu1 %v17368_v16  ;;  %12804 = vmatprep.subr.bf16.mxu0 %v17233_v3  ;;  %v6528_v45 = vld [vmem:[#allocation5 + $0x7c8] sm:$0xff]  ;;  %v17329_v28 = vcombine.high %v6400_v21, %v6404_v44 }
 0x4a8   : > { %12845 = vmatprep.subr.bf16.mxu1 %v17361_v14  ;;  %v6532_v52 = vld [vmem:[#allocation5 + $0x7e8] sm:$0xff]  ;;  %v17328_v14 = vcombine.low %v6400_v21, %v6404_v44 }
 0x4a9   : > { %v17457_v50 = vcombine.high %v6528_v45, %v6532_v52  ;;  %v6392_v22 = vld [vmem:[#allocation5 + $0x388] sm:$0xff]  ;;  %v17456_v5 = vcombine.low %v6528_v45, %v6532_v52 }
 0x4aa   : > { %12805 = vmatpush1.bf16.msra.mxu0 %v17232_v10  ;;  %v6396_v63 = vld [vmem:[#allocation5 + $0x3a8] sm:$0xff] }
 0x4ab   : > { %12846 = vmatpush1.bf16.msra.mxu1 %v17360_v53  ;;  %12806 = vmatprep.subr.bf16.mxu0 %v17225_v11  ;;  %v6520_v16 = vld [vmem:[#allocation5 + $0x788] sm:$0xff]  ;;  %v17321_v7 = vcombine.high %v6392_v22, %v6396_v63 }
 0x4ac   : > { %12847 = vmatprep.subr.bf16.mxu1 %v17353_v12  ;;  %v6524_v3 = vld [vmem:[#allocation5 + $0x7a8] sm:$0xff]  ;;  %v17320_v12 = vcombine.low %v6392_v22, %v6396_v63 }
 0x4ad   : > { %v17449_v19 = vcombine.high %v6520_v16, %v6524_v3  ;;  %v6384_v58 = vld [vmem:[#allocation5 + $0x348] sm:$0xff]  ;;  %v17448_v13 = vcombine.low %v6520_v16, %v6524_v3 }
 0x4ae   : > { %12807 = vmatpush1.bf16.msra.mxu0 %v17224_v0  ;;  %v6388_v10 = vld [vmem:[#allocation5 + $0x368] sm:$0xff] }
 0x4af   : > { %12848 = vmatpush1.bf16.msra.mxu1 %v17352_v54  ;;  %12808 = vmatprep.subr.bf16.mxu0 %v17217_v1  ;;  %v6512_v53 = vld [vmem:[#allocation5 + $0x748] sm:$0xff]  ;;  %v17313_v55 = vcombine.high %v6384_v58, %v6388_v10 }
 0x4b0   : > { %12849 = vmatprep.subr.bf16.mxu1 %v17345_v60  ;;  %v6516_v11 = vld [vmem:[#allocation5 + $0x768] sm:$0xff]  ;;  %v17312_v60 = vcombine.low %v6384_v58, %v6388_v10 }
 0x4b1   : > { %v17441_v25 = vcombine.high %v6512_v53, %v6516_v11  ;;  %v6376_v26 = vld [vmem:[#allocation5 + $0x308] sm:$0xff]  ;;  %v17440_v29 = vcombine.low %v6512_v53, %v6516_v11 }
 0x4b2   : > { %12809 = vmatpush1.bf16.msra.mxu0 %v17216_v36  ;;  %v6380_v0 = vld [vmem:[#allocation5 + $0x328] sm:$0xff] }
 0x4b3   : > { %12850 = vmatpush1.bf16.msra.mxu1 %v17344_v37  ;;  %12810 = vmatprep.subr.bf16.mxu0 %v17209_v47  ;;  %v6504_v54 = vld [vmem:[#allocation5 + $0x708] sm:$0xff]  ;;  %v17305_v46 = vcombine.high %v6376_v26, %v6380_v0 }
 0x4b4   : > { %12851 = vmatprep.subr.bf16.mxu1 %v17337_v38  ;;  %v6508_v1 = vld [vmem:[#allocation5 + $0x728] sm:$0xff]  ;;  %v17304_v38 = vcombine.low %v6376_v26, %v6380_v0 }
 0x4b5   : > { %v17433_v20 = vcombine.high %v6504_v54, %v6508_v1  ;;  %v6368_v35 = vld [vmem:[#allocation5 + $0x2c8] sm:$0xff]  ;;  %v17432_v21 = vcombine.low %v6504_v54, %v6508_v1 }
 0x4b6   : > { %12811 = vmatpush1.bf16.msra.mxu0 %v17208_v59  ;;  %v6372_v36 = vld [vmem:[#allocation5 + $0x2e8] sm:$0xff] }
 0x4b7   : > { %12852 = vmatpush1.bf16.msra.mxu1 %v17336_v27  ;;  %12812 = vmatprep.subr.bf16.mxu0 %v17329_v28  ;;  %v6496_v37 = vld [vmem:[#allocation5 + $0x6c8] sm:$0xff]  ;;  %v17297_v44 = vcombine.high %v6368_v35, %v6372_v36 }
 0x4b8   : > { %12853 = vmatprep.subr.bf16.mxu1 %v17457_v50  ;;  %v6500_v47 = vld [vmem:[#allocation5 + $0x6e8] sm:$0xff]  ;;  %v17296_v50 = vcombine.low %v6368_v35, %v6372_v36 }
 0x4b9   : > { %v17425_v45 = vcombine.high %v6496_v37, %v6500_v47  ;;  %v6360_v52 = vld [vmem:[#allocation5 + $0x288] sm:$0xff]  ;;  %v17424_v22 = vcombine.low %v6496_v37, %v6500_v47 }
 0x4ba   : > { %12813 = vmatpush2.bf16.msra.mxu0 %v17328_v14  ;;  %v6364_v59 = vld [vmem:[#allocation5 + $0x2a8] sm:$0xff] }
 0x4bb   : > { %12854 = vmatpush2.bf16.msra.mxu1 %v17456_v5  ;;  %12814 = vmatprep.subr.bf16.mxu0 %v17321_v7  ;;  %v6488_v27 = vld [vmem:[#allocation5 + $0x688] sm:$0xff]  ;;  %v17289_v63 = vcombine.high %v6360_v52, %v6364_v59 }
 0x4bc   : > { %12855 = vmatprep.subr.bf16.mxu1 %v17449_v19  ;;  %v6492_v28 = vld [vmem:[#allocation5 + $0x6a8] sm:$0xff]  ;;  %v17288_v19 = vcombine.low %v6360_v52, %v6364_v59 }
 0x4bd   : > { %v17417_v16 = vcombine.high %v6488_v27, %v6492_v28  ;;  %v6352_v3 = vld [vmem:[#allocation5 + $0x248] sm:$0xff]  ;;  %v17416_v58 = vcombine.low %v6488_v27, %v6492_v28 }
 0x4be   : > { %12815 = vmatpush2.bf16.msra.mxu0 %v17320_v12  ;;  %v6356_v14 = vld [vmem:[#allocation5 + $0x268] sm:$0xff] }
 0x4bf   : > { %12856 = vmatpush2.bf16.msra.mxu1 %v17448_v13  ;;  %12816 = vmatprep.subr.bf16.mxu0 %v17313_v55  ;;  %v6480_v5 = vld [vmem:[#allocation5 + $0x648] sm:$0xff]  ;;  %v17281_v10 = vcombine.high %v6352_v3, %v6356_v14 }
 0x4c0   : > { %12857 = vmatprep.subr.bf16.mxu1 %v17441_v25  ;;  %v6484_v7 = vld [vmem:[#allocation5 + $0x668] sm:$0xff]  ;;  %v17280_v25 = vcombine.low %v6352_v3, %v6356_v14 }
 0x4c1   : > { %v17409_v53 = vcombine.high %v6480_v5, %v6484_v7  ;;  %v6344_v11 = vld [vmem:[#allocation5 + $0x208] sm:$0xff]  ;;  %v17408_v26 = vcombine.low %v6480_v5, %v6484_v7 }
 0x4c2   : > { %12817 = vmatpush2.bf16.msra.mxu0 %v17312_v60  ;;  %v6348_v12 = vld [vmem:[#allocation5 + $0x228] sm:$0xff] }
 0x4c3   : > { %12858 = vmatpush2.bf16.msra.mxu1 %v17440_v29  ;;  %12818 = vmatprep.subr.bf16.mxu0 %v17305_v46  ;;  %v6472_v13 = vld [vmem:[#allocation5 + $0x608] sm:$0xff]  ;;  %v17273_v0 = vcombine.high %v6344_v11, %v6348_v12 }
 0x4c4   : > { %12859 = vmatprep.subr.bf16.mxu1 %v17433_v20  ;;  %v6476_v55 = vld [vmem:[#allocation5 + $0x628] sm:$0xff]  ;;  %v17272_v20 = vcombine.low %v6344_v11, %v6348_v12 }
 0x4c5   : > { %v17401_v54 = vcombine.high %v6472_v13, %v6476_v55  ;;  %v6592_v1 = vld [vmem:[#allocation5 + $0x9c8] sm:$0xff]  ;;  %v17400_v35 = vcombine.low %v6472_v13, %v6476_v55 }
 0x4c6   : > { %12819 = vmatpush2.bf16.msra.mxu0 %v17304_v38  ;;  %v6596_v60 = vld [vmem:[#allocation5 + $0x9e8] sm:$0xff] }
 0x4c7   : > { %12860 = vmatpush2.bf16.msra.mxu1 %v17432_v21  ;;  %12820 = vmatprep.subr.bf16.mxu0 %v17297_v44  ;;  %v6720_v29 = vld [vmem:[#allocation5 + $0xdc8] sm:$0xff]  ;;  %v17521_v36 = vcombine.high %v6592_v1, %v6596_v60  ;;  %v17520_v21 = vcombine.low %v6592_v1, %v6596_v60 }
 0x4c8   : > { %12861 = vmatprep.subr.bf16.mxu1 %v17425_v45  ;;  %v6724_v46 = vld [vmem:[#allocation5 + $0xde8] sm:$0xff] }
 0x4c9   : > { %v17649_v37 = vcombine.high %v6720_v29, %v6724_v46  ;;  %v6584_v47 = vld [vmem:[#allocation5 + $0x988] sm:$0xff]  ;;  %v17648_v52 = vcombine.low %v6720_v29, %v6724_v46 }
 0x4ca   : > { %12821 = vmatpush2.bf16.msra.mxu0 %v17296_v50  ;;  %v6588_v38 = vld [vmem:[#allocation5 + $0x9a8] sm:$0xff] }
 0x4cb   : > { %12862 = vmatpush2.bf16.msra.mxu1 %v17424_v22  ;;  %12822 = vmatprep.subr.bf16.mxu0 %v17289_v63  ;;  %v6712_v44 = vld [vmem:[#allocation5 + $0xd88] sm:$0xff]  ;;  %v17513_v59 = vcombine.high %v6584_v47, %v6588_v38  ;;  %v17512_v5 = vcombine.low %v6584_v47, %v6588_v38 }
 0x4cc   : > { %12863 = vmatprep.subr.bf16.mxu1 %v17417_v16  ;;  %v6716_v45 = vld [vmem:[#allocation5 + $0xda8] sm:$0xff] }
 0x4cd   : > { %v6576_v27 = vld [vmem:[#allocation5 + $0x948] sm:$0xff]  ;;  %v17641_v22 = vcombine.high %v6712_v44, %v6716_v45 }
 0x4ce   : > { %12823 = vmatpush2.bf16.msra.mxu0 %v17288_v19  ;;  %v6580_v28 = vld [vmem:[#allocation5 + $0x968] sm:$0xff]  ;;  %v17640_v19 = vcombine.low %v6712_v44, %v6716_v45 }
 0x4cf   : > { %12864 = vmatpush2.bf16.msra.mxu1 %v17416_v58  ;;  %12824 = vmatprep.subr.bf16.mxu0 %v17281_v10  ;;  %v6704_v63 = vld [vmem:[#allocation5 + $0xd48] sm:$0xff]  ;;  %v17505_v58 = vcombine.high %v6576_v27, %v6580_v28  ;;  %v17504_v1 = vcombine.low %v6576_v27, %v6580_v28 }
 0x4d0   : > { %12865 = vmatprep.subr.bf16.mxu1 %v17409_v53  ;;  %v6708_v16 = vld [vmem:[#allocation5 + $0xd68] sm:$0xff] }
 0x4d1   : > { %v6568_v12 = vld [vmem:[#allocation5 + $0x908] sm:$0xff]  ;;  %v17632_v29 = vcombine.low %v6704_v63, %v6708_v16 }
 0x4d2   : > { %12825 = vmatpush2.bf16.msra.mxu0 %v17280_v25  ;;  %v6572_v13 = vld [vmem:[#allocation5 + $0x928] sm:$0xff] }
 0x4d3   : > { %12866 = vmatpush2.bf16.msra.mxu1 %v17408_v26  ;;  %12826 = vmatprep.subr.bf16.mxu0 %v17273_v0  ;;  %v6696_v25 = vld [vmem:[#allocation5 + $0xd08] sm:$0xff]  ;;  %v17497_v46 = vcombine.high %v6568_v12, %v6572_v13  ;;  %v17496_v38 = vcombine.low %v6568_v12, %v6572_v13 }
 0x4d4   : > { %12867 = vmatprep.subr.bf16.mxu1 %v17401_v54  ;;  %v6700_v26 = vld [vmem:[#allocation5 + $0xd28] sm:$0xff] }
 0x4d5   : > { %v6692_v47 = vld [vmem:[#allocation5 + $0xce8] sm:$0xff] }
 0x4d6   : > { %12827 = vmatpush2.bf16.msra.mxu0 %v17272_v20  ;;  %v17625_v20 = vcombine.high %v6696_v25, %v6700_v26  ;;  %v6680_v27 = vld [vmem:[#allocation5 + $0xc88] sm:$0xff] }
 0x4d7   : > { %12868 = vmatpush2.bf16.msra.mxu1 %v17400_v35  ;;  %12878 = vmatprep.subr.bf16.mxu0 %v17521_v36  ;;  %v6560_v35 = vld [vmem:[#allocation5 + $0x8c8] sm:$0xff] }
 0x4d8   : > { %12919 = vmatprep.subr.bf16.mxu1 %v17649_v37  ;;  %v6564_v36 = vld [vmem:[#allocation5 + $0x8e8] sm:$0xff] }
 0x4d9   : > { %v12584_v50 = vpop.f32.mrf.mxu0  ;;  %12829 = vmatmul.mubr.bf16.vlgmr.msra.gmra.mxu0 %v19911_v57  ;;  %v6688_v37 = vld [vmem:[#allocation5 + $0xcc8] sm:$0xff]  ;;  %v17489_v44 = vcombine.high %v6560_v35, %v6564_v36 }
 0x4da   : > { %v12585_v3 = vadd.f32 %v12584_v50, %v19996_v41  ;;  %v12625_v14 = vpop.f32.mrf.mxu1  ;;  %12870 = vmatmul.mubr.bf16.vlgmr.msra.gmra.mxu1 %v19913_v24  ;;  %12879 = vmatpush1.bf16.msra.mxu0 %v17520_v21  ;;  %v17633_v41 = vcombine.high %v6704_v63, %v6708_v16  ;;  %v17624_v21 = vcombine.low %v6696_v25, %v6700_v26  ;;  %v6684_v28 = vld [vmem:[#allocation5 + $0xca8] sm:$0xff] }
 0x4db   : > { %12910 = vmatprep.mubr.bf16.mxu0 %v19917_v8  ;;  %12920 = vmatpush1.bf16.msra.mxu1 %v17648_v52  ;;  %v12586_v7 = vpop.f32.mrf.mxu0  ;;  %v17617_v45 = vcombine.high %v6688_v37, %v6692_v47  ;;  %v6552_v52 = vld [vmem:[#allocation5 + $0x888] sm:$0xff]  ;;  %v17488_v50 = vcombine.low %v6560_v35, %v6564_v36  ;;  %v17609_v16 = vcombine.high %v6680_v27, %v6684_v28 }
 0x4dc   : > { %v20005_v10 = vadd.f32 %v12625_v14, %v12585_v3  ;;  %12951 = vmatprep.mubr.bf16.mxu1 %v19920_v49  ;;  %v12587_v53 = vadd.f32 %v12586_v7, %v19999_v61  ;;  %v12627_v11 = vpop.f32.mrf.mxu1  ;;  %12880 = vmatprep.subr.bf16.mxu0 %v17513_v59  ;;  %v6556_v59 = vld [vmem:[#allocation5 + $0x8a8] sm:$0xff] }
 0x4dd   : > { %v12588_v55 = vpop.f32.mrf.mxu0  ;;  %12921 = vmatprep.subr.bf16.mxu1 %v17641_v22  ;;  %v17616_v22 = vcombine.low %v6688_v37, %v6692_v47  ;;  %v17481_v63 = vcombine.high %v6552_v52, %v6556_v59  ;;  %v6544_v3 = vld [vmem:[#allocation5 + $0x848] sm:$0xff] }
 0x4de   : > { %v20009_v0 = vadd.f32 %v12627_v11, %v12587_v53  ;;  %v12629_v54 = vpop.f32.mrf.mxu1  ;;  %12881 = vmatpush1.bf16.msra.mxu0 %v17512_v5  ;;  %v6548_v14 = vld [vmem:[#allocation5 + $0x868] sm:$0xff] }
 0x4df   : > { %12922 = vmatpush1.bf16.msra.mxu1 %v17640_v19  ;;  %v12589_v60 = vpop.f32.mrf.mxu0  ;;  %12882 = vmatprep.subr.bf16.mxu0 %v17505_v58  ;;  %v6672_v5 = vld [vmem:[#allocation5 + $0xc48] sm:$0xff]  ;;  %v17480_v19 = vcombine.low %v6552_v52, %v6556_v59  ;;  %v17608_v58 = vcombine.low %v6680_v27, %v6684_v28  ;;  %v17473_v53 = vcombine.high %v6544_v3, %v6548_v14 }
 0x4e0   : > { %v12630_v61 = vpop.f32.mrf.mxu1  ;;  %12923 = vmatprep.subr.bf16.mxu1 %v17633_v41  ;;  %v6676_v7 = vld [vmem:[#allocation5 + $0xc68] sm:$0xff]  ;;  %v17472_v25 = vcombine.low %v6544_v3, %v6548_v14 }
 0x4e1   : > { %v17601_v11 = vcombine.high %v6672_v5, %v6676_v7  ;;  %v6536_v41 = vld [vmem:[#allocation5 + $0x808] sm:$0xff]  ;;  %v17600_v26 = vcombine.low %v6672_v5, %v6676_v7 }
 0x4e2   : > { %12883 = vmatpush1.bf16.msra.mxu0 %v17504_v1  ;;  %v6540_v12 = vld [vmem:[#allocation5 + $0x828] sm:$0xff] }
 0x4e3   : > { %12924 = vmatpush1.bf16.msra.mxu1 %v17632_v29  ;;  %12884 = vmatprep.subr.bf16.mxu0 %v17497_v46  ;;  %v6664_v13 = vld [vmem:[#allocation5 + $0xc08] sm:$0xff]  ;;  %v17465_v54 = vcombine.high %v6536_v41, %v6540_v12 }
 0x4e4   : > { %12925 = vmatprep.subr.bf16.mxu1 %v17625_v20  ;;  %v6668_v55 = vld [vmem:[#allocation5 + $0xc28] sm:$0xff]  ;;  %v17464_v20 = vcombine.low %v6536_v41, %v6540_v12 }
 0x4e5   : > { %v17593_v1 = vcombine.high %v6664_v13, %v6668_v55  ;;  %v6656_v60 = vld [vmem:[#allocation5 + $0xbc8] sm:$0xff]  ;;  %v17592_v35 = vcombine.low %v6664_v13, %v6668_v55 }
 0x4e6   : > { %12885 = vmatpush1.bf16.msra.mxu0 %v17496_v38  ;;  %v6660_v29 = vld [vmem:[#allocation5 + $0xbe8] sm:$0xff] }
 0x4e7   : > { %12926 = vmatpush1.bf16.msra.mxu1 %v17624_v21  ;;  %12886 = vmatprep.subr.bf16.mxu0 %v17489_v44  ;;  %v6784_v46 = vld [vmem:[#allocation5 + $0xfc8] sm:$0xff]  ;;  %v17585_v36 = vcombine.high %v6656_v60, %v6660_v29 }
 0x4e8   : > { %12927 = vmatprep.subr.bf16.mxu1 %v17617_v45  ;;  %v6788_v61 = vld [vmem:[#allocation5 + $0xfe8] sm:$0xff]  ;;  %v17584_v45 = vcombine.low %v6656_v60, %v6660_v29 }
 0x4e9   : > { %v17713_v37 = vcombine.high %v6784_v46, %v6788_v61  ;;  %v6648_v47 = vld [vmem:[#allocation5 + $0xb88] sm:$0xff]  ;;  %v17712_v52 = vcombine.low %v6784_v46, %v6788_v61 }
 0x4ea   : > { %12887 = vmatpush1.bf16.msra.mxu0 %v17488_v50  ;;  %v6652_v38 = vld [vmem:[#allocation5 + $0xba8] sm:$0xff] }
 0x4eb   : > { %12928 = vmatpush1.bf16.msra.mxu1 %v17616_v22  ;;  %12888 = vmatprep.subr.bf16.mxu0 %v17481_v63  ;;  %v6776_v21 = vld [vmem:[#allocation5 + $0xf88] sm:$0xff]  ;;  %v17577_v59 = vcombine.high %v6648_v47, %v6652_v38 }
 0x4ec   : > { %12929 = vmatprep.subr.bf16.mxu1 %v17609_v16  ;;  %v6780_v44 = vld [vmem:[#allocation5 + $0xfa8] sm:$0xff]  ;;  %v17576_v16 = vcombine.low %v6648_v47, %v6652_v38 }
 0x4ed   : > { %v17705_v27 = vcombine.high %v6776_v21, %v6780_v44  ;;  %v6640_v28 = vld [vmem:[#allocation5 + $0xb48] sm:$0xff]  ;;  %v17704_v3 = vcombine.low %v6776_v21, %v6780_v44 }
 0x4ee   : > { %12889 = vmatpush1.bf16.msra.mxu0 %v17480_v19  ;;  %v6644_v50 = vld [vmem:[#allocation5 + $0xb68] sm:$0xff] }
 0x4ef   : > { %12930 = vmatpush1.bf16.msra.mxu1 %v17608_v58  ;;  %12890 = vmatprep.subr.bf16.mxu0 %v17473_v53  ;;  %v6768_v22 = vld [vmem:[#allocation5 + $0xf48] sm:$0xff]  ;;  %v17569_v14 = vcombine.high %v6640_v28, %v6644_v50 }
 0x4f0   : > { %12931 = vmatprep.subr.bf16.mxu1 %v17601_v11  ;;  %v6772_v63 = vld [vmem:[#allocation5 + $0xf68] sm:$0xff]  ;;  %v17568_v11 = vcombine.low %v6640_v28, %v6644_v50 }
 0x4f1   : > { %v17697_v5 = vcombine.high %v6768_v22, %v6772_v63  ;;  %v6632_v7 = vld [vmem:[#allocation5 + $0xb08] sm:$0xff]  ;;  %v17696_v41 = vcombine.low %v6768_v22, %v6772_v63 }
 0x4f2   : > { %12891 = vmatpush1.bf16.msra.mxu0 %v17472_v25  ;;  %v6636_v19 = vld [vmem:[#allocation5 + $0xb28] sm:$0xff] }
 0x4f3   : > { %12932 = vmatpush1.bf16.msra.mxu1 %v17600_v26  ;;  %12892 = vmatprep.subr.bf16.mxu0 %v17465_v54  ;;  %v6760_v58 = vld [vmem:[#allocation5 + $0xf08] sm:$0xff]  ;;  %v17561_v12 = vcombine.high %v6632_v7, %v6636_v19 }
 0x4f4   : > { %12933 = vmatprep.subr.bf16.mxu1 %v17593_v1  ;;  %v6764_v53 = vld [vmem:[#allocation5 + $0xf28] sm:$0xff]  ;;  %v17560_v1 = vcombine.low %v6632_v7, %v6636_v19 }
 0x4f5   : > { %v17689_v13 = vcombine.high %v6760_v58, %v6764_v53  ;;  %v6624_v55 = vld [vmem:[#allocation5 + $0xac8] sm:$0xff]  ;;  %v17688_v60 = vcombine.low %v6760_v58, %v6764_v53 }
 0x4f6   : > { %12893 = vmatpush1.bf16.msra.mxu0 %v17464_v20  ;;  %v6628_v25 = vld [vmem:[#allocation5 + $0xae8] sm:$0xff] }
 0x4f7   : > { %12934 = vmatpush1.bf16.msra.mxu1 %v17592_v35  ;;  %12894 = vmatprep.subr.bf16.mxu0 %v17585_v36  ;;  %v6752_v26 = vld [vmem:[#allocation5 + $0xec8] sm:$0xff]  ;;  %v17553_v29 = vcombine.high %v6624_v55, %v6628_v25 }
 0x4f8   : > { %12935 = vmatprep.subr.bf16.mxu1 %v17713_v37  ;;  %v6756_v54 = vld [vmem:[#allocation5 + $0xee8] sm:$0xff]  ;;  %v17552_v37 = vcombine.low %v6624_v55, %v6628_v25 }
 0x4f9   : > { %v17681_v46 = vcombine.high %v6752_v26, %v6756_v54  ;;  %v6616_v61 = vld [vmem:[#allocation5 + $0xa88] sm:$0xff]  ;;  %v17680_v47 = vcombine.low %v6752_v26, %v6756_v54 }
 0x4fa   : > { %12895 = vmatpush2.bf16.msra.mxu0 %v17584_v45  ;;  %v6620_v20 = vld [vmem:[#allocation5 + $0xaa8] sm:$0xff] }
 0x4fb   : > { %12936 = vmatpush2.bf16.msra.mxu1 %v17712_v52  ;;  %12896 = vmatprep.subr.bf16.mxu0 %v17577_v59  ;;  %v6744_v35 = vld [vmem:[#allocation5 + $0xe88] sm:$0xff]  ;;  %v17545_v38 = vcombine.high %v6616_v61, %v6620_v20 }
 0x4fc   : > { %12937 = vmatprep.subr.bf16.mxu1 %v17705_v27  ;;  %v6748_v36 = vld [vmem:[#allocation5 + $0xea8] sm:$0xff]  ;;  %v17544_v27 = vcombine.low %v6616_v61, %v6620_v20 }
 0x4fd   : > { %v17673_v21 = vcombine.high %v6744_v35, %v6748_v36  ;;  %v6608_v44 = vld [vmem:[#allocation5 + $0xa48] sm:$0xff]  ;;  %v17672_v28 = vcombine.low %v6744_v35, %v6748_v36 }
 0x4fe   : > { %12897 = vmatpush2.bf16.msra.mxu0 %v17576_v16  ;;  %v6612_v45 = vld [vmem:[#allocation5 + $0xa68] sm:$0xff] }
 0x4ff   : > { %12938 = vmatpush2.bf16.msra.mxu1 %v17704_v3  ;;  %12898 = vmatprep.subr.bf16.mxu0 %v17569_v14  ;;  %v6736_v52 = vld [vmem:[#allocation5 + $0xe48] sm:$0xff]  ;;  %v17537_v50 = vcombine.high %v6608_v44, %v6612_v45 }
 0x500   : > { %12939 = vmatprep.subr.bf16.mxu1 %v17697_v5  ;;  %v6740_v59 = vld [vmem:[#allocation5 + $0xe68] sm:$0xff]  ;;  %v17536_v5 = vcombine.low %v6608_v44, %v6612_v45 }
 0x501   : > { %v17665_v22 = vcombine.high %v6736_v52, %v6740_v59  ;;  %v6600_v63 = vld [vmem:[#allocation5 + $0xa08] sm:$0xff]  ;;  %v17664_v7 = vcombine.low %v6736_v52, %v6740_v59 }
 0x502   : > { %12899 = vmatpush2.bf16.msra.mxu0 %v17568_v11  ;;  %v6604_v16 = vld [vmem:[#allocation5 + $0xa28] sm:$0xff] }
 0x503   : > { %12940 = vmatpush2.bf16.msra.mxu1 %v17696_v41  ;;  %12900 = vmatprep.subr.bf16.mxu0 %v17561_v12  ;;  %v6728_v3 = vld [vmem:[#allocation5 + $0xe08] sm:$0xff]  ;;  %v17529_v19 = vcombine.high %v6600_v63, %v6604_v16 }
 0x504   : > { %12941 = vmatprep.subr.bf16.mxu1 %v17689_v13  ;;  %v6732_v14 = vld [vmem:[#allocation5 + $0xe28] sm:$0xff]  ;;  %v17528_v13 = vcombine.low %v6600_v63, %v6604_v16 }
 0x505   : > { %v17657_v58 = vcombine.high %v6728_v3, %v6732_v14  ;;  %v6848_v53 = vld [vmem:[#allocation5 + $0x11c8] sm:$0xff]  ;;  %v17656_v55 = vcombine.low %v6728_v3, %v6732_v14 }
 0x506   : > { %12901 = vmatpush2.bf16.msra.mxu0 %v17560_v1  ;;  %v6852_v11 = vld [vmem:[#allocation5 + $0x11e8] sm:$0xff] }
 0x507   : > { %12942 = vmatpush2.bf16.msra.mxu1 %v17688_v60  ;;  %12902 = vmatprep.subr.bf16.mxu0 %v17553_v29  ;;  %v6976_v41 = vld [vmem:[#allocation5 + $0x15c8] sm:$0xff]  ;;  %v17777_v25 = vcombine.high %v6848_v53, %v6852_v11  ;;  %v17776_v60 = vcombine.low %v6848_v53, %v6852_v11 }
 0x508   : > { %12943 = vmatprep.subr.bf16.mxu1 %v17681_v46  ;;  %v6980_v12 = vld [vmem:[#allocation5 + $0x15e8] sm:$0xff] }
 0x509   : > { %v17905_v26 = vcombine.high %v6976_v41, %v6980_v12  ;;  %v6840_v54 = vld [vmem:[#allocation5 + $0x1188] sm:$0xff]  ;;  %v17904_v61 = vcombine.low %v6976_v41, %v6980_v12 }
 0x50a   : > { %12903 = vmatpush2.bf16.msra.mxu0 %v17552_v37  ;;  %v6844_v1 = vld [vmem:[#allocation5 + $0x11a8] sm:$0xff] }
 0x50b   : > { %12944 = vmatpush2.bf16.msra.mxu1 %v17680_v47  ;;  %12904 = vmatprep.subr.bf16.mxu0 %v17545_v38  ;;  %v6968_v29 = vld [vmem:[#allocation5 + $0x1588] sm:$0xff]  ;;  %v17769_v20 = vcombine.high %v6840_v54, %v6844_v1  ;;  %v17768_v52 = vcombine.low %v6840_v54, %v6844_v1 }
 0x50c   : > { %12945 = vmatprep.subr.bf16.mxu1 %v17673_v21  ;;  %v6972_v46 = vld [vmem:[#allocation5 + $0x15a8] sm:$0xff] }
 0x50d   : > { %v6832_v35 = vld [vmem:[#allocation5 + $0x1148] sm:$0xff]  ;;  %v17897_v47 = vcombine.high %v6968_v29, %v6972_v46 }
 0x50e   : > { %12905 = vmatpush2.bf16.msra.mxu0 %v17544_v27  ;;  %v6836_v36 = vld [vmem:[#allocation5 + $0x1168] sm:$0xff]  ;;  %v17896_v27 = vcombine.low %v6968_v29, %v6972_v46 }
 0x50f   : > { %12946 = vmatpush2.bf16.msra.mxu1 %v17672_v28  ;;  %12906 = vmatprep.subr.bf16.mxu0 %v17537_v50  ;;  %v6960_v38 = vld [vmem:[#allocation5 + $0x1548] sm:$0xff]  ;;  %v17761_v28 = vcombine.high %v6832_v35, %v6836_v36  ;;  %v17760_v53 = vcombine.low %v6832_v35, %v6836_v36 }
 0x510   : > { %12947 = vmatprep.subr.bf16.mxu1 %v17665_v22  ;;  %v6964_v21 = vld [vmem:[#allocation5 + $0x1568] sm:$0xff] }
 0x511   : > { %v6824_v16 = vld [vmem:[#allocation5 + $0x1108] sm:$0xff]  ;;  %v17888_v41 = vcombine.low %v6960_v38, %v6964_v21 }
 0x512   : > { %12907 = vmatpush2.bf16.msra.mxu0 %v17536_v5  ;;  %v6828_v3 = vld [vmem:[#allocation5 + $0x1128] sm:$0xff] }
 0x513   : > { %12948 = vmatpush2.bf16.msra.mxu1 %v17664_v7  ;;  %12908 = vmatprep.subr.bf16.mxu0 %v17529_v19  ;;  %v6952_v5 = vld [vmem:[#allocation5 + $0x1508] sm:$0xff]  ;;  %v17753_v12 = vcombine.high %v6824_v16, %v6828_v3  ;;  %v17752_v1 = vcombine.low %v6824_v16, %v6828_v3 }
 0x514   : > { %12949 = vmatprep.subr.bf16.mxu1 %v17657_v58  ;;  %v6956_v7 = vld [vmem:[#allocation5 + $0x1528] sm:$0xff] }
 0x515   : > { %v6948_v54 = vld [vmem:[#allocation5 + $0x14e8] sm:$0xff] }
 0x516   : > { %12909 = vmatpush2.bf16.msra.mxu0 %v17528_v13  ;;  %v17881_v13 = vcombine.high %v6952_v5, %v6956_v7  ;;  %v6936_v35 = vld [vmem:[#allocation5 + $0x1488] sm:$0xff] }
 0x517   : > { %12950 = vmatpush2.bf16.msra.mxu1 %v17656_v55  ;;  %12960 = vmatprep.subr.bf16.mxu0 %v17777_v25  ;;  %v6816_v55 = vld [vmem:[#allocation5 + $0x10c8] sm:$0xff] }
 0x518   : > { %13001 = vmatprep.subr.bf16.mxu1 %v17905_v26  ;;  %v6820_v25 = vld [vmem:[#allocation5 + $0x10e8] sm:$0xff] }
 0x519   : > { %v12666_v37 = vpop.f32.mrf.mxu0  ;;  %12911 = vmatmul.mubr.bf16.vlgmr.msra.gmra.mxu0 %v19933_v4  ;;  %v6944_v26 = vld [vmem:[#allocation5 + $0x14c8] sm:$0xff]  ;;  %v17745_v29 = vcombine.high %v6816_v55, %v6820_v25 }
 0x51a   : > { %v12667_v44 = vadd.f32 %v12666_v37, %v20005_v10  ;;  %v12707_v45 = vpop.f32.mrf.mxu1  ;;  %12952 = vmatmul.mubr.bf16.vlgmr.msra.gmra.mxu1 %v19935_v34  ;;  %12961 = vmatpush1.bf16.msra.mxu0 %v17776_v60  ;;  %v17889_v10 = vcombine.high %v6960_v38, %v6964_v21  ;;  %v17880_v60 = vcombine.low %v6952_v5, %v6956_v7  ;;  %v6940_v36 = vld [vmem:[#allocation5 + $0x14a8] sm:$0xff] }
 0x51b   : > { %12992 = vmatprep.mubr.bf16.mxu0 %v19937_v51  ;;  %13002 = vmatpush1.bf16.msra.mxu1 %v17904_v61  ;;  %v12668_v59 = vpop.f32.mrf.mxu0  ;;  %v17873_v46 = vcombine.high %v6944_v26, %v6948_v54  ;;  %v6808_v61 = vld [vmem:[#allocation5 + $0x1088] sm:$0xff]  ;;  %v17744_v37 = vcombine.low %v6816_v55, %v6820_v25  ;;  %v17865_v21 = vcombine.high %v6936_v35, %v6940_v36 }
 0x51c   : > { %v20015_v50 = vadd.f32 %v12707_v45, %v12667_v44  ;;  %13033 = vmatprep.mubr.bf16.mxu1 %v19940_v39  ;;  %v12669_v22 = vadd.f32 %v12668_v59, %v20009_v0  ;;  %v12709_v63 = vpop.f32.mrf.mxu1  ;;  %12962 = vmatprep.subr.bf16.mxu0 %v17769_v20  ;;  %v6812_v20 = vld [vmem:[#allocation5 + $0x10a8] sm:$0xff] }
 0x51d   : > { %v12670_v14 = vpop.f32.mrf.mxu0  ;;  %13003 = vmatprep.subr.bf16.mxu1 %v17897_v47  ;;  %v17872_v47 = vcombine.low %v6944_v26, %v6948_v54  ;;  %v17737_v38 = vcombine.high %v6808_v61, %v6812_v20  ;;  %v6800_v44 = vld [vmem:[#allocation5 + $0x1048] sm:$0xff] }
 0x51e   : > { %v20019_v19 = vadd.f32 %v12709_v63, %v12669_v22  ;;  %v12711_v58 = vpop.f32.mrf.mxu1  ;;  %12963 = vmatpush1.bf16.msra.mxu0 %v17768_v52  ;;  %v6804_v45 = vld [vmem:[#allocation5 + $0x1068] sm:$0xff] }
 0x51f   : > { %13004 = vmatpush1.bf16.msra.mxu1 %v17896_v27  ;;  %v12671_v11 = vpop.f32.mrf.mxu0  ;;  %12964 = vmatprep.subr.bf16.mxu0 %v17761_v28  ;;  %v6928_v52 = vld [vmem:[#allocation5 + $0x1448] sm:$0xff]  ;;  %v17736_v27 = vcombine.low %v6808_v61, %v6812_v20  ;;  %v17864_v28 = vcombine.low %v6936_v35, %v6940_v36  ;;  %v17729_v22 = vcombine.high %v6800_v44, %v6804_v45 }
 0x520   : > { %v12712_v0 = vpop.f32.mrf.mxu1  ;;  %13005 = vmatprep.subr.bf16.mxu1 %v17889_v10  ;;  %v6932_v59 = vld [vmem:[#allocation5 + $0x1468] sm:$0xff]  ;;  %v17728_v5 = vcombine.low %v6800_v44, %v6804_v45 }
 0x521   : > { %v17857_v63 = vcombine.high %v6928_v52, %v6932_v59  ;;  %v6792_v10 = vld [vmem:[#allocation5 + $0x1008] sm:$0xff]  ;;  %v17856_v7 = vcombine.low %v6928_v52, %v6932_v59 }
 0x522   : > { %12965 = vmatpush1.bf16.msra.mxu0 %v17760_v53  ;;  %v6796_v16 = vld [vmem:[#allocation5 + $0x1028] sm:$0xff] }
 0x523   : > { %13006 = vmatpush1.bf16.msra.mxu1 %v17888_v41  ;;  %12966 = vmatprep.subr.bf16.mxu0 %v17753_v12  ;;  %v6920_v3 = vld [vmem:[#allocation5 + $0x1408] sm:$0xff]  ;;  %v17721_v58 = vcombine.high %v6792_v10, %v6796_v16 }
 0x524   : > { %13007 = vmatprep.subr.bf16.mxu1 %v17881_v13  ;;  %v6924_v14 = vld [vmem:[#allocation5 + $0x1428] sm:$0xff]  ;;  %v17720_v13 = vcombine.low %v6792_v10, %v6796_v16 }
 0x525   : > { %v17849_v53 = vcombine.high %v6920_v3, %v6924_v14  ;;  %v6912_v11 = vld [vmem:[#allocation5 + $0x13c8] sm:$0xff]  ;;  %v17848_v55 = vcombine.low %v6920_v3, %v6924_v14 }
 0x526   : > { %12967 = vmatpush1.bf16.msra.mxu0 %v17752_v1  ;;  %v6916_v41 = vld [vmem:[#allocation5 + $0x13e8] sm:$0xff] }
 0x527   : > { %13008 = vmatpush1.bf16.msra.mxu1 %v17880_v60  ;;  %12968 = vmatprep.subr.bf16.mxu0 %v17745_v29  ;;  %v7040_v12 = vld [vmem:[#allocation5 + $0x17c8] sm:$0xff]  ;;  %v17841_v25 = vcombine.high %v6912_v11, %v6916_v41 }
 0x528   : > { %13009 = vmatprep.subr.bf16.mxu1 %v17873_v46  ;;  %v7044_v0 = vld [vmem:[#allocation5 + $0x17e8] sm:$0xff]  ;;  %v17840_v46 = vcombine.low %v6912_v11, %v6916_v41 }
 0x529   : > { %v17969_v26 = vcombine.high %v7040_v12, %v7044_v0  ;;  %v6904_v54 = vld [vmem:[#allocation5 + $0x1388] sm:$0xff]  ;;  %v17968_v61 = vcombine.low %v7040_v12, %v7044_v0 }
 0x52a   : > { %12969 = vmatpush1.bf16.msra.mxu0 %v17744_v37  ;;  %v6908_v1 = vld [vmem:[#allocation5 + $0x13a8] sm:$0xff] }
 0x52b   : > { %13010 = vmatpush1.bf16.msra.mxu1 %v17872_v47  ;;  %12970 = vmatprep.subr.bf16.mxu0 %v17737_v38  ;;  %v7032_v60 = vld [vmem:[#allocation5 + $0x1788] sm:$0xff]  ;;  %v17833_v20 = vcombine.high %v6904_v54, %v6908_v1 }
 0x52c   : > { %13011 = vmatprep.subr.bf16.mxu1 %v17865_v21  ;;  %v7036_v29 = vld [vmem:[#allocation5 + $0x17a8] sm:$0xff]  ;;  %v17832_v21 = vcombine.low %v6904_v54, %v6908_v1 }
 0x52d   : > { %v17961_v35 = vcombine.high %v7032_v60, %v7036_v29  ;;  %v6896_v36 = vld [vmem:[#allocation5 + $0x1348] sm:$0xff]  ;;  %v17960_v44 = vcombine.low %v7032_v60, %v7036_v29 }
 0x52e   : > { %12971 = vmatpush1.bf16.msra.mxu0 %v17736_v27  ;;  %v6900_v37 = vld [vmem:[#allocation5 + $0x1368] sm:$0xff] }
 0x52f   : > { %13012 = vmatpush1.bf16.msra.mxu1 %v17864_v28  ;;  %12972 = vmatprep.subr.bf16.mxu0 %v17729_v22  ;;  %v7024_v47 = vld [vmem:[#allocation5 + $0x1748] sm:$0xff]  ;;  %v17825_v45 = vcombine.high %v6896_v36, %v6900_v37 }
 0x530   : > { %13013 = vmatprep.subr.bf16.mxu1 %v17857_v63  ;;  %v7028_v38 = vld [vmem:[#allocation5 + $0x1768] sm:$0xff]  ;;  %v17824_v63 = vcombine.low %v6896_v36, %v6900_v37 }
 0x531   : > { %v17953_v52 = vcombine.high %v7024_v47, %v7028_v38  ;;  %v6888_v59 = vld [vmem:[#allocation5 + $0x1308] sm:$0xff]  ;;  %v17952_v10 = vcombine.low %v7024_v47, %v7028_v38 }
 0x532   : > { %12973 = vmatpush1.bf16.msra.mxu0 %v17728_v5  ;;  %v6892_v27 = vld [vmem:[#allocation5 + $0x1328] sm:$0xff] }
 0x533   : > { %13014 = vmatpush1.bf16.msra.mxu1 %v17856_v7  ;;  %12974 = vmatprep.subr.bf16.mxu0 %v17721_v58  ;;  %v7016_v28 = vld [vmem:[#allocation5 + $0x1708] sm:$0xff]  ;;  %v17817_v16 = vcombine.high %v6888_v59, %v6892_v27 }
 0x534   : > { %13015 = vmatprep.subr.bf16.mxu1 %v17849_v53  ;;  %v7020_v22 = vld [vmem:[#allocation5 + $0x1728] sm:$0xff]  ;;  %v17816_v53 = vcombine.low %v6888_v59, %v6892_v27 }
 0x535   : > { %v17945_v3 = vcombine.high %v7016_v28, %v7020_v22  ;;  %v6880_v14 = vld [vmem:[#allocation5 + $0x12c8] sm:$0xff]  ;;  %v17944_v11 = vcombine.low %v7016_v28, %v7020_v22 }
 0x536   : > { %12975 = vmatpush1.bf16.msra.mxu0 %v17720_v13  ;;  %v6884_v5 = vld [vmem:[#allocation5 + $0x12e8] sm:$0xff] }
 0x537   : > { %13016 = vmatpush1.bf16.msra.mxu1 %v17848_v55  ;;  %12976 = vmatprep.subr.bf16.mxu0 %v17841_v25  ;;  %v7008_v7 = vld [vmem:[#allocation5 + $0x16c8] sm:$0xff]  ;;  %v17809_v41 = vcombine.high %v6880_v14, %v6884_v5 }
 0x538   : > { %13017 = vmatprep.subr.bf16.mxu1 %v17969_v26  ;;  %v7012_v58 = vld [vmem:[#allocation5 + $0x16e8] sm:$0xff]  ;;  %v17808_v26 = vcombine.low %v6880_v14, %v6884_v5 }
 0x539   : > { %v17937_v12 = vcombine.high %v7008_v7, %v7012_v58  ;;  %v6872_v0 = vld [vmem:[#allocation5 + $0x1288] sm:$0xff]  ;;  %v17936_v54 = vcombine.low %v7008_v7, %v7012_v58 }
 0x53a   : > { %12977 = vmatpush2.bf16.msra.mxu0 %v17840_v46  ;;  %v6876_v13 = vld [vmem:[#allocation5 + $0x12a8] sm:$0xff] }
 0x53b   : > { %13018 = vmatpush2.bf16.msra.mxu1 %v17968_v61  ;;  %12978 = vmatprep.subr.bf16.mxu0 %v17833_v20  ;;  %v7000_v55 = vld [vmem:[#allocation5 + $0x1688] sm:$0xff]  ;;  %v17801_v1 = vcombine.high %v6872_v0, %v6876_v13 }
 0x53c   : > { %13019 = vmatprep.subr.bf16.mxu1 %v17961_v35  ;;  %v7004_v25 = vld [vmem:[#allocation5 + $0x16a8] sm:$0xff]  ;;  %v17800_v35 = vcombine.low %v6872_v0, %v6876_v13 }
 0x53d   : > { %v17929_v60 = vcombine.high %v7000_v55, %v7004_v25  ;;  %v6864_v29 = vld [vmem:[#allocation5 + $0x1248] sm:$0xff]  ;;  %v17928_v36 = vcombine.low %v7000_v55, %v7004_v25 }
 0x53e   : > { %12979 = vmatpush2.bf16.msra.mxu0 %v17832_v21  ;;  %v6868_v46 = vld [vmem:[#allocation5 + $0x1268] sm:$0xff] }
 0x53f   : > { %13020 = vmatpush2.bf16.msra.mxu1 %v17960_v44  ;;  %12980 = vmatprep.subr.bf16.mxu0 %v17825_v45  ;;  %v6992_v61 = vld [vmem:[#allocation5 + $0x1648] sm:$0xff]  ;;  %v17793_v37 = vcombine.high %v6864_v29, %v6868_v46 }
 0x540   : > { %13021 = vmatprep.subr.bf16.mxu1 %v17953_v52  ;;  %v6996_v20 = vld [vmem:[#allocation5 + $0x1668] sm:$0xff]  ;;  %v17792_v52 = vcombine.low %v6864_v29, %v6868_v46 }
 0x541   : > { %v17921_v47 = vcombine.high %v6992_v61, %v6996_v20  ;;  %v6856_v38 = vld [vmem:[#allocation5 + $0x1208] sm:$0xff]  ;;  %v17920_v59 = vcombine.low %v6992_v61, %v6996_v20 }
 0x542   : > { %12981 = vmatpush2.bf16.msra.mxu0 %v17824_v63  ;;  %v6860_v21 = vld [vmem:[#allocation5 + $0x1228] sm:$0xff] }
 0x543   : > { %13022 = vmatpush2.bf16.msra.mxu1 %v17952_v10  ;;  %12982 = vmatprep.subr.bf16.mxu0 %v17817_v16  ;;  %v6984_v44 = vld [vmem:[#allocation5 + $0x1608] sm:$0xff]  ;;  %v17785_v27 = vcombine.high %v6856_v38, %v6860_v21 }
 0x544   : > { %13023 = vmatprep.subr.bf16.mxu1 %v17945_v3  ;;  %v6988_v45 = vld [vmem:[#allocation5 + $0x1628] sm:$0xff]  ;;  %v17784_v3 = vcombine.low %v6856_v38, %v6860_v21 }
 0x545   : > { %v17913_v28 = vcombine.high %v6984_v44, %v6988_v45  ;;  %v7104_v22 = vld [vmem:[#allocation5 + $0x19c8] sm:$0xff]  ;;  %v17912_v14 = vcombine.low %v6984_v44, %v6988_v45 }
 0x546   : > { %12983 = vmatpush2.bf16.msra.mxu0 %v17816_v53  ;;  %v7108_v63 = vld [vmem:[#allocation5 + $0x19e8] sm:$0xff] }
 0x547   : > { %13024 = vmatpush2.bf16.msra.mxu1 %v17944_v11  ;;  %12984 = vmatprep.subr.bf16.mxu0 %v17809_v41  ;;  %v7232_v10 = vld [vmem:[#allocation5 + $0x1dc8] sm:$0xff]  ;;  %v18033_v5 = vcombine.high %v7104_v22, %v7108_v63  ;;  %v18032_v11 = vcombine.low %v7104_v22, %v7108_v63 }
 0x548   : > { %13025 = vmatprep.subr.bf16.mxu1 %v17937_v12  ;;  %v7236_v16 = vld [vmem:[#allocation5 + $0x1de8] sm:$0xff] }
 0x549   : > { %v18161_v7 = vcombine.high %v7232_v10, %v7236_v16  ;;  %v7096_v58 = vld [vmem:[#allocation5 + $0x1988] sm:$0xff]  ;;  %v18160_v0 = vcombine.low %v7232_v10, %v7236_v16 }
 0x54a   : > { %12985 = vmatpush2.bf16.msra.mxu0 %v17808_v26  ;;  %v7100_v53 = vld [vmem:[#allocation5 + $0x19a8] sm:$0xff] }
 0x54b   : > { %13026 = vmatpush2.bf16.msra.mxu1 %v17936_v54  ;;  %12986 = vmatprep.subr.bf16.mxu0 %v17801_v1  ;;  %v7224_v41 = vld [vmem:[#allocation5 + $0x1d88] sm:$0xff]  ;;  %v18025_v13 = vcombine.high %v7096_v58, %v7100_v53  ;;  %v18024_v61 = vcombine.low %v7096_v58, %v7100_v53 }
 0x54c   : > { %13027 = vmatprep.subr.bf16.mxu1 %v17929_v60  ;;  %v7228_v12 = vld [vmem:[#allocation5 + $0x1da8] sm:$0xff] }
 0x54d   : > { %v7088_v55 = vld [vmem:[#allocation5 + $0x1948] sm:$0xff]  ;;  %v18153_v54 = vcombine.high %v7224_v41, %v7228_v12 }
 0x54e   : > { %12987 = vmatpush2.bf16.msra.mxu0 %v17800_v35  ;;  %v7092_v25 = vld [vmem:[#allocation5 + $0x1968] sm:$0xff]  ;;  %v18152_v35 = vcombine.low %v7224_v41, %v7228_v12 }
 0x54f   : > { %13028 = vmatpush2.bf16.msra.mxu1 %v17928_v36  ;;  %12988 = vmatprep.subr.bf16.mxu0 %v17793_v37  ;;  %v7216_v1 = vld [vmem:[#allocation5 + $0x1d48] sm:$0xff]  ;;  %v18017_v36 = vcombine.high %v7088_v55, %v7092_v25  ;;  %v18016_v22 = vcombine.low %v7088_v55, %v7092_v25 }
 0x550   : > { %13029 = vmatprep.subr.bf16.mxu1 %v17921_v47  ;;  %v7220_v60 = vld [vmem:[#allocation5 + $0x1d68] sm:$0xff] }
 0x551   : > { %v7080_v21 = vld [vmem:[#allocation5 + $0x1908] sm:$0xff]  ;;  %v18144_v10 = vcombine.low %v7216_v1, %v7220_v60 }
 0x552   : > { %12989 = vmatpush2.bf16.msra.mxu0 %v17792_v52  ;;  %v7084_v44 = vld [vmem:[#allocation5 + $0x1928] sm:$0xff] }
 0x553   : > { %13030 = vmatpush2.bf16.msra.mxu1 %v17920_v59  ;;  %12990 = vmatprep.subr.bf16.mxu0 %v17785_v27  ;;  %v7208_v52 = vld [vmem:[#allocation5 + $0x1d08] sm:$0xff]  ;;  %v18009_v16 = vcombine.high %v7080_v21, %v7084_v44  ;;  %v18008_v53 = vcombine.low %v7080_v21, %v7084_v44 }
 0x554   : > { %13031 = vmatprep.subr.bf16.mxu1 %v17913_v28  ;;  %v7212_v59 = vld [vmem:[#allocation5 + $0x1d28] sm:$0xff] }
 0x555   : > { %v7204_v58 = vld [vmem:[#allocation5 + $0x1ce8] sm:$0xff] }
 0x556   : > { %12991 = vmatpush2.bf16.msra.mxu0 %v17784_v3  ;;  %v18137_v3 = vcombine.high %v7208_v52, %v7212_v59  ;;  %v7192_v55 = vld [vmem:[#allocation5 + $0x1c88] sm:$0xff] }
 0x557   : > { %13032 = vmatpush2.bf16.msra.mxu1 %v17912_v14  ;;  %13042 = vmatprep.subr.bf16.mxu0 %v18033_v5  ;;  %v7072_v14 = vld [vmem:[#allocation5 + $0x18c8] sm:$0xff] }
 0x558   : > { %13083 = vmatprep.subr.bf16.mxu1 %v18161_v7  ;;  %v7076_v5 = vld [vmem:[#allocation5 + $0x18e8] sm:$0xff] }
 0x559   : > { %v12748_v26 = vpop.f32.mrf.mxu0  ;;  %12993 = vmatmul.mubr.bf16.vlgmr.msra.gmra.mxu0 %v19960_v42  ;;  %v7200_v7 = vld [vmem:[#allocation5 + $0x1cc8] sm:$0xff]  ;;  %v18001_v41 = vcombine.high %v7072_v14, %v7076_v5 }
 0x55a   : > { %v12749_v29 = vadd.f32 %v12748_v26, %v20015_v50  ;;  %v12789_v46 = vpop.f32.mrf.mxu1  ;;  %13034 = vmatmul.mubr.bf16.vlgmr.msra.gmra.mxu1 %v19962_v15  ;;  %13043 = vmatpush1.bf16.msra.mxu0 %v18032_v11  ;;  %v18145_v50 = vcombine.high %v7216_v1, %v7220_v60  ;;  %v18136_v11 = vcombine.low %v7208_v52, %v7212_v59  ;;  %v7196_v25 = vld [vmem:[#allocation5 + $0x1ca8] sm:$0xff] }
 0x55b   : > { %13074 = vmatprep.mubr.bf16.mxu0 %v19965_v18  ;;  %13084 = vmatpush1.bf16.msra.mxu1 %v18160_v0  ;;  %v12750_v20 = vpop.f32.mrf.mxu0  ;;  %v18129_v12 = vcombine.high %v7200_v7, %v7204_v58  ;;  %v7064_v0 = vld [vmem:[#allocation5 + $0x1888] sm:$0xff]  ;;  %v18000_v26 = vcombine.low %v7072_v14, %v7076_v5  ;;  %v18121_v60 = vcombine.high %v7192_v55, %v7196_v25 }
 0x55c   : > { %v20025_v37 = vadd.f32 %v12789_v46, %v12749_v29  ;;  %13115 = vmatprep.mubr.bf16.mxu1 %v19974_v48  ;;  %v12751_v47 = vadd.f32 %v12750_v20, %v20019_v19  ;;  %v12791_v38 = vpop.f32.mrf.mxu1  ;;  %13044 = vmatprep.subr.bf16.mxu0 %v18025_v13  ;;  %v7068_v13 = vld [vmem:[#allocation5 + $0x18a8] sm:$0xff] }
 0x55d   : > { %v12752_v45 = vpop.f32.mrf.mxu0  ;;  %13085 = vmatprep.subr.bf16.mxu1 %v18153_v54  ;;  %v18128_v54 = vcombine.low %v7200_v7, %v7204_v58  ;;  %v17993_v1 = vcombine.high %v7064_v0, %v7068_v13  ;;  %v7056_v29 = vld [vmem:[#allocation5 + $0x1848] sm:$0xff] }
 0x55e   : > { %v20029_v27 = vadd.f32 %v12791_v38, %v12751_v47  ;;  %v12793_v28 = vpop.f32.mrf.mxu1  ;;  %13045 = vmatpush1.bf16.msra.mxu0 %v18024_v61  ;;  %v7060_v46 = vld [vmem:[#allocation5 + $0x1868] sm:$0xff] }
 0x55f   : > { %13086 = vmatpush1.bf16.msra.mxu1 %v18152_v35  ;;  %v12753_v63 = vpop.f32.mrf.mxu0  ;;  %13046 = vmatprep.subr.bf16.mxu0 %v18017_v36  ;;  %v7184_v61 = vld [vmem:[#allocation5 + $0x1c48] sm:$0xff]  ;;  %v17992_v35 = vcombine.low %v7064_v0, %v7068_v13  ;;  %v18120_v36 = vcombine.low %v7192_v55, %v7196_v25  ;;  %v17985_v47 = vcombine.high %v7056_v29, %v7060_v46 }
 0x560   : > { %v12794_v19 = vpop.f32.mrf.mxu1  ;;  %13087 = vmatprep.subr.bf16.mxu1 %v18145_v50  ;;  %v7188_v20 = vld [vmem:[#allocation5 + $0x1c68] sm:$0xff]  ;;  %v17984_v52 = vcombine.low %v7056_v29, %v7060_v46 }
 0x561   : > { %v18113_v38 = vcombine.high %v7184_v61, %v7188_v20  ;;  %v7048_v50 = vld [vmem:[#allocation5 + $0x1808] sm:$0xff]  ;;  %v18112_v59 = vcombine.low %v7184_v61, %v7188_v20 }
 0x562   : > { %13047 = vmatpush1.bf16.msra.mxu0 %v18016_v22  ;;  %v7052_v21 = vld [vmem:[#allocation5 + $0x1828] sm:$0xff] }
 0x563   : > { %13088 = vmatpush1.bf16.msra.mxu1 %v18144_v10  ;;  %13048 = vmatprep.subr.bf16.mxu0 %v18009_v16  ;;  %v7176_v44 = vld [vmem:[#allocation5 + $0x1c08] sm:$0xff]  ;;  %v17977_v28 = vcombine.high %v7048_v50, %v7052_v21 }
 0x564   : > { %13089 = vmatprep.subr.bf16.mxu1 %v18137_v3  ;;  %v7180_v45 = vld [vmem:[#allocation5 + $0x1c28] sm:$0xff]  ;;  %v17976_v3 = vcombine.low %v7048_v50, %v7052_v21 }
 0x565   : > { %v18105_v22 = vcombine.high %v7176_v44, %v7180_v45  ;;  %v7168_v63 = vld [vmem:[#allocation5 + $0x1bc8] sm:$0xff]  ;;  %v18104_v14 = vcombine.low %v7176_v44, %v7180_v45 }
 0x566   : > { %13049 = vmatpush1.bf16.msra.mxu0 %v18008_v53  ;;  %v7172_v10 = vld [vmem:[#allocation5 + $0x1be8] sm:$0xff] }
 0x567   : > { %13090 = vmatpush1.bf16.msra.mxu1 %v18136_v11  ;;  %13050 = vmatprep.subr.bf16.mxu0 %v18001_v41  ;;  %v7296_v16 = vld [vmem:[#allocation5 + $0x1fc8] sm:$0xff]  ;;  %v18097_v5 = vcombine.high %v7168_v63, %v7172_v10 }
 0x568   : > { %13091 = vmatprep.subr.bf16.mxu1 %v18129_v12  ;;  %v7300_v19 = vld [vmem:[#allocation5 + $0x1fe8] sm:$0xff]  ;;  %v18096_v12 = vcombine.low %v7168_v63, %v7172_v10 }
 0x569   : > { %v18225_v7 = vcombine.high %v7296_v16, %v7300_v19  ;;  %v7160_v58 = vld [vmem:[#allocation5 + $0x1b88] sm:$0xff]  ;;  %v18224_v0 = vcombine.low %v7296_v16, %v7300_v19 }
 0x56a   : > { %13051 = vmatpush1.bf16.msra.mxu0 %v18000_v26  ;;  %v7164_v53 = vld [vmem:[#allocation5 + $0x1ba8] sm:$0xff] }
 0x56b   : > { %13092 = vmatpush1.bf16.msra.mxu1 %v18128_v54  ;;  %13052 = vmatprep.subr.bf16.mxu0 %v17993_v1  ;;  %v7288_v11 = vld [vmem:[#allocation5 + $0x1f88] sm:$0xff]  ;;  %v18089_v13 = vcombine.high %v7160_v58, %v7164_v53 }
 0x56c   : > { %13093 = vmatprep.subr.bf16.mxu1 %v18121_v60  ;;  %v7292_v41 = vld [vmem:[#allocation5 + $0x1fa8] sm:$0xff]  ;;  %v18088_v60 = vcombine.low %v7160_v58, %v7164_v53 }
 0x56d   : > { %v18217_v55 = vcombine.high %v7288_v11, %v7292_v41  ;;  %v7152_v25 = vld [vmem:[#allocation5 + $0x1b48] sm:$0xff]  ;;  %v18216_v29 = vcombine.low %v7288_v11, %v7292_v41 }
 0x56e   : > { %13053 = vmatpush1.bf16.msra.mxu0 %v17992_v35  ;;  %v7156_v26 = vld [vmem:[#allocation5 + $0x1b68] sm:$0xff] }
 0x56f   : > { %13094 = vmatpush1.bf16.msra.mxu1 %v18120_v36  ;;  %13054 = vmatprep.subr.bf16.mxu0 %v17985_v47  ;;  %v7280_v54 = vld [vmem:[#allocation5 + $0x1f48] sm:$0xff]  ;;  %v18081_v46 = vcombine.high %v7152_v25, %v7156_v26 }
 0x570   : > { %13095 = vmatprep.subr.bf16.mxu1 %v18113_v38  ;;  %v7284_v1 = vld [vmem:[#allocation5 + $0x1f68] sm:$0xff]  ;;  %v18080_v38 = vcombine.low %v7152_v25, %v7156_v26 }
 0x571   : > { %v18209_v61 = vcombine.high %v7280_v54, %v7284_v1  ;;  %v7144_v20 = vld [vmem:[#allocation5 + $0x1b08] sm:$0xff]  ;;  %v18208_v50 = vcombine.low %v7280_v54, %v7284_v1 }
 0x572   : > { %13055 = vmatpush1.bf16.msra.mxu0 %v17984_v52  ;;  %v7148_v35 = vld [vmem:[#allocation5 + $0x1b28] sm:$0xff] }
 0x573   : > { %13096 = vmatpush1.bf16.msra.mxu1 %v18112_v59  ;;  %13056 = vmatprep.subr.bf16.mxu0 %v17977_v28  ;;  %v7272_v36 = vld [vmem:[#allocation5 + $0x1f08] sm:$0xff]  ;;  %v18073_v21 = vcombine.high %v7144_v20, %v7148_v35 }
 0x574   : > { %13097 = vmatprep.subr.bf16.mxu1 %v18105_v22  ;;  %v7276_v47 = vld [vmem:[#allocation5 + $0x1f28] sm:$0xff]  ;;  %v18072_v22 = vcombine.low %v7144_v20, %v7148_v35 }
 0x575   : > { %v18201_v44 = vcombine.high %v7272_v36, %v7276_v47  ;;  %v7136_v45 = vld [vmem:[#allocation5 + $0x1ac8] sm:$0xff]  ;;  %v18200_v63 = vcombine.low %v7272_v36, %v7276_v47  ;;  %v6337_v47 = vld [vmem:[#allocation5 + $0x1d0] sm:$0xff] }
 0x576   : > { %13057 = vmatpush1.bf16.msra.mxu0 %v17976_v3  ;;  %v7140_v52 = vld [vmem:[#allocation5 + $0x1ae8] sm:$0xff] }
 0x577   : > { %13098 = vmatpush1.bf16.msra.mxu1 %v18104_v14  ;;  %13058 = vmatprep.subr.bf16.mxu0 %v18097_v5  ;;  %v7264_v59 = vld [vmem:[#allocation5 + $0x1ec8] sm:$0xff]  ;;  %v18065_v10 = vcombine.high %v7136_v45, %v7140_v52 }
 0x578   : > { %13099 = vmatprep.subr.bf16.mxu1 %v18225_v7  ;;  %v7268_v28 = vld [vmem:[#allocation5 + $0x1ee8] sm:$0xff]  ;;  %v18064_v7 = vcombine.low %v7136_v45, %v7140_v52 }
 0x579   : > { %v18193_v16 = vcombine.high %v7264_v59, %v7268_v28  ;;  %v7128_v19 = vld [vmem:[#allocation5 + $0x1a88] sm:$0xff]  ;;  %v18192_v58 = vcombine.low %v7264_v59, %v7268_v28  ;;  %v6329_v28 = vld [vmem:[#allocation5 + $0x190] sm:$0xff] }
 0x57a   : > { %13059 = vmatpush2.bf16.msra.mxu0 %v18096_v12  ;;  %v7132_v3 = vld [vmem:[#allocation5 + $0x1aa8] sm:$0xff] }
 0x57b   : > { %13100 = vmatpush2.bf16.msra.mxu1 %v18224_v0  ;;  %13060 = vmatprep.subr.bf16.mxu0 %v18089_v13  ;;  %v7256_v14 = vld [vmem:[#allocation5 + $0x1e88] sm:$0xff]  ;;  %v18057_v53 = vcombine.high %v7128_v19, %v7132_v3 }
 0x57c   : > { %13101 = vmatprep.subr.bf16.mxu1 %v18217_v55  ;;  %v7260_v5 = vld [vmem:[#allocation5 + $0x1ea8] sm:$0xff]  ;;  %v18056_v55 = vcombine.low %v7128_v19, %v7132_v3  ;;  %v6461_v19 = vld [vmem:[#allocation5 + $0x5b0] sm:$0xff] }
 0x57d   : > { %v18185_v11 = vcombine.high %v7256_v14, %v7260_v5  ;;  %v7120_v41 = vld [vmem:[#allocation5 + $0x1a48] sm:$0xff]  ;;  %v18184_v25 = vcombine.low %v7256_v14, %v7260_v5  ;;  %v7323_v14 = vrot.slane %v19982_v40, %v19786_v31 }
 0x57e   : > { %13061 = vmatpush2.bf16.msra.mxu0 %v18088_v60  ;;  %v7124_v12 = vld [vmem:[#allocation5 + $0x1a68] sm:$0xff] }
 0x57f   : > { %13102 = vmatpush2.bf16.msra.mxu1 %v18216_v29  ;;  %13062 = vmatprep.subr.bf16.mxu0 %v18081_v46  ;;  %v7248_v0 = vld [vmem:[#allocation5 + $0x1e48] sm:$0xff]  ;;  %v18049_v26 = vcombine.high %v7120_v41, %v7124_v12 }
 0x580   : > { %13103 = vmatprep.subr.bf16.mxu1 %v18209_v61  ;;  %v7252_v13 = vld [vmem:[#allocation5 + $0x1e68] sm:$0xff]  ;;  %v18048_v61 = vcombine.low %v7120_v41, %v7124_v12  ;;  %v6449_v41 = vld [vmem:[#allocation5 + $0x550] sm:$0xff] }
 0x581   : > { %v18177_v54 = vcombine.high %v7248_v0, %v7252_v13  ;;  %v7112_v1 = vld [vmem:[#allocation5 + $0x1a08] sm:$0xff]  ;;  %v18176_v20 = vcombine.low %v7248_v0, %v7252_v13  ;;  %v6453_v12 = vld [vmem:[#allocation5 + $0x570] sm:$0xff] }
 0x582   : > { %13063 = vmatpush2.bf16.msra.mxu0 %v18080_v38  ;;  %v7116_v60 = vld [vmem:[#allocation5 + $0x1a28] sm:$0xff]  ;;  %v6341_v38 = vld [vmem:[#allocation5 + $0x1f0] sm:$0xff] }
 0x583   : > { %13104 = vmatpush2.bf16.msra.mxu1 %v18208_v50  ;;  %13064 = vmatprep.subr.bf16.mxu0 %v18073_v21  ;;  %v7240_v29 = vld [vmem:[#allocation5 + $0x1e08] sm:$0xff]  ;;  %v18041_v35 = vcombine.high %v7112_v1, %v7116_v60  ;;  %v6465_v50 = vld [vmem:[#allocation5 + $0x5d0] sm:$0xff]  ;;  %v17267_v52 = vcombine.high %v6337_v47, %v6341_v38 }
 0x584   : > { %13105 = vmatprep.subr.bf16.mxu1 %v18201_v44  ;;  %v7244_v46 = vld [vmem:[#allocation5 + $0x1e28] sm:$0xff]  ;;  %v6469_v21 = vld [vmem:[#allocation5 + $0x5f0] sm:$0xff]  ;;  %v18040_v44 = vcombine.low %v7112_v1, %v7116_v60 }
 0x585   : > { %v18169_v36 = vcombine.high %v7240_v29, %v7244_v46  ;;  %v18168_v45 = vcombine.low %v7240_v29, %v7244_v46  ;;  %v17395_v59 = vcombine.high %v6465_v50, %v6469_v21  ;;  %v17394_v3 = vcombine.low %v6465_v50, %v6469_v21 }
 0x586   : > { %13065 = vmatpush2.bf16.msra.mxu0 %v18072_v22  ;;  %v6333_v22 = vld [vmem:[#allocation5 + $0x1b0] sm:$0xff]  ;;  %v17379_v46 = vcombine.high %v6449_v41, %v6453_v12 }
 0x587   : > { %13106 = vmatpush2.bf16.msra.mxu1 %v18200_v63  ;;  %13066 = vmatprep.subr.bf16.mxu0 %v18065_v10  ;;  %v7319_v63 = vrot.slane %v19982_v40, %v19783_v9  ;;  %v17266_v10 = vcombine.low %v6337_v47, %v6341_v38  ;;  %v17259_v5 = vcombine.high %v6329_v28, %v6333_v22  ;;  %v6445_v47 = vld [vmem:[#allocation5 + $0x530] sm:$0xff] }
 0x588   : > { %13107 = vmatprep.subr.bf16.mxu1 %v18193_v16  ;;  %v6457_v16 = vld [vmem:[#allocation5 + $0x590] sm:$0xff] }
 0x58a   : > { %13067 = vmatpush2.bf16.msra.mxu0 %v18064_v7  ;;  %v6321_v7 = vld [vmem:[#allocation5 + $0x150] sm:$0xff] }
 0x58b   : > { %13108 = vmatpush2.bf16.msra.mxu1 %v18192_v58  ;;  %13068 = vmatprep.subr.bf16.mxu0 %v18057_v53  ;;  %v6325_v58 = vld [vmem:[#allocation5 + $0x170] sm:$0xff] }
 0x58c   : > { %13109 = vmatprep.subr.bf16.mxu1 %v18185_v11  ;;  %v17387_v11 = vcombine.high %v6457_v16, %v6461_v19  ;;  %v17250_v21 = vcombine.low %v6321_v7, %v6325_v58 }
 0x58e   : > { %13069 = vmatpush2.bf16.msra.mxu0 %v18056_v55  ;;  %v17258_v55 = vcombine.low %v6329_v28, %v6333_v22  ;;  %v6305_v22 = vld [vmem:[#allocation5 + $0xd0] sm:$0xff] }
 0x58f   : > { %13110 = vmatpush2.bf16.msra.mxu1 %v18184_v25  ;;  %13070 = vmatprep.subr.bf16.mxu0 %v18049_v26  ;;  %v17386_v26 = vcombine.low %v6457_v16, %v6461_v19  ;;  %v6437_v16 = vld [vmem:[#allocation5 + $0x4f0] sm:$0xff] }
 0x590   : > { %13111 = vmatprep.subr.bf16.mxu1 %v18177_v54  ;;  %v17251_v54 = vcombine.high %v6321_v7, %v6325_v58  ;;  %v6297_v7 = vld [vmem:[#allocation5 + $0x90] sm:$0xff] }
 0x591   : > { %v6301_v58 = vld [vmem:[#allocation5 + $0xb0] sm:$0xff] }
 0x592   : > { %13071 = vmatpush2.bf16.msra.mxu0 %v18048_v61  ;;  %v6313_v61 = vld [vmem:[#allocation5 + $0x110] sm:$0xff] }
 0x593   : > { %13112 = vmatpush2.bf16.msra.mxu1 %v18176_v20  ;;  %13072 = vmatprep.subr.bf16.mxu0 %v18041_v35  ;;  %v6317_v20 = vld [vmem:[#allocation5 + $0x130] sm:$0xff] }
 0x594   : > { %13113 = vmatprep.subr.bf16.mxu1 %v18169_v36  ;;  %v6441_v36 = vld [vmem:[#allocation5 + $0x510] sm:$0xff]  ;;  %v17242_v19 = vcombine.low %v6313_v61, %v6317_v20 }
 0x595   : > { %v17371_v28 = vcombine.high %v6441_v36, %v6445_v47 }
 0x596   : > { %13073 = vmatpush2.bf16.msra.mxu0 %v18040_v44 }
 0x597   : > { %13114 = vmatpush2.bf16.msra.mxu1 %v18168_v45  ;;  %13124 = vmatprep.subr.bf16.mxu0 %v17267_v52  ;;  %v17378_v45 = vcombine.low %v6449_v41, %v6453_v12  ;;  %v17243_v52 = vcombine.high %v6313_v61, %v6317_v20  ;;  %v6281_v20 = vld [vmem:[#allocation5 + $0x10] sm:$0xff] }
 0x598   : > { %13165 = vmatprep.subr.bf16.mxu1 %v17395_v59 }
 0x599   : > { %v12830_v53 = vpop.f32.mrf.mxu0  ;;  %13075 = vmatmul.mubr.bf16.vlgmr.msra.gmra.mxu0 %v19987_v6 }
 0x59a   : > { %v12831_v0 = vadd.f32 %v12830_v53, %v7319_v63  ;;  %v12871_v13 = vpop.f32.mrf.mxu1  ;;  %13116 = vmatmul.mubr.bf16.vlgmr.msra.gmra.mxu1 %v19989_v43  ;;  %13125 = vmatpush1.bf16.msra.mxu0 %v17266_v10  ;;  %v6309_v63 = vld [vmem:[#allocation5 + $0xf0] sm:$0xff] }
 0x59b   : > { %13156 = vmatprep.mubr.bf16.mxu0 %v19885_v2  ;;  %13166 = vmatpush1.bf16.msra.mxu1 %v17394_v3  ;;  %v12832_v25 = vpop.f32.mrf.mxu0  ;;  %v6433_v10 = vld [vmem:[#allocation5 + $0x4d0] sm:$0xff]  ;;  %v17370_v3 = vcombine.low %v6441_v36, %v6445_v47  ;;  %v17234_v41 = vcombine.low %v6305_v22, %v6309_v63 }
 0x59c   : > { %v20038_v1 = vadd.f32 %v12871_v13, %v12831_v0  ;;  %13197 = vmatprep.mubr.bf16.mxu1 %v19888_v30  ;;  %v12833_v60 = vadd.f32 %v12832_v25, %v7323_v14  ;;  %v12873_v29 = vpop.f32.mrf.mxu1  ;;  %13126 = vmatprep.subr.bf16.mxu0 %v17259_v5  ;;  %v17235_v14 = vcombine.high %v6305_v22, %v6309_v63  ;;  %v6425_v53 = vld [vmem:[#allocation5 + $0x490] sm:$0xff] }
 0x59d   : > { %v12834_v35 = vpop.f32.mrf.mxu0  ;;  %13167 = vmatprep.subr.bf16.mxu1 %v17387_v11  ;;  %v17363_v5 = vcombine.high %v6433_v10, %v6437_v16  ;;  %v6429_v11 = vld [vmem:[#allocation5 + $0x4b0] sm:$0xff]  ;;  %v17362_v12 = vcombine.low %v6433_v10, %v6437_v16  ;;  %v17227_v0 = vcombine.high %v6297_v7, %v6301_v58 }
 0x59e   : > { %v20041_v38 = vadd.f32 %v12873_v29, %v12833_v60  ;;  %v12875_v50 = vpop.f32.mrf.mxu1  ;;  %13127 = vmatpush1.bf16.msra.mxu0 %v17258_v55  ;;  %v17355_v13 = vcombine.high %v6425_v53, %v6429_v11  ;;  %v6289_v55 = vld [vmem:[#allocation5 + $0x50] sm:$0xff]  ;;  %v17226_v60 = vcombine.low %v6297_v7, %v6301_v58  ;;  %v17354_v29 = vcombine.low %v6425_v53, %v6429_v11 }
 0x59f   : > { %13168 = vmatpush1.bf16.msra.mxu1 %v17386_v26  ;;  %v12835_v44 = vpop.f32.mrf.mxu0  ;;  %13128 = vmatprep.subr.bf16.mxu0 %v17251_v54  ;;  %v6293_v25 = vld [vmem:[#allocation5 + $0x70] sm:$0xff] }
 0x5a0   : > { %v12876_v59 = vpop.f32.mrf.mxu1  ;;  %13169 = vmatprep.subr.bf16.mxu1 %v17379_v46  ;;  %v6417_v26 = vld [vmem:[#allocation5 + $0x450] sm:$0xff]  ;;  %v17219_v46 = vcombine.high %v6289_v55, %v6293_v25  ;;  %v17218_v50 = vcombine.low %v6289_v55, %v6293_v25 }
 0x5a1   : > { %v6421_v54 = vld [vmem:[#allocation5 + $0x470] sm:$0xff] }
 0x5a2   : > { %13129 = vmatpush1.bf16.msra.mxu0 %v17250_v21  ;;  %v17347_v61 = vcombine.high %v6417_v26, %v6421_v54  ;;  %v6285_v35 = vld [vmem:[#allocation5 + $0x30] sm:$0xff]  ;;  %v17346_v21 = vcombine.low %v6417_v26, %v6421_v54 }
 0x5a3   : > { %13170 = vmatpush1.bf16.msra.mxu1 %v17378_v45  ;;  %13130 = vmatprep.subr.bf16.mxu0 %v17243_v52  ;;  %v6409_v36 = vld [vmem:[#allocation5 + $0x410] sm:$0xff]  ;;  %v17211_v44 = vcombine.high %v6281_v20, %v6285_v35  ;;  %v17210_v63 = vcombine.low %v6281_v20, %v6285_v35 }
 0x5a4   : > { %13171 = vmatprep.subr.bf16.mxu1 %v17371_v28  ;;  %v6413_v47 = vld [vmem:[#allocation5 + $0x430] sm:$0xff] }
 0x5a5   : > { %v17339_v45 = vcombine.high %v6409_v36, %v6413_v47  ;;  %v6401_v52 = vld [vmem:[#allocation5 + $0x3d0] sm:$0xff]  ;;  %v17338_v10 = vcombine.low %v6409_v36, %v6413_v47 }
 0x5a6   : > { %13131 = vmatpush1.bf16.msra.mxu0 %v17242_v19  ;;  %v6405_v59 = vld [vmem:[#allocation5 + $0x3f0] sm:$0xff] }
 0x5a7   : > { %13172 = vmatpush1.bf16.msra.mxu1 %v17370_v3  ;;  %13132 = vmatprep.subr.bf16.mxu0 %v17235_v14  ;;  %v6529_v28 = vld [vmem:[#allocation5 + $0x7d0] sm:$0xff]  ;;  %v17331_v16 = vcombine.high %v6401_v52, %v6405_v59  ;;  %v17330_v58 = vcombine.low %v6401_v52, %v6405_v59 }
 0x5a8   : > { %13173 = vmatprep.subr.bf16.mxu1 %v17363_v5  ;;  %v6533_v22 = vld [vmem:[#allocation5 + $0x7f0] sm:$0xff] }
 0x5a9   : > { %v17459_v19 = vcombine.high %v6529_v28, %v6533_v22  ;;  %v6393_v3 = vld [vmem:[#allocation5 + $0x390] sm:$0xff]  ;;  %v17458_v53 = vcombine.low %v6529_v28, %v6533_v22 }
 0x5aa   : > { %13133 = vmatpush1.bf16.msra.mxu0 %v17234_v41  ;;  %v6397_v14 = vld [vmem:[#allocation5 + $0x3b0] sm:$0xff] }
 0x5ab   : > { %13174 = vmatpush1.bf16.msra.mxu1 %v17362_v12  ;;  %13134 = vmatprep.subr.bf16.mxu0 %v17227_v0  ;;  %v6521_v5 = vld [vmem:[#allocation5 + $0x790] sm:$0xff]  ;;  %v17323_v11 = vcombine.high %v6393_v3, %v6397_v14  ;;  %v17322_v25 = vcombine.low %v6393_v3, %v6397_v14 }
 0x5ac   : > { %13175 = vmatprep.subr.bf16.mxu1 %v17355_v13  ;;  %v6525_v7 = vld [vmem:[#allocation5 + $0x7b0] sm:$0xff] }
 0x5ad   : > { %v17451_v41 = vcombine.high %v6521_v5, %v6525_v7  ;;  %v6385_v12 = vld [vmem:[#allocation5 + $0x350] sm:$0xff]  ;;  %v17450_v26 = vcombine.low %v6521_v5, %v6525_v7 }
 0x5ae   : > { %13135 = vmatpush1.bf16.msra.mxu0 %v17226_v60  ;;  %v6389_v0 = vld [vmem:[#allocation5 + $0x370] sm:$0xff] }
 0x5af   : > { %13176 = vmatpush1.bf16.msra.mxu1 %v17354_v29  ;;  %13136 = vmatprep.subr.bf16.mxu0 %v17219_v46  ;;  %v6513_v13 = vld [vmem:[#allocation5 + $0x750] sm:$0xff]  ;;  %v17315_v54 = vcombine.high %v6385_v12, %v6389_v0  ;;  %v17314_v35 = vcombine.low %v6385_v12, %v6389_v0 }
 0x5b0   : > { %13177 = vmatprep.subr.bf16.mxu1 %v17347_v61  ;;  %v6517_v55 = vld [vmem:[#allocation5 + $0x770] sm:$0xff] }
 0x5b1   : > { %v17443_v60 = vcombine.high %v6513_v13, %v6517_v55  ;;  %v6377_v29 = vld [vmem:[#allocation5 + $0x310] sm:$0xff]  ;;  %v17442_v36 = vcombine.low %v6513_v13, %v6517_v55 }
 0x5b2   : > { %13137 = vmatpush1.bf16.msra.mxu0 %v17218_v50  ;;  %v6381_v46 = vld [vmem:[#allocation5 + $0x330] sm:$0xff] }
 0x5b3   : > { %13178 = vmatpush1.bf16.msra.mxu1 %v17346_v21  ;;  %13138 = vmatprep.subr.bf16.mxu0 %v17211_v44  ;;  %v6505_v61 = vld [vmem:[#allocation5 + $0x710] sm:$0xff]  ;;  %v17307_v47 = vcombine.high %v6377_v29, %v6381_v46  ;;  %v17306_v59 = vcombine.low %v6377_v29, %v6381_v46 }
 0x5b4   : > { %13179 = vmatprep.subr.bf16.mxu1 %v17339_v45  ;;  %v6509_v20 = vld [vmem:[#allocation5 + $0x730] sm:$0xff] }
 0x5b5   : > { %v17435_v50 = vcombine.high %v6505_v61, %v6509_v20  ;;  %v6369_v21 = vld [vmem:[#allocation5 + $0x2d0] sm:$0xff]  ;;  %v17434_v28 = vcombine.low %v6505_v61, %v6509_v20 }
 0x5b6   : > { %13139 = vmatpush1.bf16.msra.mxu0 %v17210_v63  ;;  %v6373_v44 = vld [vmem:[#allocation5 + $0x2f0] sm:$0xff] }
 0x5b7   : > { %13180 = vmatpush1.bf16.msra.mxu1 %v17338_v10  ;;  %13140 = vmatprep.subr.bf16.mxu0 %v17331_v16  ;;  %v6497_v45 = vld [vmem:[#allocation5 + $0x6d0] sm:$0xff]  ;;  %v17299_v22 = vcombine.high %v6369_v21, %v6373_v44  ;;  %v17298_v14 = vcombine.low %v6369_v21, %v6373_v44 }
 0x5b8   : > { %13181 = vmatprep.subr.bf16.mxu1 %v17459_v19  ;;  %v6501_v52 = vld [vmem:[#allocation5 + $0x6f0] sm:$0xff] }
 0x5b9   : > { %v17427_v63 = vcombine.high %v6497_v45, %v6501_v52  ;;  %v6361_v10 = vld [vmem:[#allocation5 + $0x290] sm:$0xff]  ;;  %v17426_v5 = vcombine.low %v6497_v45, %v6501_v52 }
 0x5ba   : > { %13141 = vmatpush2.bf16.msra.mxu0 %v17330_v58  ;;  %v6365_v16 = vld [vmem:[#allocation5 + $0x2b0] sm:$0xff] }
 0x5bb   : > { %13182 = vmatpush2.bf16.msra.mxu1 %v17458_v53  ;;  %13142 = vmatprep.subr.bf16.mxu0 %v17323_v11  ;;  %v6489_v19 = vld [vmem:[#allocation5 + $0x690] sm:$0xff]  ;;  %v17291_v7 = vcombine.high %v6361_v10, %v6365_v16  ;;  %v17290_v0 = vcombine.low %v6361_v10, %v6365_v16 }
 0x5bc   : > { %13183 = vmatprep.subr.bf16.mxu1 %v17451_v41  ;;  %v6493_v3 = vld [vmem:[#allocation5 + $0x6b0] sm:$0xff] }
 0x5bd   : > { %v17419_v58 = vcombine.high %v6489_v19, %v6493_v3  ;;  %v6353_v53 = vld [vmem:[#allocation5 + $0x250] sm:$0xff]  ;;  %v17418_v13 = vcombine.low %v6489_v19, %v6493_v3 }
 0x5be   : > { %13143 = vmatpush2.bf16.msra.mxu0 %v17322_v25  ;;  %v6357_v11 = vld [vmem:[#allocation5 + $0x270] sm:$0xff] }
 0x5bf   : > { %13184 = vmatpush2.bf16.msra.mxu1 %v17450_v26  ;;  %13144 = vmatprep.subr.bf16.mxu0 %v17315_v54  ;;  %v6481_v41 = vld [vmem:[#allocation5 + $0x650] sm:$0xff]  ;;  %v17283_v55 = vcombine.high %v6353_v53, %v6357_v11  ;;  %v17282_v46 = vcombine.low %v6353_v53, %v6357_v11 }
 0x5c0   : > { %13185 = vmatprep.subr.bf16.mxu1 %v17443_v60  ;;  %v6485_v12 = vld [vmem:[#allocation5 + $0x670] sm:$0xff] }
 0x5c1   : > { %v17411_v25 = vcombine.high %v6481_v41, %v6485_v12  ;;  %v6345_v26 = vld [vmem:[#allocation5 + $0x210] sm:$0xff]  ;;  %v17410_v61 = vcombine.low %v6481_v41, %v6485_v12 }
 0x5c2   : > { %13145 = vmatpush2.bf16.msra.mxu0 %v17314_v35  ;;  %v6349_v54 = vld [vmem:[#allocation5 + $0x230] sm:$0xff] }
 0x5c3   : > { %13186 = vmatpush2.bf16.msra.mxu1 %v17442_v36  ;;  %13146 = vmatprep.subr.bf16.mxu0 %v17307_v47  ;;  %v6473_v60 = vld [vmem:[#allocation5 + $0x610] sm:$0xff]  ;;  %v17275_v20 = vcombine.high %v6345_v26, %v6349_v54  ;;  %v17274_v44 = vcombine.low %v6345_v26, %v6349_v54 }
 0x5c4   : > { %13187 = vmatprep.subr.bf16.mxu1 %v17435_v50  ;;  %v6477_v29 = vld [vmem:[#allocation5 + $0x630] sm:$0xff] }
 0x5c5   : > { %v17403_v35 = vcombine.high %v6473_v60, %v6477_v29  ;;  %v6593_v36 = vld [vmem:[#allocation5 + $0x9d0] sm:$0xff]  ;;  %v17402_v45 = vcombine.low %v6473_v60, %v6477_v29 }
 0x5c6   : > { %13147 = vmatpush2.bf16.msra.mxu0 %v17306_v59  ;;  %v6597_v47 = vld [vmem:[#allocation5 + $0x9f0] sm:$0xff] }
 0x5c7   : > { %13188 = vmatpush2.bf16.msra.mxu1 %v17434_v28  ;;  %13148 = vmatprep.subr.bf16.mxu0 %v17299_v22  ;;  %v6721_v50 = vld [vmem:[#allocation5 + $0xdd0] sm:$0xff]  ;;  %v17523_v52 = vcombine.high %v6593_v36, %v6597_v47 }
 0x5c8   : > { %13189 = vmatprep.subr.bf16.mxu1 %v17427_v63  ;;  %v6725_v21 = vld [vmem:[#allocation5 + $0xdf0] sm:$0xff]  ;;  %v17522_v63 = vcombine.low %v6593_v36, %v6597_v47 }
 0x5c9   : > { %v17651_v59 = vcombine.high %v6721_v50, %v6725_v21  ;;  %v6585_v28 = vld [vmem:[#allocation5 + $0x990] sm:$0xff]  ;;  %v17650_v19 = vcombine.low %v6721_v50, %v6725_v21 }
 0x5ca   : > { %13149 = vmatpush2.bf16.msra.mxu0 %v17298_v14  ;;  %v6589_v22 = vld [vmem:[#allocation5 + $0x9b0] sm:$0xff] }
 0x5cb   : > { %13190 = vmatpush2.bf16.msra.mxu1 %v17426_v5  ;;  %13150 = vmatprep.subr.bf16.mxu0 %v17291_v7  ;;  %v6713_v10 = vld [vmem:[#allocation5 + $0xd90] sm:$0xff]  ;;  %v17515_v3 = vcombine.high %v6585_v28, %v6589_v22 }
 0x5cc   : > { %13191 = vmatprep.subr.bf16.mxu1 %v17419_v58  ;;  %v6717_v16 = vld [vmem:[#allocation5 + $0xdb0] sm:$0xff] }
 0x5cd   : > { %v6577_v14 = vld [vmem:[#allocation5 + $0x950] sm:$0xff]  ;;  %v17643_v58 = vcombine.high %v6713_v10, %v6717_v16 }
 0x5ce   : > { %13151 = vmatpush2.bf16.msra.mxu0 %v17290_v0  ;;  %v6581_v5 = vld [vmem:[#allocation5 + $0x970] sm:$0xff]  ;;  %v17514_v0 = vcombine.low %v6585_v28, %v6589_v22 }
 0x5cf   : > { %13192 = vmatpush2.bf16.msra.mxu1 %v17418_v13  ;;  %13152 = vmatprep.subr.bf16.mxu0 %v17283_v55  ;;  %v6705_v53 = vld [vmem:[#allocation5 + $0xd50] sm:$0xff]  ;;  %v17642_v55 = vcombine.low %v6713_v10, %v6717_v16  ;;  %v17506_v50 = vcombine.low %v6577_v14, %v6581_v5 }
 0x5d0   : > { %13193 = vmatprep.subr.bf16.mxu1 %v17411_v25  ;;  %v6709_v11 = vld [vmem:[#allocation5 + $0xd70] sm:$0xff]  ;;  %v17507_v25 = vcombine.high %v6577_v14, %v6581_v5 }
 0x5d1   : > { %v6569_v29 = vld [vmem:[#allocation5 + $0x910] sm:$0xff] }
 0x5d2   : > { %13153 = vmatpush2.bf16.msra.mxu0 %v17282_v46  ;;  %v6573_v46 = vld [vmem:[#allocation5 + $0x930] sm:$0xff] }
 0x5d3   : > { %13194 = vmatpush2.bf16.msra.mxu1 %v17410_v61  ;;  %13154 = vmatprep.subr.bf16.mxu0 %v17275_v20  ;;  %v6697_v20 = vld [vmem:[#allocation5 + $0xd10] sm:$0xff]  ;;  %v17498_v10 = vcombine.low %v6569_v29, %v6573_v46 }
 0x5d4   : > { %13195 = vmatprep.subr.bf16.mxu1 %v17403_v35  ;;  %v6701_v35 = vld [vmem:[#allocation5 + $0xd30] sm:$0xff] }
 0x5d5   : > { %v6565_v28 = vld [vmem:[#allocation5 + $0x8f0] sm:$0xff]  ;;  %v17626_v16 = vcombine.low %v6697_v20, %v6701_v35 }
 0x5d6   : > { %13155 = vmatpush2.bf16.msra.mxu0 %v17274_v44  ;;  %v17634_v44 = vcombine.low %v6705_v53, %v6709_v11  ;;  %v6689_v22 = vld [vmem:[#allocation5 + $0xcd0] sm:$0xff] }
 0x5d7   : > { %13196 = vmatpush2.bf16.msra.mxu1 %v17402_v45  ;;  %13206 = vmatprep.subr.bf16.mxu0 %v17523_v52  ;;  %v17499_v45 = vcombine.high %v6569_v29, %v6573_v46  ;;  %v17627_v52 = vcombine.high %v6697_v20, %v6701_v35  ;;  %v6553_v14 = vld [vmem:[#allocation5 + $0x890] sm:$0xff] }
 0x5d8   : > { %13247 = vmatprep.subr.bf16.mxu1 %v17651_v59  ;;  %v6561_v59 = vld [vmem:[#allocation5 + $0x8d0] sm:$0xff] }
 0x5d9   : > { %v12912_v7 = vpop.f32.mrf.mxu0  ;;  %13157 = vmatmul.mubr.bf16.vlgmr.msra.gmra.mxu0 %v19911_v57  ;;  %v6557_v5 = vld [vmem:[#allocation5 + $0x8b0] sm:$0xff] }
 0x5da   : > { %v12913_v41 = vadd.f32 %v12912_v7, %v20038_v1  ;;  %v12953_v12 = vpop.f32.mrf.mxu1  ;;  %13198 = vmatmul.mubr.bf16.vlgmr.msra.gmra.mxu1 %v19913_v24  ;;  %13207 = vmatpush1.bf16.msra.mxu0 %v17522_v63  ;;  %v17635_v1 = vcombine.high %v6705_v53, %v6709_v11  ;;  %v6693_v63 = vld [vmem:[#allocation5 + $0xcf0] sm:$0xff]  ;;  %v17490_v53 = vcombine.low %v6561_v59, %v6565_v28 }
 0x5db   : > { %13238 = vmatprep.mubr.bf16.mxu0 %v19917_v8  ;;  %13248 = vmatpush1.bf16.msra.mxu1 %v17650_v19  ;;  %v12914_v13 = vpop.f32.mrf.mxu0  ;;  %v17491_v19 = vcombine.high %v6561_v59, %v6565_v28  ;;  %v6681_v7 = vld [vmem:[#allocation5 + $0xc90] sm:$0xff]  ;;  %v17618_v11 = vcombine.low %v6689_v22, %v6693_v63 }
 0x5dc   : > { %v20047_v26 = vadd.f32 %v12953_v12, %v12913_v41  ;;  %13279 = vmatprep.mubr.bf16.mxu1 %v19920_v49  ;;  %v12915_v54 = vadd.f32 %v12914_v13, %v20041_v38  ;;  %v12955_v60 = vpop.f32.mrf.mxu1  ;;  %13208 = vmatprep.subr.bf16.mxu0 %v17515_v3  ;;  %v17619_v3 = vcombine.high %v6689_v22, %v6693_v63  ;;  %v6549_v13 = vld [vmem:[#allocation5 + $0x870] sm:$0xff] }
 0x5dd   : > { %v12916_v61 = vpop.f32.mrf.mxu0  ;;  %13249 = vmatprep.subr.bf16.mxu1 %v17643_v58  ;;  %v6685_v58 = vld [vmem:[#allocation5 + $0xcb0] sm:$0xff]  ;;  %v17483_v41 = vcombine.high %v6553_v14, %v6557_v5 }
 0x5de   : > { %v20051_v36 = vadd.f32 %v12955_v60, %v12915_v54  ;;  %v12957_v47 = vpop.f32.mrf.mxu1  ;;  %13209 = vmatpush1.bf16.msra.mxu0 %v17514_v0  ;;  %v17611_v12 = vcombine.high %v6681_v7, %v6685_v58  ;;  %v6545_v0 = vld [vmem:[#allocation5 + $0x850] sm:$0xff]  ;;  %v17482_v54 = vcombine.low %v6553_v14, %v6557_v5  ;;  %v17610_v60 = vcombine.low %v6681_v7, %v6685_v58 }
 0x5df   : > { %13250 = vmatpush1.bf16.msra.mxu1 %v17642_v55  ;;  %v12917_v21 = vpop.f32.mrf.mxu0  ;;  %13210 = vmatprep.subr.bf16.mxu0 %v17507_v25  ;;  %v6673_v55 = vld [vmem:[#allocation5 + $0xc50] sm:$0xff]  ;;  %v17474_v47 = vcombine.low %v6545_v0, %v6549_v13 }
 0x5e0   : > { %v12958_v38 = vpop.f32.mrf.mxu1  ;;  %13251 = vmatprep.subr.bf16.mxu1 %v17635_v1  ;;  %v6677_v25 = vld [vmem:[#allocation5 + $0xc70] sm:$0xff]  ;;  %v17475_v1 = vcombine.high %v6545_v0, %v6549_v13 }
 0x5e1   : > { %v17603_v29 = vcombine.high %v6673_v55, %v6677_v25  ;;  %v6537_v46 = vld [vmem:[#allocation5 + $0x810] sm:$0xff] }
 0x5e2   : > { %13211 = vmatpush1.bf16.msra.mxu0 %v17506_v50  ;;  %v6541_v61 = vld [vmem:[#allocation5 + $0x830] sm:$0xff]  ;;  %v17602_v50 = vcombine.low %v6673_v55, %v6677_v25 }
 0x5e3   : > { %13252 = vmatpush1.bf16.msra.mxu1 %v17634_v44  ;;  %13212 = vmatprep.subr.bf16.mxu0 %v17499_v45  ;;  %v6665_v20 = vld [vmem:[#allocation5 + $0xc10] sm:$0xff]  ;;  %v17467_v21 = vcombine.high %v6537_v46, %v6541_v61  ;;  %v17466_v28 = vcombine.low %v6537_v46, %v6541_v61 }
 0x5e4   : > { %13253 = vmatprep.subr.bf16.mxu1 %v17627_v52  ;;  %v6669_v35 = vld [vmem:[#allocation5 + $0xc30] sm:$0xff] }
 0x5e5   : > { %v17595_v44 = vcombine.high %v6665_v20, %v6669_v35  ;;  %v6657_v45 = vld [vmem:[#allocation5 + $0xbd0] sm:$0xff]  ;;  %v17594_v22 = vcombine.low %v6665_v20, %v6669_v35 }
 0x5e6   : > { %13213 = vmatpush1.bf16.msra.mxu0 %v17498_v10  ;;  %v6661_v38 = vld [vmem:[#allocation5 + $0xbf0] sm:$0xff] }
 0x5e7   : > { %13254 = vmatpush1.bf16.msra.mxu1 %v17626_v16  ;;  %13214 = vmatprep.subr.bf16.mxu0 %v17491_v19  ;;  %v6785_v52 = vld [vmem:[#allocation5 + $0xfd0] sm:$0xff]  ;;  %v17587_v63 = vcombine.high %v6657_v45, %v6661_v38  ;;  %v17586_v5 = vcombine.low %v6657_v45, %v6661_v38 }
 0x5e8   : > { %13255 = vmatprep.subr.bf16.mxu1 %v17619_v3  ;;  %v6789_v59 = vld [vmem:[#allocation5 + $0xff0] sm:$0xff] }
 0x5e9   : > { %v17715_v10 = vcombine.high %v6785_v52, %v6789_v59  ;;  %v6649_v16 = vld [vmem:[#allocation5 + $0xb90] sm:$0xff]  ;;  %v17714_v7 = vcombine.low %v6785_v52, %v6789_v59 }
 0x5ea   : > { %13215 = vmatpush1.bf16.msra.mxu0 %v17490_v53  ;;  %v6653_v19 = vld [vmem:[#allocation5 + $0xbb0] sm:$0xff] }
 0x5eb   : > { %13256 = vmatpush1.bf16.msra.mxu1 %v17618_v11  ;;  %13216 = vmatprep.subr.bf16.mxu0 %v17483_v41  ;;  %v6777_v3 = vld [vmem:[#allocation5 + $0xf90] sm:$0xff]  ;;  %v17579_v58 = vcombine.high %v6649_v16, %v6653_v19  ;;  %v17578_v13 = vcombine.low %v6649_v16, %v6653_v19 }
 0x5ec   : > { %13257 = vmatprep.subr.bf16.mxu1 %v17611_v12  ;;  %v6781_v14 = vld [vmem:[#allocation5 + $0xfb0] sm:$0xff] }
 0x5ed   : > { %v17707_v53 = vcombine.high %v6777_v3, %v6781_v14  ;;  %v6641_v11 = vld [vmem:[#allocation5 + $0xb50] sm:$0xff]  ;;  %v17706_v55 = vcombine.low %v6777_v3, %v6781_v14 }
 0x5ee   : > { %13217 = vmatpush1.bf16.msra.mxu0 %v17482_v54  ;;  %v6645_v41 = vld [vmem:[#allocation5 + $0xb70] sm:$0xff] }
 0x5ef   : > { %13258 = vmatpush1.bf16.msra.mxu1 %v17610_v60  ;;  %13218 = vmatprep.subr.bf16.mxu0 %v17475_v1  ;;  %v6769_v12 = vld [vmem:[#allocation5 + $0xf50] sm:$0xff]  ;;  %v17571_v25 = vcombine.high %v6641_v11, %v6645_v41  ;;  %v17570_v61 = vcombine.low %v6641_v11, %v6645_v41 }
 0x5f0   : > { %13259 = vmatprep.subr.bf16.mxu1 %v17603_v29  ;;  %v6773_v0 = vld [vmem:[#allocation5 + $0xf70] sm:$0xff] }
 0x5f1   : > { %v17699_v54 = vcombine.high %v6769_v12, %v6773_v0  ;;  %v6633_v60 = vld [vmem:[#allocation5 + $0xb10] sm:$0xff]  ;;  %v17698_v20 = vcombine.low %v6769_v12, %v6773_v0 }
 0x5f2   : > { %13219 = vmatpush1.bf16.msra.mxu0 %v17474_v47  ;;  %v6637_v1 = vld [vmem:[#allocation5 + $0xb30] sm:$0xff] }
 0x5f3   : > { %13260 = vmatpush1.bf16.msra.mxu1 %v17602_v50  ;;  %13220 = vmatprep.subr.bf16.mxu0 %v17467_v21  ;;  %v6761_v29 = vld [vmem:[#allocation5 + $0xf10] sm:$0xff]  ;;  %v17563_v35 = vcombine.high %v6633_v60, %v6637_v1  ;;  %v17562_v38 = vcombine.low %v6633_v60, %v6637_v1 }
 0x5f4   : > { %13261 = vmatprep.subr.bf16.mxu1 %v17595_v44  ;;  %v6765_v46 = vld [vmem:[#allocation5 + $0xf30] sm:$0xff] }
 0x5f5   : > { %v17691_v47 = vcombine.high %v6761_v29, %v6765_v46  ;;  %v6625_v50 = vld [vmem:[#allocation5 + $0xad0] sm:$0xff]  ;;  %v17690_v52 = vcombine.low %v6761_v29, %v6765_v46 }
 0x5f6   : > { %13221 = vmatpush1.bf16.msra.mxu0 %v17466_v28  ;;  %v6629_v21 = vld [vmem:[#allocation5 + $0xaf0] sm:$0xff] }
 0x5f7   : > { %13262 = vmatpush1.bf16.msra.mxu1 %v17594_v22  ;;  %13222 = vmatprep.subr.bf16.mxu0 %v17587_v63  ;;  %v6753_v44 = vld [vmem:[#allocation5 + $0xed0] sm:$0xff]  ;;  %v17555_v59 = vcombine.high %v6625_v50, %v6629_v21  ;;  %v17554_v19 = vcombine.low %v6625_v50, %v6629_v21 }
 0x5f8   : > { %13263 = vmatprep.subr.bf16.mxu1 %v17715_v10  ;;  %v6757_v45 = vld [vmem:[#allocation5 + $0xef0] sm:$0xff] }
 0x5f9   : > { %v17683_v28 = vcombine.high %v6753_v44, %v6757_v45  ;;  %v6617_v22 = vld [vmem:[#allocation5 + $0xa90] sm:$0xff]  ;;  %v17682_v3 = vcombine.low %v6753_v44, %v6757_v45 }
 0x5fa   : > { %13223 = vmatpush2.bf16.msra.mxu0 %v17586_v5  ;;  %v6621_v63 = vld [vmem:[#allocation5 + $0xab0] sm:$0xff] }
 0x5fb   : > { %13264 = vmatpush2.bf16.msra.mxu1 %v17714_v7  ;;  %13224 = vmatprep.subr.bf16.mxu0 %v17579_v58  ;;  %v6745_v10 = vld [vmem:[#allocation5 + $0xe90] sm:$0xff]  ;;  %v17547_v14 = vcombine.high %v6617_v22, %v6621_v63  ;;  %v17546_v41 = vcombine.low %v6617_v22, %v6621_v63 }
 0x5fc   : > { %13265 = vmatprep.subr.bf16.mxu1 %v17707_v53  ;;  %v6749_v16 = vld [vmem:[#allocation5 + $0xeb0] sm:$0xff] }
 0x5fd   : > { %v17675_v5 = vcombine.high %v6745_v10, %v6749_v16  ;;  %v6609_v7 = vld [vmem:[#allocation5 + $0xa50] sm:$0xff]  ;;  %v17674_v12 = vcombine.low %v6745_v10, %v6749_v16 }
 0x5fe   : > { %13225 = vmatpush2.bf16.msra.mxu0 %v17578_v13  ;;  %v6613_v58 = vld [vmem:[#allocation5 + $0xa70] sm:$0xff] }
 0x5ff   : > { %13266 = vmatpush2.bf16.msra.mxu1 %v17706_v55  ;;  %13226 = vmatprep.subr.bf16.mxu0 %v17571_v25  ;;  %v6737_v53 = vld [vmem:[#allocation5 + $0xe50] sm:$0xff]  ;;  %v17539_v0 = vcombine.high %v6609_v7, %v6613_v58  ;;  %v17538_v1 = vcombine.low %v6609_v7, %v6613_v58 }
 0x600   : > { %13267 = vmatprep.subr.bf16.mxu1 %v17699_v54  ;;  %v6741_v11 = vld [vmem:[#allocation5 + $0xe70] sm:$0xff] }
 0x601   : > { %v17667_v13 = vcombine.high %v6737_v53, %v6741_v11  ;;  %v6601_v55 = vld [vmem:[#allocation5 + $0xa10] sm:$0xff]  ;;  %v17666_v29 = vcombine.low %v6737_v53, %v6741_v11 }
 0x602   : > { %13227 = vmatpush2.bf16.msra.mxu0 %v17570_v61  ;;  %v6605_v25 = vld [vmem:[#allocation5 + $0xa30] sm:$0xff] }
 0x603   : > { %13268 = vmatpush2.bf16.msra.mxu1 %v17698_v20  ;;  %13228 = vmatprep.subr.bf16.mxu0 %v17563_v35  ;;  %v6729_v54 = vld [vmem:[#allocation5 + $0xe10] sm:$0xff]  ;;  %v17531_v46 = vcombine.high %v6601_v55, %v6605_v25  ;;  %v17530_v21 = vcombine.low %v6601_v55, %v6605_v25 }
 0x604   : > { %13269 = vmatprep.subr.bf16.mxu1 %v17691_v47  ;;  %v6733_v60 = vld [vmem:[#allocation5 + $0xe30] sm:$0xff] }
 0x605   : > { %v17659_v61 = vcombine.high %v6729_v54, %v6733_v60  ;;  %v6849_v20 = vld [vmem:[#allocation5 + $0x11d0] sm:$0xff]  ;;  %v17658_v44 = vcombine.low %v6729_v54, %v6733_v60 }
 0x606   : > { %13229 = vmatpush2.bf16.msra.mxu0 %v17562_v38  ;;  %v6853_v35 = vld [vmem:[#allocation5 + $0x11f0] sm:$0xff] }
 0x607   : > { %13270 = vmatpush2.bf16.msra.mxu1 %v17690_v52  ;;  %13230 = vmatprep.subr.bf16.mxu0 %v17555_v59  ;;  %v6977_v47 = vld [vmem:[#allocation5 + $0x15d0] sm:$0xff]  ;;  %v17779_v45 = vcombine.high %v6849_v20, %v6853_v35 }
 0x608   : > { %13271 = vmatprep.subr.bf16.mxu1 %v17683_v28  ;;  %v6981_v50 = vld [vmem:[#allocation5 + $0x15f0] sm:$0xff]  ;;  %v17778_v28 = vcombine.low %v6849_v20, %v6853_v35 }
 0x609   : > { %v17907_v38 = vcombine.high %v6977_v47, %v6981_v50  ;;  %v6841_v52 = vld [vmem:[#allocation5 + $0x1190] sm:$0xff]  ;;  %v17906_v10 = vcombine.low %v6977_v47, %v6981_v50 }
 0x60a   : > { %13231 = vmatpush2.bf16.msra.mxu0 %v17554_v19  ;;  %v6845_v59 = vld [vmem:[#allocation5 + $0x11b0] sm:$0xff] }
 0x60b   : > { %13272 = vmatpush2.bf16.msra.mxu1 %v17682_v3  ;;  %13232 = vmatprep.subr.bf16.mxu0 %v17547_v14  ;;  %v6969_v22 = vld [vmem:[#allocation5 + $0x1590] sm:$0xff]  ;;  %v17771_v16 = vcombine.high %v6841_v52, %v6845_v59 }
 0x60c   : > { %13273 = vmatprep.subr.bf16.mxu1 %v17675_v5  ;;  %v6973_v63 = vld [vmem:[#allocation5 + $0x15b0] sm:$0xff] }
 0x60d   : > { %v6833_v19 = vld [vmem:[#allocation5 + $0x1150] sm:$0xff]  ;;  %v17899_v5 = vcombine.high %v6969_v22, %v6973_v63 }
 0x60e   : > { %13233 = vmatpush2.bf16.msra.mxu0 %v17546_v41  ;;  %v6837_v3 = vld [vmem:[#allocation5 + $0x1170] sm:$0xff]  ;;  %v17770_v41 = vcombine.low %v6841_v52, %v6845_v59 }
 0x60f   : > { %13274 = vmatpush2.bf16.msra.mxu1 %v17674_v12  ;;  %13234 = vmatprep.subr.bf16.mxu0 %v17539_v0  ;;  %v6961_v7 = vld [vmem:[#allocation5 + $0x1550] sm:$0xff]  ;;  %v17898_v0 = vcombine.low %v6969_v22, %v6973_v63  ;;  %v17762_v47 = vcombine.low %v6833_v19, %v6837_v3 }
 0x610   : > { %13275 = vmatprep.subr.bf16.mxu1 %v17667_v13  ;;  %v6965_v58 = vld [vmem:[#allocation5 + $0x1570] sm:$0xff]  ;;  %v17763_v13 = vcombine.high %v6833_v19, %v6837_v3 }
 0x611   : > { %v6825_v60 = vld [vmem:[#allocation5 + $0x1110] sm:$0xff] }
 0x612   : > { %13235 = vmatpush2.bf16.msra.mxu0 %v17538_v1  ;;  %v6829_v1 = vld [vmem:[#allocation5 + $0x1130] sm:$0xff] }
 0x613   : > { %13276 = vmatpush2.bf16.msra.mxu1 %v17666_v29  ;;  %13236 = vmatprep.subr.bf16.mxu0 %v17531_v46  ;;  %v6953_v46 = vld [vmem:[#allocation5 + $0x1510] sm:$0xff]  ;;  %v17754_v22 = vcombine.low %v6825_v60, %v6829_v1 }
 0x614   : > { %13277 = vmatprep.subr.bf16.mxu1 %v17659_v61  ;;  %v6957_v61 = vld [vmem:[#allocation5 + $0x1530] sm:$0xff] }
 0x615   : > { %v6821_v52 = vld [vmem:[#allocation5 + $0x10f0] sm:$0xff]  ;;  %v17882_v63 = vcombine.low %v6953_v46, %v6957_v61 }
 0x616   : > { %13237 = vmatpush2.bf16.msra.mxu0 %v17530_v21  ;;  %v17890_v21 = vcombine.low %v6961_v7, %v6965_v58  ;;  %v6945_v59 = vld [vmem:[#allocation5 + $0x14d0] sm:$0xff] }
 0x617   : > { %13278 = vmatpush2.bf16.msra.mxu1 %v17658_v44  ;;  %13288 = vmatprep.subr.bf16.mxu0 %v17779_v45  ;;  %v17755_v44 = vcombine.high %v6825_v60, %v6829_v1  ;;  %v17883_v45 = vcombine.high %v6953_v46, %v6957_v61  ;;  %v6809_v19 = vld [vmem:[#allocation5 + $0x1090] sm:$0xff] }
 0x618   : > { %13329 = vmatprep.subr.bf16.mxu1 %v17907_v38  ;;  %v6817_v38 = vld [vmem:[#allocation5 + $0x10d0] sm:$0xff] }
 0x619   : > { %v12994_v14 = vpop.f32.mrf.mxu0  ;;  %13239 = vmatmul.mubr.bf16.vlgmr.msra.gmra.mxu0 %v19933_v4  ;;  %v6813_v3 = vld [vmem:[#allocation5 + $0x10b0] sm:$0xff] }
 0x61a   : > { %v12995_v53 = vadd.f32 %v12994_v14, %v20047_v26  ;;  %v13035_v11 = vpop.f32.mrf.mxu1  ;;  %13280 = vmatmul.mubr.bf16.vlgmr.msra.gmra.mxu1 %v19935_v34  ;;  %13289 = vmatpush1.bf16.msra.mxu0 %v17778_v28  ;;  %v17891_v26 = vcombine.high %v6961_v7, %v6965_v58  ;;  %v6949_v28 = vld [vmem:[#allocation5 + $0x14f0] sm:$0xff]  ;;  %v17746_v7 = vcombine.low %v6817_v38, %v6821_v52 }
 0x61b   : > { %13320 = vmatprep.mubr.bf16.mxu0 %v19937_v51  ;;  %13330 = vmatpush1.bf16.msra.mxu1 %v17906_v10  ;;  %v12996_v12 = vpop.f32.mrf.mxu0  ;;  %v17747_v10 = vcombine.high %v6817_v38, %v6821_v52  ;;  %v6937_v14 = vld [vmem:[#allocation5 + $0x1490] sm:$0xff]  ;;  %v17874_v58 = vcombine.low %v6945_v59, %v6949_v28 }
 0x61c   : > { %v20057_v55 = vadd.f32 %v13035_v11, %v12995_v53  ;;  %13361 = vmatprep.mubr.bf16.mxu1 %v19940_v39  ;;  %v12997_v25 = vadd.f32 %v12996_v12, %v20051_v36  ;;  %v13037_v54 = vpop.f32.mrf.mxu1  ;;  %13290 = vmatprep.subr.bf16.mxu0 %v17771_v16  ;;  %v17875_v16 = vcombine.high %v6945_v59, %v6949_v28  ;;  %v6805_v12 = vld [vmem:[#allocation5 + $0x1070] sm:$0xff] }
 0x61d   : > { %v12998_v29 = vpop.f32.mrf.mxu0  ;;  %13331 = vmatprep.subr.bf16.mxu1 %v17899_v5  ;;  %v6941_v5 = vld [vmem:[#allocation5 + $0x14b0] sm:$0xff]  ;;  %v17739_v53 = vcombine.high %v6809_v19, %v6813_v3 }
 0x61e   : > { %v20061_v20 = vadd.f32 %v13037_v54, %v12997_v25  ;;  %v13039_v35 = vpop.f32.mrf.mxu1  ;;  %13291 = vmatpush1.bf16.msra.mxu0 %v17770_v41  ;;  %v17867_v11 = vcombine.high %v6937_v14, %v6941_v5  ;;  %v6801_v41 = vld [vmem:[#allocation5 + $0x1050] sm:$0xff]  ;;  %v17738_v25 = vcombine.low %v6809_v19, %v6813_v3  ;;  %v17866_v54 = vcombine.low %v6937_v14, %v6941_v5 }
 0x61f   : > { %13332 = vmatpush1.bf16.msra.mxu1 %v17898_v0  ;;  %v12999_v50 = vpop.f32.mrf.mxu0  ;;  %13292 = vmatprep.subr.bf16.mxu0 %v17763_v13  ;;  %v6929_v0 = vld [vmem:[#allocation5 + $0x1450] sm:$0xff]  ;;  %v17730_v35 = vcombine.low %v6801_v41, %v6805_v12 }
 0x620   : > { %v13040_v36 = vpop.f32.mrf.mxu1  ;;  %13333 = vmatprep.subr.bf16.mxu1 %v17891_v26  ;;  %v6933_v13 = vld [vmem:[#allocation5 + $0x1470] sm:$0xff]  ;;  %v17731_v26 = vcombine.high %v6801_v41, %v6805_v12 }
 0x621   : > { %v17859_v60 = vcombine.high %v6929_v0, %v6933_v13  ;;  %v6793_v1 = vld [vmem:[#allocation5 + $0x1010] sm:$0xff] }
 0x622   : > { %13293 = vmatpush1.bf16.msra.mxu0 %v17762_v47  ;;  %v6797_v29 = vld [vmem:[#allocation5 + $0x1030] sm:$0xff]  ;;  %v17858_v47 = vcombine.low %v6929_v0, %v6933_v13 }
 0x623   : > { %13334 = vmatpush1.bf16.msra.mxu1 %v17890_v21  ;;  %13294 = vmatprep.subr.bf16.mxu0 %v17755_v44  ;;  %v6921_v46 = vld [vmem:[#allocation5 + $0x1410] sm:$0xff]  ;;  %v17723_v50 = vcombine.high %v6793_v1, %v6797_v29  ;;  %v17722_v52 = vcombine.low %v6793_v1, %v6797_v29 }
 0x624   : > { %13335 = vmatprep.subr.bf16.mxu1 %v17883_v45  ;;  %v6925_v61 = vld [vmem:[#allocation5 + $0x1430] sm:$0xff] }
 0x625   : > { %v17851_v21 = vcombine.high %v6921_v46, %v6925_v61  ;;  %v6913_v44 = vld [vmem:[#allocation5 + $0x13d0] sm:$0xff]  ;;  %v17850_v59 = vcombine.low %v6921_v46, %v6925_v61 }
 0x626   : > { %13295 = vmatpush1.bf16.msra.mxu0 %v17754_v22  ;;  %v6917_v36 = vld [vmem:[#allocation5 + $0x13f0] sm:$0xff] }
 0x627   : > { %13336 = vmatpush1.bf16.msra.mxu1 %v17882_v63  ;;  %13296 = vmatprep.subr.bf16.mxu0 %v17747_v10  ;;  %v7041_v45 = vld [vmem:[#allocation5 + $0x17d0] sm:$0xff]  ;;  %v17843_v28 = vcombine.high %v6913_v44, %v6917_v36  ;;  %v17842_v3 = vcombine.low %v6913_v44, %v6917_v36 }
 0x628   : > { %13337 = vmatprep.subr.bf16.mxu1 %v17875_v16  ;;  %v7045_v38 = vld [vmem:[#allocation5 + $0x17f0] sm:$0xff] }
 0x629   : > { %v17971_v22 = vcombine.high %v7041_v45, %v7045_v38  ;;  %v6905_v63 = vld [vmem:[#allocation5 + $0x1390] sm:$0xff]  ;;  %v17970_v14 = vcombine.low %v7041_v45, %v7045_v38 }
 0x62a   : > { %13297 = vmatpush1.bf16.msra.mxu0 %v17746_v7  ;;  %v6909_v10 = vld [vmem:[#allocation5 + $0x13b0] sm:$0xff] }
 0x62b   : > { %13338 = vmatpush1.bf16.msra.mxu1 %v17874_v58  ;;  %13298 = vmatprep.subr.bf16.mxu0 %v17739_v53  ;;  %v7033_v16 = vld [vmem:[#allocation5 + $0x1790] sm:$0xff]  ;;  %v17835_v5 = vcombine.high %v6905_v63, %v6909_v10  ;;  %v17834_v12 = vcombine.low %v6905_v63, %v6909_v10 }
 0x62c   : > { %13339 = vmatprep.subr.bf16.mxu1 %v17867_v11  ;;  %v7037_v19 = vld [vmem:[#allocation5 + $0x17b0] sm:$0xff] }
 0x62d   : > { %v17963_v7 = vcombine.high %v7033_v16, %v7037_v19  ;;  %v6897_v58 = vld [vmem:[#allocation5 + $0x1350] sm:$0xff]  ;;  %v17962_v0 = vcombine.low %v7033_v16, %v7037_v19 }
 0x62e   : > { %13299 = vmatpush1.bf16.msra.mxu0 %v17738_v25  ;;  %v6901_v53 = vld [vmem:[#allocation5 + $0x1370] sm:$0xff] }
 0x62f   : > { %13340 = vmatpush1.bf16.msra.mxu1 %v17866_v54  ;;  %13300 = vmatprep.subr.bf16.mxu0 %v17731_v26  ;;  %v7025_v11 = vld [vmem:[#allocation5 + $0x1750] sm:$0xff]  ;;  %v17827_v13 = vcombine.high %v6897_v58, %v6901_v53  ;;  %v17826_v29 = vcombine.low %v6897_v58, %v6901_v53 }
 0x630   : > { %13341 = vmatprep.subr.bf16.mxu1 %v17859_v60  ;;  %v7029_v41 = vld [vmem:[#allocation5 + $0x1770] sm:$0xff] }
 0x631   : > { %v17955_v25 = vcombine.high %v7025_v11, %v7029_v41  ;;  %v6889_v54 = vld [vmem:[#allocation5 + $0x1310] sm:$0xff]  ;;  %v17954_v46 = vcombine.low %v7025_v11, %v7029_v41 }
 0x632   : > { %13301 = vmatpush1.bf16.msra.mxu0 %v17730_v35  ;;  %v6893_v26 = vld [vmem:[#allocation5 + $0x1330] sm:$0xff] }
 0x633   : > { %13342 = vmatpush1.bf16.msra.mxu1 %v17858_v47  ;;  %13302 = vmatprep.subr.bf16.mxu0 %v17723_v50  ;;  %v7017_v60 = vld [vmem:[#allocation5 + $0x1710] sm:$0xff]  ;;  %v17819_v61 = vcombine.high %v6889_v54, %v6893_v26  ;;  %v17818_v36 = vcombine.low %v6889_v54, %v6893_v26 }
 0x634   : > { %13343 = vmatprep.subr.bf16.mxu1 %v17851_v21  ;;  %v7021_v1 = vld [vmem:[#allocation5 + $0x1730] sm:$0xff] }
 0x635   : > { %v17947_v35 = vcombine.high %v7017_v60, %v7021_v1  ;;  %v6881_v47 = vld [vmem:[#allocation5 + $0x12d0] sm:$0xff]  ;;  %v17946_v45 = vcombine.low %v7017_v60, %v7021_v1 }
 0x636   : > { %13303 = vmatpush1.bf16.msra.mxu0 %v17722_v52  ;;  %v6885_v50 = vld [vmem:[#allocation5 + $0x12f0] sm:$0xff] }
 0x637   : > { %13344 = vmatpush1.bf16.msra.mxu1 %v17850_v59  ;;  %13304 = vmatprep.subr.bf16.mxu0 %v17843_v28  ;;  %v7009_v21 = vld [vmem:[#allocation5 + $0x16d0] sm:$0xff]  ;;  %v17811_v38 = vcombine.high %v6881_v47, %v6885_v50  ;;  %v17810_v10 = vcombine.low %v6881_v47, %v6885_v50 }
 0x638   : > { %13345 = vmatprep.subr.bf16.mxu1 %v17971_v22  ;;  %v7013_v44 = vld [vmem:[#allocation5 + $0x16f0] sm:$0xff] }
 0x639   : > { %v17939_v52 = vcombine.high %v7009_v21, %v7013_v44  ;;  %v6873_v59 = vld [vmem:[#allocation5 + $0x1290] sm:$0xff]  ;;  %v17938_v16 = vcombine.low %v7009_v21, %v7013_v44 }
 0x63a   : > { %13305 = vmatpush2.bf16.msra.mxu0 %v17842_v3  ;;  %v6877_v28 = vld [vmem:[#allocation5 + $0x12b0] sm:$0xff] }
 0x63b   : > { %13346 = vmatpush2.bf16.msra.mxu1 %v17970_v14  ;;  %13306 = vmatprep.subr.bf16.mxu0 %v17835_v5  ;;  %v7001_v22 = vld [vmem:[#allocation5 + $0x1690] sm:$0xff]  ;;  %v17803_v19 = vcombine.high %v6873_v59, %v6877_v28  ;;  %v17802_v53 = vcombine.low %v6873_v59, %v6877_v28 }
 0x63c   : > { %13347 = vmatprep.subr.bf16.mxu1 %v17963_v7  ;;  %v7005_v63 = vld [vmem:[#allocation5 + $0x16b0] sm:$0xff] }
 0x63d   : > { %v17931_v3 = vcombine.high %v7001_v22, %v7005_v63  ;;  %v6865_v14 = vld [vmem:[#allocation5 + $0x1250] sm:$0xff]  ;;  %v17930_v11 = vcombine.low %v7001_v22, %v7005_v63 }
 0x63e   : > { %13307 = vmatpush2.bf16.msra.mxu0 %v17834_v12  ;;  %v6869_v5 = vld [vmem:[#allocation5 + $0x1270] sm:$0xff] }
 0x63f   : > { %13348 = vmatpush2.bf16.msra.mxu1 %v17962_v0  ;;  %13308 = vmatprep.subr.bf16.mxu0 %v17827_v13  ;;  %v6993_v7 = vld [vmem:[#allocation5 + $0x1650] sm:$0xff]  ;;  %v17795_v41 = vcombine.high %v6865_v14, %v6869_v5  ;;  %v17794_v26 = vcombine.low %v6865_v14, %v6869_v5 }
 0x640   : > { %13349 = vmatprep.subr.bf16.mxu1 %v17955_v25  ;;  %v6997_v58 = vld [vmem:[#allocation5 + $0x1670] sm:$0xff] }
 0x641   : > { %v17923_v12 = vcombine.high %v6993_v7, %v6997_v58  ;;  %v6857_v0 = vld [vmem:[#allocation5 + $0x1210] sm:$0xff]  ;;  %v17922_v60 = vcombine.low %v6993_v7, %v6997_v58 }
 0x642   : > { %13309 = vmatpush2.bf16.msra.mxu0 %v17826_v29  ;;  %v6861_v13 = vld [vmem:[#allocation5 + $0x1230] sm:$0xff] }
 0x643   : > { %13350 = vmatpush2.bf16.msra.mxu1 %v17954_v46  ;;  %13310 = vmatprep.subr.bf16.mxu0 %v17819_v61  ;;  %v6985_v25 = vld [vmem:[#allocation5 + $0x1610] sm:$0xff]  ;;  %v17787_v1 = vcombine.high %v6857_v0, %v6861_v13  ;;  %v17786_v50 = vcombine.low %v6857_v0, %v6861_v13 }
 0x644   : > { %13351 = vmatprep.subr.bf16.mxu1 %v17947_v35  ;;  %v6989_v54 = vld [vmem:[#allocation5 + $0x1630] sm:$0xff] }
 0x645   : > { %v17915_v29 = vcombine.high %v6985_v25, %v6989_v54  ;;  %v7105_v46 = vld [vmem:[#allocation5 + $0x19d0] sm:$0xff]  ;;  %v17914_v21 = vcombine.low %v6985_v25, %v6989_v54 }
 0x646   : > { %13311 = vmatpush2.bf16.msra.mxu0 %v17818_v36  ;;  %v7109_v61 = vld [vmem:[#allocation5 + $0x19f0] sm:$0xff] }
 0x647   : > { %13352 = vmatpush2.bf16.msra.mxu1 %v17946_v45  ;;  %13312 = vmatprep.subr.bf16.mxu0 %v17811_v38  ;;  %v7233_v35 = vld [vmem:[#allocation5 + $0x1dd0] sm:$0xff]  ;;  %v18035_v44 = vcombine.high %v7105_v46, %v7109_v61 }
 0x648   : > { %13353 = vmatprep.subr.bf16.mxu1 %v17939_v52  ;;  %v7237_v47 = vld [vmem:[#allocation5 + $0x1df0] sm:$0xff]  ;;  %v18034_v52 = vcombine.low %v7105_v46, %v7109_v61 }
 0x649   : > { %v18163_v36 = vcombine.high %v7233_v35, %v7237_v47  ;;  %v7097_v45 = vld [vmem:[#allocation5 + $0x1990] sm:$0xff]  ;;  %v18162_v22 = vcombine.low %v7233_v35, %v7237_v47 }
 0x64a   : > { %13313 = vmatpush2.bf16.msra.mxu0 %v17810_v10  ;;  %v7101_v38 = vld [vmem:[#allocation5 + $0x19b0] sm:$0xff] }
 0x64b   : > { %13354 = vmatpush2.bf16.msra.mxu1 %v17938_v16  ;;  %13314 = vmatprep.subr.bf16.mxu0 %v17803_v19  ;;  %v7225_v59 = vld [vmem:[#allocation5 + $0x1d90] sm:$0xff]  ;;  %v18027_v63 = vcombine.high %v7097_v45, %v7101_v38 }
 0x64c   : > { %13355 = vmatprep.subr.bf16.mxu1 %v17931_v3  ;;  %v7229_v28 = vld [vmem:[#allocation5 + $0x1db0] sm:$0xff] }
 0x64d   : > { %v7089_v10 = vld [vmem:[#allocation5 + $0x1950] sm:$0xff]  ;;  %v18155_v3 = vcombine.high %v7225_v59, %v7229_v28 }
 0x64e   : > { %13315 = vmatpush2.bf16.msra.mxu0 %v17802_v53  ;;  %v7093_v16 = vld [vmem:[#allocation5 + $0x1970] sm:$0xff]  ;;  %v18026_v53 = vcombine.low %v7097_v45, %v7101_v38 }
 0x64f   : > { %13356 = vmatpush2.bf16.msra.mxu1 %v17930_v11  ;;  %13316 = vmatprep.subr.bf16.mxu0 %v17795_v41  ;;  %v7217_v14 = vld [vmem:[#allocation5 + $0x1d50] sm:$0xff]  ;;  %v18154_v41 = vcombine.low %v7225_v59, %v7229_v28  ;;  %v18018_v35 = vcombine.low %v7089_v10, %v7093_v16 }
 0x650   : > { %13357 = vmatprep.subr.bf16.mxu1 %v17923_v12  ;;  %v7221_v5 = vld [vmem:[#allocation5 + $0x1d70] sm:$0xff]  ;;  %v18019_v12 = vcombine.high %v7089_v10, %v7093_v16 }
 0x651   : > { %v7081_v54 = vld [vmem:[#allocation5 + $0x1910] sm:$0xff] }
 0x652   : > { %13317 = vmatpush2.bf16.msra.mxu0 %v17794_v26  ;;  %v7085_v26 = vld [vmem:[#allocation5 + $0x1930] sm:$0xff] }
 0x653   : > { %13358 = vmatpush2.bf16.msra.mxu1 %v17922_v60  ;;  %13318 = vmatprep.subr.bf16.mxu0 %v17787_v1  ;;  %v7209_v1 = vld [vmem:[#allocation5 + $0x1d10] sm:$0xff]  ;;  %v18010_v59 = vcombine.low %v7081_v54, %v7085_v26 }
 0x654   : > { %13359 = vmatprep.subr.bf16.mxu1 %v17915_v29  ;;  %v7213_v29 = vld [vmem:[#allocation5 + $0x1d30] sm:$0xff] }
 0x655   : > { %v7077_v45 = vld [vmem:[#allocation5 + $0x18f0] sm:$0xff]  ;;  %v18138_v28 = vcombine.low %v7209_v1, %v7213_v29 }
 0x656   : > { %13319 = vmatpush2.bf16.msra.mxu0 %v17786_v50  ;;  %v18146_v50 = vcombine.low %v7217_v14, %v7221_v5  ;;  %v7201_v38 = vld [vmem:[#allocation5 + $0x1cd0] sm:$0xff] }
 0x657   : > { %13360 = vmatpush2.bf16.msra.mxu1 %v17914_v21  ;;  %13370 = vmatprep.subr.bf16.mxu0 %v18035_v44  ;;  %v18011_v21 = vcombine.high %v7081_v54, %v7085_v26  ;;  %v18139_v44 = vcombine.high %v7209_v1, %v7213_v29  ;;  %v7065_v10 = vld [vmem:[#allocation5 + $0x1890] sm:$0xff] }
 0x658   : > { %13411 = vmatprep.subr.bf16.mxu1 %v18163_v36  ;;  %v7073_v36 = vld [vmem:[#allocation5 + $0x18d0] sm:$0xff] }
 0x659   : > { %v13076_v19 = vpop.f32.mrf.mxu0  ;;  %13321 = vmatmul.mubr.bf16.vlgmr.msra.gmra.mxu0 %v19960_v42  ;;  %v7069_v16 = vld [vmem:[#allocation5 + $0x18b0] sm:$0xff] }
 0x65a   : > { %v13077_v7 = vadd.f32 %v13076_v19, %v20057_v55  ;;  %v13117_v58 = vpop.f32.mrf.mxu1  ;;  %13362 = vmatmul.mubr.bf16.vlgmr.msra.gmra.mxu1 %v19962_v15  ;;  %13371 = vmatpush1.bf16.msra.mxu0 %v18034_v52  ;;  %v18147_v55 = vcombine.high %v7217_v14, %v7221_v5  ;;  %v7205_v52 = vld [vmem:[#allocation5 + $0x1cf0] sm:$0xff]  ;;  %v18002_v14 = vcombine.low %v7073_v36, %v7077_v45 }
 0x65b   : > { %13402 = vmatprep.mubr.bf16.mxu0 %v19965_v18  ;;  %13412 = vmatpush1.bf16.msra.mxu1 %v18162_v22  ;;  %v13078_v11 = vpop.f32.mrf.mxu0  ;;  %v18003_v22 = vcombine.high %v7073_v36, %v7077_v45  ;;  %v7193_v19 = vld [vmem:[#allocation5 + $0x1c90] sm:$0xff]  ;;  %v18130_v5 = vcombine.low %v7201_v38, %v7205_v52 }
 0x65c   : > { %v20067_v0 = vadd.f32 %v13117_v58, %v13077_v7  ;;  %13443 = vmatprep.mubr.bf16.mxu1 %v19974_v48  ;;  %v13079_v13 = vadd.f32 %v13078_v11, %v20061_v20  ;;  %v13119_v25 = vpop.f32.mrf.mxu1  ;;  %13372 = vmatprep.subr.bf16.mxu0 %v18027_v63  ;;  %v18131_v63 = vcombine.high %v7201_v38, %v7205_v52  ;;  %v7061_v11 = vld [vmem:[#allocation5 + $0x1870] sm:$0xff] }
 0x65d   : > { %v13080_v60 = vpop.f32.mrf.mxu0  ;;  %13413 = vmatprep.subr.bf16.mxu1 %v18155_v3  ;;  %v7197_v3 = vld [vmem:[#allocation5 + $0x1cb0] sm:$0xff]  ;;  %v17995_v7 = vcombine.high %v7065_v10, %v7069_v16 }
 0x65e   : > { %v20071_v46 = vadd.f32 %v13119_v25, %v13079_v13  ;;  %v13121_v61 = vpop.f32.mrf.mxu1  ;;  %13373 = vmatpush1.bf16.msra.mxu0 %v18026_v53  ;;  %v18123_v58 = vcombine.high %v7193_v19, %v7197_v3  ;;  %v7057_v53 = vld [vmem:[#allocation5 + $0x1850] sm:$0xff]  ;;  %v17994_v13 = vcombine.low %v7065_v10, %v7069_v16  ;;  %v18122_v25 = vcombine.low %v7193_v19, %v7197_v3 }
 0x65f   : > { %13414 = vmatpush1.bf16.msra.mxu1 %v18154_v41  ;;  %v13081_v47 = vpop.f32.mrf.mxu0  ;;  %13374 = vmatprep.subr.bf16.mxu0 %v18019_v12  ;;  %v7185_v41 = vld [vmem:[#allocation5 + $0x1c50] sm:$0xff]  ;;  %v17986_v61 = vcombine.low %v7057_v53, %v7061_v11 }
 0x660   : > { %v13122_v20 = vpop.f32.mrf.mxu1  ;;  %13415 = vmatprep.subr.bf16.mxu1 %v18147_v55  ;;  %v7189_v12 = vld [vmem:[#allocation5 + $0x1c70] sm:$0xff]  ;;  %v17987_v55 = vcombine.high %v7057_v53, %v7061_v11 }
 0x661   : > { %v18115_v54 = vcombine.high %v7185_v41, %v7189_v12  ;;  %v7049_v26 = vld [vmem:[#allocation5 + $0x1810] sm:$0xff] }
 0x662   : > { %13375 = vmatpush1.bf16.msra.mxu0 %v18018_v35  ;;  %v7053_v60 = vld [vmem:[#allocation5 + $0x1830] sm:$0xff]  ;;  %v18114_v35 = vcombine.low %v7185_v41, %v7189_v12 }
 0x663   : > { %13416 = vmatpush1.bf16.msra.mxu1 %v18146_v50  ;;  %13376 = vmatprep.subr.bf16.mxu0 %v18011_v21  ;;  %v7177_v1 = vld [vmem:[#allocation5 + $0x1c10] sm:$0xff]  ;;  %v17979_v47 = vcombine.high %v7049_v26, %v7053_v60  ;;  %v17978_v45 = vcombine.low %v7049_v26, %v7053_v60 }
 0x664   : > { %13417 = vmatprep.subr.bf16.mxu1 %v18139_v44  ;;  %v7181_v29 = vld [vmem:[#allocation5 + $0x1c30] sm:$0xff] }
 0x665   : > { %v18107_v50 = vcombine.high %v7177_v1, %v7181_v29  ;;  %v7169_v21 = vld [vmem:[#allocation5 + $0x1bd0] sm:$0xff]  ;;  %v18106_v38 = vcombine.low %v7177_v1, %v7181_v29 }
 0x666   : > { %13377 = vmatpush1.bf16.msra.mxu0 %v18010_v59  ;;  %v7173_v20 = vld [vmem:[#allocation5 + $0x1bf0] sm:$0xff] }
 0x667   : > { %13418 = vmatpush1.bf16.msra.mxu1 %v18138_v28  ;;  %13378 = vmatprep.subr.bf16.mxu0 %v18003_v22  ;;  %v7297_v44 = vld [vmem:[#allocation5 + $0x1fd0] sm:$0xff]  ;;  %v18099_v52 = vcombine.high %v7169_v21, %v7173_v20  ;;  %v18098_v16 = vcombine.low %v7169_v21, %v7173_v20 }
 0x668   : > { %13419 = vmatprep.subr.bf16.mxu1 %v18131_v63  ;;  %v7301_v36 = vld [vmem:[#allocation5 + $0x1ff0] sm:$0xff] }
 0x669   : > { %v18227_v59 = vcombine.high %v7297_v44, %v7301_v36  ;;  %v7161_v28 = vld [vmem:[#allocation5 + $0x1b90] sm:$0xff]  ;;  %v18226_v19 = vcombine.low %v7297_v44, %v7301_v36 }
 0x66a   : > { %13379 = vmatpush1.bf16.msra.mxu0 %v18002_v14  ;;  %v7165_v22 = vld [vmem:[#allocation5 + $0x1bb0] sm:$0xff] }
 0x66b   : > { %13420 = vmatpush1.bf16.msra.mxu1 %v18130_v5  ;;  %13380 = vmatprep.subr.bf16.mxu0 %v17995_v7  ;;  %v7289_v63 = vld [vmem:[#allocation5 + $0x1f90] sm:$0xff]  ;;  %v18091_v3 = vcombine.high %v7161_v28, %v7165_v22  ;;  %v18090_v11 = vcombine.low %v7161_v28, %v7165_v22 }
 0x66c   : > { %13421 = vmatprep.subr.bf16.mxu1 %v18123_v58  ;;  %v7293_v10 = vld [vmem:[#allocation5 + $0x1fb0] sm:$0xff] }
 0x66d   : > { %v18219_v14 = vcombine.high %v7289_v63, %v7293_v10  ;;  %v7153_v5 = vld [vmem:[#allocation5 + $0x1b50] sm:$0xff]  ;;  %v18218_v41 = vcombine.low %v7289_v63, %v7293_v10 }
 0x66e   : > { %13381 = vmatpush1.bf16.msra.mxu0 %v17994_v13  ;;  %v7157_v7 = vld [vmem:[#allocation5 + $0x1b70] sm:$0xff] }
 0x66f   : > { %13422 = vmatpush1.bf16.msra.mxu1 %v18122_v25  ;;  %13382 = vmatprep.subr.bf16.mxu0 %v17987_v55  ;;  %v7281_v58 = vld [vmem:[#allocation5 + $0x1f50] sm:$0xff]  ;;  %v18083_v12 = vcombine.high %v7153_v5, %v7157_v7  ;;  %v18082_v60 = vcombine.low %v7153_v5, %v7157_v7 }
 0x670   : > { %13423 = vmatprep.subr.bf16.mxu1 %v18115_v54  ;;  %v7285_v53 = vld [vmem:[#allocation5 + $0x1f70] sm:$0xff] }
 0x671   : > { %v18211_v13 = vcombine.high %v7281_v58, %v7285_v53  ;;  %v7145_v25 = vld [vmem:[#allocation5 + $0x1b10] sm:$0xff]  ;;  %v18210_v1 = vcombine.low %v7281_v58, %v7285_v53 }
 0x672   : > { %13383 = vmatpush1.bf16.msra.mxu0 %v17986_v61  ;;  %v7149_v55 = vld [vmem:[#allocation5 + $0x1b30] sm:$0xff] }
 0x673   : > { %13424 = vmatpush1.bf16.msra.mxu1 %v18114_v35  ;;  %13384 = vmatprep.subr.bf16.mxu0 %v17979_v47  ;;  %v7273_v54 = vld [vmem:[#allocation5 + $0x1f10] sm:$0xff]  ;;  %v18075_v29 = vcombine.high %v7145_v25, %v7149_v55  ;;  %v18074_v20 = vcombine.low %v7145_v25, %v7149_v55 }
 0x674   : > { %13425 = vmatprep.subr.bf16.mxu1 %v18107_v50  ;;  %v7277_v26 = vld [vmem:[#allocation5 + $0x1f30] sm:$0xff] }
 0x675   : > { %v18203_v61 = vcombine.high %v7273_v54, %v7277_v26  ;;  %v7137_v35 = vld [vmem:[#allocation5 + $0x1ad0] sm:$0xff]  ;;  %v18202_v44 = vcombine.low %v7273_v54, %v7277_v26 }
 0x676   : > { %13385 = vmatpush1.bf16.msra.mxu0 %v17978_v45  ;;  %v7141_v47 = vld [vmem:[#allocation5 + $0x1af0] sm:$0xff] }
 0x677   : > { %13426 = vmatpush1.bf16.msra.mxu1 %v18106_v38  ;;  %13386 = vmatprep.subr.bf16.mxu0 %v18099_v52  ;;  %v7265_v50 = vld [vmem:[#allocation5 + $0x1ed0] sm:$0xff]  ;;  %v18067_v36 = vcombine.high %v7137_v35, %v7141_v47  ;;  %v18066_v22 = vcombine.low %v7137_v35, %v7141_v47  ;;  %v6470_v35 = vld [vmem:[#allocation5 + $0x5f8] sm:$0xff] }
 0x678   : > { %13427 = vmatprep.subr.bf16.mxu1 %v18227_v59  ;;  %v7269_v21 = vld [vmem:[#allocation5 + $0x1ef0] sm:$0xff] }
 0x679   : > { %v18195_v45 = vcombine.high %v7265_v50, %v7269_v21  ;;  %v7129_v38 = vld [vmem:[#allocation5 + $0x1a90] sm:$0xff]  ;;  %v18194_v63 = vcombine.low %v7265_v50, %v7269_v21 }
 0x67a   : > { %13387 = vmatpush2.bf16.msra.mxu0 %v18098_v16  ;;  %v7133_v52 = vld [vmem:[#allocation5 + $0x1ab0] sm:$0xff] }
 0x67b   : > { %13428 = vmatpush2.bf16.msra.mxu1 %v18226_v19  ;;  %13388 = vmatprep.subr.bf16.mxu0 %v18091_v3  ;;  %v7257_v59 = vld [vmem:[#allocation5 + $0x1e90] sm:$0xff]  ;;  %v18059_v10 = vcombine.high %v7129_v38, %v7133_v52  ;;  %v18058_v7 = vcombine.low %v7129_v38, %v7133_v52  ;;  %v6458_v52 = vld [vmem:[#allocation5 + $0x598] sm:$0xff] }
 0x67c   : > { %13429 = vmatprep.subr.bf16.mxu1 %v18219_v14  ;;  %v7261_v28 = vld [vmem:[#allocation5 + $0x1eb0] sm:$0xff] }
 0x67d   : > { %v18187_v16 = vcombine.high %v7257_v59, %v7261_v28  ;;  %v7121_v19 = vld [vmem:[#allocation5 + $0x1a50] sm:$0xff]  ;;  %v18186_v58 = vcombine.low %v7257_v59, %v7261_v28  ;;  %v6462_v59 = vld [vmem:[#allocation5 + $0x5b8] sm:$0xff] }
 0x67e   : > { %13389 = vmatpush2.bf16.msra.mxu0 %v18090_v11  ;;  %v7125_v3 = vld [vmem:[#allocation5 + $0x1a70] sm:$0xff] }
 0x67f   : > { %13430 = vmatpush2.bf16.msra.mxu1 %v18218_v41  ;;  %13390 = vmatprep.subr.bf16.mxu0 %v18083_v12  ;;  %v7249_v14 = vld [vmem:[#allocation5 + $0x1e50] sm:$0xff]  ;;  %v18051_v53 = vcombine.high %v7121_v19, %v7125_v3  ;;  %v18050_v55 = vcombine.low %v7121_v19, %v7125_v3  ;;  %v17389_v3 = vcombine.high %v6458_v52, %v6462_v59 }
 0x680   : > { %13431 = vmatprep.subr.bf16.mxu1 %v18211_v13  ;;  %v7253_v5 = vld [vmem:[#allocation5 + $0x1e70] sm:$0xff] }
 0x681   : > { %v18179_v11 = vcombine.high %v7249_v14, %v7253_v5  ;;  %v7113_v41 = vld [vmem:[#allocation5 + $0x1a10] sm:$0xff]  ;;  %v18178_v54 = vcombine.low %v7249_v14, %v7253_v5  ;;  %v6450_v14 = vld [vmem:[#allocation5 + $0x558] sm:$0xff] }
 0x682   : > { %13391 = vmatpush2.bf16.msra.mxu0 %v18082_v60  ;;  %v7117_v12 = vld [vmem:[#allocation5 + $0x1a30] sm:$0xff]  ;;  %v6454_v5 = vld [vmem:[#allocation5 + $0x578] sm:$0xff] }
 0x683   : > { %13432 = vmatpush2.bf16.msra.mxu1 %v18210_v1  ;;  %13392 = vmatprep.subr.bf16.mxu0 %v18075_v29  ;;  %v7241_v13 = vld [vmem:[#allocation5 + $0x1e10] sm:$0xff]  ;;  %v18043_v26 = vcombine.high %v7113_v41, %v7117_v12  ;;  %v6338_v1 = vld [vmem:[#allocation5 + $0x1d8] sm:$0xff]  ;;  %v18042_v47 = vcombine.low %v7113_v41, %v7117_v12 }
 0x684   : > { %13433 = vmatprep.subr.bf16.mxu1 %v18203_v61  ;;  %v7245_v25 = vld [vmem:[#allocation5 + $0x1e30] sm:$0xff]  ;;  %v6342_v29 = vld [vmem:[#allocation5 + $0x1f8] sm:$0xff] }
 0x685   : > { %v18171_v60 = vcombine.high %v7241_v13, %v7245_v25  ;;  %v6466_v61 = vld [vmem:[#allocation5 + $0x5d8] sm:$0xff]  ;;  %v18170_v50 = vcombine.low %v7241_v13, %v7245_v25  ;;  %v17269_v21 = vcombine.high %v6338_v1, %v6342_v29  ;;  %v17268_v38 = vcombine.low %v6338_v1, %v6342_v29 }
 0x686   : > { %13393 = vmatpush2.bf16.msra.mxu0 %v18074_v20  ;;  %v17397_v20 = vcombine.high %v6466_v61, %v6470_v35  ;;  %v17396_v28 = vcombine.low %v6466_v61, %v6470_v35  ;;  %v17381_v25 = vcombine.high %v6450_v14, %v6454_v5  ;;  %v6446_v1 = vld [vmem:[#allocation5 + $0x538] sm:$0xff] }
 0x687   : > { %13434 = vmatpush2.bf16.msra.mxu1 %v18202_v44  ;;  %13394 = vmatprep.subr.bf16.mxu0 %v18067_v36  ;;  %v6330_v44 = vld [vmem:[#allocation5 + $0x198] sm:$0xff] }
 0x688   : > { %13435 = vmatprep.subr.bf16.mxu1 %v18195_v45  ;;  %v6334_v36 = vld [vmem:[#allocation5 + $0x1b8] sm:$0xff]  ;;  %v7327_v45 = vrot.slane %v19982_v40, %v19803_v17 }
 0x68a   : > { %13395 = vmatpush2.bf16.msra.mxu0 %v18066_v22  ;;  %v7331_v22 = vrot.slane %v19982_v40, %v19806_v23  ;;  %v17388_v23 = vcombine.low %v6458_v52, %v6462_v59 }
 0x68b   : > { %13436 = vmatpush2.bf16.msra.mxu1 %v18194_v63  ;;  %13396 = vmatprep.subr.bf16.mxu0 %v18059_v10  ;;  %v17261_v63 = vcombine.high %v6330_v44, %v6334_v36  ;;  %v6322_v10 = vld [vmem:[#allocation5 + $0x158] sm:$0xff] }
 0x68c   : > { %13437 = vmatprep.subr.bf16.mxu1 %v18187_v16  ;;  %v6326_v16 = vld [vmem:[#allocation5 + $0x178] sm:$0xff] }
 0x68d   : > { %v17252_v61 = vcombine.low %v6322_v10, %v6326_v16 }
 0x68e   : > { %13397 = vmatpush2.bf16.msra.mxu0 %v18058_v7 }
 0x68f   : > { %13438 = vmatpush2.bf16.msra.mxu1 %v18186_v58  ;;  %13398 = vmatprep.subr.bf16.mxu0 %v18051_v53  ;;  %v17260_v58 = vcombine.low %v6330_v44, %v6334_v36  ;;  %v6310_v44 = vld [vmem:[#allocation5 + $0xf8] sm:$0xff] }
 0x690   : > { %13439 = vmatprep.subr.bf16.mxu1 %v18179_v11  ;;  %v17253_v11 = vcombine.high %v6322_v10, %v6326_v16  ;;  %v6434_v36 = vld [vmem:[#allocation5 + $0x4d8] sm:$0xff] }
 0x691   : > { %v6426_v10 = vld [vmem:[#allocation5 + $0x498] sm:$0xff] }
 0x692   : > { %13399 = vmatpush2.bf16.msra.mxu0 %v18050_v55  ;;  %v6314_v55 = vld [vmem:[#allocation5 + $0x118] sm:$0xff] }
 0x693   : > { %13440 = vmatpush2.bf16.msra.mxu1 %v18178_v54  ;;  %13400 = vmatprep.subr.bf16.mxu0 %v18043_v26  ;;  %v6318_v54 = vld [vmem:[#allocation5 + $0x138] sm:$0xff] }
 0x694   : > { %13441 = vmatprep.subr.bf16.mxu1 %v18171_v60  ;;  %v6442_v60 = vld [vmem:[#allocation5 + $0x518] sm:$0xff] }
 0x695   : > { %v17372_v52 = vcombine.low %v6442_v60, %v6446_v1  ;;  %v6430_v16 = vld [vmem:[#allocation5 + $0x4b8] sm:$0xff] }
 0x696   : > { %13401 = vmatpush2.bf16.msra.mxu0 %v18042_v47  ;;  %v17380_v47 = vcombine.low %v6450_v14, %v6454_v5  ;;  %v17357_v5 = vcombine.high %v6426_v10, %v6430_v16 }
 0x697   : > { %13442 = vmatpush2.bf16.msra.mxu1 %v18170_v50  ;;  %13452 = vmatprep.subr.bf16.mxu0 %v17269_v21  ;;  %v17373_v21 = vcombine.high %v6442_v60, %v6446_v1 }
 0x698   : > { %13493 = vmatprep.subr.bf16.mxu1 %v17397_v20  ;;  %v6306_v20 = vld [vmem:[#allocation5 + $0xd8] sm:$0xff] }
 0x699   : > { %v13158_v19 = vpop.f32.mrf.mxu0  ;;  %13403 = vmatmul.mubr.bf16.vlgmr.msra.gmra.mxu0 %v19987_v6  ;;  %v17237_v59 = vcombine.high %v6306_v20, %v6310_v44 }
 0x69a   : > { %v13159_v17 = vadd.f32 %v13158_v19, %v7327_v45  ;;  %v13199_v7 = vpop.f32.mrf.mxu1  ;;  %13444 = vmatmul.mubr.bf16.vlgmr.msra.gmra.mxu1 %v19989_v43  ;;  %13453 = vmatpush1.bf16.msra.mxu0 %v17268_v38  ;;  %v6438_v45 = vld [vmem:[#allocation5 + $0x4f8] sm:$0xff]  ;;  %v17244_v38 = vcombine.low %v6314_v55, %v6318_v54  ;;  %v17236_v19 = vcombine.low %v6306_v20, %v6310_v44 }
 0x69b   : > { %13484 = vmatprep.mubr.bf16.mxu0 %v19885_v2  ;;  %13494 = vmatpush1.bf16.msra.mxu1 %v17396_v28  ;;  %v13160_v53 = vpop.f32.mrf.mxu0  ;;  %v17365_v28 = vcombine.high %v6434_v36, %v6438_v45 }
 0x69c   : > { %v20080_v41 = vadd.f32 %v13199_v7, %v13159_v17  ;;  %13525 = vmatprep.mubr.bf16.mxu1 %v19888_v30  ;;  %v13161_v12 = vadd.f32 %v13160_v53, %v7331_v22  ;;  %v13201_v13 = vpop.f32.mrf.mxu1  ;;  %13454 = vmatprep.subr.bf16.mxu0 %v17261_v63  ;;  %v17245_v30 = vcombine.high %v6314_v55, %v6318_v54  ;;  %v6298_v22 = vld [vmem:[#allocation5 + $0x98] sm:$0xff] }
 0x69d   : > { %v13162_v26 = vpop.f32.mrf.mxu0  ;;  %13495 = vmatprep.subr.bf16.mxu1 %v17389_v3  ;;  %v6302_v63 = vld [vmem:[#allocation5 + $0xb8] sm:$0xff]  ;;  %v17364_v3 = vcombine.low %v6434_v36, %v6438_v45 }
 0x69e   : > { %v20083_v29 = vadd.f32 %v13201_v13, %v13161_v12  ;;  %v13203_v2 = vpop.f32.mrf.mxu1  ;;  %13455 = vmatpush1.bf16.msra.mxu0 %v17260_v58  ;;  %v17229_v14 = vcombine.high %v6298_v22, %v6302_v63  ;;  %v6290_v17 = vld [vmem:[#allocation5 + $0x58] sm:$0xff] }
 0x69f   : > { %13496 = vmatpush1.bf16.msra.mxu1 %v17388_v23  ;;  %v13163_v35 = vpop.f32.mrf.mxu0  ;;  %13456 = vmatprep.subr.bf16.mxu0 %v17253_v11  ;;  %v6294_v7 = vld [vmem:[#allocation5 + $0x78] sm:$0xff]  ;;  %v17228_v23 = vcombine.low %v6298_v22, %v6302_v63  ;;  %v17356_v11 = vcombine.low %v6426_v10, %v6430_v16 }
 0x6a0   : > { %v13204_v50 = vpop.f32.mrf.mxu1  ;;  %13497 = vmatprep.subr.bf16.mxu1 %v17381_v25  ;;  %v6418_v58 = vld [vmem:[#allocation5 + $0x458] sm:$0xff]  ;;  %v17221_v12 = vcombine.high %v6290_v17, %v6294_v7  ;;  %v17220_v60 = vcombine.low %v6290_v17, %v6294_v7 }
 0x6a1   : > { %v6422_v53 = vld [vmem:[#allocation5 + $0x478] sm:$0xff] }
 0x6a2   : > { %13457 = vmatpush1.bf16.msra.mxu0 %v17252_v61  ;;  %v17349_v13 = vcombine.high %v6418_v58, %v6422_v53  ;;  %v6282_v25 = vld [vmem:[#allocation5 + $0x18] sm:$0xff]  ;;  %v17348_v1 = vcombine.low %v6418_v58, %v6422_v53 }
 0x6a3   : > { %13498 = vmatpush1.bf16.msra.mxu1 %v17380_v47  ;;  %13458 = vmatprep.subr.bf16.mxu0 %v17245_v30  ;;  %v6286_v55 = vld [vmem:[#allocation5 + $0x38] sm:$0xff] }
 0x6a4   : > { %13499 = vmatprep.subr.bf16.mxu1 %v17373_v21  ;;  %v6410_v54 = vld [vmem:[#allocation5 + $0x418] sm:$0xff]  ;;  %v17213_v2 = vcombine.high %v6282_v25, %v6286_v55  ;;  %v17212_v21 = vcombine.low %v6282_v25, %v6286_v55 }
 0x6a5   : > { %v6414_v26 = vld [vmem:[#allocation5 + $0x438] sm:$0xff] }
 0x6a6   : > { %13459 = vmatpush1.bf16.msra.mxu0 %v17244_v38  ;;  %v17341_v61 = vcombine.high %v6410_v54, %v6414_v26  ;;  %v6402_v35 = vld [vmem:[#allocation5 + $0x3d8] sm:$0xff]  ;;  %v17340_v20 = vcombine.low %v6410_v54, %v6414_v26 }
 0x6a7   : > { %13500 = vmatpush1.bf16.msra.mxu1 %v17372_v52  ;;  %13460 = vmatprep.subr.bf16.mxu0 %v17237_v59  ;;  %v6406_v47 = vld [vmem:[#allocation5 + $0x3f8] sm:$0xff] }
 0x6a8   : > { %13501 = vmatprep.subr.bf16.mxu1 %v17365_v28  ;;  %v6530_v30 = vld [vmem:[#allocation5 + $0x7d8] sm:$0xff]  ;;  %v17333_v44 = vcombine.high %v6402_v35, %v6406_v47  ;;  %v17332_v28 = vcombine.low %v6402_v35, %v6406_v47 }
 0x6a9   : > { %v6534_v50 = vld [vmem:[#allocation5 + $0x7f8] sm:$0xff] }
 0x6aa   : > { %13461 = vmatpush1.bf16.msra.mxu0 %v17236_v19  ;;  %v17461_v36 = vcombine.high %v6530_v30, %v6534_v50  ;;  %v6394_v45 = vld [vmem:[#allocation5 + $0x398] sm:$0xff]  ;;  %v17460_v22 = vcombine.low %v6530_v30, %v6534_v50 }
 0x6ab   : > { %13502 = vmatpush1.bf16.msra.mxu1 %v17364_v3  ;;  %13462 = vmatprep.subr.bf16.mxu0 %v17229_v14  ;;  %v6398_v38 = vld [vmem:[#allocation5 + $0x3b8] sm:$0xff] }
 0x6ac   : > { %13503 = vmatprep.subr.bf16.mxu1 %v17357_v5  ;;  %v6522_v52 = vld [vmem:[#allocation5 + $0x798] sm:$0xff]  ;;  %v17325_v63 = vcombine.high %v6394_v45, %v6398_v38  ;;  %v17324_v5 = vcombine.low %v6394_v45, %v6398_v38 }
 0x6ad   : > { %v6526_v59 = vld [vmem:[#allocation5 + $0x7b8] sm:$0xff] }
 0x6ae   : > { %13463 = vmatpush1.bf16.msra.mxu0 %v17228_v23  ;;  %v17453_v10 = vcombine.high %v6522_v52, %v6526_v59  ;;  %v6386_v16 = vld [vmem:[#allocation5 + $0x358] sm:$0xff]  ;;  %v17452_v17 = vcombine.low %v6522_v52, %v6526_v59 }
 0x6af   : > { %13504 = vmatpush1.bf16.msra.mxu1 %v17356_v11  ;;  %13464 = vmatprep.subr.bf16.mxu0 %v17221_v12  ;;  %v6390_v19 = vld [vmem:[#allocation5 + $0x378] sm:$0xff] }
 0x6b0   : > { %13505 = vmatprep.subr.bf16.mxu1 %v17349_v13  ;;  %v6514_v3 = vld [vmem:[#allocation5 + $0x758] sm:$0xff]  ;;  %v17317_v7 = vcombine.high %v6386_v16, %v6390_v19  ;;  %v17316_v13 = vcombine.low %v6386_v16, %v6390_v19 }
 0x6b1   : > { %v6518_v14 = vld [vmem:[#allocation5 + $0x778] sm:$0xff] }
 0x6b2   : > { %13465 = vmatpush1.bf16.msra.mxu0 %v17220_v60  ;;  %v17445_v58 = vcombine.high %v6514_v3, %v6518_v14  ;;  %v6378_v53 = vld [vmem:[#allocation5 + $0x318] sm:$0xff]  ;;  %v17444_v25 = vcombine.low %v6514_v3, %v6518_v14 }
 0x6b3   : > { %13506 = vmatpush1.bf16.msra.mxu1 %v17348_v1  ;;  %13466 = vmatprep.subr.bf16.mxu0 %v17213_v2  ;;  %v6382_v23 = vld [vmem:[#allocation5 + $0x338] sm:$0xff] }
 0x6b4   : > { %13507 = vmatprep.subr.bf16.mxu1 %v17341_v61  ;;  %v6506_v11 = vld [vmem:[#allocation5 + $0x718] sm:$0xff]  ;;  %v17309_v55 = vcombine.high %v6378_v53, %v6382_v23  ;;  %v17308_v61 = vcombine.low %v6378_v53, %v6382_v23 }
 0x6b5   : > { %v6510_v12 = vld [vmem:[#allocation5 + $0x738] sm:$0xff] }
 0x6b6   : > { %13467 = vmatpush1.bf16.msra.mxu0 %v17212_v21  ;;  %v17437_v54 = vcombine.high %v6506_v11, %v6510_v12  ;;  %v6370_v26 = vld [vmem:[#allocation5 + $0x2d8] sm:$0xff]  ;;  %v17436_v35 = vcombine.low %v6506_v11, %v6510_v12 }
 0x6b7   : > { %13508 = vmatpush1.bf16.msra.mxu1 %v17340_v20  ;;  %13468 = vmatprep.subr.bf16.mxu0 %v17333_v44  ;;  %v6374_v60 = vld [vmem:[#allocation5 + $0x2f8] sm:$0xff] }
 0x6b8   : > { %13509 = vmatprep.subr.bf16.mxu1 %v17461_v36  ;;  %v6498_v1 = vld [vmem:[#allocation5 + $0x6d8] sm:$0xff]  ;;  %v17301_v47 = vcombine.high %v6370_v26, %v6374_v60  ;;  %v17300_v36 = vcombine.low %v6370_v26, %v6374_v60 }
 0x6b9   : > { %v6502_v2 = vld [vmem:[#allocation5 + $0x6f8] sm:$0xff] }
 0x6ba   : > { %13469 = vmatpush2.bf16.msra.mxu0 %v17332_v28  ;;  %v17429_v30 = vcombine.high %v6498_v1, %v6502_v2  ;;  %v6362_v50 = vld [vmem:[#allocation5 + $0x298] sm:$0xff]  ;;  %v17428_v45 = vcombine.low %v6498_v1, %v6502_v2 }
 0x6bb   : > { %13510 = vmatpush2.bf16.msra.mxu1 %v17460_v22  ;;  %13470 = vmatprep.subr.bf16.mxu0 %v17325_v63  ;;  %v6366_v21 = vld [vmem:[#allocation5 + $0x2b8] sm:$0xff] }
 0x6bc   : > { %13511 = vmatprep.subr.bf16.mxu1 %v17453_v10  ;;  %v6490_v20 = vld [vmem:[#allocation5 + $0x698] sm:$0xff]  ;;  %v17293_v38 = vcombine.high %v6362_v50, %v6366_v21  ;;  %v17292_v10 = vcombine.low %v6362_v50, %v6366_v21 }
 0x6bd   : > { %v6494_v44 = vld [vmem:[#allocation5 + $0x6b8] sm:$0xff] }
 0x6be   : > { %13471 = vmatpush2.bf16.msra.mxu0 %v17324_v5  ;;  %v17421_v52 = vcombine.high %v6490_v20, %v6494_v44  ;;  %v6354_v59 = vld [vmem:[#allocation5 + $0x258] sm:$0xff]  ;;  %v17420_v16 = vcombine.low %v6490_v20, %v6494_v44 }
 0x6bf   : > { %13512 = vmatpush2.bf16.msra.mxu1 %v17452_v17  ;;  %13472 = vmatprep.subr.bf16.mxu0 %v17317_v7  ;;  %v6358_v28 = vld [vmem:[#allocation5 + $0x278] sm:$0xff] }
 0x6c0   : > { %13513 = vmatprep.subr.bf16.mxu1 %v17445_v58  ;;  %v6482_v22 = vld [vmem:[#allocation5 + $0x658] sm:$0xff]  ;;  %v17285_v19 = vcombine.high %v6354_v59, %v6358_v28  ;;  %v17284_v58 = vcombine.low %v6354_v59, %v6358_v28 }
 0x6c1   : > { %v6486_v63 = vld [vmem:[#allocation5 + $0x678] sm:$0xff] }
 0x6c2   : > { %13473 = vmatpush2.bf16.msra.mxu0 %v17316_v13  ;;  %v17413_v3 = vcombine.high %v6482_v22, %v6486_v63  ;;  %v6346_v14 = vld [vmem:[#allocation5 + $0x218] sm:$0xff]  ;;  %v17412_v53 = vcombine.low %v6482_v22, %v6486_v63 }
 0x6c3   : > { %13514 = vmatpush2.bf16.msra.mxu1 %v17444_v25  ;;  %13474 = vmatprep.subr.bf16.mxu0 %v17309_v55  ;;  %v6350_v5 = vld [vmem:[#allocation5 + $0x238] sm:$0xff] }
 0x6c4   : > { %13515 = vmatprep.subr.bf16.mxu1 %v17437_v54  ;;  %v6474_v17 = vld [vmem:[#allocation5 + $0x618] sm:$0xff]  ;;  %v17277_v23 = vcombine.high %v6346_v14, %v6350_v5  ;;  %v17276_v54 = vcombine.low %v6346_v14, %v6350_v5 }
 0x6c5   : > { %v6478_v7 = vld [vmem:[#allocation5 + $0x638] sm:$0xff] }
 0x6c6   : > { %13475 = vmatpush2.bf16.msra.mxu0 %v17308_v61  ;;  %v17405_v11 = vcombine.high %v6474_v17, %v6478_v7  ;;  %v6594_v12 = vld [vmem:[#allocation5 + $0x9d8] sm:$0xff]  ;;  %v17404_v26 = vcombine.low %v6474_v17, %v6478_v7 }
 0x6c7   : > { %13516 = vmatpush2.bf16.msra.mxu1 %v17436_v35  ;;  %13476 = vmatprep.subr.bf16.mxu0 %v17301_v47  ;;  %v6598_v13 = vld [vmem:[#allocation5 + $0x9f8] sm:$0xff] }
 0x6c8   : > { %13517 = vmatprep.subr.bf16.mxu1 %v17429_v30  ;;  %v6722_v25 = vld [vmem:[#allocation5 + $0xdd8] sm:$0xff]  ;;  %v17525_v60 = vcombine.high %v6594_v12, %v6598_v13  ;;  %v17524_v35 = vcombine.low %v6594_v12, %v6598_v13 }
 0x6c9   : > { %v6726_v55 = vld [vmem:[#allocation5 + $0xdf8] sm:$0xff] }
 0x6ca   : > { %13477 = vmatpush2.bf16.msra.mxu0 %v17300_v36  ;;  %v17653_v1 = vcombine.high %v6722_v25, %v6726_v55  ;;  %v6586_v2 = vld [vmem:[#allocation5 + $0x998] sm:$0xff]  ;;  %v17652_v50 = vcombine.low %v6722_v25, %v6726_v55 }
 0x6cb   : > { %13518 = vmatpush2.bf16.msra.mxu1 %v17428_v45  ;;  %13478 = vmatprep.subr.bf16.mxu0 %v17293_v38  ;;  %v6590_v61 = vld [vmem:[#allocation5 + $0x9b8] sm:$0xff] }
 0x6cc   : > { %13519 = vmatprep.subr.bf16.mxu1 %v17421_v52  ;;  %v6714_v47 = vld [vmem:[#allocation5 + $0xd98] sm:$0xff]  ;;  %v17517_v21 = vcombine.high %v6586_v2, %v6590_v61  ;;  %v17516_v22 = vcombine.low %v6586_v2, %v6590_v61 }
 0x6cd   : > { %v6718_v30 = vld [vmem:[#allocation5 + $0xdb8] sm:$0xff] }
 0x6ce   : > { %13479 = vmatpush2.bf16.msra.mxu0 %v17292_v10  ;;  %v6578_v20 = vld [vmem:[#allocation5 + $0x958] sm:$0xff]  ;;  %v17645_v45 = vcombine.high %v6714_v47, %v6718_v30  ;;  %v17644_v10 = vcombine.low %v6714_v47, %v6718_v30 }
 0x6cf   : > { %13520 = vmatpush2.bf16.msra.mxu1 %v17420_v16  ;;  %13480 = vmatprep.subr.bf16.mxu0 %v17285_v19  ;;  %v6582_v44 = vld [vmem:[#allocation5 + $0x978] sm:$0xff] }
 0x6d0   : > { %13521 = vmatprep.subr.bf16.mxu1 %v17413_v3  ;;  %v6706_v38 = vld [vmem:[#allocation5 + $0xd58] sm:$0xff]  ;;  %v17509_v16 = vcombine.high %v6578_v20, %v6582_v44 }
 0x6d1   : > { %v6710_v52 = vld [vmem:[#allocation5 + $0xd78] sm:$0xff] }
 0x6d2   : > { %13481 = vmatpush2.bf16.msra.mxu0 %v17284_v58  ;;  %v6570_v14 = vld [vmem:[#allocation5 + $0x918] sm:$0xff] }
 0x6d3   : > { %13522 = vmatpush2.bf16.msra.mxu1 %v17412_v53  ;;  %13482 = vmatprep.subr.bf16.mxu0 %v17277_v23  ;;  %v6574_v5 = vld [vmem:[#allocation5 + $0x938] sm:$0xff]  ;;  %v17508_v53 = vcombine.low %v6578_v20, %v6582_v44 }
 0x6d4   : > { %13523 = vmatprep.subr.bf16.mxu1 %v17405_v11  ;;  %v6698_v17 = vld [vmem:[#allocation5 + $0xd18] sm:$0xff]  ;;  %v17501_v11 = vcombine.high %v6570_v14, %v6574_v5 }
 0x6d5   : > { %v6702_v7 = vld [vmem:[#allocation5 + $0xd38] sm:$0xff] }
 0x6d6   : > { %13483 = vmatpush2.bf16.msra.mxu0 %v17276_v54  ;;  %v17629_v12 = vcombine.high %v6698_v17, %v6702_v7  ;;  %v6562_v13 = vld [vmem:[#allocation5 + $0x8d8] sm:$0xff] }
 0x6d7   : > { %13524 = vmatpush2.bf16.msra.mxu1 %v17404_v26  ;;  %13534 = vmatprep.subr.bf16.mxu0 %v17525_v60  ;;  %v6566_v25 = vld [vmem:[#allocation5 + $0x8f8] sm:$0xff]  ;;  %v17500_v26 = vcombine.low %v6570_v14, %v6574_v5  ;;  %v17628_v60 = vcombine.low %v6698_v17, %v6702_v7 }
 0x6d8   : > { %13575 = vmatprep.subr.bf16.mxu1 %v17653_v1  ;;  %v6690_v55 = vld [vmem:[#allocation5 + $0xcd8] sm:$0xff]  ;;  %v17493_v1 = vcombine.high %v6562_v13, %v6566_v25 }
 0x6d9   : > { %v13240_v36 = vpop.f32.mrf.mxu0  ;;  %13485 = vmatmul.mubr.bf16.vlgmr.msra.gmra.mxu0 %v19911_v57  ;;  %v6694_v54 = vld [vmem:[#allocation5 + $0xcf8] sm:$0xff] }
 0x6da   : > { %v13241_v59 = vadd.f32 %v13240_v36, %v20080_v41  ;;  %v13281_v28 = vpop.f32.mrf.mxu1  ;;  %13526 = vmatmul.mubr.bf16.vlgmr.msra.gmra.mxu1 %v19913_v24  ;;  %13535 = vmatpush1.bf16.msra.mxu0 %v17524_v35  ;;  %v17637_v41 = vcombine.high %v6706_v38, %v6710_v52  ;;  %v17621_v2 = vcombine.high %v6690_v55, %v6694_v54  ;;  %v6554_v61 = vld [vmem:[#allocation5 + $0x898] sm:$0xff] }
 0x6db   : > { %13566 = vmatprep.mubr.bf16.mxu0 %v19917_v8  ;;  %13576 = vmatpush1.bf16.msra.mxu1 %v17652_v50  ;;  %v13242_v63 = vpop.f32.mrf.mxu0  ;;  %v6558_v35 = vld [vmem:[#allocation5 + $0x8b8] sm:$0xff]  ;;  %v17492_v50 = vcombine.low %v6562_v13, %v6566_v25 }
 0x6dc   : > { %v20089_v19 = vadd.f32 %v13281_v28, %v13241_v59  ;;  %13607 = vmatprep.mubr.bf16.mxu1 %v19920_v49  ;;  %v13243_v57 = vadd.f32 %v13242_v63, %v20083_v29  ;;  %v13283_v3 = vpop.f32.mrf.mxu1  ;;  %13536 = vmatprep.subr.bf16.mxu0 %v17517_v21  ;;  %v17636_v49 = vcombine.low %v6706_v38, %v6710_v52  ;;  %v6682_v47 = vld [vmem:[#allocation5 + $0xc98] sm:$0xff] }
 0x6dd   : > { %v13244_v24 = vpop.f32.mrf.mxu0  ;;  %13577 = vmatprep.subr.bf16.mxu1 %v17645_v45  ;;  %v6686_v30 = vld [vmem:[#allocation5 + $0xcb8] sm:$0xff]  ;;  %v17620_v21 = vcombine.low %v6690_v55, %v6694_v54  ;;  %v17485_v20 = vcombine.high %v6554_v61, %v6558_v35  ;;  %v17484_v59 = vcombine.low %v6554_v61, %v6558_v35 }
 0x6de   : > { %v20093_v8 = vadd.f32 %v13283_v3, %v13243_v57  ;;  %v13285_v58 = vpop.f32.mrf.mxu1  ;;  %13537 = vmatpush1.bf16.msra.mxu0 %v17516_v22  ;;  %v17613_v44 = vcombine.high %v6682_v47, %v6686_v30  ;;  %v6546_v36 = vld [vmem:[#allocation5 + $0x858] sm:$0xff]  ;;  %v17612_v28 = vcombine.low %v6682_v47, %v6686_v30 }
 0x6df   : > { %13578 = vmatpush1.bf16.msra.mxu1 %v17644_v10  ;;  %v13245_v23 = vpop.f32.mrf.mxu0  ;;  %13538 = vmatprep.subr.bf16.mxu0 %v17509_v16  ;;  %v6550_v45 = vld [vmem:[#allocation5 + $0x878] sm:$0xff] }
 0x6e0   : > { %v13286_v29 = vpop.f32.mrf.mxu1  ;;  %13579 = vmatprep.subr.bf16.mxu1 %v17637_v41  ;;  %v6674_v38 = vld [vmem:[#allocation5 + $0xc58] sm:$0xff]  ;;  %v17477_v22 = vcombine.high %v6546_v36, %v6550_v45  ;;  %v17476_v41 = vcombine.low %v6546_v36, %v6550_v45 }
 0x6e1   : > { %v6678_v52 = vld [vmem:[#allocation5 + $0xc78] sm:$0xff] }
 0x6e2   : > { %13539 = vmatpush1.bf16.msra.mxu0 %v17508_v53  ;;  %v17605_v63 = vcombine.high %v6674_v38, %v6678_v52  ;;  %v6538_v10 = vld [vmem:[#allocation5 + $0x818] sm:$0xff]  ;;  %v17604_v14 = vcombine.low %v6674_v38, %v6678_v52 }
 0x6e3   : > { %13580 = vmatpush1.bf16.msra.mxu1 %v17636_v49  ;;  %13540 = vmatprep.subr.bf16.mxu0 %v17501_v11  ;;  %v6542_v16 = vld [vmem:[#allocation5 + $0x838] sm:$0xff] }
 0x6e4   : > { %13581 = vmatprep.subr.bf16.mxu1 %v17629_v12  ;;  %v6666_v57 = vld [vmem:[#allocation5 + $0xc18] sm:$0xff]  ;;  %v17469_v5 = vcombine.high %v6538_v10, %v6542_v16  ;;  %v17468_v23 = vcombine.low %v6538_v10, %v6542_v16 }
 0x6e5   : > { %v6670_v3 = vld [vmem:[#allocation5 + $0xc38] sm:$0xff] }
 0x6e6   : > { %13541 = vmatpush1.bf16.msra.mxu0 %v17500_v26  ;;  %v17597_v24 = vcombine.high %v6666_v57, %v6670_v3  ;;  %v6658_v17 = vld [vmem:[#allocation5 + $0xbd8] sm:$0xff]  ;;  %v17596_v49 = vcombine.low %v6666_v57, %v6670_v3 }
 0x6e7   : > { %13582 = vmatpush1.bf16.msra.mxu1 %v17628_v60  ;;  %13542 = vmatprep.subr.bf16.mxu0 %v17493_v1  ;;  %v6662_v7 = vld [vmem:[#allocation5 + $0xbf8] sm:$0xff] }
 0x6e8   : > { %13583 = vmatprep.subr.bf16.mxu1 %v17621_v2  ;;  %v6786_v58 = vld [vmem:[#allocation5 + $0xfd8] sm:$0xff]  ;;  %v17589_v11 = vcombine.high %v6658_v17, %v6662_v7  ;;  %v17588_v54 = vcombine.low %v6658_v17, %v6662_v7 }
 0x6e9   : > { %v6790_v53 = vld [vmem:[#allocation5 + $0xff8] sm:$0xff] }
 0x6ea   : > { %13543 = vmatpush1.bf16.msra.mxu0 %v17492_v50  ;;  %v17717_v29 = vcombine.high %v6786_v58, %v6790_v53  ;;  %v6650_v12 = vld [vmem:[#allocation5 + $0xb98] sm:$0xff]  ;;  %v17716_v26 = vcombine.low %v6786_v58, %v6790_v53 }
 0x6eb   : > { %13584 = vmatpush1.bf16.msra.mxu1 %v17620_v21  ;;  %13544 = vmatprep.subr.bf16.mxu0 %v17485_v20  ;;  %v6654_v13 = vld [vmem:[#allocation5 + $0xbb8] sm:$0xff] }
 0x6ec   : > { %13585 = vmatprep.subr.bf16.mxu1 %v17613_v44  ;;  %v6778_v25 = vld [vmem:[#allocation5 + $0xf98] sm:$0xff]  ;;  %v17581_v60 = vcombine.high %v6650_v12, %v6654_v13  ;;  %v17580_v30 = vcombine.low %v6650_v12, %v6654_v13 }
 0x6ed   : > { %v6782_v55 = vld [vmem:[#allocation5 + $0xfb8] sm:$0xff] }
 0x6ee   : > { %13545 = vmatpush1.bf16.msra.mxu0 %v17484_v59  ;;  %v17709_v1 = vcombine.high %v6778_v25, %v6782_v55  ;;  %v6642_v2 = vld [vmem:[#allocation5 + $0xb58] sm:$0xff]  ;;  %v17708_v50 = vcombine.low %v6778_v25, %v6782_v55 }
 0x6ef   : > { %13586 = vmatpush1.bf16.msra.mxu1 %v17612_v28  ;;  %13546 = vmatprep.subr.bf16.mxu0 %v17477_v22  ;;  %v6646_v61 = vld [vmem:[#allocation5 + $0xb78] sm:$0xff] }
 0x6f0   : > { %13587 = vmatprep.subr.bf16.mxu1 %v17605_v63  ;;  %v6770_v35 = vld [vmem:[#allocation5 + $0xf58] sm:$0xff]  ;;  %v17573_v21 = vcombine.high %v6642_v2, %v6646_v61  ;;  %v17572_v52 = vcombine.low %v6642_v2, %v6646_v61 }
 0x6f1   : > { %v6774_v47 = vld [vmem:[#allocation5 + $0xf78] sm:$0xff] }
 0x6f2   : > { %13547 = vmatpush1.bf16.msra.mxu0 %v17476_v41  ;;  %v17701_v20 = vcombine.high %v6770_v35, %v6774_v47  ;;  %v6634_v44 = vld [vmem:[#allocation5 + $0xb18] sm:$0xff]  ;;  %v17700_v59 = vcombine.low %v6770_v35, %v6774_v47 }
 0x6f3   : > { %13588 = vmatpush1.bf16.msra.mxu1 %v17604_v14  ;;  %13548 = vmatprep.subr.bf16.mxu0 %v17469_v5  ;;  %v6638_v36 = vld [vmem:[#allocation5 + $0xb38] sm:$0xff] }
 0x6f4   : > { %13589 = vmatprep.subr.bf16.mxu1 %v17597_v24  ;;  %v6762_v45 = vld [vmem:[#allocation5 + $0xf18] sm:$0xff]  ;;  %v17565_v28 = vcombine.high %v6634_v44, %v6638_v36  ;;  %v17564_v3 = vcombine.low %v6634_v44, %v6638_v36 }
 0x6f5   : > { %v6766_v38 = vld [vmem:[#allocation5 + $0xf38] sm:$0xff] }
 0x6f6   : > { %13549 = vmatpush1.bf16.msra.mxu0 %v17468_v23  ;;  %v17693_v22 = vcombine.high %v6762_v45, %v6766_v38  ;;  %v6626_v63 = vld [vmem:[#allocation5 + $0xad8] sm:$0xff]  ;;  %v17692_v41 = vcombine.low %v6762_v45, %v6766_v38 }
 0x6f7   : > { %13590 = vmatpush1.bf16.msra.mxu1 %v17596_v49  ;;  %13550 = vmatprep.subr.bf16.mxu0 %v17589_v11  ;;  %v6630_v10 = vld [vmem:[#allocation5 + $0xaf8] sm:$0xff] }
 0x6f8   : > { %13591 = vmatprep.subr.bf16.mxu1 %v17717_v29  ;;  %v6754_v16 = vld [vmem:[#allocation5 + $0xed8] sm:$0xff]  ;;  %v17557_v14 = vcombine.high %v6626_v63, %v6630_v10  ;;  %v17556_v53 = vcombine.low %v6626_v63, %v6630_v10 }
 0x6f9   : > { %v6758_v57 = vld [vmem:[#allocation5 + $0xef8] sm:$0xff] }
 0x6fa   : > { %13551 = vmatpush2.bf16.msra.mxu0 %v17588_v54  ;;  %v17685_v5 = vcombine.high %v6754_v16, %v6758_v57  ;;  %v6618_v24 = vld [vmem:[#allocation5 + $0xa98] sm:$0xff]  ;;  %v17684_v23 = vcombine.low %v6754_v16, %v6758_v57 }
 0x6fb   : > { %13592 = vmatpush2.bf16.msra.mxu1 %v17716_v26  ;;  %13552 = vmatprep.subr.bf16.mxu0 %v17581_v60  ;;  %v6622_v17 = vld [vmem:[#allocation5 + $0xab8] sm:$0xff] }
 0x6fc   : > { %13593 = vmatprep.subr.bf16.mxu1 %v17709_v1  ;;  %v6746_v7 = vld [vmem:[#allocation5 + $0xe98] sm:$0xff]  ;;  %v17549_v49 = vcombine.high %v6618_v24, %v6622_v17  ;;  %v17548_v55 = vcombine.low %v6618_v24, %v6622_v17 }
 0x6fd   : > { %v6750_v58 = vld [vmem:[#allocation5 + $0xeb8] sm:$0xff] }
 0x6fe   : > { %13553 = vmatpush2.bf16.msra.mxu0 %v17580_v30  ;;  %v17677_v11 = vcombine.high %v6746_v7, %v6750_v58  ;;  %v6610_v29 = vld [vmem:[#allocation5 + $0xa58] sm:$0xff]  ;;  %v17676_v54 = vcombine.low %v6746_v7, %v6750_v58 }
 0x6ff   : > { %13594 = vmatpush2.bf16.msra.mxu1 %v17708_v50  ;;  %13554 = vmatprep.subr.bf16.mxu0 %v17573_v21  ;;  %v6614_v12 = vld [vmem:[#allocation5 + $0xa78] sm:$0xff] }
 0x700   : > { %13595 = vmatprep.subr.bf16.mxu1 %v17701_v20  ;;  %v6738_v13 = vld [vmem:[#allocation5 + $0xe58] sm:$0xff]  ;;  %v17541_v26 = vcombine.high %v6610_v29, %v6614_v12  ;;  %v17540_v47 = vcombine.low %v6610_v29, %v6614_v12 }
 0x701   : > { %v6742_v25 = vld [vmem:[#allocation5 + $0xe78] sm:$0xff] }
 0x702   : > { %13555 = vmatpush2.bf16.msra.mxu0 %v17572_v52  ;;  %v17669_v60 = vcombine.high %v6738_v13, %v6742_v25  ;;  %v6602_v1 = vld [vmem:[#allocation5 + $0xa18] sm:$0xff]  ;;  %v17668_v30 = vcombine.low %v6738_v13, %v6742_v25 }
 0x703   : > { %13596 = vmatpush2.bf16.msra.mxu1 %v17700_v59  ;;  %13556 = vmatprep.subr.bf16.mxu0 %v17565_v28  ;;  %v6606_v2 = vld [vmem:[#allocation5 + $0xa38] sm:$0xff] }
 0x704   : > { %13597 = vmatprep.subr.bf16.mxu1 %v17693_v22  ;;  %v6730_v61 = vld [vmem:[#allocation5 + $0xe18] sm:$0xff]  ;;  %v17533_v50 = vcombine.high %v6602_v1, %v6606_v2  ;;  %v17532_v38 = vcombine.low %v6602_v1, %v6606_v2 }
 0x705   : > { %v6734_v35 = vld [vmem:[#allocation5 + $0xe38] sm:$0xff] }
 0x706   : > { %13557 = vmatpush2.bf16.msra.mxu0 %v17564_v3  ;;  %v17661_v21 = vcombine.high %v6730_v61, %v6734_v35  ;;  %v6850_v20 = vld [vmem:[#allocation5 + $0x11d8] sm:$0xff]  ;;  %v17660_v52 = vcombine.low %v6730_v61, %v6734_v35 }
 0x707   : > { %13598 = vmatpush2.bf16.msra.mxu1 %v17692_v41  ;;  %13558 = vmatprep.subr.bf16.mxu0 %v17557_v14  ;;  %v6854_v44 = vld [vmem:[#allocation5 + $0x11f8] sm:$0xff] }
 0x708   : > { %13599 = vmatprep.subr.bf16.mxu1 %v17685_v5  ;;  %v6978_v36 = vld [vmem:[#allocation5 + $0x15d8] sm:$0xff]  ;;  %v17781_v59 = vcombine.high %v6850_v20, %v6854_v44  ;;  %v17780_v10 = vcombine.low %v6850_v20, %v6854_v44 }
 0x709   : > { %v6982_v45 = vld [vmem:[#allocation5 + $0x15f8] sm:$0xff] }
 0x70a   : > { %13559 = vmatpush2.bf16.msra.mxu0 %v17556_v53  ;;  %v17909_v28 = vcombine.high %v6978_v36, %v6982_v45  ;;  %v6842_v22 = vld [vmem:[#allocation5 + $0x1198] sm:$0xff]  ;;  %v17908_v3 = vcombine.low %v6978_v36, %v6982_v45 }
 0x70b   : > { %13600 = vmatpush2.bf16.msra.mxu1 %v17684_v23  ;;  %13560 = vmatprep.subr.bf16.mxu0 %v17549_v49  ;;  %v6846_v63 = vld [vmem:[#allocation5 + $0x11b8] sm:$0xff] }
 0x70c   : > { %13601 = vmatprep.subr.bf16.mxu1 %v17677_v11  ;;  %v6970_v16 = vld [vmem:[#allocation5 + $0x1598] sm:$0xff]  ;;  %v17773_v41 = vcombine.high %v6842_v22, %v6846_v63  ;;  %v17772_v49 = vcombine.low %v6842_v22, %v6846_v63 }
 0x70d   : > { %v6974_v57 = vld [vmem:[#allocation5 + $0x15b8] sm:$0xff] }
 0x70e   : > { %13561 = vmatpush2.bf16.msra.mxu0 %v17548_v55  ;;  %v6834_v14 = vld [vmem:[#allocation5 + $0x1158] sm:$0xff]  ;;  %v17901_v17 = vcombine.high %v6970_v16, %v6974_v57  ;;  %v17900_v29 = vcombine.low %v6970_v16, %v6974_v57 }
 0x70f   : > { %13602 = vmatpush2.bf16.msra.mxu1 %v17676_v54  ;;  %13562 = vmatprep.subr.bf16.mxu0 %v17541_v26  ;;  %v6838_v5 = vld [vmem:[#allocation5 + $0x1178] sm:$0xff] }
 0x710   : > { %13603 = vmatprep.subr.bf16.mxu1 %v17669_v60  ;;  %v6962_v7 = vld [vmem:[#allocation5 + $0x1558] sm:$0xff]  ;;  %v17765_v12 = vcombine.high %v6834_v14, %v6838_v5  ;;  %v17764_v2 = vcombine.low %v6834_v14, %v6838_v5 }
 0x711   : > { %v6966_v58 = vld [vmem:[#allocation5 + $0x1578] sm:$0xff] }
 0x712   : > { %13563 = vmatpush2.bf16.msra.mxu0 %v17540_v47  ;;  %v6826_v55 = vld [vmem:[#allocation5 + $0x1118] sm:$0xff] }
 0x713   : > { %13604 = vmatpush2.bf16.msra.mxu1 %v17668_v30  ;;  %13564 = vmatprep.subr.bf16.mxu0 %v17533_v50  ;;  %v6830_v54 = vld [vmem:[#allocation5 + $0x1138] sm:$0xff] }
 0x714   : > { %13605 = vmatprep.subr.bf16.mxu1 %v17661_v21  ;;  %v6954_v26 = vld [vmem:[#allocation5 + $0x1518] sm:$0xff]  ;;  %v17757_v35 = vcombine.high %v6826_v55, %v6830_v54  ;;  %v17756_v44 = vcombine.low %v6826_v55, %v6830_v54 }
 0x715   : > { %v6958_v60 = vld [vmem:[#allocation5 + $0x1538] sm:$0xff] }
 0x716   : > { %13565 = vmatpush2.bf16.msra.mxu0 %v17532_v38  ;;  %v17885_v47 = vcombine.high %v6954_v26, %v6958_v60  ;;  %v6818_v30 = vld [vmem:[#allocation5 + $0x10d8] sm:$0xff]  ;;  %v17884_v36 = vcombine.low %v6954_v26, %v6958_v60 }
 0x717   : > { %13606 = vmatpush2.bf16.msra.mxu1 %v17660_v52  ;;  %13616 = vmatprep.subr.bf16.mxu0 %v17781_v59  ;;  %v6822_v50 = vld [vmem:[#allocation5 + $0x10f8] sm:$0xff] }
 0x718   : > { %13657 = vmatprep.subr.bf16.mxu1 %v17909_v28  ;;  %v6946_v21 = vld [vmem:[#allocation5 + $0x14d8] sm:$0xff]  ;;  %v17749_v45 = vcombine.high %v6818_v30, %v6822_v50  ;;  %v17748_v63 = vcombine.low %v6818_v30, %v6822_v50 }
 0x719   : > { %v13322_v24 = vpop.f32.mrf.mxu0  ;;  %13567 = vmatmul.mubr.bf16.vlgmr.msra.gmra.mxu0 %v19933_v4  ;;  %v6950_v20 = vld [vmem:[#allocation5 + $0x14f8] sm:$0xff] }
 0x71a   : > { %v13323_v53 = vadd.f32 %v13322_v24, %v20089_v19  ;;  %v13363_v23 = vpop.f32.mrf.mxu1  ;;  %13608 = vmatmul.mubr.bf16.vlgmr.msra.gmra.mxu1 %v19935_v34  ;;  %13617 = vmatpush1.bf16.msra.mxu0 %v17780_v10  ;;  %v17893_v19 = vcombine.high %v6962_v7, %v6966_v58  ;;  %v17877_v38 = vcombine.high %v6946_v21, %v6950_v20  ;;  %v6810_v52 = vld [vmem:[#allocation5 + $0x1098] sm:$0xff] }
 0x71b   : > { %13648 = vmatprep.mubr.bf16.mxu0 %v19937_v51  ;;  %13658 = vmatpush1.bf16.msra.mxu1 %v17908_v3  ;;  %v13324_v11 = vpop.f32.mrf.mxu0  ;;  %v6814_v59 = vld [vmem:[#allocation5 + $0x10b8] sm:$0xff]  ;;  %v17876_v10 = vcombine.low %v6946_v21, %v6950_v20 }
 0x71c   : > { %v20099_v13 = vadd.f32 %v13363_v23, %v13323_v53  ;;  %13689 = vmatprep.mubr.bf16.mxu1 %v19940_v39  ;;  %v13325_v4 = vadd.f32 %v13324_v11, %v20093_v8  ;;  %v13365_v25 = vpop.f32.mrf.mxu1  ;;  %13618 = vmatprep.subr.bf16.mxu0 %v17773_v41  ;;  %v17892_v39 = vcombine.low %v6962_v7, %v6966_v58  ;;  %v6938_v28 = vld [vmem:[#allocation5 + $0x1498] sm:$0xff] }
 0x71d   : > { %v13326_v34 = vpop.f32.mrf.mxu0  ;;  %13659 = vmatprep.subr.bf16.mxu1 %v17901_v17  ;;  %v6942_v22 = vld [vmem:[#allocation5 + $0x14b8] sm:$0xff]  ;;  %v17741_v16 = vcombine.high %v6810_v52, %v6814_v59  ;;  %v17740_v24 = vcombine.low %v6810_v52, %v6814_v59 }
 0x71e   : > { %v20103_v51 = vadd.f32 %v13365_v25, %v13325_v4  ;;  %v13367_v1 = vpop.f32.mrf.mxu1  ;;  %13619 = vmatpush1.bf16.msra.mxu0 %v17772_v49  ;;  %v17869_v57 = vcombine.high %v6938_v28, %v6942_v22  ;;  %v6802_v3 = vld [vmem:[#allocation5 + $0x1058] sm:$0xff]  ;;  %v17868_v17 = vcombine.low %v6938_v28, %v6942_v22 }
 0x71f   : > { %13660 = vmatpush1.bf16.msra.mxu1 %v17900_v29  ;;  %v13327_v61 = vpop.f32.mrf.mxu0  ;;  %13620 = vmatprep.subr.bf16.mxu0 %v17765_v12  ;;  %v6806_v41 = vld [vmem:[#allocation5 + $0x1078] sm:$0xff] }
 0x720   : > { %v13368_v8 = vpop.f32.mrf.mxu1  ;;  %13661 = vmatprep.subr.bf16.mxu1 %v17893_v19  ;;  %v6930_v14 = vld [vmem:[#allocation5 + $0x1458] sm:$0xff]  ;;  %v17733_v7 = vcombine.high %v6802_v3, %v6806_v41  ;;  %v17732_v29 = vcombine.low %v6802_v3, %v6806_v41 }
 0x721   : > { %v6934_v5 = vld [vmem:[#allocation5 + $0x1478] sm:$0xff] }
 0x722   : > { %13621 = vmatpush1.bf16.msra.mxu0 %v17764_v2  ;;  %v17861_v58 = vcombine.high %v6930_v14, %v6934_v5  ;;  %v6794_v53 = vld [vmem:[#allocation5 + $0x1018] sm:$0xff]  ;;  %v17860_v12 = vcombine.low %v6930_v14, %v6934_v5 }
 0x723   : > { %13662 = vmatpush1.bf16.msra.mxu1 %v17892_v39  ;;  %13622 = vmatprep.subr.bf16.mxu0 %v17757_v35  ;;  %v6798_v23 = vld [vmem:[#allocation5 + $0x1038] sm:$0xff] }
 0x724   : > { %13663 = vmatprep.subr.bf16.mxu1 %v17885_v47  ;;  %v6922_v49 = vld [vmem:[#allocation5 + $0x1418] sm:$0xff]  ;;  %v17725_v4 = vcombine.high %v6794_v53, %v6798_v23  ;;  %v17724_v26 = vcombine.low %v6794_v53, %v6798_v23 }
 0x725   : > { %v6926_v11 = vld [vmem:[#allocation5 + $0x1438] sm:$0xff] }
 0x726   : > { %13623 = vmatpush1.bf16.msra.mxu0 %v17756_v44  ;;  %v17853_v25 = vcombine.high %v6922_v49, %v6926_v11  ;;  %v6914_v19 = vld [vmem:[#allocation5 + $0x13d8] sm:$0xff]  ;;  %v17852_v60 = vcombine.low %v6922_v49, %v6926_v11 }
 0x727   : > { %13664 = vmatpush1.bf16.msra.mxu1 %v17884_v36  ;;  %13624 = vmatprep.subr.bf16.mxu0 %v17749_v45  ;;  %v6918_v55 = vld [vmem:[#allocation5 + $0x13f8] sm:$0xff] }
 0x728   : > { %13665 = vmatprep.subr.bf16.mxu1 %v17877_v38  ;;  %v7042_v54 = vld [vmem:[#allocation5 + $0x17d8] sm:$0xff]  ;;  %v17845_v1 = vcombine.high %v6914_v19, %v6918_v55  ;;  %v17844_v47 = vcombine.low %v6914_v19, %v6918_v55 }
 0x729   : > { %v7046_v34 = vld [vmem:[#allocation5 + $0x17f8] sm:$0xff] }
 0x72a   : > { %13625 = vmatpush1.bf16.msra.mxu0 %v17748_v63  ;;  %v17973_v2 = vcombine.high %v7042_v54, %v7046_v34  ;;  %v6906_v61 = vld [vmem:[#allocation5 + $0x1398] sm:$0xff]  ;;  %v17972_v30 = vcombine.low %v7042_v54, %v7046_v34 }
 0x72b   : > { %13666 = vmatpush1.bf16.msra.mxu1 %v17876_v10  ;;  %13626 = vmatprep.subr.bf16.mxu0 %v17741_v16  ;;  %v6910_v39 = vld [vmem:[#allocation5 + $0x13b8] sm:$0xff] }
 0x72c   : > { %13667 = vmatprep.subr.bf16.mxu1 %v17869_v57  ;;  %v7034_v35 = vld [vmem:[#allocation5 + $0x1798] sm:$0xff]  ;;  %v17837_v50 = vcombine.high %v6906_v61, %v6910_v39  ;;  %v17836_v38 = vcombine.low %v6906_v61, %v6910_v39 }
 0x72d   : > { %v7038_v8 = vld [vmem:[#allocation5 + $0x17b8] sm:$0xff] }
 0x72e   : > { %13627 = vmatpush1.bf16.msra.mxu0 %v17740_v24  ;;  %v17965_v21 = vcombine.high %v7034_v35, %v7038_v8  ;;  %v6898_v20 = vld [vmem:[#allocation5 + $0x1358] sm:$0xff]  ;;  %v17964_v52 = vcombine.low %v7034_v35, %v7038_v8 }
 0x72f   : > { %13668 = vmatpush1.bf16.msra.mxu1 %v17868_v17  ;;  %13628 = vmatprep.subr.bf16.mxu0 %v17733_v7  ;;  %v6902_v44 = vld [vmem:[#allocation5 + $0x1378] sm:$0xff] }
 0x730   : > { %13669 = vmatprep.subr.bf16.mxu1 %v17861_v58  ;;  %v7026_v36 = vld [vmem:[#allocation5 + $0x1758] sm:$0xff]  ;;  %v17829_v59 = vcombine.high %v6898_v20, %v6902_v44  ;;  %v17828_v57 = vcombine.low %v6898_v20, %v6902_v44 }
 0x731   : > { %v7030_v45 = vld [vmem:[#allocation5 + $0x1778] sm:$0xff] }
 0x732   : > { %13629 = vmatpush1.bf16.msra.mxu0 %v17732_v29  ;;  %v17957_v28 = vcombine.high %v7026_v36, %v7030_v45  ;;  %v6890_v22 = vld [vmem:[#allocation5 + $0x1318] sm:$0xff]  ;;  %v17956_v3 = vcombine.low %v7026_v36, %v7030_v45 }
 0x733   : > { %13670 = vmatpush1.bf16.msra.mxu1 %v17860_v12  ;;  %13630 = vmatprep.subr.bf16.mxu0 %v17725_v4  ;;  %v6894_v63 = vld [vmem:[#allocation5 + $0x1338] sm:$0xff] }
 0x734   : > { %13671 = vmatprep.subr.bf16.mxu1 %v17853_v25  ;;  %v7018_v10 = vld [vmem:[#allocation5 + $0x1718] sm:$0xff]  ;;  %v17821_v41 = vcombine.high %v6890_v22, %v6894_v63  ;;  %v17820_v58 = vcombine.low %v6890_v22, %v6894_v63 }
 0x735   : > { %v7022_v16 = vld [vmem:[#allocation5 + $0x1738] sm:$0xff] }
 0x736   : > { %13631 = vmatpush1.bf16.msra.mxu0 %v17724_v26  ;;  %v17949_v14 = vcombine.high %v7018_v10, %v7022_v16  ;;  %v6882_v5 = vld [vmem:[#allocation5 + $0x12d8] sm:$0xff]  ;;  %v17948_v53 = vcombine.low %v7018_v10, %v7022_v16 }
 0x737   : > { %13672 = vmatpush1.bf16.msra.mxu1 %v17852_v60  ;;  %13632 = vmatprep.subr.bf16.mxu0 %v17845_v1  ;;  %v6886_v24 = vld [vmem:[#allocation5 + $0x12f8] sm:$0xff] }
 0x738   : > { %13673 = vmatprep.subr.bf16.mxu1 %v17973_v2  ;;  %v7010_v17 = vld [vmem:[#allocation5 + $0x16d8] sm:$0xff]  ;;  %v17813_v23 = vcombine.high %v6882_v5, %v6886_v24  ;;  %v17812_v25 = vcombine.low %v6882_v5, %v6886_v24 }
 0x739   : > { %v7014_v7 = vld [vmem:[#allocation5 + $0x16f8] sm:$0xff] }
 0x73a   : > { %13633 = vmatpush2.bf16.msra.mxu0 %v17844_v47  ;;  %v17941_v49 = vcombine.high %v7010_v17, %v7014_v7  ;;  %v6874_v11 = vld [vmem:[#allocation5 + $0x1298] sm:$0xff]  ;;  %v17940_v19 = vcombine.low %v7010_v17, %v7014_v7 }
 0x73b   : > { %13674 = vmatpush2.bf16.msra.mxu1 %v17972_v30  ;;  %13634 = vmatprep.subr.bf16.mxu0 %v17837_v50  ;;  %v6878_v29 = vld [vmem:[#allocation5 + $0x12b8] sm:$0xff] }
 0x73c   : > { %13675 = vmatprep.subr.bf16.mxu1 %v17965_v21  ;;  %v7002_v12 = vld [vmem:[#allocation5 + $0x1698] sm:$0xff]  ;;  %v17805_v55 = vcombine.high %v6874_v11, %v6878_v29  ;;  %v17804_v2 = vcombine.low %v6874_v11, %v6878_v29 }
 0x73d   : > { %v7006_v4 = vld [vmem:[#allocation5 + $0x16b8] sm:$0xff] }
 0x73e   : > { %13635 = vmatpush2.bf16.msra.mxu0 %v17836_v38  ;;  %v17933_v54 = vcombine.high %v7002_v12, %v7006_v4  ;;  %v6866_v34 = vld [vmem:[#allocation5 + $0x1258] sm:$0xff]  ;;  %v17932_v61 = vcombine.low %v7002_v12, %v7006_v4 }
 0x73f   : > { %13676 = vmatpush2.bf16.msra.mxu1 %v17964_v52  ;;  %13636 = vmatprep.subr.bf16.mxu0 %v17829_v59  ;;  %v6870_v26 = vld [vmem:[#allocation5 + $0x1278] sm:$0xff] }
 0x740   : > { %13677 = vmatprep.subr.bf16.mxu1 %v17957_v28  ;;  %v6994_v60 = vld [vmem:[#allocation5 + $0x1658] sm:$0xff]  ;;  %v17797_v39 = vcombine.high %v6866_v34, %v6870_v26  ;;  %v17796_v21 = vcombine.low %v6866_v34, %v6870_v26 }
 0x741   : > { %v6998_v1 = vld [vmem:[#allocation5 + $0x1678] sm:$0xff] }
 0x742   : > { %13637 = vmatpush2.bf16.msra.mxu0 %v17828_v57  ;;  %v17925_v35 = vcombine.high %v6994_v60, %v6998_v1  ;;  %v6858_v8 = vld [vmem:[#allocation5 + $0x1218] sm:$0xff]  ;;  %v17924_v20 = vcombine.low %v6994_v60, %v6998_v1 }
 0x743   : > { %13678 = vmatpush2.bf16.msra.mxu1 %v17956_v3  ;;  %13638 = vmatprep.subr.bf16.mxu0 %v17821_v41  ;;  %v6862_v47 = vld [vmem:[#allocation5 + $0x1238] sm:$0xff] }
 0x744   : > { %13679 = vmatprep.subr.bf16.mxu1 %v17949_v14  ;;  %v6986_v30 = vld [vmem:[#allocation5 + $0x1618] sm:$0xff]  ;;  %v17789_v44 = vcombine.high %v6858_v8, %v6862_v47  ;;  %v17788_v28 = vcombine.low %v6858_v8, %v6862_v47 }
 0x745   : > { %v6990_v50 = vld [vmem:[#allocation5 + $0x1638] sm:$0xff] }
 0x746   : > { %13639 = vmatpush2.bf16.msra.mxu0 %v17820_v58  ;;  %v17917_v36 = vcombine.high %v6986_v30, %v6990_v50  ;;  %v7106_v45 = vld [vmem:[#allocation5 + $0x19d8] sm:$0xff]  ;;  %v17916_v22 = vcombine.low %v6986_v30, %v6990_v50 }
 0x747   : > { %13680 = vmatpush2.bf16.msra.mxu1 %v17948_v53  ;;  %13640 = vmatprep.subr.bf16.mxu0 %v17813_v23  ;;  %v7110_v38 = vld [vmem:[#allocation5 + $0x19f8] sm:$0xff] }
 0x748   : > { %13681 = vmatprep.subr.bf16.mxu1 %v17941_v49  ;;  %v7234_v52 = vld [vmem:[#allocation5 + $0x1dd8] sm:$0xff]  ;;  %v18037_v63 = vcombine.high %v7106_v45, %v7110_v38  ;;  %v18036_v3 = vcombine.low %v7106_v45, %v7110_v38 }
 0x749   : > { %v7238_v59 = vld [vmem:[#allocation5 + $0x1df8] sm:$0xff] }
 0x74a   : > { %13641 = vmatpush2.bf16.msra.mxu0 %v17812_v25  ;;  %v18165_v10 = vcombine.high %v7234_v52, %v7238_v59  ;;  %v7098_v16 = vld [vmem:[#allocation5 + $0x1998] sm:$0xff]  ;;  %v18164_v5 = vcombine.low %v7234_v52, %v7238_v59 }
 0x74b   : > { %13682 = vmatpush2.bf16.msra.mxu1 %v17940_v19  ;;  %13642 = vmatprep.subr.bf16.mxu0 %v17805_v55  ;;  %v7102_v57 = vld [vmem:[#allocation5 + $0x19b8] sm:$0xff] }
 0x74c   : > { %13683 = vmatprep.subr.bf16.mxu1 %v17933_v54  ;;  %v7226_v41 = vld [vmem:[#allocation5 + $0x1d98] sm:$0xff]  ;;  %v18029_v24 = vcombine.high %v7098_v16, %v7102_v57  ;;  %v18028_v12 = vcombine.low %v7098_v16, %v7102_v57 }
 0x74d   : > { %v7230_v14 = vld [vmem:[#allocation5 + $0x1db8] sm:$0xff] }
 0x74e   : > { %13643 = vmatpush2.bf16.msra.mxu0 %v17804_v2  ;;  %v7090_v17 = vld [vmem:[#allocation5 + $0x1958] sm:$0xff]  ;;  %v18157_v53 = vcombine.high %v7226_v41, %v7230_v14  ;;  %v18156_v25 = vcombine.low %v7226_v41, %v7230_v14 }
 0x74f   : > { %13684 = vmatpush2.bf16.msra.mxu1 %v17932_v61  ;;  %13644 = vmatprep.subr.bf16.mxu0 %v17797_v39  ;;  %v7094_v7 = vld [vmem:[#allocation5 + $0x1978] sm:$0xff] }
 0x750   : > { %13685 = vmatprep.subr.bf16.mxu1 %v17925_v35  ;;  %v7218_v23 = vld [vmem:[#allocation5 + $0x1d58] sm:$0xff]  ;;  %v18021_v19 = vcombine.high %v7090_v17, %v7094_v7  ;;  %v18020_v61 = vcombine.low %v7090_v17, %v7094_v7 }
 0x751   : > { %v7222_v49 = vld [vmem:[#allocation5 + $0x1d78] sm:$0xff] }
 0x752   : > { %13645 = vmatpush2.bf16.msra.mxu0 %v17796_v21  ;;  %v7082_v34 = vld [vmem:[#allocation5 + $0x1918] sm:$0xff] }
 0x753   : > { %13686 = vmatpush2.bf16.msra.mxu1 %v17924_v20  ;;  %13646 = vmatprep.subr.bf16.mxu0 %v17789_v44  ;;  %v7086_v26 = vld [vmem:[#allocation5 + $0x1938] sm:$0xff] }
 0x754   : > { %13687 = vmatprep.subr.bf16.mxu1 %v17917_v36  ;;  %v7210_v60 = vld [vmem:[#allocation5 + $0x1d18] sm:$0xff]  ;;  %v18013_v35 = vcombine.high %v7082_v34, %v7086_v26  ;;  %v18012_v20 = vcombine.low %v7082_v34, %v7086_v26 }
 0x755   : > { %v7214_v1 = vld [vmem:[#allocation5 + $0x1d38] sm:$0xff] }
 0x756   : > { %13647 = vmatpush2.bf16.msra.mxu0 %v17788_v28  ;;  %v18141_v8 = vcombine.high %v7210_v60, %v7214_v1  ;;  %v7074_v47 = vld [vmem:[#allocation5 + $0x18d8] sm:$0xff]  ;;  %v18140_v44 = vcombine.low %v7210_v60, %v7214_v1 }
 0x757   : > { %13688 = vmatpush2.bf16.msra.mxu1 %v17916_v22  ;;  %13698 = vmatprep.subr.bf16.mxu0 %v18037_v63  ;;  %v7078_v30 = vld [vmem:[#allocation5 + $0x18f8] sm:$0xff] }
 0x758   : > { %13739 = vmatprep.subr.bf16.mxu1 %v18165_v10  ;;  %v7202_v50 = vld [vmem:[#allocation5 + $0x1cd8] sm:$0xff]  ;;  %v18005_v36 = vcombine.high %v7074_v47, %v7078_v30  ;;  %v18004_v22 = vcombine.low %v7074_v47, %v7078_v30 }
 0x759   : > { %v13404_v58 = vpop.f32.mrf.mxu0  ;;  %13649 = vmatmul.mubr.bf16.vlgmr.msra.gmra.mxu0 %v19960_v42  ;;  %v7206_v21 = vld [vmem:[#allocation5 + $0x1cf8] sm:$0xff] }
 0x75a   : > { %v13405_v11 = vadd.f32 %v13404_v58, %v20099_v13  ;;  %v13445_v29 = vpop.f32.mrf.mxu1  ;;  %13690 = vmatmul.mubr.bf16.vlgmr.msra.gmra.mxu1 %v19962_v15  ;;  %13699 = vmatpush1.bf16.msra.mxu0 %v18036_v3  ;;  %v18149_v13 = vcombine.high %v7218_v23, %v7222_v49  ;;  %v18133_v45 = vcombine.high %v7202_v50, %v7206_v21  ;;  %v7066_v38 = vld [vmem:[#allocation5 + $0x1898] sm:$0xff] }
 0x75b   : > { %13730 = vmatprep.mubr.bf16.mxu0 %v19965_v18  ;;  %13740 = vmatpush1.bf16.msra.mxu1 %v18164_v5  ;;  %v13406_v4 = vpop.f32.mrf.mxu0  ;;  %v7070_v52 = vld [vmem:[#allocation5 + $0x18b8] sm:$0xff]  ;;  %v18132_v63 = vcombine.low %v7202_v50, %v7206_v21 }
 0x75c   : > { %v20109_v55 = vadd.f32 %v13445_v29, %v13405_v11  ;;  %13771 = vmatprep.mubr.bf16.mxu1 %v19974_v48  ;;  %v13407_v42 = vadd.f32 %v13406_v4, %v20103_v51  ;;  %v13447_v54 = vpop.f32.mrf.mxu1  ;;  %13700 = vmatprep.subr.bf16.mxu0 %v18029_v24  ;;  %v18148_v48 = vcombine.low %v7218_v23, %v7222_v49  ;;  %v7194_v59 = vld [vmem:[#allocation5 + $0x1c98] sm:$0xff] }
 0x75d   : > { %v13408_v15 = vpop.f32.mrf.mxu0  ;;  %13741 = vmatprep.subr.bf16.mxu1 %v18157_v53  ;;  %v7198_v28 = vld [vmem:[#allocation5 + $0x1cb8] sm:$0xff]  ;;  %v17997_v10 = vcombine.high %v7066_v38, %v7070_v52  ;;  %v17996_v5 = vcombine.low %v7066_v38, %v7070_v52 }
 0x75e   : > { %v20113_v18 = vadd.f32 %v13447_v54, %v13407_v42  ;;  %v13449_v2 = vpop.f32.mrf.mxu1  ;;  %13701 = vmatpush1.bf16.msra.mxu0 %v18028_v12  ;;  %v18125_v16 = vcombine.high %v7194_v59, %v7198_v28  ;;  %v7058_v57 = vld [vmem:[#allocation5 + $0x1858] sm:$0xff]  ;;  %v18124_v24 = vcombine.low %v7194_v59, %v7198_v28 }
 0x75f   : > { %13742 = vmatpush1.bf16.msra.mxu1 %v18156_v25  ;;  %v13409_v39 = vpop.f32.mrf.mxu0  ;;  %13702 = vmatprep.subr.bf16.mxu0 %v18021_v19  ;;  %v7062_v3 = vld [vmem:[#allocation5 + $0x1878] sm:$0xff] }
 0x760   : > { %v13450_v51 = vpop.f32.mrf.mxu1  ;;  %13743 = vmatprep.subr.bf16.mxu1 %v18149_v13  ;;  %v7186_v41 = vld [vmem:[#allocation5 + $0x1c58] sm:$0xff]  ;;  %v17989_v17 = vcombine.high %v7058_v57, %v7062_v3  ;;  %v17988_v11 = vcombine.low %v7058_v57, %v7062_v3 }
 0x761   : > { %v7190_v14 = vld [vmem:[#allocation5 + $0x1c78] sm:$0xff] }
 0x762   : > { %13703 = vmatpush1.bf16.msra.mxu0 %v18020_v61  ;;  %v18117_v7 = vcombine.high %v7186_v41, %v7190_v14  ;;  %v7050_v58 = vld [vmem:[#allocation5 + $0x1818] sm:$0xff]  ;;  %v18116_v29 = vcombine.low %v7186_v41, %v7190_v14 }
 0x763   : > { %13744 = vmatpush1.bf16.msra.mxu1 %v18148_v48  ;;  %13704 = vmatprep.subr.bf16.mxu0 %v18013_v35  ;;  %v7054_v53 = vld [vmem:[#allocation5 + $0x1838] sm:$0xff] }
 0x764   : > { %13745 = vmatprep.subr.bf16.mxu1 %v18141_v8  ;;  %v7178_v23 = vld [vmem:[#allocation5 + $0x1c18] sm:$0xff]  ;;  %v17981_v12 = vcombine.high %v7050_v58, %v7054_v53  ;;  %v17980_v13 = vcombine.low %v7050_v58, %v7054_v53 }
 0x765   : > { %v7182_v49 = vld [vmem:[#allocation5 + $0x1c38] sm:$0xff] }
 0x766   : > { %13705 = vmatpush1.bf16.msra.mxu0 %v18012_v20  ;;  %v18109_v4 = vcombine.high %v7178_v23, %v7182_v49  ;;  %v7170_v25 = vld [vmem:[#allocation5 + $0x1bd8] sm:$0xff]  ;;  %v18108_v34 = vcombine.low %v7178_v23, %v7182_v49 }
 0x767   : > { %13746 = vmatpush1.bf16.msra.mxu1 %v18140_v44  ;;  %13706 = vmatprep.subr.bf16.mxu0 %v18005_v36  ;;  %v7174_v19 = vld [vmem:[#allocation5 + $0x1bf8] sm:$0xff] }
 0x768   : > { %13747 = vmatprep.subr.bf16.mxu1 %v18133_v45  ;;  %v7298_v42 = vld [vmem:[#allocation5 + $0x1fd8] sm:$0xff]  ;;  %v18101_v26 = vcombine.high %v7170_v25, %v7174_v19  ;;  %v18100_v39 = vcombine.low %v7170_v25, %v7174_v19 }
 0x769   : > { %v7302_v54 = vld [vmem:[#allocation5 + $0x1ff8] sm:$0xff] }
 0x76a   : > { %13707 = vmatpush1.bf16.msra.mxu0 %v18004_v22  ;;  %v18229_v15 = vcombine.high %v7298_v42, %v7302_v54  ;;  %v7162_v60 = vld [vmem:[#allocation5 + $0x1b98] sm:$0xff]  ;;  %v18228_v48 = vcombine.low %v7298_v42, %v7302_v54 }
 0x76b   : > { %13748 = vmatpush1.bf16.msra.mxu1 %v18132_v63  ;;  %13708 = vmatprep.subr.bf16.mxu0 %v17997_v10  ;;  %v7166_v1 = vld [vmem:[#allocation5 + $0x1bb8] sm:$0xff] }
 0x76c   : > { %13749 = vmatprep.subr.bf16.mxu1 %v18125_v16  ;;  %v7290_v2 = vld [vmem:[#allocation5 + $0x1f98] sm:$0xff]  ;;  %v18093_v35 = vcombine.high %v7162_v60, %v7166_v1  ;;  %v18092_v21 = vcombine.low %v7162_v60, %v7166_v1 }
 0x76d   : > { %v7294_v61 = vld [vmem:[#allocation5 + $0x1fb8] sm:$0xff] }
 0x76e   : > { %13709 = vmatpush1.bf16.msra.mxu0 %v17996_v5  ;;  %v18221_v51 = vcombine.high %v7290_v2, %v7294_v61  ;;  %v7154_v8 = vld [vmem:[#allocation5 + $0x1b58] sm:$0xff]  ;;  %v18220_v20 = vcombine.low %v7290_v2, %v7294_v61 }
 0x76f   : > { %13750 = vmatpush1.bf16.msra.mxu1 %v18124_v24  ;;  %13710 = vmatprep.subr.bf16.mxu0 %v17989_v17  ;;  %v7158_v47 = vld [vmem:[#allocation5 + $0x1b78] sm:$0xff] }
 0x770   : > { %13751 = vmatprep.subr.bf16.mxu1 %v18117_v7  ;;  %v7282_v30 = vld [vmem:[#allocation5 + $0x1f58] sm:$0xff]  ;;  %v18085_v44 = vcombine.high %v7154_v8, %v7158_v47  ;;  %v18084_v28 = vcombine.low %v7154_v8, %v7158_v47  ;;  %v18782_v47 = vld [vmem:[#allocation7 + $0xe4] ss:$16 sps:$4 sm:$0xff]  }
 0x771   : > { %v7286_v50 = vld [vmem:[#allocation5 + $0x1f78] sm:$0xff] }
 0x772   : > { %13711 = vmatpush1.bf16.msra.mxu0 %v17988_v11  ;;  %v18213_v36 = vcombine.high %v7282_v30, %v7286_v50  ;;  %v7146_v45 = vld [vmem:[#allocation5 + $0x1b18] sm:$0xff]  ;;  %v18212_v22 = vcombine.low %v7282_v30, %v7286_v50  ;;  %v18785_v30 = vld [vmem:[#allocation7 + $0x2e4] ss:$16 sps:$4 sm:$0xff]   ;;  %v13781_v50 = vmax.f32 %v20029_v27, 0.0 }
 0x773   : > { %13752 = vmatpush1.bf16.msra.mxu1 %v18116_v29  ;;  %13712 = vmatprep.subr.bf16.mxu0 %v17981_v12  ;;  %v7150_v38 = vld [vmem:[#allocation5 + $0x1b38] sm:$0xff]  ;;  %v18791_v27 = vld [vmem:[#allocation7 + $0x2c4] ss:$16 sps:$4 sm:$0xff]  }
 0x774   : > { %13753 = vmatprep.subr.bf16.mxu1 %v18109_v4  ;;  %v7274_v52 = vld [vmem:[#allocation5 + $0x1f18] sm:$0xff]  ;;  %v18077_v63 = vcombine.high %v7146_v45, %v7150_v38  ;;  %v18076_v14 = vcombine.low %v7146_v45, %v7150_v38  ;;  %v7339_v45 = vrot.slane %v19982_v40, %v19898_v32  ;;  %v18788_v38 = vld [vmem:[#allocation7 + $0xc4] ss:$16 sps:$4 sm:$0xff]   ;;  %v18789_v32 = vld [vmem:[#allocation7 + $0x2c0] ss:$16 sps:$4 sm:$0xff]  }
 0x775   : > { %v7278_v59 = vld [vmem:[#allocation5 + $0x1f38] sm:$0xff] }
 0x776   : > { %13713 = vmatpush1.bf16.msra.mxu0 %v17980_v13  ;;  %v18205_v10 = vcombine.high %v7274_v52, %v7278_v59  ;;  %v7138_v16 = vld [vmem:[#allocation5 + $0x1ad8] sm:$0xff]  ;;  %v18204_v5 = vcombine.low %v7274_v52, %v7278_v59  ;;  %v20121_v52 = vpack.c.bf16 %v13781_v50, %v13781_v50  ;;  %v18842_v50 = vld [vmem:[#allocation7 + $0x1a4] ss:$16 sps:$4 sm:$0xff]  }
 0x777   : > { %13754 = vmatpush1.bf16.msra.mxu1 %v18108_v34  ;;  %13714 = vmatprep.subr.bf16.mxu0 %v18101_v26  ;;  %v7142_v57 = vld [vmem:[#allocation5 + $0x1af8] sm:$0xff] }
 0x778   : > { %13755 = vmatprep.subr.bf16.mxu1 %v18229_v15  ;;  %v7266_v3 = vld [vmem:[#allocation5 + $0x1ed8] sm:$0xff]  ;;  %v18069_v24 = vcombine.high %v7138_v16, %v7142_v57  ;;  %v18068_v49 = vcombine.low %v7138_v16, %v7142_v57  ;;  %v18797_v57 = vld [vmem:[#allocation7 + $0x2a4] ss:$16 sps:$4 sm:$0xff]  }
 0x779   : > { %v7270_v41 = vld [vmem:[#allocation5 + $0x1ef8] sm:$0xff] }
 0x77a   : > { %13715 = vmatpush2.bf16.msra.mxu0 %v18100_v39  ;;  %v18197_v17 = vcombine.high %v7266_v3, %v7270_v41  ;;  %v7130_v7 = vld [vmem:[#allocation5 + $0x1a98] sm:$0xff]  ;;  %v18196_v11 = vcombine.low %v7266_v3, %v7270_v41 }
 0x77b   : > { %13756 = vmatpush2.bf16.msra.mxu1 %v18228_v48  ;;  %13716 = vmatprep.subr.bf16.mxu0 %v18093_v35  ;;  %v7134_v58 = vld [vmem:[#allocation5 + $0x1ab8] sm:$0xff] }
 0x77c   : > { %13757 = vmatprep.subr.bf16.mxu1 %v18221_v51  ;;  %v7258_v53 = vld [vmem:[#allocation5 + $0x1e98] sm:$0xff]  ;;  %v18061_v29 = vcombine.high %v7130_v7, %v7134_v58  ;;  %v18060_v54 = vcombine.low %v7130_v7, %v7134_v58  ;;  %v18803_v58 = vld [vmem:[#allocation7 + $0x284] ss:$16 sps:$4 sm:$0xff]  }
 0x77d   : > { %v7262_v23 = vld [vmem:[#allocation5 + $0x1eb8] sm:$0xff] }
 0x77e   : > { %13717 = vmatpush2.bf16.msra.mxu0 %v18092_v21  ;;  %v18189_v12 = vcombine.high %v7258_v53, %v7262_v23  ;;  %v7122_v4 = vld [vmem:[#allocation5 + $0x1a58] sm:$0xff]  ;;  %v18188_v13 = vcombine.low %v7258_v53, %v7262_v23  ;;  %v13783_v21 = vmax.f32 %v20071_v46, 0.0  ;;  %v18798_v53 = vld [vmem:[#allocation7 + $0x80] ss:$16 sps:$4 sm:$0xff]  }
 0x77f   : > { %13758 = vmatpush2.bf16.msra.mxu1 %v18220_v20  ;;  %13718 = vmatprep.subr.bf16.mxu0 %v18085_v44  ;;  %v7126_v25 = vld [vmem:[#allocation5 + $0x1a78] sm:$0xff]  ;;  %v7335_v20 = vrot.slane %v19982_v40, %v19834_v33  ;;  %v18780_v44 = vld [vmem:[#allocation7 + $0xe0] ss:$16 sps:$4 sm:$0xff]   ;;  %v18794_v40 = vld [vmem:[#allocation7 + $0xa4] ss:$16 sps:$4 sm:$0xff]  }
 0x780   : > { %13759 = vmatprep.subr.bf16.mxu1 %v18213_v36  ;;  %v7250_v19 = vld [vmem:[#allocation5 + $0x1e58] sm:$0xff]  ;;  %v18053_v34 = vcombine.high %v7122_v4, %v7126_v25  ;;  %v18052_v61 = vcombine.low %v7122_v4, %v7126_v25  ;;  %v18783_v36 = vld [vmem:[#allocation7 + $0x2e0] ss:$16 sps:$4 sm:$0xff]   ;;  %v20124_v46 = vpack.c.bf16 %v13783_v21, %v13783_v21  ;;  %v18812_v4 = vld [vmem:[#allocation7 + $0x44] ss:$16 sps:$4 sm:$0xff]  }
 0x781   : > { %v7254_v42 = vld [vmem:[#allocation5 + $0x1e78] sm:$0xff]  ;;  %v18786_v33 = vld [vmem:[#allocation7 + $0xc0] ss:$16 sps:$4 sm:$0xff]   ;;  %v18815_v25 = vld [vmem:[#allocation7 + $0x244] ss:$16 sps:$4 sm:$0xff]  }
 0x782   : > { %13719 = vmatpush2.bf16.msra.mxu0 %v18084_v28  ;;  %v18181_v26 = vcombine.high %v7250_v19, %v7254_v42  ;;  %v7114_v15 = vld [vmem:[#allocation5 + $0x1a18] sm:$0xff]  ;;  %v18180_v39 = vcombine.low %v7250_v19, %v7254_v42  ;;  %v18801_v23 = vld [vmem:[#allocation7 + $0x280] ss:$16 sps:$4 sm:$0xff]   ;;  %v18845_v21 = vld [vmem:[#allocation7 + $0x3a4] ss:$16 sps:$4 sm:$0xff]  }
 0x783   : > { %13760 = vmatpush2.bf16.msra.mxu1 %v18212_v22  ;;  %13720 = vmatprep.subr.bf16.mxu0 %v18077_v63  ;;  %v7118_v60 = vld [vmem:[#allocation5 + $0x1a38] sm:$0xff]  ;;  %v18810_v19 = vld [vmem:[#allocation7 + $0x40] ss:$16 sps:$4 sm:$0xff]  }
 0x784   : > { %13761 = vmatprep.subr.bf16.mxu1 %v18205_v10  ;;  %v7242_v1 = vld [vmem:[#allocation5 + $0x1e18] sm:$0xff]  ;;  %v18045_v48 = vcombine.high %v7114_v15, %v7118_v60  ;;  %v18044_v51 = vcombine.low %v7114_v15, %v7118_v60  ;;  %v18813_v42 = vld [vmem:[#allocation7 + $0x240] ss:$16 sps:$4 sm:$0xff]   ;;  %v18824_v15 = vld [vmem:[#allocation7 + $0x4] ss:$16 sps:$4 sm:$0xff]  }
 0x785   : > { %v7246_v2 = vld [vmem:[#allocation5 + $0x1e38] sm:$0xff]  ;;  %v18827_v60 = vld [vmem:[#allocation7 + $0x204] ss:$16 sps:$4 sm:$0xff]  }
 0x786   : > { %13721 = vmatpush2.bf16.msra.mxu0 %v18076_v14  ;;  %v18173_v35 = vcombine.high %v7242_v1, %v7246_v2  ;;  %v18172_v8 = vcombine.low %v7242_v1, %v7246_v2  ;;  %v18792_v14 = vld [vmem:[#allocation7 + $0xa0] ss:$16 sps:$4 sm:$0xff]  }
 0x787   : > { %13762 = vmatpush2.bf16.msra.mxu1 %v18204_v5  ;;  %13722 = vmatprep.subr.bf16.mxu0 %v18069_v24  ;;  %v18795_v24 = vld [vmem:[#allocation7 + $0x2a0] ss:$16 sps:$4 sm:$0xff]  }
 0x788   : > { %13763 = vmatprep.subr.bf16.mxu1 %v18197_v17  ;;  %v18800_v17 = vld [vmem:[#allocation7 + $0x84] ss:$16 sps:$4 sm:$0xff]   ;;  %v18822_v1 = vld [vmem:[#allocation7] ss:$16 sps:$4 sm:$0xff]  }
 0x789   : > { %v18825_v2 = vld [vmem:[#allocation7 + $0x200] ss:$16 sps:$4 sm:$0xff]  }
 0x78a   : > { %13723 = vmatpush2.bf16.msra.mxu0 %v18068_v49  ;;  %v18806_v49 = vld [vmem:[#allocation7 + $0x64] ss:$16 sps:$4 sm:$0xff]  }
 0x78b   : > { %13764 = vmatpush2.bf16.msra.mxu1 %v18196_v11  ;;  %13724 = vmatprep.subr.bf16.mxu0 %v18061_v29  ;;  %v18809_v11 = vld [vmem:[#allocation7 + $0x264] ss:$16 sps:$4 sm:$0xff]   ;;  %v18804_v29 = vld [vmem:[#allocation7 + $0x60] ss:$16 sps:$4 sm:$0xff]  }
 0x78c   : > { %13765 = vmatprep.subr.bf16.mxu1 %v18189_v12  ;;  %v18807_v12 = vld [vmem:[#allocation7 + $0x260] ss:$16 sps:$4 sm:$0xff]  }
 0x78e   : > { %13725 = vmatpush2.bf16.msra.mxu0 %v18060_v54  ;;  %v18818_v54 = vld [vmem:[#allocation7 + $0x24] ss:$16 sps:$4 sm:$0xff]  }
 0x78f   : > { %13766 = vmatpush2.bf16.msra.mxu1 %v18188_v13  ;;  %13726 = vmatprep.subr.bf16.mxu0 %v18053_v34  ;;  %v18821_v13 = vld [vmem:[#allocation7 + $0x224] ss:$16 sps:$4 sm:$0xff]   ;;  %v18816_v34 = vld [vmem:[#allocation7 + $0x20] ss:$16 sps:$4 sm:$0xff]  }
 0x790   : > { %13767 = vmatprep.subr.bf16.mxu1 %v18181_v26  ;;  %v18819_v26 = vld [vmem:[#allocation7 + $0x220] ss:$16 sps:$4 sm:$0xff]  }
 0x792   : > { %13727 = vmatpush2.bf16.msra.mxu0 %v18052_v61  ;;  %v18830_v61 = vld [vmem:[#allocation7 + $0x1e4] ss:$16 sps:$4 sm:$0xff]  }
 0x793   : > { %13768 = vmatpush2.bf16.msra.mxu1 %v18180_v39  ;;  %13728 = vmatprep.subr.bf16.mxu0 %v18045_v48  ;;  %v18833_v39 = vld [vmem:[#allocation7 + $0x3e4] ss:$16 sps:$4 sm:$0xff]   ;;  %v18828_v48 = vld [vmem:[#allocation7 + $0x1e0] ss:$16 sps:$4 sm:$0xff]  }
 0x794   : > { %13769 = vmatprep.subr.bf16.mxu1 %v18173_v35  ;;  %v18831_v35 = vld [vmem:[#allocation7 + $0x3e0] ss:$16 sps:$4 sm:$0xff]  }
 0x796   : > { %13729 = vmatpush2.bf16.msra.mxu0 %v18044_v51  ;;  %v18836_v51 = vld [vmem:[#allocation7 + $0x1c4] ss:$16 sps:$4 sm:$0xff]  }
 0x797   : > { %13770 = vmatpush2.bf16.msra.mxu1 %v18172_v8  ;;  %15355 = vmatprep.subr.bf16.mxu0 %v18782_v47  ;;  %v18839_v8 = vld [vmem:[#allocation7 + $0x3c4] ss:$16 sps:$4 sm:$0xff]   ;;  %v18834_v47 = vld [vmem:[#allocation7 + $0x1c0] ss:$16 sps:$4 sm:$0xff]  }
 0x798   : > { %15396 = vmatprep.subr.bf16.mxu1 %v18785_v30  ;;  %v18837_v30 = vld [vmem:[#allocation7 + $0x3c0] ss:$16 sps:$4 sm:$0xff]  }
 0x799   : > { %v13486_v59 = vpop.f32.mrf.mxu0  ;;  %13731 = vmatmul.mubr.bf16.vlgmr.msra.gmra.mxu0 %v19987_v6 }
 0x79a   : > { %v13487_v28 = vadd.f32 %v13486_v59, %v7335_v20  ;;  %v13527_v22 = vpop.f32.mrf.mxu1  ;;  %13772 = vmatmul.mubr.bf16.vlgmr.msra.gmra.mxu1 %v19989_v43  ;;  %15356 = vmatpush1.bf16.msra.mxu0 %v18780_v44  ;;  %v18840_v20 = vld [vmem:[#allocation7 + $0x1a0] ss:$16 sps:$4 sm:$0xff]  }
 0x79b   : > { %15387 = vmatprep.mubr.bf16.mxu0 %v20121_v52  ;;  %15397 = vmatpush1.bf16.msra.mxu1 %v18783_v36  ;;  %v13488_v63 = vpop.f32.mrf.mxu0  ;;  %v18843_v44 = vld [vmem:[#allocation7 + $0x3a0] ss:$16 sps:$4 sm:$0xff]   ;;  %v18848_v36 = vld [vmem:[#allocation7 + $0x184] ss:$16 sps:$4 sm:$0xff]  }
 0x79c   : > { %v20128_v10 = vadd.f32 %v13527_v22, %v13487_v28  ;;  %15428 = vmatprep.mubr.bf16.mxu1 %v20124_v46  ;;  %v13489_v6 = vadd.f32 %v13488_v63, %v7339_v45  ;;  %v13529_v16 = vpop.f32.mrf.mxu1  ;;  %15357 = vmatprep.subr.bf16.mxu0 %v18788_v38  ;;  %v18851_v45 = vld [vmem:[#allocation7 + $0x384] ss:$16 sps:$4 sm:$0xff]   ;;  %v18846_v38 = vld [vmem:[#allocation7 + $0x180] ss:$16 sps:$4 sm:$0xff]  }
 0x79d   : > { %v13490_v3 = vpop.f32.mrf.mxu0  ;;  %15398 = vmatprep.subr.bf16.mxu1 %v18791_v27  ;;  %v18849_v59 = vld [vmem:[#allocation7 + $0x380] ss:$16 sps:$4 sm:$0xff]   ;;  %v18854_v27 = vld [vmem:[#allocation7 + $0x164] ss:$16 sps:$4 sm:$0xff]  }
 0x79e   : > { %v20131_v41 = vadd.f32 %v13529_v16, %v13489_v6  ;;  %v13531_v43 = vpop.f32.mrf.mxu1  ;;  %15358 = vmatpush1.bf16.msra.mxu0 %v18786_v33  ;;  %v18857_v28 = vld [vmem:[#allocation7 + $0x364] ss:$16 sps:$4 sm:$0xff]   ;;  %v18852_v22 = vld [vmem:[#allocation7 + $0x160] ss:$16 sps:$4 sm:$0xff]  }
 0x79f   : > { %15399 = vmatpush1.bf16.msra.mxu1 %v18789_v32  ;;  %v13491_v5 = vpop.f32.mrf.mxu0  ;;  %15359 = vmatprep.subr.bf16.mxu0 %v18794_v40  ;;  %v18855_v33 = vld [vmem:[#allocation7 + $0x360] ss:$16 sps:$4 sm:$0xff]   ;;  %v18860_v63 = vld [vmem:[#allocation7 + $0x144] ss:$16 sps:$4 sm:$0xff]  }
 0x7a0   : > { %v13532_v7 = vpop.f32.mrf.mxu1  ;;  %15400 = vmatprep.subr.bf16.mxu1 %v18797_v57  ;;  %v18863_v32 = vld [vmem:[#allocation7 + $0x344] ss:$16 sps:$4 sm:$0xff]   ;;  %v18858_v40 = vld [vmem:[#allocation7 + $0x140] ss:$16 sps:$4 sm:$0xff]  }
 0x7a1   : > { %v18861_v6 = vld [vmem:[#allocation7 + $0x340] ss:$16 sps:$4 sm:$0xff]   ;;  %v18866_v16 = vld [vmem:[#allocation7 + $0x124] ss:$16 sps:$4 sm:$0xff]  }
 0x7a2   : > { %15360 = vmatpush1.bf16.msra.mxu0 %v18792_v14  ;;  %v18869_v57 = vld [vmem:[#allocation7 + $0x324] ss:$16 sps:$4 sm:$0xff]   ;;  %v18864_v3 = vld [vmem:[#allocation7 + $0x120] ss:$16 sps:$4 sm:$0xff]  }
 0x7a3   : > { %15401 = vmatpush1.bf16.msra.mxu1 %v18795_v24  ;;  %15361 = vmatprep.subr.bf16.mxu0 %v18800_v17  ;;  %v18867_v43 = vld [vmem:[#allocation7 + $0x320] ss:$16 sps:$4 sm:$0xff]   ;;  %v18872_v14 = vld [vmem:[#allocation7 + $0x104] ss:$16 sps:$4 sm:$0xff]   ;;  %v13780_v17 = vmax.f32 %v20025_v37, 0.0 }
 0x7a4   : > { %15402 = vmatprep.subr.bf16.mxu1 %v18803_v58  ;;  %v18875_v5 = vld [vmem:[#allocation7 + $0x304] ss:$16 sps:$4 sm:$0xff]   ;;  %v18870_v24 = vld [vmem:[#allocation7 + $0x100] ss:$16 sps:$4 sm:$0xff]  }
 0x7a5   : > { %v18873_v7 = vld [vmem:[#allocation7 + $0x300] ss:$16 sps:$4 sm:$0xff]   ;;  %v18878_v58 = vld [vmem:[#allocation7 + $0x4e4] ss:$16 sps:$4 sm:$0xff]  }
 0x7a6   : > { %15362 = vmatpush1.bf16.msra.mxu0 %v18798_v53  ;;  %v13782_v53 = vmax.f32 %v20067_v0, 0.0  ;;  %v18933_v37 = vld [vmem:[#allocation7 + $0x6e0] ss:$16 sps:$4 sm:$0xff]   ;;  %v18941_v0 = vld [vmem:[#allocation7 + $0x6c4] ss:$16 sps:$4 sm:$0xff]  }
 0x7a7   : > { %15403 = vmatpush1.bf16.msra.mxu1 %v18801_v23  ;;  %15363 = vmatprep.subr.bf16.mxu0 %v18806_v49  ;;  %v18935_v23 = vld [vmem:[#allocation7 + $0x6e4] ss:$16 sps:$4 sm:$0xff]   ;;  %v13785_v49 = vmax.f32 %v20113_v18, 0.0 }
 0x7a8   : > { %15404 = vmatprep.subr.bf16.mxu1 %v18809_v11  ;;  %v18876_v11 = vld [vmem:[#allocation7 + $0x4e0] ss:$16 sps:$4 sm:$0xff]  }
 0x7aa   : > { %15364 = vmatpush1.bf16.msra.mxu0 %v18804_v29  ;;  %v20136_v29 = vpack.c.bf16 %v13780_v17, %v13780_v17  ;;  %v18903_v17 = vld [vmem:[#allocation7 + $0x5c0] ss:$16 sps:$4 sm:$0xff]  }
 0x7ab   : > { %15405 = vmatpush1.bf16.msra.mxu1 %v18807_v12  ;;  %15365 = vmatprep.subr.bf16.mxu0 %v18812_v4  ;;  %v18881_v12 = vld [vmem:[#allocation7 + $0x4c4] ss:$16 sps:$4 sm:$0xff]   ;;  %v20138_v4 = vpack.c.bf16 %v13782_v53, %v13782_v53 }
 0x7ac   : > { %15406 = vmatprep.subr.bf16.mxu1 %v18815_v25  ;;  %v20140_v25 = vpack.c.bf16 %v13785_v49, %v13785_v49  ;;  %v18995_v53 = vld [vmem:[#allocation7 + $0x7a4] ss:$16 sps:$4 sm:$0xff]  }
 0x7ad   : > { %v18911_v49 = vld [vmem:[#allocation7 + $0x584] ss:$16 sps:$4 sm:$0xff]  }
 0x7ae   : > { %15366 = vmatpush1.bf16.msra.mxu0 %v18810_v19 }
 0x7af   : > { %15407 = vmatpush1.bf16.msra.mxu1 %v18813_v42  ;;  %15367 = vmatprep.subr.bf16.mxu0 %v18818_v54  ;;  %v18879_v54 = vld [vmem:[#allocation7 + $0x4c0] ss:$16 sps:$4 sm:$0xff]  }
 0x7b0   : > { %15408 = vmatprep.subr.bf16.mxu1 %v18821_v13 }
 0x7b2   : > { %15368 = vmatpush1.bf16.msra.mxu0 %v18816_v34  ;;  %v18884_v34 = vld [vmem:[#allocation7 + $0x4a4] ss:$16 sps:$4 sm:$0xff]  }
 0x7b3   : > { %15409 = vmatpush1.bf16.msra.mxu1 %v18819_v26  ;;  %15369 = vmatprep.subr.bf16.mxu0 %v18824_v15 }
 0x7b4   : > { %15410 = vmatprep.subr.bf16.mxu1 %v18827_v60 }
 0x7b6   : > { %15370 = vmatpush1.bf16.msra.mxu0 %v18822_v1  ;;  %v18939_v1 = vld [vmem:[#allocation7 + $0x6c0] ss:$16 sps:$4 sm:$0xff]  }
 0x7b7   : > { %15411 = vmatpush1.bf16.msra.mxu1 %v18825_v2  ;;  %15371 = vmatprep.subr.bf16.mxu0 %v18830_v61 }
 0x7b8   : > { %15412 = vmatprep.subr.bf16.mxu1 %v18833_v39 }
 0x7ba   : > { %15372 = vmatpush2.bf16.msra.mxu0 %v18828_v48  ;;  %v18882_v48 = vld [vmem:[#allocation7 + $0x4a0] ss:$16 sps:$4 sm:$0xff]  }
 0x7bb   : > { %15413 = vmatpush2.bf16.msra.mxu1 %v18831_v35  ;;  %15373 = vmatprep.subr.bf16.mxu0 %v18836_v51  ;;  %v18887_v51 = vld [vmem:[#allocation7 + $0x484] ss:$16 sps:$4 sm:$0xff]  }
 0x7bc   : > { %15414 = vmatprep.subr.bf16.mxu1 %v18839_v8 }
 0x7be   : > { %15374 = vmatpush2.bf16.msra.mxu0 %v18834_v47  ;;  %v18945_v47 = vld [vmem:[#allocation7 + $0x6a0] ss:$16 sps:$4 sm:$0xff]  }
 0x7bf   : > { %15415 = vmatpush2.bf16.msra.mxu1 %v18837_v30  ;;  %15375 = vmatprep.subr.bf16.mxu0 %v18842_v50  ;;  %v18953_v30 = vld [vmem:[#allocation7 + $0x684] ss:$16 sps:$4 sm:$0xff]  }
 0x7c0   : > { %15416 = vmatprep.subr.bf16.mxu1 %v18845_v21  ;;  %v18890_v50 = vld [vmem:[#allocation7 + $0x464] ss:$16 sps:$4 sm:$0xff]   ;;  %v18951_v21 = vld [vmem:[#allocation7 + $0x680] ss:$16 sps:$4 sm:$0xff]  }
 0x7c2   : > { %15376 = vmatpush2.bf16.msra.mxu0 %v18840_v20  ;;  %v18959_v20 = vld [vmem:[#allocation7 + $0x664] ss:$16 sps:$4 sm:$0xff]  }
 0x7c3   : > { %15417 = vmatpush2.bf16.msra.mxu1 %v18843_v44  ;;  %15377 = vmatprep.subr.bf16.mxu0 %v18848_v36  ;;  %v18888_v44 = vld [vmem:[#allocation7 + $0x460] ss:$16 sps:$4 sm:$0xff]   ;;  %v18893_v36 = vld [vmem:[#allocation7 + $0x444] ss:$16 sps:$4 sm:$0xff]  }
 0x7c4   : > { %15418 = vmatprep.subr.bf16.mxu1 %v18851_v45  ;;  %v18957_v45 = vld [vmem:[#allocation7 + $0x660] ss:$16 sps:$4 sm:$0xff]  }
 0x7c6   : > { %15378 = vmatpush2.bf16.msra.mxu0 %v18846_v38  ;;  %v18965_v38 = vld [vmem:[#allocation7 + $0x644] ss:$16 sps:$4 sm:$0xff]  }
 0x7c7   : > { %15419 = vmatpush2.bf16.msra.mxu1 %v18849_v59  ;;  %15379 = vmatprep.subr.bf16.mxu0 %v18854_v27  ;;  %v18891_v59 = vld [vmem:[#allocation7 + $0x440] ss:$16 sps:$4 sm:$0xff]   ;;  %v18896_v27 = vld [vmem:[#allocation7 + $0x424] ss:$16 sps:$4 sm:$0xff]  }
 0x7c8   : > { %15420 = vmatprep.subr.bf16.mxu1 %v18857_v28  ;;  %v18963_v28 = vld [vmem:[#allocation7 + $0x640] ss:$16 sps:$4 sm:$0xff]  }
 0x7ca   : > { %15380 = vmatpush2.bf16.msra.mxu0 %v18852_v22  ;;  %v18971_v22 = vld [vmem:[#allocation7 + $0x624] ss:$16 sps:$4 sm:$0xff]  }
 0x7cb   : > { %15421 = vmatpush2.bf16.msra.mxu1 %v18855_v33  ;;  %15381 = vmatprep.subr.bf16.mxu0 %v18860_v63  ;;  %v18894_v33 = vld [vmem:[#allocation7 + $0x420] ss:$16 sps:$4 sm:$0xff]   ;;  %v18899_v63 = vld [vmem:[#allocation7 + $0x404] ss:$16 sps:$4 sm:$0xff]  }
 0x7cc   : > { %15422 = vmatprep.subr.bf16.mxu1 %v18863_v32  ;;  %v18969_v32 = vld [vmem:[#allocation7 + $0x620] ss:$16 sps:$4 sm:$0xff]  }
 0x7ce   : > { %15382 = vmatpush2.bf16.msra.mxu0 %v18858_v40  ;;  %v18977_v40 = vld [vmem:[#allocation7 + $0x604] ss:$16 sps:$4 sm:$0xff]  }
 0x7cf   : > { %15423 = vmatpush2.bf16.msra.mxu1 %v18861_v6  ;;  %15383 = vmatprep.subr.bf16.mxu0 %v18866_v16  ;;  %v18897_v6 = vld [vmem:[#allocation7 + $0x400] ss:$16 sps:$4 sm:$0xff]   ;;  %v18902_v16 = vld [vmem:[#allocation7 + $0x5e4] ss:$16 sps:$4 sm:$0xff]  }
 0x7d0   : > { %15424 = vmatprep.subr.bf16.mxu1 %v18869_v57  ;;  %v18975_v57 = vld [vmem:[#allocation7 + $0x600] ss:$16 sps:$4 sm:$0xff]  }
 0x7d2   : > { %15384 = vmatpush2.bf16.msra.mxu0 %v18864_v3  ;;  %v18983_v3 = vld [vmem:[#allocation7 + $0x7e4] ss:$16 sps:$4 sm:$0xff]  }
 0x7d3   : > { %15425 = vmatpush2.bf16.msra.mxu1 %v18867_v43  ;;  %15385 = vmatprep.subr.bf16.mxu0 %v18872_v14  ;;  %v18900_v43 = vld [vmem:[#allocation7 + $0x5e0] ss:$16 sps:$4 sm:$0xff]   ;;  %v18905_v14 = vld [vmem:[#allocation7 + $0x5c4] ss:$16 sps:$4 sm:$0xff]  }
 0x7d4   : > { %15426 = vmatprep.subr.bf16.mxu1 %v18875_v5  ;;  %v18981_v5 = vld [vmem:[#allocation7 + $0x7e0] ss:$16 sps:$4 sm:$0xff]  }
 0x7d6   : > { %15386 = vmatpush2.bf16.msra.mxu0 %v18870_v24  ;;  %v18989_v24 = vld [vmem:[#allocation7 + $0x7c4] ss:$16 sps:$4 sm:$0xff]  }
 0x7d7   : > { %15427 = vmatpush2.bf16.msra.mxu1 %v18873_v7  ;;  %15437 = vmatprep.subr.bf16.mxu0 %v18878_v58  ;;  %v18908_v7 = vld [vmem:[#allocation7 + $0x5a4] ss:$16 sps:$4 sm:$0xff]   ;;  %v18987_v58 = vld [vmem:[#allocation7 + $0x7c0] ss:$16 sps:$4 sm:$0xff]  }
 0x7d8   : > { %15478 = vmatprep.subr.bf16.mxu1 %v18935_v23  ;;  %v18906_v23 = vld [vmem:[#allocation7 + $0x5a0] ss:$16 sps:$4 sm:$0xff]  }
 0x7d9   : > { %v13568_v19 = vpop.f32.mrf.mxu0  ;;  %15388 = vmatmul.mubr.bf16.vlgmr.msra.gmra.mxu0 %v20136_v29 }
 0x7da   : > { %v13569_v42 = vadd.f32 %v13568_v19, %v20128_v10  ;;  %v13609_v18 = vpop.f32.mrf.mxu1  ;;  %15429 = vmatmul.mubr.bf16.vlgmr.msra.gmra.mxu1 %v20138_v4  ;;  %15438 = vmatpush1.bf16.msra.mxu0 %v18876_v11  ;;  %v18947_v10 = vld [vmem:[#allocation7 + $0x6a4] ss:$16 sps:$4 sm:$0xff]   ;;  %v18993_v11 = vld [vmem:[#allocation7 + $0x7a0] ss:$16 sps:$4 sm:$0xff]  }
 0x7db   : > { %15469 = vmatprep.mubr.bf16.mxu0 %v20140_v25  ;;  %v13570_v13 = vpop.f32.mrf.mxu0  ;;  %15439 = vmatprep.subr.bf16.mxu0 %v18881_v12  ;;  %v19001_v12 = vld [vmem:[#allocation7 + $0x784] ss:$16 sps:$4 sm:$0xff]  }
 0x7dc   : > { %v20146_v26 = vadd.f32 %v13609_v18, %v13569_v42  ;;  %v13571_v15 = vadd.f32 %v13570_v13, %v20131_v41  ;;  %v13611_v60 = vpop.f32.mrf.mxu1  ;;  %15479 = vmatpush1.bf16.msra.mxu1 %v18933_v37  ;;  %v18885_v41 = vld [vmem:[#allocation7 + $0x480] ss:$16 sps:$4 sm:$0xff]   ;;  %v18914_v19 = vld [vmem:[#allocation7 + $0x564] ss:$16 sps:$4 sm:$0xff]  }
 0x7dd   : > { %v13572_v2 = vpop.f32.mrf.mxu0  ;;  %15480 = vmatprep.subr.bf16.mxu1 %v18941_v0  ;;  %v18909_v37 = vld [vmem:[#allocation7 + $0x580] ss:$16 sps:$4 sm:$0xff]   ;;  %v19007_v42 = vld [vmem:[#allocation7 + $0x764] ss:$16 sps:$4 sm:$0xff]  }
 0x7de   : > { %v20149_v61 = vadd.f32 %v13611_v60, %v13571_v15  ;;  %v13613_v39 = vpop.f32.mrf.mxu1  ;;  %15440 = vmatpush1.bf16.msra.mxu0 %v18879_v54  ;;  %v18999_v0 = vld [vmem:[#allocation7 + $0x780] ss:$16 sps:$4 sm:$0xff]   ;;  %v18917_v54 = vld [vmem:[#allocation7 + $0x544] ss:$16 sps:$4 sm:$0xff]  }
 0x7df   : > { %v13573_v35 = vpop.f32.mrf.mxu0  ;;  %15441 = vmatprep.subr.bf16.mxu0 %v18884_v34  ;;  %v18912_v18 = vld [vmem:[#allocation7 + $0x560] ss:$16 sps:$4 sm:$0xff]   ;;  %v19013_v34 = vld [vmem:[#allocation7 + $0x744] ss:$16 sps:$4 sm:$0xff]  }
 0x7e0   : > { %v13614_v8 = vpop.f32.mrf.mxu1  ;;  %15481 = vmatpush1.bf16.msra.mxu1 %v18939_v1  ;;  %v19005_v13 = vld [vmem:[#allocation7 + $0x760] ss:$16 sps:$4 sm:$0xff]   ;;  %v18920_v60 = vld [vmem:[#allocation7 + $0x524] ss:$16 sps:$4 sm:$0xff]  }
 0x7e1   : > { %15482 = vmatprep.subr.bf16.mxu1 %v18947_v10  ;;  %v18915_v15 = vld [vmem:[#allocation7 + $0x540] ss:$16 sps:$4 sm:$0xff]   ;;  %v19019_v2 = vld [vmem:[#allocation7 + $0x724] ss:$16 sps:$4 sm:$0xff]   ;;  %v13784_v8 = vmax.f32 %v20109_v55, 0.0 }
 0x7e2   : > { %15442 = vmatpush1.bf16.msra.mxu0 %v18882_v48  ;;  %v19011_v1 = vld [vmem:[#allocation7 + $0x740] ss:$16 sps:$4 sm:$0xff]   ;;  %v18923_v39 = vld [vmem:[#allocation7 + $0x504] ss:$16 sps:$4 sm:$0xff]  }
 0x7e3   : > { %15443 = vmatprep.subr.bf16.mxu0 %v18887_v51  ;;  %v18918_v10 = vld [vmem:[#allocation7 + $0x520] ss:$16 sps:$4 sm:$0xff]   ;;  %v19025_v35 = vld [vmem:[#allocation7 + $0x704] ss:$16 sps:$4 sm:$0xff]  }
 0x7e4   : > { %15483 = vmatpush1.bf16.msra.mxu1 %v18945_v47  ;;  %v19017_v48 = vld [vmem:[#allocation7 + $0x720] ss:$16 sps:$4 sm:$0xff]   ;;  %v18926_v47 = vld [vmem:[#allocation7 + $0xec] ss:$16 sps:$4 sm:$0xff]  }
 0x7e5   : > { %15484 = vmatprep.subr.bf16.mxu1 %v18953_v30  ;;  %v18921_v51 = vld [vmem:[#allocation7 + $0x500] ss:$16 sps:$4 sm:$0xff]  }
 0x7e6   : > { %15444 = vmatpush1.bf16.msra.mxu0 %v18885_v41  ;;  %v19023_v30 = vld [vmem:[#allocation7 + $0x700] ss:$16 sps:$4 sm:$0xff]   ;;  %v19031_v41 = vld [vmem:[#allocation7 + $0x2ec] ss:$16 sps:$4 sm:$0xff]  }
 0x7e7   : > { %15445 = vmatprep.subr.bf16.mxu0 %v18890_v50  ;;  %v18924_v50 = vld [vmem:[#allocation7 + $0xe8] ss:$16 sps:$4 sm:$0xff]  }
 0x7e8   : > { %15485 = vmatpush1.bf16.msra.mxu1 %v18951_v21  ;;  %v20152_v21 = vpack.c.bf16 %v13784_v8, %v13784_v8 }
 0x7e9   : > { %15486 = vmatprep.subr.bf16.mxu1 %v18959_v20  ;;  %v18929_v20 = vld [vmem:[#allocation7 + $0xcc] ss:$16 sps:$4 sm:$0xff]  }
 0x7ea   : > { %15446 = vmatpush1.bf16.msra.mxu0 %v18888_v44 }
 0x7eb   : > { %15447 = vmatprep.subr.bf16.mxu0 %v18893_v36 }
 0x7ec   : > { %15487 = vmatpush1.bf16.msra.mxu1 %v18957_v45  ;;  %v18927_v45 = vld [vmem:[#allocation7 + $0xc8] ss:$16 sps:$4 sm:$0xff]  }
 0x7ed   : > { %15488 = vmatprep.subr.bf16.mxu1 %v18965_v38 }
 0x7ee   : > { %15448 = vmatpush1.bf16.msra.mxu0 %v18891_v59  ;;  %v18932_v59 = vld [vmem:[#allocation7 + $0xac] ss:$16 sps:$4 sm:$0xff]  }
 0x7ef   : > { %15449 = vmatprep.subr.bf16.mxu0 %v18896_v27 }
 0x7f0   : > { %15489 = vmatpush1.bf16.msra.mxu1 %v18963_v28 }
 0x7f1   : > { %15490 = vmatprep.subr.bf16.mxu1 %v18971_v22 }
 0x7f2   : > { %15450 = vmatpush1.bf16.msra.mxu0 %v18894_v33 }
 0x7f3   : > { %15451 = vmatprep.subr.bf16.mxu0 %v18899_v63  ;;  %v18930_v63 = vld [vmem:[#allocation7 + $0xa8] ss:$16 sps:$4 sm:$0xff]  }
 0x7f4   : > { %15491 = vmatpush1.bf16.msra.mxu1 %v18969_v32 }
 0x7f5   : > { %15492 = vmatprep.subr.bf16.mxu1 %v18977_v40 }
 0x7f6   : > { %15452 = vmatpush1.bf16.msra.mxu0 %v18897_v6  ;;  %v18936_v6 = vld [vmem:[#allocation7 + $0x88] ss:$16 sps:$4 sm:$0xff]  }
 0x7f7   : > { %15453 = vmatprep.subr.bf16.mxu0 %v18902_v16  ;;  %v18942_v16 = vld [vmem:[#allocation7 + $0x68] ss:$16 sps:$4 sm:$0xff]  }
 0x7f8   : > { %15493 = vmatpush1.bf16.msra.mxu1 %v18975_v57  ;;  %v18950_v57 = vld [vmem:[#allocation7 + $0x4c] ss:$16 sps:$4 sm:$0xff]  }
 0x7f9   : > { %15494 = vmatprep.subr.bf16.mxu1 %v18983_v3  ;;  %v18948_v3 = vld [vmem:[#allocation7 + $0x48] ss:$16 sps:$4 sm:$0xff]  }
 0x7fa   : > { %15454 = vmatpush2.bf16.msra.mxu0 %v18900_v43  ;;  %v18956_v43 = vld [vmem:[#allocation7 + $0x2c] ss:$16 sps:$4 sm:$0xff]  }
 0x7fb   : > { %15455 = vmatprep.subr.bf16.mxu0 %v18905_v14  ;;  %v18954_v14 = vld [vmem:[#allocation7 + $0x28] ss:$16 sps:$4 sm:$0xff]  }
 0x7fc   : > { %15495 = vmatpush2.bf16.msra.mxu1 %v18981_v5  ;;  %v18962_v5 = vld [vmem:[#allocation7 + $0xc] ss:$16 sps:$4 sm:$0xff]  }
 0x7fd   : > { %15496 = vmatprep.subr.bf16.mxu1 %v18989_v24  ;;  %v18960_v24 = vld [vmem:[#allocation7 + $0x8] ss:$16 sps:$4 sm:$0xff]  }
 0x7fe   : > { %15456 = vmatpush2.bf16.msra.mxu0 %v18903_v17  ;;  %v18968_v17 = vld [vmem:[#allocation7 + $0x1ec] ss:$16 sps:$4 sm:$0xff]  }
 0x7ff   : > { %15457 = vmatprep.subr.bf16.mxu0 %v18908_v7  ;;  %v18966_v7 = vld [vmem:[#allocation7 + $0x1e8] ss:$16 sps:$4 sm:$0xff]  }
 0x800   : > { %15497 = vmatpush2.bf16.msra.mxu1 %v18987_v58  ;;  %v18974_v58 = vld [vmem:[#allocation7 + $0x1cc] ss:$16 sps:$4 sm:$0xff]  }
 0x801   : > { %15498 = vmatprep.subr.bf16.mxu1 %v18995_v53  ;;  %v18972_v53 = vld [vmem:[#allocation7 + $0x1c8] ss:$16 sps:$4 sm:$0xff]  }
 0x802   : > { %15458 = vmatpush2.bf16.msra.mxu0 %v18906_v23  ;;  %v18980_v23 = vld [vmem:[#allocation7 + $0x1ac] ss:$16 sps:$4 sm:$0xff]  }
 0x803   : > { %15459 = vmatprep.subr.bf16.mxu0 %v18911_v49  ;;  %v18978_v49 = vld [vmem:[#allocation7 + $0x1a8] ss:$16 sps:$4 sm:$0xff]  }
 0x804   : > { %15499 = vmatpush2.bf16.msra.mxu1 %v18993_v11  ;;  %v18986_v11 = vld [vmem:[#allocation7 + $0x18c] ss:$16 sps:$4 sm:$0xff]  }
 0x805   : > { %15500 = vmatprep.subr.bf16.mxu1 %v19001_v12  ;;  %v18984_v12 = vld [vmem:[#allocation7 + $0x188] ss:$16 sps:$4 sm:$0xff]  }
 0x806   : > { %15460 = vmatpush2.bf16.msra.mxu0 %v18909_v37  ;;  %v18992_v37 = vld [vmem:[#allocation7 + $0x16c] ss:$16 sps:$4 sm:$0xff]  }
 0x807   : > { %15461 = vmatprep.subr.bf16.mxu0 %v18914_v19  ;;  %v18990_v19 = vld [vmem:[#allocation7 + $0x168] ss:$16 sps:$4 sm:$0xff]  }
 0x808   : > { %15501 = vmatpush2.bf16.msra.mxu1 %v18999_v0  ;;  %v18998_v0 = vld [vmem:[#allocation7 + $0x14c] ss:$16 sps:$4 sm:$0xff]  }
 0x809   : > { %15502 = vmatprep.subr.bf16.mxu1 %v19007_v42  ;;  %v18996_v42 = vld [vmem:[#allocation7 + $0x148] ss:$16 sps:$4 sm:$0xff]  }
 0x80a   : > { %15462 = vmatpush2.bf16.msra.mxu0 %v18912_v18  ;;  %v19004_v18 = vld [vmem:[#allocation7 + $0x12c] ss:$16 sps:$4 sm:$0xff]  }
 0x80b   : > { %15463 = vmatprep.subr.bf16.mxu0 %v18917_v54  ;;  %v19002_v54 = vld [vmem:[#allocation7 + $0x128] ss:$16 sps:$4 sm:$0xff]  }
 0x80c   : > { %15503 = vmatpush2.bf16.msra.mxu1 %v19005_v13  ;;  %v19010_v13 = vld [vmem:[#allocation7 + $0x10c] ss:$16 sps:$4 sm:$0xff]  }
 0x80d   : > { %15504 = vmatprep.subr.bf16.mxu1 %v19013_v34  ;;  %v19008_v34 = vld [vmem:[#allocation7 + $0x108] ss:$16 sps:$4 sm:$0xff]  }
 0x80e   : > { %15464 = vmatpush2.bf16.msra.mxu0 %v18915_v15  ;;  %v19016_v15 = vld [vmem:[#allocation7 + $0x4ec] ss:$16 sps:$4 sm:$0xff]  }
 0x80f   : > { %15465 = vmatprep.subr.bf16.mxu0 %v18920_v60 }
 0x810   : > { %15505 = vmatpush2.bf16.msra.mxu1 %v19011_v1  ;;  %v19014_v1 = vld [vmem:[#allocation7 + $0x4e8] ss:$16 sps:$4 sm:$0xff]  }
 0x811   : > { %15506 = vmatprep.subr.bf16.mxu1 %v19019_v2  ;;  %v19022_v2 = vld [vmem:[#allocation7 + $0x4cc] ss:$16 sps:$4 sm:$0xff]  }
 0x812   : > { %15466 = vmatpush2.bf16.msra.mxu0 %v18918_v10 }
 0x813   : > { %15467 = vmatprep.subr.bf16.mxu0 %v18923_v39 }
 0x814   : > { %15507 = vmatpush2.bf16.msra.mxu1 %v19017_v48 }
 0x815   : > { %15508 = vmatprep.subr.bf16.mxu1 %v19025_v35 }
 0x816   : > { %15468 = vmatpush2.bf16.msra.mxu0 %v18921_v51  ;;  %v19020_v51 = vld [vmem:[#allocation7 + $0x4c8] ss:$16 sps:$4 sm:$0xff]  }
 0x817   : > { %15519 = vmatprep.subr.bf16.mxu0 %v18926_v47  ;;  %v19028_v47 = vld [vmem:[#allocation7 + $0x4ac] ss:$16 sps:$4 sm:$0xff]  }
 0x818   : > { %15509 = vmatpush2.bf16.msra.mxu1 %v19023_v30 }
 0x819   : > { %v13650_v44 = vpop.f32.mrf.mxu0  ;;  %15470 = vmatmul.mubr.bf16.vlgmr.msra.gmra.mxu0 %v20152_v21  ;;  %15560 = vmatprep.subr.bf16.mxu1 %v19031_v41 }
 0x81a   : > { %v13651_v36 = vadd.f32 %v13650_v44, %v20146_v26  ;;  %v13691_v55 = vpop.f32.mrf.mxu1  ;;  %15520 = vmatpush1.bf16.msra.mxu0 %v18924_v50  ;;  %15551 = vmatprep.mubr.bf16.mxu0 %v20121_v52  ;;  %v18938_v26 = vld [vmem:[#allocation7 + $0x8c] ss:$16 sps:$4 sm:$0xff]  }
 0x81b   : > { %v20157_v38 = vpop.f32.mrf.mxu0  ;;  %15521 = vmatprep.subr.bf16.mxu0 %v18929_v20  ;;  %v18944_v52 = vld [vmem:[#allocation7 + $0x6c] ss:$16 sps:$4 sm:$0xff]  }
 0x81c   : > { %v20159_v27 = vadd.f32 %v13691_v55, %v13651_v36  ;;  %v20161_v28 = vpop.f32.mrf.mxu1  ;;  %v13653_v60 = vadd.f32 %v20157_v38, %v20149_v61 }
 0x81d   : > { %v13654_v22 = vpop.f32.mrf.mxu0 }
 0x81e   : > { %v13695_v33 = vpop.f32.mrf.mxu1  ;;  %15522 = vmatpush1.bf16.msra.mxu0 %v18927_v45  ;;  %v13694_v39 = vadd.f32 %v20161_v28, %v13653_v60  ;;  %v19034_v45 = vld [vmem:[#allocation7 + $0x48c] ss:$16 sps:$4 sm:$0xff]   ;;  %v19032_v22 = vld [vmem:[#allocation7 + $0x488] ss:$16 sps:$4 sm:$0xff]  }
 0x81f   : > { %v13655_v32 = vpop.f32.mrf.mxu0  ;;  %15523 = vmatprep.subr.bf16.mxu0 %v18932_v59  ;;  %v19037_v33 = vld [vmem:[#allocation7 + $0x2cc] ss:$16 sps:$4 sm:$0xff]  }
 0x820   : > { %v13696_v40 = vpop.f32.mrf.mxu1  ;;  %v19035_v32 = vld [vmem:[#allocation7 + $0x2c8] ss:$16 sps:$4 sm:$0xff]   ;;  %v19085_v60 = vld [vmem:[#allocation7 + $0x3cc] ss:$16 sps:$4 sm:$0xff]  }
 0x821   : > { %v19043_v40 = vld [vmem:[#allocation7 + $0x2ac] ss:$16 sps:$4 sm:$0xff]  }
 0x822   : > { %15524 = vmatpush1.bf16.msra.mxu0 %v18930_v63  ;;  %v19040_v63 = vld [vmem:[#allocation7 + $0x46c] ss:$16 sps:$4 sm:$0xff]  }
 0x823   : > { %15525 = vmatprep.subr.bf16.mxu0 %v18938_v26  ;;  %v19038_v26 = vld [vmem:[#allocation7 + $0x468] ss:$16 sps:$4 sm:$0xff]  }
 0x826   : > { %15526 = vmatpush1.bf16.msra.mxu0 %v18936_v6  ;;  %v19046_v6 = vld [vmem:[#allocation7 + $0x44c] ss:$16 sps:$4 sm:$0xff]  }
 0x827   : > { %15527 = vmatprep.subr.bf16.mxu0 %v18944_v52  ;;  %v19041_v52 = vld [vmem:[#allocation7 + $0x2a8] ss:$16 sps:$4 sm:$0xff]  }
 0x82a   : > { %15528 = vmatpush1.bf16.msra.mxu0 %v18942_v16  ;;  %v19044_v16 = vld [vmem:[#allocation7 + $0x448] ss:$16 sps:$4 sm:$0xff]  }
 0x82b   : > { %15529 = vmatprep.subr.bf16.mxu0 %v18950_v57  ;;  %v19049_v57 = vld [vmem:[#allocation7 + $0x28c] ss:$16 sps:$4 sm:$0xff]  }
 0x82e   : > { %15530 = vmatpush1.bf16.msra.mxu0 %v18948_v3  ;;  %v19052_v3 = vld [vmem:[#allocation7 + $0x42c] ss:$16 sps:$4 sm:$0xff]  }
 0x82f   : > { %15531 = vmatprep.subr.bf16.mxu0 %v18956_v43  ;;  %v19047_v43 = vld [vmem:[#allocation7 + $0x288] ss:$16 sps:$4 sm:$0xff]  }
 0x832   : > { %15532 = vmatpush1.bf16.msra.mxu0 %v18954_v14  ;;  %v19055_v14 = vld [vmem:[#allocation7 + $0x26c] ss:$16 sps:$4 sm:$0xff]  }
 0x833   : > { %15533 = vmatprep.subr.bf16.mxu0 %v18962_v5  ;;  %v19058_v5 = vld [vmem:[#allocation7 + $0x40c] ss:$16 sps:$4 sm:$0xff]  }
 0x836   : > { %15534 = vmatpush1.bf16.msra.mxu0 %v18960_v24  ;;  %v19053_v24 = vld [vmem:[#allocation7 + $0x268] ss:$16 sps:$4 sm:$0xff]  }
 0x837   : > { %15535 = vmatprep.subr.bf16.mxu0 %v18968_v17  ;;  %v19056_v17 = vld [vmem:[#allocation7 + $0x408] ss:$16 sps:$4 sm:$0xff]  }
 0x83a   : > { %15536 = vmatpush2.bf16.msra.mxu0 %v18966_v7  ;;  %v19061_v7 = vld [vmem:[#allocation7 + $0x24c] ss:$16 sps:$4 sm:$0xff]  }
 0x83b   : > { %15537 = vmatprep.subr.bf16.mxu0 %v18974_v58  ;;  %v19064_v58 = vld [vmem:[#allocation7 + $0x5ec] ss:$16 sps:$4 sm:$0xff]  }
 0x83e   : > { %15538 = vmatpush2.bf16.msra.mxu0 %v18972_v53  ;;  %v19059_v53 = vld [vmem:[#allocation7 + $0x248] ss:$16 sps:$4 sm:$0xff]  }
 0x83f   : > { %15539 = vmatprep.subr.bf16.mxu0 %v18980_v23  ;;  %v19062_v23 = vld [vmem:[#allocation7 + $0x5e8] ss:$16 sps:$4 sm:$0xff]  }
 0x842   : > { %15540 = vmatpush2.bf16.msra.mxu0 %v18978_v49  ;;  %v19067_v49 = vld [vmem:[#allocation7 + $0x22c] ss:$16 sps:$4 sm:$0xff]  }
 0x843   : > { %15541 = vmatprep.subr.bf16.mxu0 %v18986_v11  ;;  %v19070_v11 = vld [vmem:[#allocation7 + $0x5cc] ss:$16 sps:$4 sm:$0xff]  }
 0x846   : > { %15542 = vmatpush2.bf16.msra.mxu0 %v18984_v12  ;;  %v19065_v12 = vld [vmem:[#allocation7 + $0x228] ss:$16 sps:$4 sm:$0xff]  }
 0x847   : > { %15543 = vmatprep.subr.bf16.mxu0 %v18992_v37  ;;  %v19068_v37 = vld [vmem:[#allocation7 + $0x5c8] ss:$16 sps:$4 sm:$0xff]  }
 0x84a   : > { %15544 = vmatpush2.bf16.msra.mxu0 %v18990_v19  ;;  %v19073_v19 = vld [vmem:[#allocation7 + $0x20c] ss:$16 sps:$4 sm:$0xff]  }
 0x84b   : > { %15545 = vmatprep.subr.bf16.mxu0 %v18998_v0  ;;  %v19076_v0 = vld [vmem:[#allocation7 + $0x5ac] ss:$16 sps:$4 sm:$0xff]  }
 0x84e   : > { %15546 = vmatpush2.bf16.msra.mxu0 %v18996_v42  ;;  %v19071_v42 = vld [vmem:[#allocation7 + $0x208] ss:$16 sps:$4 sm:$0xff]  }
 0x84f   : > { %15547 = vmatprep.subr.bf16.mxu0 %v19004_v18  ;;  %v19074_v18 = vld [vmem:[#allocation7 + $0x5a8] ss:$16 sps:$4 sm:$0xff]  }
 0x852   : > { %15548 = vmatpush2.bf16.msra.mxu0 %v19002_v54  ;;  %v19079_v54 = vld [vmem:[#allocation7 + $0x3ec] ss:$16 sps:$4 sm:$0xff]  }
 0x853   : > { %15549 = vmatprep.subr.bf16.mxu0 %v19010_v13  ;;  %v19082_v13 = vld [vmem:[#allocation7 + $0x58c] ss:$16 sps:$4 sm:$0xff]  }
 0x856   : > { %15550 = vmatpush2.bf16.msra.mxu0 %v19008_v34  ;;  %v19077_v34 = vld [vmem:[#allocation7 + $0x3e8] ss:$16 sps:$4 sm:$0xff]  }
 0x857   : > { %15601 = vmatprep.subr.bf16.mxu0 %v19016_v15  ;;  %v19080_v15 = vld [vmem:[#allocation7 + $0x588] ss:$16 sps:$4 sm:$0xff]  }
 0x859   : > { %v13732_v10 = vpop.f32.mrf.mxu0  ;;  %15552 = vmatmul.mubr.bf16.vlgmr.msra.gmra.mxu0 %v20136_v29  ;;  %v19026_v29 = vld [vmem:[#allocation7 + $0x4a8] ss:$16 sps:$4 sm:$0xff]  }
 0x85a   : > { %v13733_v48 = vadd.f32 %v13732_v10, %v20159_v27  ;;  %v13773_v35 = vpop.f32.mrf.mxu1  ;;  %15602 = vmatpush1.bf16.msra.mxu0 %v19014_v1  ;;  %15633 = vmatprep.mubr.bf16.mxu0 %v20140_v25  ;;  %v19029_v25 = vld [vmem:[#allocation7 + $0x2e8] ss:$16 sps:$4 sm:$0xff]   ;;  %v19088_v1 = vld [vmem:[#allocation7 + $0x56c] ss:$16 sps:$4 sm:$0xff]  }
 0x85b   : > { %v13734_v8 = vpop.f32.mrf.mxu0  ;;  %15603 = vmatprep.subr.bf16.mxu0 %v19022_v2  ;;  %v19083_v2 = vld [vmem:[#allocation7 + $0x3c8] ss:$16 sps:$4 sm:$0xff]  }
 0x85c   : > { %v13774_v61 = vadd.f32 %v13773_v35, %v13733_v48  ;;  %v13735_v30 = vadd.f32 %v13734_v8, %v13694_v39  ;;  %v13775_v41 = vpop.f32.mrf.mxu1  ;;  %v19086_v10 = vld [vmem:[#allocation7 + $0x568] ss:$16 sps:$4 sm:$0xff]   ;;  %v19091_v39 = vld [vmem:[#allocation7 + $0x3ac] ss:$16 sps:$4 sm:$0xff]  }
 0x85d   : > { %v13736_v50 = vpop.f32.mrf.mxu0  ;;  %v19094_v48 = vld [vmem:[#allocation7 + $0x54c] ss:$16 sps:$4 sm:$0xff]   ;;  %v19089_v35 = vld [vmem:[#allocation7 + $0x3a8] ss:$16 sps:$4 sm:$0xff]  }
 0x85e   : > { %v13776_v20 = vadd.f32 %v13775_v41, %v13735_v30  ;;  %v13777_v44 = vpop.f32.mrf.mxu1  ;;  %15604 = vmatpush1.bf16.msra.mxu0 %v19020_v51  ;;  %v13786_v36 = vmax.f32 %v13774_v61, 0.0  ;;  %v19092_v51 = vld [vmem:[#allocation7 + $0x548] ss:$16 sps:$4 sm:$0xff]   ;;  %v19097_v8 = vld [vmem:[#allocation7 + $0x38c] ss:$16 sps:$4 sm:$0xff]  }
 0x85f   : > { %v13737_v55 = vpop.f32.mrf.mxu0  ;;  %15605 = vmatprep.subr.bf16.mxu0 %v19028_v47  ;;  %v19100_v47 = vld [vmem:[#allocation7 + $0x52c] ss:$16 sps:$4 sm:$0xff]   ;;  %v19095_v61 = vld [vmem:[#allocation7 + $0x388] ss:$16 sps:$4 sm:$0xff]  }
 0x860   : > { %v13787_v38 = vmax.f32 %v13776_v20, 0.0  ;;  %v13778_v59 = vpop.f32.mrf.mxu1  ;;  %v20171_v28 = vpack.c.bf16 %v13786_v36, %v13786_v36  ;;  %v19098_v30 = vld [vmem:[#allocation7 + $0x528] ss:$16 sps:$4 sm:$0xff]   ;;  %v19103_v41 = vld [vmem:[#allocation7 + $0x36c] ss:$16 sps:$4 sm:$0xff]  }
 0x861   : > { %v19106_v50 = vld [vmem:[#allocation7 + $0x50c] ss:$16 sps:$4 sm:$0xff]   ;;  %v19101_v20 = vld [vmem:[#allocation7 + $0x368] ss:$16 sps:$4 sm:$0xff]   ;;  %v19470_v59 = vmov 0.0  }
 0x862   : > { %v20169_v27 = vpack.c.bf16 %v13787_v38, %v13787_v38  ;;  %15606 = vmatpush1.bf16.msra.mxu0 %v19026_v29  ;;  %v19104_v44 = vld [vmem:[#allocation7 + $0x508] ss:$16 sps:$4 sm:$0xff]   ;;  %v19109_v29 = vld [vmem:[#allocation7 + $0x34c] ss:$16 sps:$4 sm:$0xff]  }
 0x863   : > { %15607 = vmatprep.subr.bf16.mxu0 %v19034_v45  ;;  %v20176_v36 = vld [vmem:[#allocation14 + $0x2] ss:$8 sm:$0xf]  ;;  %v19112_v38 = vld [vmem:[#allocation7 + $0x32c] ss:$16 sps:$4 sm:$0xff]  }
 0x864   : > { %15510 = vmatprep.mubr.bf16.mxu1 %v20169_v27  ;;  %v19107_v55 = vld [vmem:[#allocation7 + $0x348] ss:$16 sps:$4 sm:$0xff]   ;;  %v14058_v45 = vrot.slane %v20176_v36, %v19751_v56 }
 0x865   : > { %15511 = vmatmul.mubr.bf16.vlgmr.msra.gmra.mxu1 %v20171_v28 }
 0x866   : > { %15561 = vmatpush1.bf16.msra.mxu1 %v19029_v25  ;;  %15592 = vmatprep.mubr.bf16.mxu1 %v20124_v46  ;;  %v19050_v46 = vld [vmem:[#allocation7 + $0x428] ss:$16 sps:$4 sm:$0xff]   ;;  %v15692_v25 = vld [vmem:[#allocation8] sm:$0xff] }
 0x867   : > { %15608 = vmatpush1.bf16.msra.mxu0 %v19032_v22  ;;  %15562 = vmatprep.subr.bf16.mxu1 %v19037_v33  ;;  %v14062_v22 = vrot.slane %v20176_v36, %v19754_v62 }
 0x868   : > { %15609 = vmatprep.subr.bf16.mxu0 %v19040_v63 }
 0x86a   : > { %15563 = vmatpush1.bf16.msra.mxu1 %v19035_v32 }
 0x86b   : > { %15610 = vmatpush1.bf16.msra.mxu0 %v19038_v26  ;;  %15564 = vmatprep.subr.bf16.mxu1 %v19043_v40  ;;  %v19110_v26 = vld [vmem:[#allocation7 + $0x328] ss:$16 sps:$4 sm:$0xff]  }
 0x86c   : > { %15611 = vmatprep.subr.bf16.mxu0 %v19046_v6  ;;  %v19115_v6 = vld [vmem:[#allocation7 + $0x30c] ss:$16 sps:$4 sm:$0xff]  }
 0x86e   : > { %15565 = vmatpush1.bf16.msra.mxu1 %v19041_v52 }
 0x86f   : > { %15612 = vmatpush1.bf16.msra.mxu0 %v19044_v16  ;;  %15566 = vmatprep.subr.bf16.mxu1 %v19049_v57 }
 0x870   : > { %15613 = vmatprep.subr.bf16.mxu0 %v19052_v3 }
 0x872   : > { %15567 = vmatpush1.bf16.msra.mxu1 %v19047_v43 }
 0x873   : > { %15614 = vmatpush1.bf16.msra.mxu0 %v19050_v46  ;;  %15568 = vmatprep.subr.bf16.mxu1 %v19055_v14  ;;  %v19113_v46 = vld [vmem:[#allocation7 + $0x308] ss:$16 sps:$4 sm:$0xff]  }
 0x874   : > { %15615 = vmatprep.subr.bf16.mxu0 %v19058_v5  ;;  %v15691_v5 = vld [vmem:[%s541_s28] sm:$0xff]  ;;  %s16429_s28 = sshll.u32 %s530_s19, 3 }
 0x875   : > { %s532_s23 = scalar_lea.vmem [#allocation16], %s16429_s28 }
 0x876   : > { %15569 = vmatpush1.bf16.msra.mxu1 %v19053_v24  ;;  %v19118_v24 = vld [vmem:[#allocation7 + $0x6ec] ss:$16 sps:$4 sm:$0xff]   ;;  %s16259_s30 = sshll.u32 %s532_s23, 4  ;;  %s16260_s30 = int_to_ptr.vmem [resolvable:$true] %s16259_s30 }
 0x877   : > { %15616 = vmatpush1.bf16.msra.mxu0 %v19056_v17  ;;  %15570 = vmatprep.subr.bf16.mxu1 %v19061_v7  ;;  %v19116_v7 = vld [vmem:[#allocation7 + $0x6e8] ss:$16 sps:$4 sm:$0xff]   ;;  %s19372_s26 = scalar_lea.vmem %s16260_s30, 128  ;;  %p19379_p13 = scmp.lt.s32.totalorder %s16260_s30, %s19377_s25 }
 0x878   : > { %15617 = vmatprep.subr.bf16.mxu0 %v19064_v58  ;;  %v19121_v58 = vld [vmem:[#allocation7 + $0x6cc] ss:$16 sps:$4 sm:$0xff]   ;;  %p19373_p8 = scmp.ne.s32.totalorder %s16260_s30, %s19372_s26  ;;  %p19380_p3 = scmp.lt.s32.totalorder %s19378_s16, %s19372_s26 }
 0x87a   : > { %15571 = vmatpush1.bf16.msra.mxu1 %v19059_v53  ;;  %v19119_v53 = vld [vmem:[#allocation7 + $0x6c8] ss:$16 sps:$4 sm:$0xff]   ;;  %p19374_p0 = pnand %p19373_p8, %p20488_p11  ;;  %p19381_p10 = por %p19380_p3, %p19379_p13 }
 0x87b   : > { %15618 = vmatpush2.bf16.msra.mxu0 %v19062_v23  ;;  %15572 = vmatprep.subr.bf16.mxu1 %v19067_v49  ;;  %v19124_v23 = vld [vmem:[#allocation7 + $0x6ac] ss:$16 sps:$4 sm:$0xff]   ;;  %v19122_v49 = vld [vmem:[#allocation7 + $0x6a8] ss:$16 sps:$4 sm:$0xff]  }
 0x87c   : > { %15619 = vmatprep.subr.bf16.mxu0 %v19070_v11  ;;  %v19127_v11 = vld [vmem:[#allocation7 + $0x68c] ss:$16 sps:$4 sm:$0xff]   ;;  %p19375_p1 = pneg %p19374_p0 }
 0x87e   : > { %15573 = vmatpush1.bf16.msra.mxu1 %v19065_v12  ;;  %v19125_v12 = vld [vmem:[#allocation7 + $0x688] ss:$16 sps:$4 sm:$0xff]   ;;  %p19382_p9 = pnand %p19381_p10, %p19375_p1 }
 0x87f   : > { %15620 = vmatpush2.bf16.msra.mxu0 %v19068_v37  ;;  %15574 = vmatprep.subr.bf16.mxu1 %v19073_v19  ;;  %v19130_v37 = vld [vmem:[#allocation7 + $0x66c] ss:$16 sps:$4 sm:$0xff]   ;;  %v19128_v19 = vld [vmem:[#allocation7 + $0x668] ss:$16 sps:$4 sm:$0xff]  }
 0x880   : > { %15621 = vmatprep.subr.bf16.mxu0 %v19076_v0  ;;  %v19133_v0 = vld [vmem:[#allocation7 + $0x64c] ss:$16 sps:$4 sm:$0xff]  }
 0x882   : > { %15575 = vmatpush1.bf16.msra.mxu1 %v19071_v42  ;;  %v19136_v42 = vld [vmem:[#allocation7 + $0x62c] ss:$16 sps:$4 sm:$0xff]  }
 0x883   : > { %15622 = vmatpush2.bf16.msra.mxu0 %v19074_v18  ;;  %15576 = vmatprep.subr.bf16.mxu1 %v19079_v54  ;;  %v19139_v18 = vld [vmem:[#allocation7 + $0x60c] ss:$16 sps:$4 sm:$0xff]   ;;  %v19137_v54 = vld [vmem:[#allocation7 + $0x608] ss:$16 sps:$4 sm:$0xff]  }
 0x884   : > { %15623 = vmatprep.subr.bf16.mxu0 %v19082_v13  ;;  %v19142_v13 = vld [vmem:[#allocation7 + $0x7ec] ss:$16 sps:$4 sm:$0xff]  }
 0x886   : > { %15577 = vmatpush2.bf16.msra.mxu1 %v19077_v34  ;;  %v19140_v34 = vld [vmem:[#allocation7 + $0x7e8] ss:$16 sps:$4 sm:$0xff]  }
 0x887   : > { %15624 = vmatpush2.bf16.msra.mxu0 %v19080_v15  ;;  %15578 = vmatprep.subr.bf16.mxu1 %v19085_v60  ;;  %v19145_v15 = vld [vmem:[#allocation7 + $0x7cc] ss:$16 sps:$4 sm:$0xff]   ;;  %v19143_v60 = vld [vmem:[#allocation7 + $0x7c8] ss:$16 sps:$4 sm:$0xff]  }
 0x888   : > { %15625 = vmatprep.subr.bf16.mxu0 %v19088_v1  ;;  %v19148_v1 = vld [vmem:[#allocation7 + $0x7ac] ss:$16 sps:$4 sm:$0xff]  }
 0x88a   : > { %15579 = vmatpush2.bf16.msra.mxu1 %v19083_v2  ;;  %v19146_v2 = vld [vmem:[#allocation7 + $0x7a8] ss:$16 sps:$4 sm:$0xff]  }
 0x88b   : > { %15626 = vmatpush2.bf16.msra.mxu0 %v19086_v10  ;;  %15580 = vmatprep.subr.bf16.mxu1 %v19091_v39  ;;  %v19151_v10 = vld [vmem:[#allocation7 + $0x78c] ss:$16 sps:$4 sm:$0xff]   ;;  %v19149_v39 = vld [vmem:[#allocation7 + $0x788] ss:$16 sps:$4 sm:$0xff]  }
 0x88c   : > { %15627 = vmatprep.subr.bf16.mxu0 %v19094_v48  ;;  %v19154_v48 = vld [vmem:[#allocation7 + $0x76c] ss:$16 sps:$4 sm:$0xff]  }
 0x88e   : > { %15581 = vmatpush2.bf16.msra.mxu1 %v19089_v35  ;;  %v19152_v35 = vld [vmem:[#allocation7 + $0x768] ss:$16 sps:$4 sm:$0xff]  }
 0x88f   : > { %15628 = vmatpush2.bf16.msra.mxu0 %v19092_v51  ;;  %15582 = vmatprep.subr.bf16.mxu1 %v19097_v8  ;;  %v19157_v51 = vld [vmem:[#allocation7 + $0x74c] ss:$16 sps:$4 sm:$0xff]   ;;  %v19155_v8 = vld [vmem:[#allocation7 + $0x748] ss:$16 sps:$4 sm:$0xff]  }
 0x890   : > { %15629 = vmatprep.subr.bf16.mxu0 %v19100_v47  ;;  %v19160_v47 = vld [vmem:[#allocation7 + $0x72c] ss:$16 sps:$4 sm:$0xff]  }
 0x892   : > { %15583 = vmatpush2.bf16.msra.mxu1 %v19095_v61 }
 0x893   : > { %15630 = vmatpush2.bf16.msra.mxu0 %v19098_v30  ;;  %15584 = vmatprep.subr.bf16.mxu1 %v19103_v41  ;;  %v19158_v41 = vld [vmem:[#allocation7 + $0x728] ss:$16 sps:$4 sm:$0xff]  }
 0x894   : > { %15631 = vmatprep.subr.bf16.mxu0 %v19106_v50 }
 0x896   : > { %15585 = vmatpush2.bf16.msra.mxu1 %v19101_v20  ;;  %v19163_v20 = vld [vmem:[#allocation7 + $0x70c] ss:$16 sps:$4 sm:$0xff]  }
 0x897   : > { %15632 = vmatpush2.bf16.msra.mxu0 %v19104_v44  ;;  %15586 = vmatprep.subr.bf16.mxu1 %v19109_v29 }
 0x898   : > { %18565 = vmatprep.subr.mxu0 %v19470_v59 }
 0x899   : > { %v15389_v33 = vpop.f32.mrf.mxu0 }
 0x89a   : > { %v15390_v63 = vadd.f32 %v15389_v33, %v14058_v45  ;;  %v15430_v32 = vpop.f32.mrf.mxu1  ;;  %15587 = vmatpush2.bf16.msra.mxu1 %v19107_v55  ;;  %15634 = vmatmul.mubr.bf16.vlgmr.msra.gmra.mxu0 %v20152_v21  ;;  %v19161_v55 = vld [vmem:[#allocation7 + $0x708] ss:$16 sps:$4 sm:$0xff]  }
 0x89b   : > { %18566 = vmatpush3.msra.mxu0 %v15692_v25  ;;  %v15391_v40 = vpop.f32.mrf.mxu0  ;;  %15588 = vmatprep.subr.bf16.mxu1 %v19112_v38  ;;  %v15776_v38 = vld [vmem:[#allocation10 + $0x38] sm:$0xff]  ;;  %v15775_v25 = vld [vmem:[#allocation10 + $0x30] sm:$0xff]  ;;  %v15773_v33 = vld [vmem:[#allocation10 + $0x20] sm:$0xff] }
 0x89c   : > { %v20185_v52 = vadd.f32 %v15430_v32, %v15390_v63  ;;  %v15392_v16 = vadd.f32 %v15391_v40, %v14062_v22  ;;  %v15432_v57 = vpop.f32.mrf.mxu1  ;;  %18567 = vmatprep.mubr.msk.f32.mxu0 %vm19471_vm0, %v19470_v59  ;;  %v15774_v22 = vld [vmem:[#allocation10 + $0x28] sm:$0xff]  ;;  %v15772_v63 = vld [vmem:[#allocation10 + $0x18] sm:$0xff] }
 0x89d   : > { %v15393_v3 = vpop.f32.mrf.mxu0  ;;  %v15770_v32 = vld [vmem:[#allocation10 + $0x8] sm:$0xff] }
 0x89e   : > { %v20192_v43 = vadd.f32 %v15432_v57, %v15392_v16  ;;  %v15434_v21 = vpop.f32.mrf.mxu1  ;;  %15589 = vmatpush2.bf16.msra.mxu1 %v19110_v26  ;;  %v15769_v26 = vld [vmem:[#allocation10] sm:$0xff] }
 0x89f   : > { %v15394_v14 = vpop.f32.mrf.mxu0  ;;  %15590 = vmatprep.subr.bf16.mxu1 %v19115_v6 }
 0x8a0   : > { %v15435_v17 = vpop.f32.mrf.mxu1 }
 0x8a2   : > { %15591 = vmatpush2.bf16.msra.mxu1 %v19113_v46  ;;  %18568 = vmatmul.mubr.msk.f32.vlgmr.msra.gmra.mxu0 %vm15694_vm1, %v15691_v5 }
 0x8a3   : > { %15642 = vmatprep.subr.bf16.mxu1 %v19118_v24  ;;  %15962 = vmatprep.mubr.f32.mxu0 %v19470_v59 }
 0x8a5   : > { %15593 = vmatmul.mubr.bf16.vlgmr.msra.gmra.mxu1 %v20138_v4  ;;  %v19131_v4 = vld [vmem:[#allocation7 + $0x648] ss:$16 sps:$4 sm:$0xff]  }
 0x8a6   : > { %15643 = vmatpush1.bf16.msra.mxu1 %v19116_v7  ;;  %15674 = vmatprep.mubr.bf16.mxu1 %v20169_v27  ;;  %v19134_v27 = vld [vmem:[#allocation7 + $0x628] ss:$16 sps:$4 sm:$0xff]   ;;  %v15884_v7 = vld [vmem:[#allocation11 + $0xf8] sm:$0xff] }
 0x8a7   : > { %15644 = vmatprep.subr.bf16.mxu1 %v19121_v58  ;;  %v15883_v58 = vld [vmem:[#allocation11 + $0xf0] sm:$0xff]  ;;  %15898 = vmatprep.subr.mxu0 %v15884_v7  ;;  %v15853_v7 = vld [vmem:[#allocation11] sm:$0xff] }
 0x8a8   : > { %15899 = vmatpush1.msra.mxu0 %v15883_v58 }
 0x8aa   : > { %15645 = vmatpush1.bf16.msra.mxu1 %v19119_v53  ;;  %v15882_v53 = vld [vmem:[#allocation11 + $0xe8] sm:$0xff] }
 0x8ab   : > { %15646 = vmatprep.subr.bf16.mxu1 %v19124_v23  ;;  %v15881_v23 = vld [vmem:[#allocation11 + $0xe0] sm:$0xff]  ;;  %15900 = vmatprep.subr.mxu0 %v15882_v53 }
 0x8ac   : > { %15901 = vmatpush1.msra.mxu0 %v15881_v23  ;;  %v16018_v23 = vld [vmem:[%s20451_s9 + $0xf8] sm:$0xff] }
 0x8ae   : > { %15647 = vmatpush1.bf16.msra.mxu1 %v19122_v49  ;;  %v15880_v49 = vld [vmem:[#allocation11 + $0xd8] sm:$0xff] }
 0x8af   : > { %15648 = vmatprep.subr.bf16.mxu1 %v19127_v11  ;;  %v15879_v11 = vld [vmem:[#allocation11 + $0xd0] sm:$0xff]  ;;  %15902 = vmatprep.subr.mxu0 %v15880_v49 }
 0x8b0   : > { %15903 = vmatpush1.msra.mxu0 %v15879_v11  ;;  %v16002_v49 = vld [vmem:[%s20451_s9 + $0x78] sm:$0xff]  ;;  %v16001_v11 = vld [vmem:[%s20451_s9 + $0x70] sm:$0xff] }
 0x8b2   : > { %15649 = vmatpush1.bf16.msra.mxu1 %v19125_v12  ;;  %v15878_v12 = vld [vmem:[#allocation11 + $0xc8] sm:$0xff] }
 0x8b3   : > { %15650 = vmatprep.subr.bf16.mxu1 %v19130_v37  ;;  %v15877_v37 = vld [vmem:[#allocation11 + $0xc0] sm:$0xff]  ;;  %15904 = vmatprep.subr.mxu0 %v15878_v12 }
 0x8b4   : > { %15905 = vmatpush1.msra.mxu0 %v15877_v37  ;;  %v16016_v12 = vld [vmem:[%s20451_s9 + $0xe8] sm:$0xff] }
 0x8b5   : > { %v16000_v37 = vld [vmem:[%s20451_s9 + $0x68] sm:$0xff] }
 0x8b6   : > { %15651 = vmatpush1.bf16.msra.mxu1 %v19128_v19  ;;  %v15876_v19 = vld [vmem:[#allocation11 + $0xb8] sm:$0xff] }
 0x8b7   : > { %15652 = vmatprep.subr.bf16.mxu1 %v19133_v0  ;;  %v15875_v0 = vld [vmem:[#allocation11 + $0xb0] sm:$0xff]  ;;  %15906 = vmatprep.subr.mxu0 %v15876_v19  ;;  %v16015_v19 = vld [vmem:[%s20451_s9 + $0xe0] sm:$0xff] }
 0x8b8   : > { %15907 = vmatpush1.msra.mxu0 %v15875_v0  ;;  %v15999_v0 = vld [vmem:[%s20451_s9 + $0x60] sm:$0xff] }
 0x8ba   : > { %15653 = vmatpush1.bf16.msra.mxu1 %v19131_v4  ;;  %v15874_v4 = vld [vmem:[#allocation11 + $0xa8] sm:$0xff] }
 0x8bb   : > { %15654 = vmatprep.subr.bf16.mxu1 %v19136_v42  ;;  %v15873_v42 = vld [vmem:[#allocation11 + $0xa0] sm:$0xff]  ;;  %15908 = vmatprep.subr.mxu0 %v15874_v4  ;;  %v16014_v4 = vld [vmem:[%s20451_s9 + $0xd8] sm:$0xff] }
 0x8bc   : > { %15909 = vmatpush1.msra.mxu0 %v15873_v42  ;;  %v15998_v42 = vld [vmem:[%s20451_s9 + $0x58] sm:$0xff] }
 0x8be   : > { %15655 = vmatpush1.bf16.msra.mxu1 %v19134_v27  ;;  %v15872_v27 = vld [vmem:[#allocation11 + $0x98] sm:$0xff] }
 0x8bf   : > { %15656 = vmatprep.subr.bf16.mxu1 %v19139_v18  ;;  %v15871_v18 = vld [vmem:[#allocation11 + $0x90] sm:$0xff]  ;;  %15910 = vmatprep.subr.mxu0 %v15872_v27  ;;  %v16013_v27 = vld [vmem:[%s20451_s9 + $0xd0] sm:$0xff] }
 0x8c0   : > { %15911 = vmatpush1.msra.mxu0 %v15871_v18  ;;  %v15997_v18 = vld [vmem:[%s20451_s9 + $0x50] sm:$0xff] }
 0x8c2   : > { %15657 = vmatpush1.bf16.msra.mxu1 %v19137_v54  ;;  %v15870_v54 = vld [vmem:[#allocation11 + $0x88] sm:$0xff] }
 0x8c3   : > { %15658 = vmatprep.subr.bf16.mxu1 %v19142_v13  ;;  %v15869_v13 = vld [vmem:[#allocation11 + $0x80] sm:$0xff]  ;;  %15912 = vmatprep.subr.mxu0 %v15870_v54 }
 0x8c4   : > { %15913 = vmatpush1.msra.mxu0 %v15869_v13  ;;  %v16012_v54 = vld [vmem:[%s20451_s9 + $0xc8] sm:$0xff] }
 0x8c5   : > { %v15996_v13 = vld [vmem:[%s20451_s9 + $0x48] sm:$0xff] }
 0x8c6   : > { %15659 = vmatpush2.bf16.msra.mxu1 %v19140_v34  ;;  %v15868_v34 = vld [vmem:[#allocation11 + $0x78] sm:$0xff] }
 0x8c7   : > { %15660 = vmatprep.subr.bf16.mxu1 %v19145_v15  ;;  %v15867_v15 = vld [vmem:[#allocation11 + $0x70] sm:$0xff]  ;;  %15914 = vmatprep.subr.mxu0 %v15868_v34  ;;  %v16011_v34 = vld [vmem:[%s20451_s9 + $0xc0] sm:$0xff] }
 0x8c8   : > { %15915 = vmatpush1.msra.mxu0 %v15867_v15  ;;  %v15995_v15 = vld [vmem:[%s20451_s9 + $0x40] sm:$0xff] }
 0x8ca   : > { %15661 = vmatpush2.bf16.msra.mxu1 %v19143_v60  ;;  %v15866_v60 = vld [vmem:[#allocation11 + $0x68] sm:$0xff] }
 0x8cb   : > { %15662 = vmatprep.subr.bf16.mxu1 %v19148_v1  ;;  %v15865_v1 = vld [vmem:[#allocation11 + $0x60] sm:$0xff]  ;;  %15916 = vmatprep.subr.mxu0 %v15866_v60  ;;  %v16010_v60 = vld [vmem:[%s20451_s9 + $0xb8] sm:$0xff] }
 0x8cc   : > { %15917 = vmatpush1.msra.mxu0 %v15865_v1  ;;  %v15994_v1 = vld [vmem:[%s20451_s9 + $0x38] sm:$0xff] }
 0x8ce   : > { %15663 = vmatpush2.bf16.msra.mxu1 %v19146_v2  ;;  %v15864_v2 = vld [vmem:[#allocation11 + $0x58] sm:$0xff] }
 0x8cf   : > { %15664 = vmatprep.subr.bf16.mxu1 %v19151_v10  ;;  %v15863_v10 = vld [vmem:[#allocation11 + $0x50] sm:$0xff]  ;;  %15918 = vmatprep.subr.mxu0 %v15864_v2  ;;  %v16009_v2 = vld [vmem:[%s20451_s9 + $0xb0] sm:$0xff] }
 0x8d0   : > { %15919 = vmatpush1.msra.mxu0 %v15863_v10  ;;  %v15993_v10 = vld [vmem:[%s20451_s9 + $0x30] sm:$0xff] }
 0x8d2   : > { %15665 = vmatpush2.bf16.msra.mxu1 %v19149_v39  ;;  %v15862_v39 = vld [vmem:[#allocation11 + $0x48] sm:$0xff] }
 0x8d3   : > { %15666 = vmatprep.subr.bf16.mxu1 %v19154_v48  ;;  %v15861_v48 = vld [vmem:[#allocation11 + $0x40] sm:$0xff]  ;;  %15920 = vmatprep.subr.mxu0 %v15862_v39 }
 0x8d4   : > { %15921 = vmatpush1.msra.mxu0 %v15861_v48  ;;  %v16008_v39 = vld [vmem:[%s20451_s9 + $0xa8] sm:$0xff] }
 0x8d5   : > { %v15992_v48 = vld [vmem:[%s20451_s9 + $0x28] sm:$0xff] }
 0x8d6   : > { %15667 = vmatpush2.bf16.msra.mxu1 %v19152_v35  ;;  %v15860_v35 = vld [vmem:[#allocation11 + $0x38] sm:$0xff] }
 0x8d7   : > { %15668 = vmatprep.subr.bf16.mxu1 %v19157_v51  ;;  %v15859_v51 = vld [vmem:[#allocation11 + $0x30] sm:$0xff]  ;;  %15922 = vmatprep.subr.mxu0 %v15860_v35  ;;  %v16007_v35 = vld [vmem:[%s20451_s9 + $0xa0] sm:$0xff] }
 0x8d8   : > { %15923 = vmatpush1.msra.mxu0 %v15859_v51  ;;  %v15991_v51 = vld [vmem:[%s20451_s9 + $0x20] sm:$0xff] }
 0x8d9   : > { %v15471_v61 = vpop.f32.mrf.mxu0 }
 0x8da   : > { %v15472_v30 = vadd.f32 %v15471_v61, %v20185_v52  ;;  %15669 = vmatpush2.bf16.msra.mxu1 %v19155_v8  ;;  %v15858_v8 = vld [vmem:[#allocation11 + $0x28] sm:$0xff] }
 0x8db   : > { %v15473_v50 = vpop.f32.mrf.mxu0  ;;  %15670 = vmatprep.subr.bf16.mxu1 %v19160_v47  ;;  %v15857_v47 = vld [vmem:[#allocation11 + $0x20] sm:$0xff]  ;;  %15924 = vmatprep.subr.mxu0 %v15858_v8 }
 0x8dc   : > { %v15474_v44 = vadd.f32 %v15473_v50, %v20192_v43  ;;  %15925 = vmatpush1.msra.mxu0 %v15857_v47  ;;  %v14066_v50 = vrot.slane %v20176_v36, %v19783_v9  ;;  %v15777_v8 = vld [vmem:[#allocation14 + $0x4] ss:$0 sm:$0xff] }
 0x8dd   : > { %v15475_v29 = vpop.f32.mrf.mxu0 }
 0x8de   : > { %15671 = vmatpush2.bf16.msra.mxu1 %v19158_v41  ;;  %v14070_v29 = vrot.slane %v20176_v36, %v19786_v31 }
 0x8df   : > { %v15476_v45 = vpop.f32.mrf.mxu0  ;;  %15672 = vmatprep.subr.bf16.mxu1 %v19163_v20 }
 0x8e2   : > { %15673 = vmatpush2.bf16.msra.mxu1 %v19161_v55 }
 0x8e3   : > { %18570 = vmatprep.subr.mxu1 %v19470_v59 }
 0x8e5   : > { %15675 = vmatmul.mubr.bf16.vlgmr.msra.gmra.mxu1 %v20171_v28  ;;  %v15771_v28 = vld [vmem:[#allocation10 + $0x10] sm:$0xff] }
 0x8e6   : > { %18571 = vmatpush3.msra.mxu1 %v15776_v38  ;;  %18586 = vmatprep.mubr.msk.f32.mxu1 %vm19471_vm0, %v19470_v59 }
 0x8e7   : > { %18572 = vmatprep.subr.mxu1 %v19470_v59 }
 0x8e8   : > { %18573 = vmatpush3.msra.mxu1 %v15775_v25 }
 0x8e9   : > { %18574 = vmatprep.subr.mxu1 %v19470_v59 }
 0x8ea   : > { %18575 = vmatpush3.msra.mxu1 %v15774_v22 }
 0x8eb   : > { %18576 = vmatprep.subr.mxu1 %v19470_v59 }
 0x8ec   : > { %18577 = vmatpush3.msra.mxu1 %v15773_v33 }
 0x8ed   : > { %18578 = vmatprep.subr.mxu1 %v19470_v59 }
 0x8ee   : > { %18579 = vmatpush3.msra.mxu1 %v15772_v63 }
 0x8ef   : > { %18580 = vmatprep.subr.mxu1 %v19470_v59 }
 0x8f0   : > { %18581 = vmatpush3.msra.mxu1 %v15771_v28 }
 0x8f1   : > { %18582 = vmatprep.subr.mxu1 %v19470_v59 }
 0x8f2   : > { %18583 = vmatpush3.msra.mxu1 %v15770_v32 }
 0x8f3   : > { %18584 = vmatprep.subr.mxu1 %v19470_v59 }
 0x8f4   : > { %18585 = vmatpush3.msra.mxu1 %v15769_v26 }
 0x8f5   : > { %18504 = vmatprep.subr.mxu1 %v16018_v23 }
 0x919   : > { %v20210_v40 = vpop.f32.mrf.mxu0 }
 0x91a   : > { %v15554_v38 = vadd.f32 %v20210_v40, %v14066_v50  ;;  %v15986_v50 = vld [vmem:[%s20450_s8 + $0x78] sm:$0xff] }
 0x91b   : > { %v20212_v6 = vpop.f32.mrf.mxu0 }
 0x91c   : > { %v15556_v63 = vadd.f32 %v20212_v6, %v14070_v29  ;;  %v15854_v6 = vld [vmem:[#allocation11 + $0x8] sm:$0xff]  ;;  %v15983_v29 = vld [vmem:[%s20450_s8 + $0x60] sm:$0xff] }
 0x91d   : > { %v15557_v52 = vpop.f32.mrf.mxu0 }
 0x91f   : > { %v15558_v16 = vpop.f32.mrf.mxu0 }
 0x925   : > { %v15512_v57 = vpop.f32.mrf.mxu1 }
 0x926   : > { %v15513_v3 = vadd.f32 %v15512_v57, %v15472_v30 }
 0x927   : > { %v15514_v43 = vpop.f32.mrf.mxu1 }
 0x928   : > { %v15515_v21 = vadd.f32 %v15514_v43, %v15474_v44  ;;  %v15683_v14 = vmax.f32 %v15513_v3, 0.0  ;;  %v15693_v44 = vld [vmem:[#allocation14 + $0x3] ss:$0 sm:$0xff]  ;;  %v15856_v43 = vld [vmem:[#allocation11 + $0x18] sm:$0xff] }
 0x929   : > { %v15516_v46 = vpop.f32.mrf.mxu1  ;;  %15926 = vmatprep.subr.mxu0 %v15856_v43  ;;  %v16004_v43 = vld [vmem:[%s20451_s9 + $0x88] sm:$0xff] }
 0x92a   : > { %v15684_v5 = vmax.f32 %v15515_v21, 0.0  ;;  %v15855_v46 = vld [vmem:[#allocation11 + $0x10] sm:$0xff] }
 0x92b   : > { %v15517_v24 = vpop.f32.mrf.mxu1  ;;  %15927 = vmatpush1.msra.mxu0 %v15855_v46  ;;  %v15987_v46 = vld [vmem:[%s20451_s9] sm:$0xff] }
 0x92c   : > { %v20214_v17 = vadd.f32 %v15684_v5, %v15683_v14  ;;  %15928 = vmatprep.subr.mxu0 %v15854_v6 }
 0x92d   : > { %15929 = vmatpush1.msra.mxu0 %v15853_v7 }
 0x92e   : > { %18589 = vmatprep.subr.mxu0 %v19470_v59 }
 0x95a   : > { %v15635_v61 = vpop.f32.mrf.mxu0 }
 0x95c   : > { %v15637_v30 = vpop.f32.mrf.mxu0 }
 0x95e   : > { %v15639_v41 = vpop.f32.mrf.mxu0 }
 0x960   : > { %v15640_v20 = vpop.f32.mrf.mxu0 }
 0x961   : > { %v15985_v20 = vld [vmem:[%s20450_s8 + $0x70] sm:$0xff] }
 0x962   : > { %v15764_v55 = vpop.f32.mrf.mxu0 }
 0x963   : > { %v15765_v45 = vadd.f32 %v15764_v55, %v15693_v44  ;;  %v15984_v44 = vld [vmem:[%s20450_s8 + $0x68] sm:$0xff]  ;;  %v15982_v55 = vld [vmem:[%s20450_s8 + $0x58] sm:$0xff] }
 0x964   : > { %v18569_v25 = vpop.f32.mrf.mxu0 }
 0x965   : > { %v15768_v22 = vmax.f32 %v15765_v45, 0.0  ;;  %v15594_v33 = vpop.f32.mrf.mxu1  ;;  %v15981_v45 = vld [vmem:[%s20450_s8 + $0x50] sm:$0xff]  ;;  %v15979_v25 = vld [vmem:[%s20450_s8 + $0x40] sm:$0xff] }
 0x966   : > { %v15595_v28 = vadd.f32 %v15594_v33, %v15554_v38  ;;  %v15980_v38 = vld [vmem:[%s20450_s8 + $0x48] sm:$0xff]  ;;  %v15977_v33 = vld [vmem:[%s20450_s8 + $0x30] sm:$0xff] }
 0x967   : > { %v15596_v32 = vpop.f32.mrf.mxu1  ;;  %18587 = vmatmul.mubr.msk.f32.vlgmr.msra.gmra.mxu1 %vm15778_vm2, %v15768_v22  ;;  %v15978_v22 = vld [vmem:[%s20450_s8 + $0x38] sm:$0xff] }
 0x968   : > { %v15597_v9 = vadd.f32 %v15596_v32, %v15556_v63  ;;  %v15636_v26 = vadd.f32 %v15635_v61, %v15595_v28  ;;  %18505 = vmatpush3.msra.mxu1 %v16002_v49  ;;  %v15976_v63 = vld [vmem:[%s20450_s8 + $0x28] sm:$0xff]  ;;  %v15975_v28 = vld [vmem:[%s20450_s8 + $0x20] sm:$0xff]  ;;  %v15974_v32 = vld [vmem:[%s20450_s8 + $0x18] sm:$0xff] }
 0x969   : > { %v15598_v52 = vpop.f32.mrf.mxu1 }
 0x96a   : > { %v15638_v16 = vadd.f32 %v15637_v30, %v15597_v9  ;;  %v15973_v9 = vld [vmem:[%s20450_s8 + $0x10] sm:$0xff]  ;;  %v15971_v52 = vld [vmem:[%s20450_s8] sm:$0xff] }
 0x96b   : > { %v15599_v57 = vpop.f32.mrf.mxu1 }
 0x96c   : > { %v16006_v57 = vld [vmem:[%s20451_s9 + $0x98] sm:$0xff] }
 0x9a5   : > { %v15676_v31 = vpop.f32.mrf.mxu1 }
 0x9a6   : > { %v15677_v36 = vadd.f32 %v15676_v31, %v15636_v26  ;;  %v15972_v26 = vld [vmem:[%s20450_s8 + $0x8] sm:$0xff]  ;;  %v15990_v31 = vld [vmem:[%s20451_s9 + $0x18] sm:$0xff] }
 0x9a7   : > { %v15678_v3 = vpop.f32.mrf.mxu1 }
 0x9a8   : > { %v15685_v40 = vmax.f32 %v15677_v36, 0.0  ;;  %v15679_v21 = vadd.f32 %v15678_v3, %v15638_v16  ;;  %v16005_v36 = vld [vmem:[%s20451_s9 + $0x90] sm:$0xff] }
 0x9a9   : > { %v15680_v14 = vpop.f32.mrf.mxu1  ;;  %v15989_v3 = vld [vmem:[%s20451_s9 + $0x10] sm:$0xff] }
 0x9aa   : > { %v15688_v5 = vadd.f32 %v20214_v17, %v15685_v40  ;;  %v15686_v24 = vmax.f32 %v15679_v21, 0.0  ;;  %v16017_v17 = vld [vmem:[%s20451_s9 + $0xf0] sm:$0xff]  ;;  %v15988_v40 = vld [vmem:[%s20451_s9 + $0x8] sm:$0xff]  ;;  %v16003_v21 = vld [vmem:[%s20451_s9 + $0x80] sm:$0xff] }
 0x9ab   : > { %v15681_v58 = vpop.f32.mrf.mxu1  ;;  %18506 = vmatprep.subr.mxu1 %v16017_v17  ;;  %v15886_v14 = vld [vmem:[#allocation14 + $0x5] ss:$8 sm:$0x3]  ;;  %v16169_v17 = vld [vmem:[#allocation13 + $0x38] sm:$0xff] }
 0x9ac   : > { %v20224_v53 = vadd.f32 %v15688_v5, %v15686_v24  ;;  %18507 = vmatpush3.msra.mxu1 %v16001_v11  ;;  %v15891_v6 = vrot.slane %v15886_v14, %v19751_v56  ;;  %v15895_v5 = vrot.slane %v15886_v14, %v19754_v62  ;;  %v16168_v11 = vld [vmem:[#allocation13 + $0x30] sm:$0xff] }
 0x9ad   : > { %18508 = vmatprep.subr.mxu1 %v16016_v12  ;;  %v16167_v12 = vld [vmem:[#allocation13 + $0x28] sm:$0xff] }
 0x9ae   : > { %18509 = vmatpush3.msra.mxu1 %v16000_v37  ;;  %v15690_v16 = vmul.f32 0.25, %v20224_v53  ;;  %v16166_v37 = vld [vmem:[#allocation13 + $0x20] sm:$0xff] }
 0x9af   : > { %18510 = vmatprep.subr.mxu1 %v16015_v19  ;;  %v16165_v19 = vld [vmem:[#allocation13 + $0x18] sm:$0xff] }
 0x9b0   : > { %18511 = vmatpush3.msra.mxu1 %v15999_v0  ;;  %v16164_v0 = vld [vmem:[#allocation13 + $0x10] sm:$0xff] }
 0x9b1   : > { %18512 = vmatprep.subr.mxu1 %v16014_v4  ;;  %v16163_v4 = vld [vmem:[#allocation13 + $0x8] sm:$0xff] }
 0x9b2   : > { %18513 = vmatpush3.msra.mxu1 %v15998_v42  ;;  %v16162_v42 = vld [vmem:[#allocation13] sm:$0xff] }
 0x9b3   : > { %18514 = vmatprep.subr.mxu1 %v16013_v27 }
 0x9b4   : > { %18515 = vmatpush3.msra.mxu1 %v15997_v18 }
 0x9b5   : > { %18516 = vmatprep.subr.mxu1 %v16012_v54 }
 0x9b6   : > { %18517 = vmatpush3.msra.mxu1 %v15996_v13  ;;  %v16159_v13 = vld [vmem:[#allocation14 + $0x6] ss:$0 sm:$0xff] }
 0x9b7   : > { %18518 = vmatprep.subr.mxu1 %v16011_v34 }
 0x9b8   : > { %18519 = vmatpush3.msra.mxu1 %v15995_v15 }
 0x9b9   : > { %18520 = vmatprep.subr.mxu1 %v16010_v60 }
 0x9ba   : > { %18521 = vmatpush3.msra.mxu1 %v15994_v1  ;;  %v16170_v1 = vld [vmem:[#allocation14 + $0x7] ss:$0 sm:$0xff] }
 0x9bb   : > { %18522 = vmatprep.subr.mxu1 %v16009_v2 }
 0x9bc   : > { %18523 = vmatpush3.msra.mxu1 %v15993_v10 }
 0x9bd   : > { %18524 = vmatprep.subr.mxu1 %v16008_v39 }
 0x9be   : > { %18525 = vmatpush3.msra.mxu1 %v15992_v48 }
 0x9bf   : > { %18526 = vmatprep.subr.mxu1 %v16007_v35 }
 0x9c0   : > { %18527 = vmatpush3.msra.mxu1 %v15991_v51 }
 0x9c1   : > { %18528 = vmatprep.subr.mxu1 %v16006_v57 }
 0x9c2   : > { %18529 = vmatpush3.msra.mxu1 %v15990_v31 }
 0x9c3   : > { %18530 = vmatprep.subr.mxu1 %v16005_v36 }
 0x9c4   : > { %18531 = vmatpush3.msra.mxu1 %v15989_v3 }
 0x9c5   : > { %18532 = vmatprep.subr.mxu1 %v16004_v43 }
 0x9c6   : > { %18533 = vmatpush3.msra.mxu1 %v15988_v40 }
 0x9c7   : > { %18534 = vmatprep.subr.mxu1 %v16003_v21 }
 0x9c8   : > { %18535 = vmatpush3.msra.mxu1 %v15987_v46 }
 0x9c9   : > { %18624 = vmatprep.subr.mxu1 %v19470_v59 }
 0xa27   : > { %v15848_v47 = vpop.f32.mrf.mxu1 }
 0xa28   : > { %v15849_v61 = vadd.f32 %v15848_v47, %v15777_v8 }
 0xa29   : > { %v18588_v30 = vpop.f32.mrf.mxu1 }
 0xa2a   : > { %v15852_v41 = vmax.f32 %v15849_v61, 0.0 }
 0xa2c   : > { %15963 = vmatmul.mubr.f32.vlgmr.msra.gmra.mxu0 %v15852_v41 }
 0xa2d   : > { %18590 = vmatpush3.msra.mxu0 %v15986_v50  ;;  %18621 = vmatprep.mubr.msk.f32.mxu0 %vm19471_vm0, %v19470_v59 }
 0xa2e   : > { %18591 = vmatprep.subr.mxu0 %v19470_v59 }
 0xa2f   : > { %18592 = vmatpush3.msra.mxu0 %v15985_v20 }
 0xa30   : > { %18593 = vmatprep.subr.mxu0 %v19470_v59 }
 0xa31   : > { %18594 = vmatpush3.msra.mxu0 %v15984_v44 }
 0xa32   : > { %18595 = vmatprep.subr.mxu0 %v19470_v59 }
 0xa33   : > { %18596 = vmatpush3.msra.mxu0 %v15983_v29 }
 0xa34   : > { %18597 = vmatprep.subr.mxu0 %v19470_v59 }
 0xa35   : > { %18598 = vmatpush3.msra.mxu0 %v15982_v55 }
 0xa36   : > { %18599 = vmatprep.subr.mxu0 %v19470_v59 }
 0xa37   : > { %18600 = vmatpush3.msra.mxu0 %v15981_v45 }
 0xa38   : > { %18601 = vmatprep.subr.mxu0 %v19470_v59 }
 0xa39   : > { %18602 = vmatpush3.msra.mxu0 %v15980_v38 }
 0xa3a   : > { %18603 = vmatprep.subr.mxu0 %v19470_v59 }
 0xa3b   : > { %18604 = vmatpush3.msra.mxu0 %v15979_v25 }
 0xa3c   : > { %18605 = vmatprep.subr.mxu0 %v19470_v59 }
 0xa3d   : > { %18606 = vmatpush3.msra.mxu0 %v15978_v22 }
 0xa3e   : > { %18607 = vmatprep.subr.mxu0 %v19470_v59 }
 0xa3f   : > { %18608 = vmatpush3.msra.mxu0 %v15977_v33 }
 0xa40   : > { %18609 = vmatprep.subr.mxu0 %v19470_v59 }
 0xa41   : > { %18610 = vmatpush3.msra.mxu0 %v15976_v63 }
 0xa42   : > { %18611 = vmatprep.subr.mxu0 %v19470_v59 }
 0xa43   : > { %18612 = vmatpush3.msra.mxu0 %v15975_v28 }
 0xa44   : > { %18613 = vmatprep.subr.mxu0 %v19470_v59 }
 0xa45   : > { %18614 = vmatpush3.msra.mxu0 %v15974_v32 }
 0xa46   : > { %18615 = vmatprep.subr.mxu0 %v19470_v59 }
 0xa47   : > { %18616 = vmatpush3.msra.mxu0 %v15973_v9 }
 0xa48   : > { %18617 = vmatprep.subr.mxu0 %v19470_v59 }
 0xa49   : > { %18618 = vmatpush3.msra.mxu0 %v15972_v26 }
 0xa4a   : > { %18619 = vmatprep.subr.mxu0 %v19470_v59 }
 0xa4b   : > { %18620 = vmatpush3.msra.mxu0 %v15971_v52 }
 0xa4c   : > { %18622 = vmatmul.mubr.f32.vlgmr.msra.gmra.mxu0 %v15690_v16 }
 0xaec   : > { %v15964_v24 = vpop.f32.mrf.mxu0 }
 0xaed   : > { %v15965_v7 = vadd.f32 %v15964_v24, %v15891_v6 }
 0xaee   : > { %v15966_v58 = vpop.f32.mrf.mxu0 }
 0xaef   : > { %v15967_v53 = vadd.f32 %v15966_v58, %v15895_v5  ;;  %v15969_v49 = vmax.f32 %v15965_v7, 0.0 }
 0xaf1   : > { %v15970_v23 = vmax.f32 %v15967_v53, 0.0 }
 0xaf3   : > { %16083 = vmatprep.mubr.f32.mxu1 %v15970_v23 }
 0xaf4   : > { %16084 = vmatmul.mubr.f32.vlgmr.msra.gmra.mxu1 %v15969_v49 }
 0xaf5   : > { %18625 = vmatpush3.msra.mxu1 %v16169_v17  ;;  %18640 = vmatprep.mubr.msk.f32.mxu1 %vm19471_vm0, %v19470_v59 }
 0xaf6   : > { %18626 = vmatprep.subr.mxu1 %v19470_v59 }
 0xaf7   : > { %18627 = vmatpush3.msra.mxu1 %v16168_v11 }
 0xaf8   : > { %18628 = vmatprep.subr.mxu1 %v19470_v59 }
 0xaf9   : > { %18629 = vmatpush3.msra.mxu1 %v16167_v12 }
 0xafa   : > { %18630 = vmatprep.subr.mxu1 %v19470_v59 }
 0xafb   : > { %18631 = vmatpush3.msra.mxu1 %v16166_v37 }
 0xafc   : > { %18632 = vmatprep.subr.mxu1 %v19470_v59 }
 0xafd   : > { %18633 = vmatpush3.msra.mxu1 %v16165_v19 }
 0xafe   : > { %18634 = vmatprep.subr.mxu1 %v19470_v59 }
 0xaff   : > { %18635 = vmatpush3.msra.mxu1 %v16164_v0 }
 0xb00   : > { %18636 = vmatprep.subr.mxu1 %v19470_v59 }
 0xb01   : > { %18637 = vmatpush3.msra.mxu1 %v16163_v4 }
 0xb02   : > { %18638 = vmatprep.subr.mxu1 %v19470_v59 }
 0xb03   : > { %18639 = vmatpush3.msra.mxu1 %v16162_v42 }
 0xb0c   : > { %v16155_v56 = vpop.f32.mrf.mxu0 }
 0xb0e   : > { %v18623_v62 = vpop.f32.mrf.mxu0 }
 0xbb4   : > { %v18536_v27 = vpop.f32.mrf.mxu1 }
 0xbb6   : > { %v18537_v18 = vpop.f32.mrf.mxu1 }
 0xbb7   : > { %v18538_v54 = vadd.f32 %v18537_v18, %v18536_v27 }
 0xbb9   : > { %v16156_v34 = vadd.f32 %v18538_v54, %v16155_v56 }
 0xbbb   : > { %v16160_v15 = vadd.f32 %v16159_v13, %v16156_v34 }
 0xbbd   : > { %v16161_v60 = vmax.f32 %v16160_v15, 0.0 }
 0xbbf   : > { %18641 = vmatmul.mubr.msk.f32.vlgmr.msra.gmra.mxu1 %vm15778_vm2, %v16161_v60 }
 0xc7f   : > { %v16240_v2 = vpop.f32.mrf.mxu1 }
 0xc80   : > { %v16241_v10 = vadd.f32 %v16240_v2, %v16170_v1 }
 0xc81   : > { %v18642_v59 = vpop.f32.mrf.mxu1 }
 0xc82   : > { %16244 = vst [vmem:[%s532_s23] sm:$0xff] %v16241_v10 }
 0xc83   : > { %19385 = shalt.err (!%p19382_p9)
}
 0xc84   : > { %s19386_s3 = scalar_lea.hbm %s20407_s15, 128  ;;  %s19390_s28 = scalar_lea.hbm %s20454_s12, 256 }
 0xc85   : > { %p19387_p12 = scmp.ne.s32.totalorder %s20407_s15, %s19386_s3  ;;  %p19391_p5 = scmp.lt.s32.totalorder %s20407_s15, %s20454_s12 }
 0xc86   : > { %p19392_p4 = scmp.lt.s32.totalorder %s19390_s28, %s19386_s3 }
 0xc87   : > { %p19388_p2 = pnand %p19387_p12, %p20488_p11 }
 0xc88   : > { %p19393_p7 = por %p19392_p4, %p19391_p5 }
 0xc89   : > { %p19389_p6 = pneg %p19388_p2 }
 0xc8b   : > { %p19394_p8 = pnand %p19393_p7, %p19389_p6 }
 0xc8d   : > { %19397 = shalt.err (!%p19394_p8)
}
 0xc8e   : > { %18676 = dma.vmem_to_hbm [thread:$0]  (%p20488_p11), %s16260_s30, 128, %s20407_s15, %s16246_s18  }
 0xc8f PF: > { %s20489_s20 = sld [smem:[#allocation26_spill]]  ;;  %p18723_p0 = scmp.ge.s32.totalorder %s19452_s24, 2 }
 0xc90   : > { %s16271_s14 = sand.u32 1, %s19440_s21  }
 0xc91   : > { %s16272_s26 = scalar_lea.sflag [#allocation4], %s16271_s14 }
 0xc95   : > { %p20490_p1 = scmp.ne.s32.totalorder %s20489_s20, 0 }
 0xc97   : > { %p18704_p13 = pnand %p18723_p0, %p20490_p1 }
 0xc99   : > { %p18705_p3 = pneg %p18704_p13 }
 0xc9b   : > { %19435 = dma.done.wait (%p18705_p3), %s16272_s26, 128  }
 0xc9c   : > { %19437 = vsyncadd (%p18705_p3), %s16272_s26, 4294967168  ;;  %s20491_s24 = sld [smem:[#allocation24_spill]]  ;;  %s20494_s21 = smov %s19444_s22 }
 0xc9d   : > { %s20492_s27 = sld [smem:[#allocation23_spill]] }
 0xc9e   : > { %s20493_s23 = sld [smem:[#allocation25_spill]] }
 0xca2   : > { %p27_p10 = scmp.ge.s32.totalorder %s20491_s24, 4  }
 0xca3   : > { %s20495_s22 = smov %s20492_s27 }
 0xca4   :  { %29 = sbr.rel (!%p27_p10) target bundleno = 10 (0xa), region = 143 }
 0xca9   :  { %16277 = vsyncpa [#allocation3], 1 }
 0xcaa   :  { %16279 = vsyncpa [#allocation3 + $0x1], 1 }
 0xcab   :  { %16280 = vsyncpa [#allocation6], 1 }
 0xcac   :  { %16281 = vsyncpa [#allocation9], 1 }
 0xcad   :  { %16282 = vsyncpa [#allocation12], 1 }
 0xcae   :  { %16283 = vsyncpa [#allocation15], 1 }
 0xcaf   :  { %16284 = vsyncpa [#allocation4], 1 }
 0xcb0   :  { %16286 = vsyncpa [#allocation4 + $0x1], 1 }

</bundles_post_ra>
